<compile_context>
chip_gen: v7x
topology: tpu7x:2x2x1
jax: 0.10.0
libtpu: 0.0.40
codegen_flags: <defaults>
</compile_context>

<pallas_src>
import numpy as np
import jax
import jax.numpy as jnp
from jax.experimental import pallas as pl
from jax.experimental.pallas import tpu as pltpu


_ACT_DTYPE = jnp.float32   # f32 end-to-end (see header)


def _round_up(x, m):
    return (x + m - 1) // m * m


def _pick_tile(s, unit=128, max_t=8192):
    """Largest multiple of `unit` <= max_t that divides s (s % unit == 0)."""
    if s <= max_t:
        return s, 1
    t = max(unit, (max_t // unit) * unit)
    while s % t != 0:
        t -= unit
    return t, s // t


def _cparams(n_axes):
    # No vmem_limit_bytes: per-call VMEM footprint here is < 3 MiB, well under
    # the default scoped limit on every generation (leaves v7x headroom).
    return pltpu.CompilerParams(dimension_semantics=("parallel",) * n_axes)


# ----------------------------------------------------------------------------
# Pallas kernels
# ----------------------------------------------------------------------------
def _conv_kernel(offs, Cin, TP, relu, want_stats):
    """Tap-stacked conv on the flattened padded grid.

    xa_ref: (1, Cin, TP)        current spatial tile
    xh_ref: (1, Cin, HALO)      small halo (next lanes) for the shifted taps
    w_ref : (Cout_p, K)         tap-stacked weights, K = Cin*KH*KW
    b_ref : (Cout_p, 1)
    m_ref : (1, TP)             valid-pixel mask (only when want_stats)
    o_ref : (1, Cout_p, TP)
    st_ref: (1, 1, Cout_p, 2)   per-tile (sum, sum^2) BN partial stats
    xt_ref: (Cin, TP+HALO)      VMEM staging buffer (tile ‖ halo)
    stk_ref:(K, TP)             VMEM im2col stack
    """
    def kernel(*refs):
        if want_stats:
            xa_ref, xh_ref, w_ref, b_ref, m_ref, o_ref, st_ref, xt_ref, stk_ref = refs
        else:
            xa_ref, xh_ref, w_ref, b_ref, o_ref, xt_ref, stk_ref = refs
            m_ref = st_ref = None

        # Stage tile + small halo contiguously in VMEM so the tap shifts are
        # ref-level static slices (no in-register slicing of a 2*TP value).
        xt_ref[:, :TP] = xa_ref[0]
        xt_ref[:, TP:] = xh_ref[0]

        # In-VMEM im2col: row block k of the stack <- shifted slice for tap k.
        for k, off in enumerate(offs):
            stk_ref[k * Cin:(k + 1) * Cin, :] = xt_ref[:, off:off + TP]

        # One large-K MXU matmul does the cross-tap accumulation internally.
        y = jnp.dot(w_ref[...], stk_ref[...], preferred_element_type=jnp.float32)
        y = y + b_ref[...]                       # (Cout_p,1) lane-broadcast
        if relu:
            y = jnp.maximum(y, 0.0)
        o_ref[0] = y.astype(o_ref.dtype)

        if want_stats:
            # BN partial sums over valid output columns only (mask is 0/1).
            ym = y * m_ref[...]
            s1 = jnp.sum(ym, axis=1, keepdims=True)        # (Cout_p, 1)
            s2 = jnp.sum(ym * ym, axis=1, keepdims=True)   # (Cout_p, 1)
            st_ref[...] = jnp.concatenate([s1, s2], axis=1)[None, None]

    return kernel


def _affine_kernel(relu, has_res):
    """y = maybe_relu(x * scale + shift [+ residual]); channels on sublanes,
    flattened spatial on lanes (lane-dense stores)."""
    def kernel(*refs):
        if has_res:
            x_ref, s_ref, t_ref, r_ref, o_ref = refs
        else:
            x_ref, s_ref, t_ref, o_ref = refs
            r_ref = None
        y = x_ref[0].astype(jnp.float32) * s_ref[...] + t_ref[...]
        if has_res:
            y = y + r_ref[0].astype(jnp.float32)
        if relu:
            y = jnp.maximum(y, 0.0)
        o_ref[0] = y.astype(o_ref.dtype)
    return kernel


# ----------------------------------------------------------------------------
# Wrappers around pallas_call
# ----------------------------------------------------------------------------
def conv2d(x, w, b, padding, relu=False, want_stats=False):
    """Stride-1 2-D conv.  x: (B,Cin,H,W) NCHW, w: (Cout,Cin,KH,KW), b: (Cout,).

    If want_stats, also returns per-(batch,tile) channel partial sums
    (B, NT, Cout_p, 2) = (sum, sum of squares) over valid output pixels.
    """
    B, Cin, H, W = x.shape
    Cout, _, KH, KW = w.shape
    assert not (relu and want_stats)            # BN stats are of the raw conv output
    Hp, Wp = H + 2 * padding, W + 2 * padding
    Ho, Wo = Hp - KH + 1, Wp - KW + 1
    P = Hp * Wp                                 # compute on the padded flat grid
    max_off = (KH - 1) * Wp + (KW - 1)

    HALO = _round_up(max(max_off, 1), 128)      # small halo block
    PH = _round_up(P, HALO)
    TP, NT = _pick_tile(PH, unit=HALO, max_t=8192)
    L = NT * TP + HALO                          # extra HALO so the halo spec is in range
    Cout_p = _round_up(Cout, 8)
    K = Cin * KH * KW
    offs = tuple(ky * Wp + kx for ky in range(KH) for kx in range(KW))

    # Flatten the zero-padded image; the zero tail (+halo) feeds only cropped outputs.
    xp = jnp.pad(x, ((0, 0), (0, 0), (padding, padding), (padding, padding)))
    xf = jnp.pad(xp.reshape(B, Cin, P), ((0, 0), (0, 0), (0, L - P))).astype(_ACT_DTYPE)

    # Tap-stacked weights (Cout_p, K): column index (ky*KW + kx)*Cin + c.
    w2d = jnp.transpose(w, (0, 2, 3, 1)).reshape(Cout, K)
    w2d = jnp.pad(w2d, ((0, Cout_p - Cout), (0, 0))).astype(_ACT_DTYPE)
    bb = jnp.pad(b.reshape(Cout, 1), ((0, Cout_p - Cout), (0, 0))).astype(jnp.float32)

    in_specs = [
        pl.BlockSpec((1, Cin, TP), lambda bi, t: (bi, 0, t)),                       # tile
        pl.BlockSpec((1, Cin, HALO), lambda bi, t: (bi, 0, (t + 1) * (TP // HALO))),  # halo
        pl.BlockSpec((Cout_p, K), lambda bi, t: (0, 0)),                            # weights
        pl.BlockSpec((Cout_p, 1), lambda bi, t: (0, 0)),                            # bias
    ]
    args = [xf, xf, w2d, bb]

    if want_stats:
        # Static 0/1 mask of valid output columns on the padded flat grid.
        ii = np.arange(P) // Wp
        jj = np.arange(P) % Wp
        mvalid = ((ii < Ho) & (jj < Wo)).astype(np.float32)
        mvalid = np.pad(mvalid, (0, NT * TP - P)).reshape(1, NT * TP)
        args.append(jnp.asarray(mvalid))
        in_specs.append(pl.BlockSpec((1, TP), lambda bi, t: (0, t)))
        out_shape = (jax.ShapeDtypeStruct((B, Cout_p, NT * TP), _ACT_DTYPE),
                     jax.ShapeDtypeStruct((B, NT, Cout_p, 2), jnp.float32))
        out_specs = (pl.BlockSpec((1, Cout_p, TP), lambda bi, t: (bi, 0, t)),
                     pl.BlockSpec((1, 1, Cout_p, 2), lambda bi, t: (bi, t, 0, 0)))
    else:
        out_shape = jax.ShapeDtypeStruct((B, Cout_p, NT * TP), _ACT_DTYPE)
        out_specs = pl.BlockSpec((1, Cout_p, TP), lambda bi, t: (bi, 0, t))

    res = pl.pallas_call(
        _conv_kernel(offs, Cin, TP, relu, want_stats),
        out_shape=out_shape,
        grid=(B, NT),
        in_specs=in_specs,
        out_specs=out_specs,
        scratch_shapes=[pltpu.VMEM((Cin, TP + HALO), _ACT_DTYPE),    # staging
                        pltpu.VMEM((K, TP), _ACT_DTYPE)],            # im2col stack
        compiler_params=_cparams(2),
    )(*args)

    out_flat, stats = (res if want_stats else (res, None))

    # Compact the padded-grid result back to (B, Cout, Ho, Wo) (XLA glue).
    # TODO(synk): fold this crop (and the next layer's pad / the PixelShuffle
    # permutation) into the consumer kernel's addressing to save glue passes.
    y = out_flat[:, :Cout, :P].reshape(B, Cout, Hp, Wp)[:, :, :Ho, :Wo]
    return (y, stats) if want_stats else y


def affine_act(x, scale, shift, residual=None, relu=False):
    """y = maybe_relu(x * scale + shift [+ residual]), per-channel scale/shift."""
    B, C, H, W = x.shape
    S = H * W
    if S % 128 == 0:
        TS, NTS = _pick_tile(S, unit=128, max_t=8192)
    else:
        TS, NTS = S, 1
    has_res = residual is not None

    args = [x.reshape(B, C, S),
            scale.reshape(C, 1).astype(jnp.float32),
            shift.reshape(C, 1).astype(jnp.float32)]
    in_specs = [pl.BlockSpec((1, C, TS), lambda b, t: (b, 0, t)),
                pl.BlockSpec((C, 1), lambda b, t: (0, 0)),
                pl.BlockSpec((C, 1), lambda b, t: (0, 0))]
    if has_res:
        args.append(residual.reshape(B, C, S))
        in_specs.append(pl.BlockSpec((1, C, TS), lambda b, t: (b, 0, t)))

    out = pl.pallas_call(
        _affine_kernel(relu, has_res),
        out_shape=jax.ShapeDtypeStruct((B, C, S), x.dtype),
        grid=(B, NTS),
        in_specs=in_specs,
        out_specs=pl.BlockSpec((1, C, TS), lambda b, t: (b, 0, t)),
        compiler_params=_cparams(2),
    )(*args)
    return out.reshape(B, C, H, W)


def conv_bn(x, w, b, gamma, beta, padding, *, eps=1e-5, relu=False, residual=None):
    """conv -> BatchNorm (training-mode batch stats) [-> +residual] [-> ReLU].

    The conv kernel emits per-tile channel partial sums; only that tiny stat
    tensor is reduced in XLA (no full-activation mean/var pass).  The BN
    affine, residual add and ReLU run in one fused lane-dense pass.
    TODO(synk): the BN affine cannot sit in the same conv's epilogue (its own
    output stats aren't known yet); a fully fused res-block would need a
    two-pass / stats-in-VMEM strategy.
    """
    y, stats = conv2d(x, w, b, padding, relu=False, want_stats=True)
    B, C, Ho, Wo = y.shape
    count = B * Ho * Wo
    s = jnp.sum(stats, axis=(0, 1))                         # (Cout_p, 2), tiny
    mean = s[:C, 0] / count
    var = jnp.maximum(s[:C, 1] / count - mean * mean, 0.0)  # biased var (train-mode BN)
    scale = gamma * jax.lax.rsqrt(var + eps)
    shift = beta - mean * scale
    return affine_act(y, scale, shift, residual=residual, relu=relu)


def pixel_shuffle_down(x, ry=2, rx=2):
    # Reference "PixelShuffle" is space-to-depth: (B,C,H,W)->(B,C*ry*rx,H/ry,W/rx).
    # TODO(synk): XLA permutation; could be folded into the consumer conv's addressing.
    B, C, H, W = x.shape
    x = x.reshape(B, C, H // ry, ry, W // rx, rx)
    x = x.transpose(0, 1, 3, 5, 2, 4)
    return x.reshape(B, C * ry * rx, H // ry, W // rx)


# ----------------------------------------------------------------------------
# Parameters (deterministic synthetic init; shapes per the module __init__)
# ----------------------------------------------------------------------------
def init_params(key, nker=8, out_chans=1, nblk=2):
    def conv_init(k, cout, cin, kh, kw):
        kw_, kb_ = jax.random.split(k)
        fan_in = kh * kw * cin
        w = jax.random.normal(kw_, (cout, cin, kh, kw), jnp.float32) / jnp.sqrt(fan_in)
        b = 0.01 * jax.random.normal(kb_, (cout,), jnp.float32)
        return w, b

    keys = jax.random.split(key, 6 + 2 * nblk)
    p = {}
    p['enc_w'], p['enc_b'] = conv_init(keys[0], nker, 1, 9, 9)   # unsqueeze(1) -> 1 chan
    p['res'] = []
    for i in range(nblk):
        w1, b1 = conv_init(keys[1 + 2 * i], nker, nker, 3, 3)
        w2, b2 = conv_init(keys[2 + 2 * i], nker, nker, 3, 3)
        p['res'].append(dict(
            w1=w1, b1=b1, g1=jnp.ones((nker,), jnp.float32), e1=jnp.zeros((nker,), jnp.float32),
            w2=w2, b2=b2, g2=jnp.ones((nker,), jnp.float32), e2=jnp.zeros((nker,), jnp.float32)))
    p['dec_w'], p['dec_b'] = conv_init(keys[1 + 2 * nblk], nker, nker, 3, 3)
    p['dec_g'] = jnp.ones((nker,), jnp.float32)
    p['dec_e'] = jnp.zeros((nker,), jnp.float32)
    p['ps1_w'], p['ps1_b'] = conv_init(keys[2 + 2 * nblk], nker, nker, 3, 3)
    # TODO(synk): reference declares the ps2 conv as nker->nker, but its input has
    # 4*nker channels after the space-to-depth PixelShuffle; using 4*nker inputs.
    p['ps2_w'], p['ps2_b'] = conv_init(keys[3 + 2 * nblk], nker, 4 * nker, 3, 3)
    # TODO(synk): same channel fix for fc (reference declares in_channels=nker).
    p['fc_w'], p['fc_b'] = conv_init(keys[4 + 2 * nblk], out_chans, 4 * nker, 9, 9)
    return p


# ----------------------------------------------------------------------------
# Forward (learning_type == 'plain')
# ----------------------------------------------------------------------------
def srresnet_forward(params, x):
    # x: (B, H, W) float32
    B, H, W = x.shape
    xf = x.astype(jnp.float32)
    flat = xf.reshape(B, H * W)
    mean = jnp.mean(flat, axis=1).reshape(B, 1, 1)
    std = jnp.std(flat, axis=1, ddof=1).reshape(B, 1, 1)   # torch .std() -> unbiased
    # (A constant image yields std=0 -> inf/nan, identical to the reference.)
    h = ((xf - mean) / std)[:, None, :, :].astype(_ACT_DTYPE)   # unsqueeze(1) NCHW

    h = conv2d(h, params['enc_w'], params['enc_b'], padding=4, relu=True)        # enc
    x0 = h

    # TODO(synk): reference ResBlock.forward returns `x + self.resblk` (a Module,
    # not a Tensor); implementing the intended residual `x + resblk(x)`.
    # TODO(synk): a whole res-block could be one fused pallas_call with all
    # weights resident in VMEM; kept layerwise (conv+stats, fused affine) here.
    for blk in params['res']:
        y = conv_bn(h, blk['w1'], blk['b1'], blk['g1'], blk['e1'], padding=1, relu=True)
        h = conv_bn(y, blk['w2'], blk['b2'], blk['g2'], blk['e2'], padding=1,
                    relu=False, residual=h)

    h = conv_bn(h, params['dec_w'], params['dec_b'], params['dec_g'], params['dec_e'],
                padding=1, relu=False, residual=x0)                              # x0 + dec(x)

    # ps1 / ps2: ReLU commutes with the space-to-depth permutation, so it is
    # folded into the conv epilogue (no standalone ReLU pass).
    h = conv2d(h, params['ps1_w'], params['ps1_b'], padding=1, relu=True)        # ps1
    h = pixel_shuffle_down(h, 2, 2)
    h = conv2d(h, params['ps2_w'], params['ps2_b'], padding=1, relu=True)        # ps2
    h = pixel_shuffle_down(h, 2, 2)

    h = conv2d(h, params['fc_w'], params['fc_b'], padding=4, relu=False)         # fc
    # TODO(synk): reference applies self.fc a second time for learning_type=='plain',
    # which is channel-inconsistent (fc maps 4*nker -> out_chans); applied once.

    out = h[:, 0].astype(jnp.float32)        # squeeze(1)  (out_chans == 1)
    out = out * std + mean                   # unnorm
    return out


if __name__ == "__main__":
    key = jax.random.PRNGKey(0)
    kx, kp = jax.random.split(key)

    B, H, W = 2, 16, 16
    nker, nblk = 8, 2        # module default nblk=16; reduced for the small demo
    x = jax.random.normal(kx, (B, H, W), jnp.float32)
    params = init_params(kp, nker=nker, out_chans=1, nblk=nblk)

    fwd = jax.jit(srresnet_forward)
    out = fwd(params, x)
    jax.block_until_ready(out)
    assert out.shape == (B, H // 4, W // 4), out.shape
    assert bool(jnp.all(jnp.isfinite(out)))
    print("KERNEL_OK")
</pallas_src>

<mosaic_0001>
module attributes {stable_mosaic.version = 11 : i64} {
  func.func @kernel(%arg0: i32, %arg1: i32, %arg2: memref<1x1x768xf32, #tpu.memory_space<vmem>>, %arg3: memref<1x1x256xf32, #tpu.memory_space<vmem>>, %arg4: memref<8x81xf32, #tpu.memory_space<vmem>>, %arg5: memref<8x1xf32, #tpu.memory_space<vmem>>, %arg6: memref<1x8x768xf32, #tpu.memory_space<vmem>>, %arg7: memref<1x1024xf32, #tpu.memory_space<vmem>>, %arg8: memref<81x768xf32, #tpu.memory_space<vmem>>) attributes {dimension_semantics = [#tpu.dimension_semantics<parallel>, #tpu.dimension_semantics<parallel>], iteration_bounds = array<i64: 2, 1>, scalar_prefetch = 0 : i64, scratch_operands = 2 : i64, tpu.core_type = #tpu.core_type<tc>, window_params = [{transform_indices = @transform_0, window_bounds = array<i64: 1, 1, 768>}, {transform_indices = @transform_1, window_bounds = array<i64: 1, 1, 256>}, {pipeline_mode = #tpu.pipeline_mode<synchronous>, transform_indices = @transform_2, window_bounds = array<i64: 8, 81>}, {pipeline_mode = #tpu.pipeline_mode<synchronous>, transform_indices = @transform_3, window_bounds = array<i64: 8, 1>}, {transform_indices = @transform_4, window_bounds = array<i64: 1, 8, 768>}]} {
    %c0 = arith.constant 0 : index
    %c0_0 = arith.constant 0 : index
    %c0_1 = arith.constant 0 : index
    %0 = vector.load %arg2[%c0, %c0_0, %c0_1] : memref<1x1x768xf32, #tpu.memory_space<vmem>>, vector<1x1x768xf32>
    %1 = vector.shape_cast %0 : vector<1x1x768xf32> to vector<1x768xf32>
    %c0_2 = arith.constant 0 : index
    %c0_3 = arith.constant 0 : index
    %2 = vector.load %arg7[%c0_2, %c0_3] : memref<1x1024xf32, #tpu.memory_space<vmem>>, vector<1x768xf32>
    tpu.vector_store %arg7[%c0_2, %c0_3], %1 {strides = array<i32>} : memref<1x1024xf32, #tpu.memory_space<vmem>>, vector<1x768xf32>,
    %c0_4 = arith.constant 0 : index
    %c0_5 = arith.constant 0 : index
    %c0_6 = arith.constant 0 : index
    %3 = vector.load %arg3[%c0_4, %c0_5, %c0_6] : memref<1x1x256xf32, #tpu.memory_space<vmem>>, vector<1x1x256xf32>
    %4 = vector.shape_cast %3 : vector<1x1x256xf32> to vector<1x256xf32>
    %c0_7 = arith.constant 0 : index
    %c768 = arith.constant 768 : index
    %5 = vector.load %arg7[%c0_7, %c768] : memref<1x1024xf32, #tpu.memory_space<vmem>>, vector<1x256xf32>
    tpu.vector_store %arg7[%c0_7, %c768], %4 {strides = array<i32>} : memref<1x1024xf32, #tpu.memory_space<vmem>>, vector<1x256xf32>,
    %c0_8 = arith.constant 0 : index
    %c0_9 = arith.constant 0 : index
    %6 = vector.load %arg7[%c0_8, %c0_9] : memref<1x1024xf32, #tpu.memory_space<vmem>>, vector<1x768xf32>
    %c0_10 = arith.constant 0 : index
    %c0_11 = arith.constant 0 : index
    %7 = vector.load %arg8[%c0_10, %c0_11] : memref<81x768xf32, #tpu.memory_space<vmem>>, vector<1x768xf32>
    tpu.vector_store %arg8[%c0_10, %c0_11], %6 {strides = array<i32>} : memref<81x768xf32, #tpu.memory_space<vmem>>, vector<1x768xf32>,
    %c0_12 = arith.constant 0 : index
    %c1 = arith.constant 1 : index
    %8 = vector.load %arg7[%c0_12, %c1] : memref<1x1024xf32, #tpu.memory_space<vmem>>, vector<1x768xf32>
    %c1_13 = arith.constant 1 : index
    %c0_14 = arith.constant 0 : index
    %9 = vector.load %arg8[%c1_13, %c0_14] : memref<81x768xf32, #tpu.memory_space<vmem>>, vector<1x768xf32>
    tpu.vector_store %arg8[%c1_13, %c0_14], %8 {strides = array<i32>} : memref<81x768xf32, #tpu.memory_space<vmem>>, vector<1x768xf32>,
    %c0_15 = arith.constant 0 : index
    %c2 = arith.constant 2 : index
    %10 = vector.load %arg7[%c0_15, %c2] : memref<1x1024xf32, #tpu.memory_space<vmem>>, vector<1x768xf32>
    %c2_16 = arith.constant 2 : index
    %c0_17 = arith.constant 0 : index
    %11 = vector.load %arg8[%c2_16, %c0_17] : memref<81x768xf32, #tpu.memory_space<vmem>>, vector<1x768xf32>
    tpu.vector_store %arg8[%c2_16, %c0_17], %10 {strides = array<i32>} : memref<81x768xf32, #tpu.memory_space<vmem>>, vector<1x768xf32>,
    %c0_18 = arith.constant 0 : index
    %c3 = arith.constant 3 : index
    %12 = vector.load %arg7[%c0_18, %c3] : memref<1x1024xf32, #tpu.memory_space<vmem>>, vector<1x768xf32>
    %c3_19 = arith.constant 3 : index
    %c0_20 = arith.constant 0 : index
    %13 = vector.load %arg8[%c3_19, %c0_20] : memref<81x768xf32, #tpu.memory_space<vmem>>, vector<1x768xf32>
    tpu.vector_store %arg8[%c3_19, %c0_20], %12 {strides = array<i32>} : memref<81x768xf32, #tpu.memory_space<vmem>>, vector<1x768xf32>,
    %c0_21 = arith.constant 0 : index
    %c4 = arith.constant 4 : index
    %14 = vector.load %arg7[%c0_21, %c4] : memref<1x1024xf32, #tpu.memory_space<vmem>>, vector<1x768xf32>
    %c4_22 = arith.constant 4 : index
    %c0_23 = arith.constant 0 : index
    %15 = vector.load %arg8[%c4_22, %c0_23] : memref<81x768xf32, #tpu.memory_space<vmem>>, vector<1x768xf32>
    tpu.vector_store %arg8[%c4_22, %c0_23], %14 {strides = array<i32>} : memref<81x768xf32, #tpu.memory_space<vmem>>, vector<1x768xf32>,
    %c0_24 = arith.constant 0 : index
    %c5 = arith.constant 5 : index
    %16 = vector.load %arg7[%c0_24, %c5] : memref<1x1024xf32, #tpu.memory_space<vmem>>, vector<1x768xf32>
    %c5_25 = arith.constant 5 : index
    %c0_26 = arith.constant 0 : index
    %17 = vector.load %arg8[%c5_25, %c0_26] : memref<81x768xf32, #tpu.memory_space<vmem>>, vector<1x768xf32>
    tpu.vector_store %arg8[%c5_25, %c0_26], %16 {strides = array<i32>} : memref<81x768xf32, #tpu.memory_space<vmem>>, vector<1x768xf32>,
    %c0_27 = arith.constant 0 : index
    %c6 = arith.constant 6 : index
    %18 = vector.load %arg7[%c0_27, %c6] : memref<1x1024xf32, #tpu.memory_space<vmem>>, vector<1x768xf32>
    %c6_28 = arith.constant 6 : index
    %c0_29 = arith.constant 0 : index
    %19 = vector.load %arg8[%c6_28, %c0_29] : memref<81x768xf32, #tpu.memory_space<vmem>>, vector<1x768xf32>
    tpu.vector_store %arg8[%c6_28, %c0_29], %18 {strides = array<i32>} : memref<81x768xf32, #tpu.memory_space<vmem>>, vector<1x768xf32>,
    %c0_30 = arith.constant 0 : index
    %c7 = arith.constant 7 : index
    %20 = vector.load %arg7[%c0_30, %c7] : memref<1x1024xf32, #tpu.memory_space<vmem>>, vector<1x768xf32>
    %c7_31 = arith.constant 7 : index
    %c0_32 = arith.constant 0 : index
    %21 = vector.load %arg8[%c7_31, %c0_32] : memref<81x768xf32, #tpu.memory_space<vmem>>, vector<1x768xf32>
    tpu.vector_store %arg8[%c7_31, %c0_32], %20 {strides = array<i32>} : memref<81x768xf32, #tpu.memory_space<vmem>>, vector<1x768xf32>,
    %c0_33 = arith.constant 0 : index
    %c8 = arith.constant 8 : index
    %22 = vector.load %arg7[%c0_33, %c8] : memref<1x1024xf32, #tpu.memory_space<vmem>>, vector<1x768xf32>
    %c8_34 = arith.constant 8 : index
    %c0_35 = arith.constant 0 : index
    %23 = vector.load %arg8[%c8_34, %c0_35] : memref<81x768xf32, #tpu.memory_space<vmem>>, vector<1x768xf32>
    tpu.vector_store %arg8[%c8_34, %c0_35], %22 {strides = array<i32>} : memref<81x768xf32, #tpu.memory_space<vmem>>, vector<1x768xf32>,
    %c0_36 = arith.constant 0 : index
    %c24 = arith.constant 24 : index
    %24 = vector.load %arg7[%c0_36, %c24] : memref<1x1024xf32, #tpu.memory_space<vmem>>, vector<1x768xf32>
    %c9 = arith.constant 9 : index
    %c0_37 = arith.constant 0 : index
    %25 = vector.load %arg8[%c9, %c0_37] : memref<81x768xf32, #tpu.memory_space<vmem>>, vector<1x768xf32>
    tpu.vector_store %arg8[%c9, %c0_37], %24 {strides = array<i32>} : memref<81x768xf32, #tpu.memory_space<vmem>>, vector<1x768xf32>,
    %c0_38 = arith.constant 0 : index
    %c25 = arith.constant 25 : index
    %26 = vector.load %arg7[%c0_38, %c25] : memref<1x1024xf32, #tpu.memory_space<vmem>>, vector<1x768xf32>
    %c10 = arith.constant 10 : index
    %c0_39 = arith.constant 0 : index
    %27 = vector.load %arg8[%c10, %c0_39] : memref<81x768xf32, #tpu.memory_space<vmem>>, vector<1x768xf32>
    tpu.vector_store %arg8[%c10, %c0_39], %26 {strides = array<i32>} : memref<81x768xf32, #tpu.memory_space<vmem>>, vector<1x768xf32>,
    %c0_40 = arith.constant 0 : index
    %c26 = arith.constant 26 : index
    %28 = vector.load %arg7[%c0_40, %c26] : memref<1x1024xf32, #tpu.memory_space<vmem>>, vector<1x768xf32>
    %c11 = arith.constant 11 : index
    %c0_41 = arith.constant 0 : index
    %29 = vector.load %arg8[%c11, %c0_41] : memref<81x768xf32, #tpu.memory_space<vmem>>, vector<1x768xf32>
    tpu.vector_store %arg8[%c11, %c0_41], %28 {strides = array<i32>} : memref<81x768xf32, #tpu.memory_space<vmem>>, vector<1x768xf32>,
    %c0_42 = arith.constant 0 : index
    %c27 = arith.constant 27 : index
    %30 = vector.load %arg7[%c0_42, %c27] : memref<1x1024xf32, #tpu.memory_space<vmem>>, vector<1x768xf32>
    %c12 = arith.constant 12 : index
    %c0_43 = arith.constant 0 : index
    %31 = vector.load %arg8[%c12, %c0_43] : memref<81x768xf32, #tpu.memory_space<vmem>>, vector<1x768xf32>
    tpu.vector_store %arg8[%c12, %c0_43], %30 {strides = array<i32>} : memref<81x768xf32, #tpu.memory_space<vmem>>, vector<1x768xf32>,
    %c0_44 = arith.constant 0 : index
    %c28 = arith.constant 28 : index
    %32 = vector.load %arg7[%c0_44, %c28] : memref<1x1024xf32, #tpu.memory_space<vmem>>, vector<1x768xf32>
    %c13 = arith.constant 13 : index
    %c0_45 = arith.constant 0 : index
    %33 = vector.load %arg8[%c13, %c0_45] : memref<81x768xf32, #tpu.memory_space<vmem>>, vector<1x768xf32>
    tpu.vector_store %arg8[%c13, %c0_45], %32 {strides = array<i32>} : memref<81x768xf32, #tpu.memory_space<vmem>>, vector<1x768xf32>,
    %c0_46 = arith.constant 0 : index
    %c29 = arith.constant 29 : index
    %34 = vector.load %arg7[%c0_46, %c29] : memref<1x1024xf32, #tpu.memory_space<vmem>>, vector<1x768xf32>
    %c14 = arith.constant 14 : index
    %c0_47 = arith.constant 0 : index
    %35 = vector.load %arg8[%c14, %c0_47] : memref<81x768xf32, #tpu.memory_space<vmem>>, vector<1x768xf32>
    tpu.vector_store %arg8[%c14, %c0_47], %34 {strides = array<i32>} : memref<81x768xf32, #tpu.memory_space<vmem>>, vector<1x768xf32>,
    %c0_48 = arith.constant 0 : index
    %c30 = arith.constant 30 : index
    %36 = vector.load %arg7[%c0_48, %c30] : memref<1x1024xf32, #tpu.memory_space<vmem>>, vector<1x768xf32>
    %c15 = arith.constant 15 : index
    %c0_49 = arith.constant 0 : index
    %37 = vector.load %arg8[%c15, %c0_49] : memref<81x768xf32, #tpu.memory_space<vmem>>, vector<1x768xf32>
    tpu.vector_store %arg8[%c15, %c0_49], %36 {strides = array<i32>} : memref<81x768xf32, #tpu.memory_space<vmem>>, vector<1x768xf32>,
    %c0_50 = arith.constant 0 : index
    %c31 = arith.constant 31 : index
    %38 = vector.load %arg7[%c0_50, %c31] : memref<1x1024xf32, #tpu.memory_space<vmem>>, vector<1x768xf32>
    %c16 = arith.constant 16 : index
    %c0_51 = arith.constant 0 : index
    %39 = vector.load %arg8[%c16, %c0_51] : memref<81x768xf32, #tpu.memory_space<vmem>>, vector<1x768xf32>
    tpu.vector_store %arg8[%c16, %c0_51], %38 {strides = array<i32>} : memref<81x768xf32, #tpu.memory_space<vmem>>, vector<1x768xf32>,
    %c0_52 = arith.constant 0 : index
    %c32 = arith.constant 32 : index
    %40 = vector.load %arg7[%c0_52, %c32] : memref<1x1024xf32, #tpu.memory_space<vmem>>, vector<1x768xf32>
    %c17 = arith.constant 17 : index
    %c0_53 = arith.constant 0 : index
    %41 = vector.load %arg8[%c17, %c0_53] : memref<81x768xf32, #tpu.memory_space<vmem>>, vector<1x768xf32>
    tpu.vector_store %arg8[%c17, %c0_53], %40 {strides = array<i32>} : memref<81x768xf32, #tpu.memory_space<vmem>>, vector<1x768xf32>,
    %c0_54 = arith.constant 0 : index
    %c48 = arith.constant 48 : index
    %42 = vector.load %arg7[%c0_54, %c48] : memref<1x1024xf32, #tpu.memory_space<vmem>>, vector<1x768xf32>
    %c18 = arith.constant 18 : index
    %c0_55 = arith.constant 0 : index
    %43 = vector.load %arg8[%c18, %c0_55] : memref<81x768xf32, #tpu.memory_space<vmem>>, vector<1x768xf32>
    tpu.vector_store %arg8[%c18, %c0_55], %42 {strides = array<i32>} : memref<81x768xf32, #tpu.memory_space<vmem>>, vector<1x768xf32>,
    %c0_56 = arith.constant 0 : index
    %c49 = arith.constant 49 : index
    %44 = vector.load %arg7[%c0_56, %c49] : memref<1x1024xf32, #tpu.memory_space<vmem>>, vector<1x768xf32>
    %c19 = arith.constant 19 : index
    %c0_57 = arith.constant 0 : index
    %45 = vector.load %arg8[%c19, %c0_57] : memref<81x768xf32, #tpu.memory_space<vmem>>, vector<1x768xf32>
    tpu.vector_store %arg8[%c19, %c0_57], %44 {strides = array<i32>} : memref<81x768xf32, #tpu.memory_space<vmem>>, vector<1x768xf32>,
    %c0_58 = arith.constant 0 : index
    %c50 = arith.constant 50 : index
    %46 = vector.load %arg7[%c0_58, %c50] : memref<1x1024xf32, #tpu.memory_space<vmem>>, vector<1x768xf32>
    %c20 = arith.constant 20 : index
    %c0_59 = arith.constant 0 : index
    %47 = vector.load %arg8[%c20, %c0_59] : memref<81x768xf32, #tpu.memory_space<vmem>>, vector<1x768xf32>
    tpu.vector_store %arg8[%c20, %c0_59], %46 {strides = array<i32>} : memref<81x768xf32, #tpu.memory_space<vmem>>, vector<1x768xf32>,
    %c0_60 = arith.constant 0 : index
    %c51 = arith.constant 51 : index
    %48 = vector.load %arg7[%c0_60, %c51] : memref<1x1024xf32, #tpu.memory_space<vmem>>, vector<1x768xf32>
    %c21 = arith.constant 21 : index
    %c0_61 = arith.constant 0 : index
    %49 = vector.load %arg8[%c21, %c0_61] : memref<81x768xf32, #tpu.memory_space<vmem>>, vector<1x768xf32>
    tpu.vector_store %arg8[%c21, %c0_61], %48 {strides = array<i32>} : memref<81x768xf32, #tpu.memory_space<vmem>>, vector<1x768xf32>,
    %c0_62 = arith.constant 0 : index
    %c52 = arith.constant 52 : index
    %50 = vector.load %arg7[%c0_62, %c52] : memref<1x1024xf32, #tpu.memory_space<vmem>>, vector<1x768xf32>
    %c22 = arith.constant 22 : index
    %c0_63 = arith.constant 0 : index
    %51 = vector.load %arg8[%c22, %c0_63] : memref<81x768xf32, #tpu.memory_space<vmem>>, vector<1x768xf32>
    tpu.vector_store %arg8[%c22, %c0_63], %50 {strides = array<i32>} : memref<81x768xf32, #tpu.memory_space<vmem>>, vector<1x768xf32>,
    %c0_64 = arith.constant 0 : index
    %c53 = arith.constant 53 : index
    %52 = vector.load %arg7[%c0_64, %c53] : memref<1x1024xf32, #tpu.memory_space<vmem>>, vector<1x768xf32>
    %c23 = arith.constant 23 : index
    %c0_65 = arith.constant 0 : index
    %53 = vector.load %arg8[%c23, %c0_65] : memref<81x768xf32, #tpu.memory_space<vmem>>, vector<1x768xf32>
    tpu.vector_store %arg8[%c23, %c0_65], %52 {strides = array<i32>} : memref<81x768xf32, #tpu.memory_space<vmem>>, vector<1x768xf32>,
    %c0_66 = arith.constant 0 : index
    %c54 = arith.constant 54 : index
    %54 = vector.load %arg7[%c0_66, %c54] : memref<1x1024xf32, #tpu.memory_space<vmem>>, vector<1x768xf32>
    %c24_67 = arith.constant 24 : index
    %c0_68 = arith.constant 0 : index
    %55 = vector.load %arg8[%c24_67, %c0_68] : memref<81x768xf32, #tpu.memory_space<vmem>>, vector<1x768xf32>
    tpu.vector_store %arg8[%c24_67, %c0_68], %54 {strides = array<i32>} : memref<81x768xf32, #tpu.memory_space<vmem>>, vector<1x768xf32>,
    %c0_69 = arith.constant 0 : index
    %c55 = arith.constant 55 : index
    %56 = vector.load %arg7[%c0_69, %c55] : memref<1x1024xf32, #tpu.memory_space<vmem>>, vector<1x768xf32>
    %c25_70 = arith.constant 25 : index
    %c0_71 = arith.constant 0 : index
    %57 = vector.load %arg8[%c25_70, %c0_71] : memref<81x768xf32, #tpu.memory_space<vmem>>, vector<1x768xf32>
    tpu.vector_store %arg8[%c25_70, %c0_71], %56 {strides = array<i32>} : memref<81x768xf32, #tpu.memory_space<vmem>>, vector<1x768xf32>,
    %c0_72 = arith.constant 0 : index
    %c56 = arith.constant 56 : index
    %58 = vector.load %arg7[%c0_72, %c56] : memref<1x1024xf32, #tpu.memory_space<vmem>>, vector<1x768xf32>
    %c26_73 = arith.constant 26 : index
    %c0_74 = arith.constant 0 : index
    %59 = vector.load %arg8[%c26_73, %c0_74] : memref<81x768xf32, #tpu.memory_space<vmem>>, vector<1x768xf32>
    tpu.vector_store %arg8[%c26_73, %c0_74], %58 {strides = array<i32>} : memref<81x768xf32, #tpu.memory_space<vmem>>, vector<1x768xf32>,
    %c0_75 = arith.constant 0 : index
    %c72 = arith.constant 72 : index
    %60 = vector.load %arg7[%c0_75, %c72] : memref<1x1024xf32, #tpu.memory_space<vmem>>, vector<1x768xf32>
    %c27_76 = arith.constant 27 : index
    %c0_77 = arith.constant 0 : index
    %61 = vector.load %arg8[%c27_76, %c0_77] : memref<81x768xf32, #tpu.memory_space<vmem>>, vector<1x768xf32>
    tpu.vector_store %arg8[%c27_76, %c0_77], %60 {strides = array<i32>} : memref<81x768xf32, #tpu.memory_space<vmem>>, vector<1x768xf32>,
    %c0_78 = arith.constant 0 : index
    %c73 = arith.constant 73 : index
    %62 = vector.load %arg7[%c0_78, %c73] : memref<1x1024xf32, #tpu.memory_space<vmem>>, vector<1x768xf32>
    %c28_79 = arith.constant 28 : index
    %c0_80 = arith.constant 0 : index
    %63 = vector.load %arg8[%c28_79, %c0_80] : memref<81x768xf32, #tpu.memory_space<vmem>>, vector<1x768xf32>
    tpu.vector_store %arg8[%c28_79, %c0_80], %62 {strides = array<i32>} : memref<81x768xf32, #tpu.memory_space<vmem>>, vector<1x768xf32>,
    %c0_81 = arith.constant 0 : index
    %c74 = arith.constant 74 : index
    %64 = vector.load %arg7[%c0_81, %c74] : memref<1x1024xf32, #tpu.memory_space<vmem>>, vector<1x768xf32>
    %c29_82 = arith.constant 29 : index
    %c0_83 = arith.constant 0 : index
    %65 = vector.load %arg8[%c29_82, %c0_83] : memref<81x768xf32, #tpu.memory_space<vmem>>, vector<1x768xf32>
    tpu.vector_store %arg8[%c29_82, %c0_83], %64 {strides = array<i32>} : memref<81x768xf32, #tpu.memory_space<vmem>>, vector<1x768xf32>,
    %c0_84 = arith.constant 0 : index
    %c75 = arith.constant 75 : index
    %66 = vector.load %arg7[%c0_84, %c75] : memref<1x1024xf32, #tpu.memory_space<vmem>>, vector<1x768xf32>
    %c30_85 = arith.constant 30 : index
    %c0_86 = arith.constant 0 : index
    %67 = vector.load %arg8[%c30_85, %c0_86] : memref<81x768xf32, #tpu.memory_space<vmem>>, vector<1x768xf32>
    tpu.vector_store %arg8[%c30_85, %c0_86], %66 {strides = array<i32>} : memref<81x768xf32, #tpu.memory_space<vmem>>, vector<1x768xf32>,
    %c0_87 = arith.constant 0 : index
    %c76 = arith.constant 76 : index
    %68 = vector.load %arg7[%c0_87, %c76] : memref<1x1024xf32, #tpu.memory_space<vmem>>, vector<1x768xf32>
    %c31_88 = arith.constant 31 : index
    %c0_89 = arith.constant 0 : index
    %69 = vector.load %arg8[%c31_88, %c0_89] : memref<81x768xf32, #tpu.memory_space<vmem>>, vector<1x768xf32>
    tpu.vector_store %arg8[%c31_88, %c0_89], %68 {strides = array<i32>} : memref<81x768xf32, #tpu.memory_space<vmem>>, vector<1x768xf32>,
    %c0_90 = arith.constant 0 : index
    %c77 = arith.constant 77 : index
    %70 = vector.load %arg7[%c0_90, %c77] : memref<1x1024xf32, #tpu.memory_space<vmem>>, vector<1x768xf32>
    %c32_91 = arith.constant 32 : index
    %c0_92 = arith.constant 0 : index
    %71 = vector.load %arg8[%c32_91, %c0_92] : memref<81x768xf32, #tpu.memory_space<vmem>>, vector<1x768xf32>
    tpu.vector_store %arg8[%c32_91, %c0_92], %70 {strides = array<i32>} : memref<81x768xf32, #tpu.memory_space<vmem>>, vector<1x768xf32>,
    %c0_93 = arith.constant 0 : index
    %c78 = arith.constant 78 : index
    %72 = vector.load %arg7[%c0_93, %c78] : memref<1x1024xf32, #tpu.memory_space<vmem>>, vector<1x768xf32>
    %c33 = arith.constant 33 : index
    %c0_94 = arith.constant 0 : index
    %73 = vector.load %arg8[%c33, %c0_94] : memref<81x768xf32, #tpu.memory_space<vmem>>, vector<1x768xf32>
    tpu.vector_store %arg8[%c33, %c0_94], %72 {strides = array<i32>} : memref<81x768xf32, #tpu.memory_space<vmem>>, vector<1x768xf32>,
    %c0_95 = arith.constant 0 : index
    %c79 = arith.constant 79 : index
    %74 = vector.load %arg7[%c0_95, %c79] : memref<1x1024xf32, #tpu.memory_space<vmem>>, vector<1x768xf32>
    %c34 = arith.constant 34 : index
    %c0_96 = arith.constant 0 : index
    %75 = vector.load %arg8[%c34, %c0_96] : memref<81x768xf32, #tpu.memory_space<vmem>>, vector<1x768xf32>
    tpu.vector_store %arg8[%c34, %c0_96], %74 {strides = array<i32>} : memref<81x768xf32, #tpu.memory_space<vmem>>, vector<1x768xf32>,
    %c0_97 = arith.constant 0 : index
    %c80 = arith.constant 80 : index
    %76 = vector.load %arg7[%c0_97, %c80] : memref<1x1024xf32, #tpu.memory_space<vmem>>, vector<1x768xf32>
    %c35 = arith.constant 35 : index
    %c0_98 = arith.constant 0 : index
    %77 = vector.load %arg8[%c35, %c0_98] : memref<81x768xf32, #tpu.memory_space<vmem>>, vector<1x768xf32>
    tpu.vector_store %arg8[%c35, %c0_98], %76 {strides = array<i32>} : memref<81x768xf32, #tpu.memory_space<vmem>>, vector<1x768xf32>,
    %c0_99 = arith.constant 0 : index
    %c96 = arith.constant 96 : index
    %78 = vector.load %arg7[%c0_99, %c96] : memref<1x1024xf32, #tpu.memory_space<vmem>>, vector<1x768xf32>
    %c36 = arith.constant 36 : index
    %c0_100 = arith.constant 0 : index
    %79 = vector.load %arg8[%c36, %c0_100] : memref<81x768xf32, #tpu.memory_space<vmem>>, vector<1x768xf32>
    tpu.vector_store %arg8[%c36, %c0_100], %78 {strides = array<i32>} : memref<81x768xf32, #tpu.memory_space<vmem>>, vector<1x768xf32>,
    %c0_101 = arith.constant 0 : index
    %c97 = arith.constant 97 : index
    %80 = vector.load %arg7[%c0_101, %c97] : memref<1x1024xf32, #tpu.memory_space<vmem>>, vector<1x768xf32>
    %c37 = arith.constant 37 : index
    %c0_102 = arith.constant 0 : index
    %81 = vector.load %arg8[%c37, %c0_102] : memref<81x768xf32, #tpu.memory_space<vmem>>, vector<1x768xf32>
    tpu.vector_store %arg8[%c37, %c0_102], %80 {strides = array<i32>} : memref<81x768xf32, #tpu.memory_space<vmem>>, vector<1x768xf32>,
    %c0_103 = arith.constant 0 : index
    %c98 = arith.constant 98 : index
    %82 = vector.load %arg7[%c0_103, %c98] : memref<1x1024xf32, #tpu.memory_space<vmem>>, vector<1x768xf32>
    %c38 = arith.constant 38 : index
    %c0_104 = arith.constant 0 : index
    %83 = vector.load %arg8[%c38, %c0_104] : memref<81x768xf32, #tpu.memory_space<vmem>>, vector<1x768xf32>
    tpu.vector_store %arg8[%c38, %c0_104], %82 {strides = array<i32>} : memref<81x768xf32, #tpu.memory_space<vmem>>, vector<1x768xf32>,
    %c0_105 = arith.constant 0 : index
    %c99 = arith.constant 99 : index
    %84 = vector.load %arg7[%c0_105, %c99] : memref<1x1024xf32, #tpu.memory_space<vmem>>, vector<1x768xf32>
    %c39 = arith.constant 39 : index
    %c0_106 = arith.constant 0 : index
    %85 = vector.load %arg8[%c39, %c0_106] : memref<81x768xf32, #tpu.memory_space<vmem>>, vector<1x768xf32>
    tpu.vector_store %arg8[%c39, %c0_106], %84 {strides = array<i32>} : memref<81x768xf32, #tpu.memory_space<vmem>>, vector<1x768xf32>,
    %c0_107 = arith.constant 0 : index
    %c100 = arith.constant 100 : index
    %86 = vector.load %arg7[%c0_107, %c100] : memref<1x1024xf32, #tpu.memory_space<vmem>>, vector<1x768xf32>
    %c40 = arith.constant 40 : index
    %c0_108 = arith.constant 0 : index
    %87 = vector.load %arg8[%c40, %c0_108] : memref<81x768xf32, #tpu.memory_space<vmem>>, vector<1x768xf32>
    tpu.vector_store %arg8[%c40, %c0_108], %86 {strides = array<i32>} : memref<81x768xf32, #tpu.memory_space<vmem>>, vector<1x768xf32>,
    %c0_109 = arith.constant 0 : index
    %c101 = arith.constant 101 : index
    %88 = vector.load %arg7[%c0_109, %c101] : memref<1x1024xf32, #tpu.memory_space<vmem>>, vector<1x768xf32>
    %c41 = arith.constant 41 : index
    %c0_110 = arith.constant 0 : index
    %89 = vector.load %arg8[%c41, %c0_110] : memref<81x768xf32, #tpu.memory_space<vmem>>, vector<1x768xf32>
    tpu.vector_store %arg8[%c41, %c0_110], %88 {strides = array<i32>} : memref<81x768xf32, #tpu.memory_space<vmem>>, vector<1x768xf32>,
    %c0_111 = arith.constant 0 : index
    %c102 = arith.constant 102 : index
    %90 = vector.load %arg7[%c0_111, %c102] : memref<1x1024xf32, #tpu.memory_space<vmem>>, vector<1x768xf32>
    %c42 = arith.constant 42 : index
    %c0_112 = arith.constant 0 : index
    %91 = vector.load %arg8[%c42, %c0_112] : memref<81x768xf32, #tpu.memory_space<vmem>>, vector<1x768xf32>
    tpu.vector_store %arg8[%c42, %c0_112], %90 {strides = array<i32>} : memref<81x768xf32, #tpu.memory_space<vmem>>, vector<1x768xf32>,
    %c0_113 = arith.constant 0 : index
    %c103 = arith.constant 103 : index
    %92 = vector.load %arg7[%c0_113, %c103] : memref<1x1024xf32, #tpu.memory_space<vmem>>, vector<1x768xf32>
    %c43 = arith.constant 43 : index
    %c0_114 = arith.constant 0 : index
    %93 = vector.load %arg8[%c43, %c0_114] : memref<81x768xf32, #tpu.memory_space<vmem>>, vector<1x768xf32>
    tpu.vector_store %arg8[%c43, %c0_114], %92 {strides = array<i32>} : memref<81x768xf32, #tpu.memory_space<vmem>>, vector<1x768xf32>,
    %c0_115 = arith.constant 0 : index
    %c104 = arith.constant 104 : index
    %94 = vector.load %arg7[%c0_115, %c104] : memref<1x1024xf32, #tpu.memory_space<vmem>>, vector<1x768xf32>
    %c44 = arith.constant 44 : index
    %c0_116 = arith.constant 0 : index
    %95 = vector.load %arg8[%c44, %c0_116] : memref<81x768xf32, #tpu.memory_space<vmem>>, vector<1x768xf32>
    tpu.vector_store %arg8[%c44, %c0_116], %94 {strides = array<i32>} : memref<81x768xf32, #tpu.memory_space<vmem>>, vector<1x768xf32>,
    %c0_117 = arith.constant 0 : index
    %c120 = arith.constant 120 : index
    %96 = vector.load %arg7[%c0_117, %c120] : memref<1x1024xf32, #tpu.memory_space<vmem>>, vector<1x768xf32>
    %c45 = arith.constant 45 : index
    %c0_118 = arith.constant 0 : index
    %97 = vector.load %arg8[%c45, %c0_118] : memref<81x768xf32, #tpu.memory_space<vmem>>, vector<1x768xf32>
    tpu.vector_store %arg8[%c45, %c0_118], %96 {strides = array<i32>} : memref<81x768xf32, #tpu.memory_space<vmem>>, vector<1x768xf32>,
    %c0_119 = arith.constant 0 : index
    %c121 = arith.constant 121 : index
    %98 = vector.load %arg7[%c0_119, %c121] : memref<1x1024xf32, #tpu.memory_space<vmem>>, vector<1x768xf32>
    %c46 = arith.constant 46 : index
    %c0_120 = arith.constant 0 : index
    %99 = vector.load %arg8[%c46, %c0_120] : memref<81x768xf32, #tpu.memory_space<vmem>>, vector<1x768xf32>
    tpu.vector_store %arg8[%c46, %c0_120], %98 {strides = array<i32>} : memref<81x768xf32, #tpu.memory_space<vmem>>, vector<1x768xf32>,
    %c0_121 = arith.constant 0 : index
    %c122 = arith.constant 122 : index
    %100 = vector.load %arg7[%c0_121, %c122] : memref<1x1024xf32, #tpu.memory_space<vmem>>, vector<1x768xf32>
    %c47 = arith.constant 47 : index
    %c0_122 = arith.constant 0 : index
    %101 = vector.load %arg8[%c47, %c0_122] : memref<81x768xf32, #tpu.memory_space<vmem>>, vector<1x768xf32>
    tpu.vector_store %arg8[%c47, %c0_122], %100 {strides = array<i32>} : memref<81x768xf32, #tpu.memory_space<vmem>>, vector<1x768xf32>,
    %c0_123 = arith.constant 0 : index
    %c123 = arith.constant 123 : index
    %102 = vector.load %arg7[%c0_123, %c123] : memref<1x1024xf32, #tpu.memory_space<vmem>>, vector<1x768xf32>
    %c48_124 = arith.constant 48 : index
    %c0_125 = arith.constant 0 : index
    %103 = vector.load %arg8[%c48_124, %c0_125] : memref<81x768xf32, #tpu.memory_space<vmem>>, vector<1x768xf32>
    tpu.vector_store %arg8[%c48_124, %c0_125], %102 {strides = array<i32>} : memref<81x768xf32, #tpu.memory_space<vmem>>, vector<1x768xf32>,
    %c0_126 = arith.constant 0 : index
    %c124 = arith.constant 124 : index
    %104 = vector.load %arg7[%c0_126, %c124] : memref<1x1024xf32, #tpu.memory_space<vmem>>, vector<1x768xf32>
    %c49_127 = arith.constant 49 : index
    %c0_128 = arith.constant 0 : index
    %105 = vector.load %arg8[%c49_127, %c0_128] : memref<81x768xf32, #tpu.memory_space<vmem>>, vector<1x768xf32>
    tpu.vector_store %arg8[%c49_127, %c0_128], %104 {strides = array<i32>} : memref<81x768xf32, #tpu.memory_space<vmem>>, vector<1x768xf32>,
    %c0_129 = arith.constant 0 : index
    %c125 = arith.constant 125 : index
    %106 = vector.load %arg7[%c0_129, %c125] : memref<1x1024xf32, #tpu.memory_space<vmem>>, vector<1x768xf32>
    %c50_130 = arith.constant 50 : index
    %c0_131 = arith.constant 0 : index
    %107 = vector.load %arg8[%c50_130, %c0_131] : memref<81x768xf32, #tpu.memory_space<vmem>>, vector<1x768xf32>
    tpu.vector_store %arg8[%c50_130, %c0_131], %106 {strides = array<i32>} : memref<81x768xf32, #tpu.memory_space<vmem>>, vector<1x768xf32>,
    %c0_132 = arith.constant 0 : index
    %c126 = arith.constant 126 : index
    %108 = vector.load %arg7[%c0_132, %c126] : memref<1x1024xf32, #tpu.memory_space<vmem>>, vector<1x768xf32>
    %c51_133 = arith.constant 51 : index
    %c0_134 = arith.constant 0 : index
    %109 = vector.load %arg8[%c51_133, %c0_134] : memref<81x768xf32, #tpu.memory_space<vmem>>, vector<1x768xf32>
    tpu.vector_store %arg8[%c51_133, %c0_134], %108 {strides = array<i32>} : memref<81x768xf32, #tpu.memory_space<vmem>>, vector<1x768xf32>,
    %c0_135 = arith.constant 0 : index
    %c127 = arith.constant 127 : index
    %110 = vector.load %arg7[%c0_135, %c127] : memref<1x1024xf32, #tpu.memory_space<vmem>>, vector<1x768xf32>
    %c52_136 = arith.constant 52 : index
    %c0_137 = arith.constant 0 : index
    %111 = vector.load %arg8[%c52_136, %c0_137] : memref<81x768xf32, #tpu.memory_space<vmem>>, vector<1x768xf32>
    tpu.vector_store %arg8[%c52_136, %c0_137], %110 {strides = array<i32>} : memref<81x768xf32, #tpu.memory_space<vmem>>, vector<1x768xf32>,
    %c0_138 = arith.constant 0 : index
    %c128 = arith.constant 128 : index
    %112 = vector.load %arg7[%c0_138, %c128] : memref<1x1024xf32, #tpu.memory_space<vmem>>, vector<1x768xf32>
    %c53_139 = arith.constant 53 : index
    %c0_140 = arith.constant 0 : index
    %113 = vector.load %arg8[%c53_139, %c0_140] : memref<81x768xf32, #tpu.memory_space<vmem>>, vector<1x768xf32>
    tpu.vector_store %arg8[%c53_139, %c0_140], %112 {strides = array<i32>} : memref<81x768xf32, #tpu.memory_space<vmem>>, vector<1x768xf32>,
    %c0_141 = arith.constant 0 : index
    %c144 = arith.constant 144 : index
    %114 = vector.load %arg7[%c0_141, %c144] : memref<1x1024xf32, #tpu.memory_space<vmem>>, vector<1x768xf32>
    %c54_142 = arith.constant 54 : index
    %c0_143 = arith.constant 0 : index
    %115 = vector.load %arg8[%c54_142, %c0_143] : memref<81x768xf32, #tpu.memory_space<vmem>>, vector<1x768xf32>
    tpu.vector_store %arg8[%c54_142, %c0_143], %114 {strides = array<i32>} : memref<81x768xf32, #tpu.memory_space<vmem>>, vector<1x768xf32>,
    %c0_144 = arith.constant 0 : index
    %c145 = arith.constant 145 : index
    %116 = vector.load %arg7[%c0_144, %c145] : memref<1x1024xf32, #tpu.memory_space<vmem>>, vector<1x768xf32>
    %c55_145 = arith.constant 55 : index
    %c0_146 = arith.constant 0 : index
    %117 = vector.load %arg8[%c55_145, %c0_146] : memref<81x768xf32, #tpu.memory_space<vmem>>, vector<1x768xf32>
    tpu.vector_store %arg8[%c55_145, %c0_146], %116 {strides = array<i32>} : memref<81x768xf32, #tpu.memory_space<vmem>>, vector<1x768xf32>,
    %c0_147 = arith.constant 0 : index
    %c146 = arith.constant 146 : index
    %118 = vector.load %arg7[%c0_147, %c146] : memref<1x1024xf32, #tpu.memory_space<vmem>>, vector<1x768xf32>
    %c56_148 = arith.constant 56 : index
    %c0_149 = arith.constant 0 : index
    %119 = vector.load %arg8[%c56_148, %c0_149] : memref<81x768xf32, #tpu.memory_space<vmem>>, vector<1x768xf32>
    tpu.vector_store %arg8[%c56_148, %c0_149], %118 {strides = array<i32>} : memref<81x768xf32, #tpu.memory_space<vmem>>, vector<1x768xf32>,
    %c0_150 = arith.constant 0 : index
    %c147 = arith.constant 147 : index
    %120 = vector.load %arg7[%c0_150, %c147] : memref<1x1024xf32, #tpu.memory_space<vmem>>, vector<1x768xf32>
    %c57 = arith.constant 57 : index
    %c0_151 = arith.constant 0 : index
    %121 = vector.load %arg8[%c57, %c0_151] : memref<81x768xf32, #tpu.memory_space<vmem>>, vector<1x768xf32>
    tpu.vector_store %arg8[%c57, %c0_151], %120 {strides = array<i32>} : memref<81x768xf32, #tpu.memory_space<vmem>>, vector<1x768xf32>,
    %c0_152 = arith.constant 0 : index
    %c148 = arith.constant 148 : index
    %122 = vector.load %arg7[%c0_152, %c148] : memref<1x1024xf32, #tpu.memory_space<vmem>>, vector<1x768xf32>
    %c58 = arith.constant 58 : index
    %c0_153 = arith.constant 0 : index
    %123 = vector.load %arg8[%c58, %c0_153] : memref<81x768xf32, #tpu.memory_space<vmem>>, vector<1x768xf32>
    tpu.vector_store %arg8[%c58, %c0_153], %122 {strides = array<i32>} : memref<81x768xf32, #tpu.memory_space<vmem>>, vector<1x768xf32>,
    %c0_154 = arith.constant 0 : index
    %c149 = arith.constant 149 : index
    %124 = vector.load %arg7[%c0_154, %c149] : memref<1x1024xf32, #tpu.memory_space<vmem>>, vector<1x768xf32>
    %c59 = arith.constant 59 : index
    %c0_155 = arith.constant 0 : index
    %125 = vector.load %arg8[%c59, %c0_155] : memref<81x768xf32, #tpu.memory_space<vmem>>, vector<1x768xf32>
    tpu.vector_store %arg8[%c59, %c0_155], %124 {strides = array<i32>} : memref<81x768xf32, #tpu.memory_space<vmem>>, vector<1x768xf32>,
    %c0_156 = arith.constant 0 : index
    %c150 = arith.constant 150 : index
    %126 = vector.load %arg7[%c0_156, %c150] : memref<1x1024xf32, #tpu.memory_space<vmem>>, vector<1x768xf32>
    %c60 = arith.constant 60 : index
    %c0_157 = arith.constant 0 : index
    %127 = vector.load %arg8[%c60, %c0_157] : memref<81x768xf32, #tpu.memory_space<vmem>>, vector<1x768xf32>
    tpu.vector_store %arg8[%c60, %c0_157], %126 {strides = array<i32>} : memref<81x768xf32, #tpu.memory_space<vmem>>, vector<1x768xf32>,
    %c0_158 = arith.constant 0 : index
    %c151 = arith.constant 151 : index
    %128 = vector.load %arg7[%c0_158, %c151] : memref<1x1024xf32, #tpu.memory_space<vmem>>, vector<1x768xf32>
    %c61 = arith.constant 61 : index
    %c0_159 = arith.constant 0 : index
    %129 = vector.load %arg8[%c61, %c0_159] : memref<81x768xf32, #tpu.memory_space<vmem>>, vector<1x768xf32>
    tpu.vector_store %arg8[%c61, %c0_159], %128 {strides = array<i32>} : memref<81x768xf32, #tpu.memory_space<vmem>>, vector<1x768xf32>,
    %c0_160 = arith.constant 0 : index
    %c152 = arith.constant 152 : index
    %130 = vector.load %arg7[%c0_160, %c152] : memref<1x1024xf32, #tpu.memory_space<vmem>>, vector<1x768xf32>
    %c62 = arith.constant 62 : index
    %c0_161 = arith.constant 0 : index
    %131 = vector.load %arg8[%c62, %c0_161] : memref<81x768xf32, #tpu.memory_space<vmem>>, vector<1x768xf32>
    tpu.vector_store %arg8[%c62, %c0_161], %130 {strides = array<i32>} : memref<81x768xf32, #tpu.memory_space<vmem>>, vector<1x768xf32>,
    %c0_162 = arith.constant 0 : index
    %c168 = arith.constant 168 : index
    %132 = vector.load %arg7[%c0_162, %c168] : memref<1x1024xf32, #tpu.memory_space<vmem>>, vector<1x768xf32>
    %c63 = arith.constant 63 : index
    %c0_163 = arith.constant 0 : index
    %133 = vector.load %arg8[%c63, %c0_163] : memref<81x768xf32, #tpu.memory_space<vmem>>, vector<1x768xf32>
    tpu.vector_store %arg8[%c63, %c0_163], %132 {strides = array<i32>} : memref<81x768xf32, #tpu.memory_space<vmem>>, vector<1x768xf32>,
    %c0_164 = arith.constant 0 : index
    %c169 = arith.constant 169 : index
    %134 = vector.load %arg7[%c0_164, %c169] : memref<1x1024xf32, #tpu.memory_space<vmem>>, vector<1x768xf32>
    %c64 = arith.constant 64 : index
    %c0_165 = arith.constant 0 : index
    %135 = vector.load %arg8[%c64, %c0_165] : memref<81x768xf32, #tpu.memory_space<vmem>>, vector<1x768xf32>
    tpu.vector_store %arg8[%c64, %c0_165], %134 {strides = array<i32>} : memref<81x768xf32, #tpu.memory_space<vmem>>, vector<1x768xf32>,
    %c0_166 = arith.constant 0 : index
    %c170 = arith.constant 170 : index
    %136 = vector.load %arg7[%c0_166, %c170] : memref<1x1024xf32, #tpu.memory_space<vmem>>, vector<1x768xf32>
    %c65 = arith.constant 65 : index
    %c0_167 = arith.constant 0 : index
    %137 = vector.load %arg8[%c65, %c0_167] : memref<81x768xf32, #tpu.memory_space<vmem>>, vector<1x768xf32>
    tpu.vector_store %arg8[%c65, %c0_167], %136 {strides = array<i32>} : memref<81x768xf32, #tpu.memory_space<vmem>>, vector<1x768xf32>,
    %c0_168 = arith.constant 0 : index
    %c171 = arith.constant 171 : index
    %138 = vector.load %arg7[%c0_168, %c171] : memref<1x1024xf32, #tpu.memory_space<vmem>>, vector<1x768xf32>
    %c66 = arith.constant 66 : index
    %c0_169 = arith.constant 0 : index
    %139 = vector.load %arg8[%c66, %c0_169] : memref<81x768xf32, #tpu.memory_space<vmem>>, vector<1x768xf32>
    tpu.vector_store %arg8[%c66, %c0_169], %138 {strides = array<i32>} : memref<81x768xf32, #tpu.memory_space<vmem>>, vector<1x768xf32>,
    %c0_170 = arith.constant 0 : index
    %c172 = arith.constant 172 : index
    %140 = vector.load %arg7[%c0_170, %c172] : memref<1x1024xf32, #tpu.memory_space<vmem>>, vector<1x768xf32>
    %c67 = arith.constant 67 : index
    %c0_171 = arith.constant 0 : index
    %141 = vector.load %arg8[%c67, %c0_171] : memref<81x768xf32, #tpu.memory_space<vmem>>, vector<1x768xf32>
    tpu.vector_store %arg8[%c67, %c0_171], %140 {strides = array<i32>} : memref<81x768xf32, #tpu.memory_space<vmem>>, vector<1x768xf32>,
    %c0_172 = arith.constant 0 : index
    %c173 = arith.constant 173 : index
    %142 = vector.load %arg7[%c0_172, %c173] : memref<1x1024xf32, #tpu.memory_space<vmem>>, vector<1x768xf32>
    %c68 = arith.constant 68 : index
    %c0_173 = arith.constant 0 : index
    %143 = vector.load %arg8[%c68, %c0_173] : memref<81x768xf32, #tpu.memory_space<vmem>>, vector<1x768xf32>
    tpu.vector_store %arg8[%c68, %c0_173], %142 {strides = array<i32>} : memref<81x768xf32, #tpu.memory_space<vmem>>, vector<1x768xf32>,
    %c0_174 = arith.constant 0 : index
    %c174 = arith.constant 174 : index
    %144 = vector.load %arg7[%c0_174, %c174] : memref<1x1024xf32, #tpu.memory_space<vmem>>, vector<1x768xf32>
    %c69 = arith.constant 69 : index
    %c0_175 = arith.constant 0 : index
    %145 = vector.load %arg8[%c69, %c0_175] : memref<81x768xf32, #tpu.memory_space<vmem>>, vector<1x768xf32>
    tpu.vector_store %arg8[%c69, %c0_175], %144 {strides = array<i32>} : memref<81x768xf32, #tpu.memory_space<vmem>>, vector<1x768xf32>,
    %c0_176 = arith.constant 0 : index
    %c175 = arith.constant 175 : index
    %146 = vector.load %arg7[%c0_176, %c175] : memref<1x1024xf32, #tpu.memory_space<vmem>>, vector<1x768xf32>
    %c70 = arith.constant 70 : index
    %c0_177 = arith.constant 0 : index
    %147 = vector.load %arg8[%c70, %c0_177] : memref<81x768xf32, #tpu.memory_space<vmem>>, vector<1x768xf32>
    tpu.vector_store %arg8[%c70, %c0_177], %146 {strides = array<i32>} : memref<81x768xf32, #tpu.memory_space<vmem>>, vector<1x768xf32>,
    %c0_178 = arith.constant 0 : index
    %c176 = arith.constant 176 : index
    %148 = vector.load %arg7[%c0_178, %c176] : memref<1x1024xf32, #tpu.memory_space<vmem>>, vector<1x768xf32>
    %c71 = arith.constant 71 : index
    %c0_179 = arith.constant 0 : index
    %149 = vector.load %arg8[%c71, %c0_179] : memref<81x768xf32, #tpu.memory_space<vmem>>, vector<1x768xf32>
    tpu.vector_store %arg8[%c71, %c0_179], %148 {strides = array<i32>} : memref<81x768xf32, #tpu.memory_space<vmem>>, vector<1x768xf32>,
    %c0_180 = arith.constant 0 : index
    %c192 = arith.constant 192 : index
    %150 = vector.load %arg7[%c0_180, %c192] : memref<1x1024xf32, #tpu.memory_space<vmem>>, vector<1x768xf32>
    %c72_181 = arith.constant 72 : index
    %c0_182 = arith.constant 0 : index
    %151 = vector.load %arg8[%c72_181, %c0_182] : memref<81x768xf32, #tpu.memory_space<vmem>>, vector<1x768xf32>
    tpu.vector_store %arg8[%c72_181, %c0_182], %150 {strides = array<i32>} : memref<81x768xf32, #tpu.memory_space<vmem>>, vector<1x768xf32>,
    %c0_183 = arith.constant 0 : index
    %c193 = arith.constant 193 : index
    %152 = vector.load %arg7[%c0_183, %c193] : memref<1x1024xf32, #tpu.memory_space<vmem>>, vector<1x768xf32>
    %c73_184 = arith.constant 73 : index
    %c0_185 = arith.constant 0 : index
    %153 = vector.load %arg8[%c73_184, %c0_185] : memref<81x768xf32, #tpu.memory_space<vmem>>, vector<1x768xf32>
    tpu.vector_store %arg8[%c73_184, %c0_185], %152 {strides = array<i32>} : memref<81x768xf32, #tpu.memory_space<vmem>>, vector<1x768xf32>,
    %c0_186 = arith.constant 0 : index
    %c194 = arith.constant 194 : index
    %154 = vector.load %arg7[%c0_186, %c194] : memref<1x1024xf32, #tpu.memory_space<vmem>>, vector<1x768xf32>
    %c74_187 = arith.constant 74 : index
    %c0_188 = arith.constant 0 : index
    %155 = vector.load %arg8[%c74_187, %c0_188] : memref<81x768xf32, #tpu.memory_space<vmem>>, vector<1x768xf32>
    tpu.vector_store %arg8[%c74_187, %c0_188], %154 {strides = array<i32>} : memref<81x768xf32, #tpu.memory_space<vmem>>, vector<1x768xf32>,
    %c0_189 = arith.constant 0 : index
    %c195 = arith.constant 195 : index
    %156 = vector.load %arg7[%c0_189, %c195] : memref<1x1024xf32, #tpu.memory_space<vmem>>, vector<1x768xf32>
    %c75_190 = arith.constant 75 : index
    %c0_191 = arith.constant 0 : index
    %157 = vector.load %arg8[%c75_190, %c0_191] : memref<81x768xf32, #tpu.memory_space<vmem>>, vector<1x768xf32>
    tpu.vector_store %arg8[%c75_190, %c0_191], %156 {strides = array<i32>} : memref<81x768xf32, #tpu.memory_space<vmem>>, vector<1x768xf32>,
    %c0_192 = arith.constant 0 : index
    %c196 = arith.constant 196 : index
    %158 = vector.load %arg7[%c0_192, %c196] : memref<1x1024xf32, #tpu.memory_space<vmem>>, vector<1x768xf32>
    %c76_193 = arith.constant 76 : index
    %c0_194 = arith.constant 0 : index
    %159 = vector.load %arg8[%c76_193, %c0_194] : memref<81x768xf32, #tpu.memory_space<vmem>>, vector<1x768xf32>
    tpu.vector_store %arg8[%c76_193, %c0_194], %158 {strides = array<i32>} : memref<81x768xf32, #tpu.memory_space<vmem>>, vector<1x768xf32>,
    %c0_195 = arith.constant 0 : index
    %c197 = arith.constant 197 : index
    %160 = vector.load %arg7[%c0_195, %c197] : memref<1x1024xf32, #tpu.memory_space<vmem>>, vector<1x768xf32>
    %c77_196 = arith.constant 77 : index
    %c0_197 = arith.constant 0 : index
    %161 = vector.load %arg8[%c77_196, %c0_197] : memref<81x768xf32, #tpu.memory_space<vmem>>, vector<1x768xf32>
    tpu.vector_store %arg8[%c77_196, %c0_197], %160 {strides = array<i32>} : memref<81x768xf32, #tpu.memory_space<vmem>>, vector<1x768xf32>,
    %c0_198 = arith.constant 0 : index
    %c198 = arith.constant 198 : index
    %162 = vector.load %arg7[%c0_198, %c198] : memref<1x1024xf32, #tpu.memory_space<vmem>>, vector<1x768xf32>
    %c78_199 = arith.constant 78 : index
    %c0_200 = arith.constant 0 : index
    %163 = vector.load %arg8[%c78_199, %c0_200] : memref<81x768xf32, #tpu.memory_space<vmem>>, vector<1x768xf32>
    tpu.vector_store %arg8[%c78_199, %c0_200], %162 {strides = array<i32>} : memref<81x768xf32, #tpu.memory_space<vmem>>, vector<1x768xf32>,
    %c0_201 = arith.constant 0 : index
    %c199 = arith.constant 199 : index
    %164 = vector.load %arg7[%c0_201, %c199] : memref<1x1024xf32, #tpu.memory_space<vmem>>, vector<1x768xf32>
    %c79_202 = arith.constant 79 : index
    %c0_203 = arith.constant 0 : index
    %165 = vector.load %arg8[%c79_202, %c0_203] : memref<81x768xf32, #tpu.memory_space<vmem>>, vector<1x768xf32>
    tpu.vector_store %arg8[%c79_202, %c0_203], %164 {strides = array<i32>} : memref<81x768xf32, #tpu.memory_space<vmem>>, vector<1x768xf32>,
    %c0_204 = arith.constant 0 : index
    %c200 = arith.constant 200 : index
    %166 = vector.load %arg7[%c0_204, %c200] : memref<1x1024xf32, #tpu.memory_space<vmem>>, vector<1x768xf32>
    %c80_205 = arith.constant 80 : index
    %c0_206 = arith.constant 0 : index
    %167 = vector.load %arg8[%c80_205, %c0_206] : memref<81x768xf32, #tpu.memory_space<vmem>>, vector<1x768xf32>
    tpu.vector_store %arg8[%c80_205, %c0_206], %166 {strides = array<i32>} : memref<81x768xf32, #tpu.memory_space<vmem>>, vector<1x768xf32>,
    %c0_207 = arith.constant 0 : index
    %c0_208 = arith.constant 0 : index
    %168 = vector.load %arg4[%c0_207, %c0_208] : memref<8x81xf32, #tpu.memory_space<vmem>>, vector<8x81xf32>
    %c0_209 = arith.constant 0 : index
    %c0_210 = arith.constant 0 : index
    %169 = vector.load %arg8[%c0_209, %c0_210] : memref<81x768xf32, #tpu.memory_space<vmem>>, vector<81x768xf32>
    %cst = arith.constant dense<0.000000e+00> : vector<8x768xf32>
    %170 = tpu.matmul %168, %169, %cst {dimension_numbers = #tpu.dot_dimension_numbers<[1], [0], [0], [1], [0, 0, 1, 1], [], []>} : vector<8x81xf32>, vector<81x768xf32>, vector<8x768xf32> -> vector<8x768xf32>
    %c0_211 = arith.constant 0 : index
    %c0_212 = arith.constant 0 : index
    %171 = vector.load %arg5[%c0_211, %c0_212] : memref<8x1xf32, #tpu.memory_space<vmem>>, vector<8x1xf32>
    %172 = vector.broadcast %171 : vector<8x1xf32> to vector<8x768xf32>
    %173 = arith.addf %170, %172 : vector<8x768xf32>
    %cst_213 = arith.constant 0.000000e+00 : f32
    %174 = vector.broadcast %cst_213 : f32 to vector<8x768xf32>
    %175 = arith.maximumf %173, %174 : vector<8x768xf32>
    %c0_214 = arith.constant 0 : index
    %c0_215 = arith.constant 0 : index
    %c0_216 = arith.constant 0 : index
    %176 = vector.load %arg6[%c0_214, %c0_215, %c0_216] : memref<1x8x768xf32, #tpu.memory_space<vmem>>, vector<1x8x768xf32>
    %177 = vector.shape_cast %176 : vector<1x8x768xf32> to vector<8x768xf32>
    %178 = vector.shape_cast %175 : vector<8x768xf32> to vector<1x8x768xf32>
    tpu.vector_store %arg6[%c0_214, %c0_215, %c0_216], %178 {strides = array<i32>} : memref<1x8x768xf32, #tpu.memory_space<vmem>>, vector<1x8x768xf32>,
    return
  }
  func.func @transform_0(%arg0: i32, %arg1: i32) -> (i32, i32, i32) {
    %c0_i32 = arith.constant 0 : i32
    %c0_i32_0 = arith.constant 0 : i32
    return %arg0, %c0_i32, %arg1 : i32, i32, i32
  }
  func.func @transform_1(%arg0: i32, %arg1: i32) -> (i32, i32, i32) {
    %c1_i32 = arith.constant 1 : i32
    %0 = arith.addi %arg1, %c1_i32 : i32
    %c3_i32 = arith.constant 3 : i32
    %1 = arith.muli %0, %c3_i32 : i32
    %c0_i32 = arith.constant 0 : i32
    %c0_i32_0 = arith.constant 0 : i32
    return %arg0, %c0_i32, %1 : i32, i32, i32
  }
  func.func @transform_2(%arg0: i32, %arg1: i32) -> (i32, i32) {
    %c0_i32 = arith.constant 0 : i32
    %c0_i32_0 = arith.constant 0 : i32
    %c0_i32_1 = arith.constant 0 : i32
    return %c0_i32, %c0_i32_0 : i32, i32
  }
  func.func @transform_3(%arg0: i32, %arg1: i32) -> (i32, i32) {
    %c0_i32 = arith.constant 0 : i32
    %c0_i32_0 = arith.constant 0 : i32
    %c0_i32_1 = arith.constant 0 : i32
    return %c0_i32, %c0_i32_0 : i32, i32
  }
  func.func @transform_4(%arg0: i32, %arg1: i32) -> (i32, i32, i32) {
    %c0_i32 = arith.constant 0 : i32
    %c0_i32_0 = arith.constant 0 : i32
    return %arg0, %c0_i32, %arg1 : i32, i32, i32
  }
}

module attributes {stable_mosaic.version = 11 : i64} {
  func.func @kernel(%arg0: i32, %arg1: i32, %arg2: memref<1x8x384xf32, #tpu.memory_space<vmem>>, %arg3: memref<1x8x128xf32, #tpu.memory_space<vmem>>, %arg4: memref<8x72xf32, #tpu.memory_space<vmem>>, %arg5: memref<8x1xf32, #tpu.memory_space<vmem>>, %arg6: memref<1x384xf32, #tpu.memory_space<vmem>>, %arg7: memref<1x8x384xf32, #tpu.memory_space<vmem>>, %arg8: memref<1x1x8x2xf32, #tpu.memory_space<vmem>>, %arg9: memref<8x512xf32, #tpu.memory_space<vmem>>, %arg10: memref<72x384xf32, #tpu.memory_space<vmem>>) attributes {dimension_semantics = [#tpu.dimension_semantics<parallel>, #tpu.dimension_semantics<parallel>], iteration_bounds = array<i64: 2, 1>, scalar_prefetch = 0 : i64, scratch_operands = 2 : i64, tpu.core_type = #tpu.core_type<tc>, window_params = [{transform_indices = @transform_0, window_bounds = array<i64: 1, 8, 384>}, {transform_indices = @transform_1, window_bounds = array<i64: 1, 8, 128>}, {pipeline_mode = #tpu.pipeline_mode<synchronous>, transform_indices = @transform_2, window_bounds = array<i64: 8, 72>}, {pipeline_mode = #tpu.pipeline_mode<synchronous>, transform_indices = @transform_3, window_bounds = array<i64: 8, 1>}, {transform_indices = @transform_4, window_bounds = array<i64: 1, 384>}, {transform_indices = @transform_5, window_bounds = array<i64: 1, 8, 384>}, {transform_indices = @transform_6, window_bounds = array<i64: 1, 1, 8, 2>}]} {
    %c0 = arith.constant 0 : index
    %c0_0 = arith.constant 0 : index
    %c0_1 = arith.constant 0 : index
    %0 = vector.load %arg2[%c0, %c0_0, %c0_1] : memref<1x8x384xf32, #tpu.memory_space<vmem>>, vector<1x8x384xf32>
    %1 = vector.shape_cast %0 : vector<1x8x384xf32> to vector<8x384xf32>
    %c0_2 = arith.constant 0 : index
    %c0_3 = arith.constant 0 : index
    %2 = vector.load %arg9[%c0_2, %c0_3] : memref<8x512xf32, #tpu.memory_space<vmem>>, vector<8x384xf32>
    tpu.vector_store %arg9[%c0_2, %c0_3], %1 {strides = array<i32>} : memref<8x512xf32, #tpu.memory_space<vmem>>, vector<8x384xf32>,
    %c0_4 = arith.constant 0 : index
    %c0_5 = arith.constant 0 : index
    %c0_6 = arith.constant 0 : index
    %3 = vector.load %arg3[%c0_4, %c0_5, %c0_6] : memref<1x8x128xf32, #tpu.memory_space<vmem>>, vector<1x8x128xf32>
    %4 = vector.shape_cast %3 : vector<1x8x128xf32> to vector<8x128xf32>
    %c0_7 = arith.constant 0 : index
    %c384 = arith.constant 384 : index
    %5 = vector.load %arg9[%c0_7, %c384] : memref<8x512xf32, #tpu.memory_space<vmem>>, vector<8x128xf32>
    tpu.vector_store %arg9[%c0_7, %c384], %4 {strides = array<i32>} : memref<8x512xf32, #tpu.memory_space<vmem>>, vector<8x128xf32>,
    %c0_8 = arith.constant 0 : index
    %c0_9 = arith.constant 0 : index
    %6 = vector.load %arg9[%c0_8, %c0_9] : memref<8x512xf32, #tpu.memory_space<vmem>>, vector<8x384xf32>
    %c0_10 = arith.constant 0 : index
    %c0_11 = arith.constant 0 : index
    %7 = vector.load %arg10[%c0_10, %c0_11] : memref<72x384xf32, #tpu.memory_space<vmem>>, vector<8x384xf32>
    tpu.vector_store %arg10[%c0_10, %c0_11], %6 {strides = array<i32>} : memref<72x384xf32, #tpu.memory_space<vmem>>, vector<8x384xf32>,
    %c0_12 = arith.constant 0 : index
    %c1 = arith.constant 1 : index
    %8 = vector.load %arg9[%c0_12, %c1] : memref<8x512xf32, #tpu.memory_space<vmem>>, vector<8x384xf32>
    %c8 = arith.constant 8 : index
    %c0_13 = arith.constant 0 : index
    %9 = vector.load %arg10[%c8, %c0_13] : memref<72x384xf32, #tpu.memory_space<vmem>>, vector<8x384xf32>
    tpu.vector_store %arg10[%c8, %c0_13], %8 {strides = array<i32>} : memref<72x384xf32, #tpu.memory_space<vmem>>, vector<8x384xf32>,
    %c0_14 = arith.constant 0 : index
    %c2 = arith.constant 2 : index
    %10 = vector.load %arg9[%c0_14, %c2] : memref<8x512xf32, #tpu.memory_space<vmem>>, vector<8x384xf32>
    %c16 = arith.constant 16 : index
    %c0_15 = arith.constant 0 : index
    %11 = vector.load %arg10[%c16, %c0_15] : memref<72x384xf32, #tpu.memory_space<vmem>>, vector<8x384xf32>
    tpu.vector_store %arg10[%c16, %c0_15], %10 {strides = array<i32>} : memref<72x384xf32, #tpu.memory_space<vmem>>, vector<8x384xf32>,
    %c0_16 = arith.constant 0 : index
    %c18 = arith.constant 18 : index
    %12 = vector.load %arg9[%c0_16, %c18] : memref<8x512xf32, #tpu.memory_space<vmem>>, vector<8x384xf32>
    %c24 = arith.constant 24 : index
    %c0_17 = arith.constant 0 : index
    %13 = vector.load %arg10[%c24, %c0_17] : memref<72x384xf32, #tpu.memory_space<vmem>>, vector<8x384xf32>
    tpu.vector_store %arg10[%c24, %c0_17], %12 {strides = array<i32>} : memref<72x384xf32, #tpu.memory_space<vmem>>, vector<8x384xf32>,
    %c0_18 = arith.constant 0 : index
    %c19 = arith.constant 19 : index
    %14 = vector.load %arg9[%c0_18, %c19] : memref<8x512xf32, #tpu.memory_space<vmem>>, vector<8x384xf32>
    %c32 = arith.constant 32 : index
    %c0_19 = arith.constant 0 : index
    %15 = vector.load %arg10[%c32, %c0_19] : memref<72x384xf32, #tpu.memory_space<vmem>>, vector<8x384xf32>
    tpu.vector_store %arg10[%c32, %c0_19], %14 {strides = array<i32>} : memref<72x384xf32, #tpu.memory_space<vmem>>, vector<8x384xf32>,
    %c0_20 = arith.constant 0 : index
    %c20 = arith.constant 20 : index
    %16 = vector.load %arg9[%c0_20, %c20] : memref<8x512xf32, #tpu.memory_space<vmem>>, vector<8x384xf32>
    %c40 = arith.constant 40 : index
    %c0_21 = arith.constant 0 : index
    %17 = vector.load %arg10[%c40, %c0_21] : memref<72x384xf32, #tpu.memory_space<vmem>>, vector<8x384xf32>
    tpu.vector_store %arg10[%c40, %c0_21], %16 {strides = array<i32>} : memref<72x384xf32, #tpu.memory_space<vmem>>, vector<8x384xf32>,
    %c0_22 = arith.constant 0 : index
    %c36 = arith.constant 36 : index
    %18 = vector.load %arg9[%c0_22, %c36] : memref<8x512xf32, #tpu.memory_space<vmem>>, vector<8x384xf32>
    %c48 = arith.constant 48 : index
    %c0_23 = arith.constant 0 : index
    %19 = vector.load %arg10[%c48, %c0_23] : memref<72x384xf32, #tpu.memory_space<vmem>>, vector<8x384xf32>
    tpu.vector_store %arg10[%c48, %c0_23], %18 {strides = array<i32>} : memref<72x384xf32, #tpu.memory_space<vmem>>, vector<8x384xf32>,
    %c0_24 = arith.constant 0 : index
    %c37 = arith.constant 37 : index
    %20 = vector.load %arg9[%c0_24, %c37] : memref<8x512xf32, #tpu.memory_space<vmem>>, vector<8x384xf32>
    %c56 = arith.constant 56 : index
    %c0_25 = arith.constant 0 : index
    %21 = vector.load %arg10[%c56, %c0_25] : memref<72x384xf32, #tpu.memory_space<vmem>>, vector<8x384xf32>
    tpu.vector_store %arg10[%c56, %c0_25], %20 {strides = array<i32>} : memref<72x384xf32, #tpu.memory_space<vmem>>, vector<8x384xf32>,
    %c0_26 = arith.constant 0 : index
    %c38 = arith.constant 38 : index
    %22 = vector.load %arg9[%c0_26, %c38] : memref<8x512xf32, #tpu.memory_space<vmem>>, vector<8x384xf32>
    %c64 = arith.constant 64 : index
    %c0_27 = arith.constant 0 : index
    %23 = vector.load %arg10[%c64, %c0_27] : memref<72x384xf32, #tpu.memory_space<vmem>>, vector<8x384xf32>
    tpu.vector_store %arg10[%c64, %c0_27], %22 {strides = array<i32>} : memref<72x384xf32, #tpu.memory_space<vmem>>, vector<8x384xf32>,
    %c0_28 = arith.constant 0 : index
    %c0_29 = arith.constant 0 : index
    %24 = vector.load %arg4[%c0_28, %c0_29] : memref<8x72xf32, #tpu.memory_space<vmem>>, vector<8x72xf32>
    %c0_30 = arith.constant 0 : index
    %c0_31 = arith.constant 0 : index
    %25 = vector.load %arg10[%c0_30, %c0_31] : memref<72x384xf32, #tpu.memory_space<vmem>>, vector<72x384xf32>
    %cst = arith.constant dense<0.000000e+00> : vector<8x384xf32>
    %26 = tpu.matmul %24, %25, %cst {dimension_numbers = #tpu.dot_dimension_numbers<[1], [0], [0], [1], [0, 0, 1, 1], [], []>} : vector<8x72xf32>, vector<72x384xf32>, vector<8x384xf32> -> vector<8x384xf32>
    %c0_32 = arith.constant 0 : index
    %c0_33 = arith.constant 0 : index
    %27 = vector.load %arg5[%c0_32, %c0_33] : memref<8x1xf32, #tpu.memory_space<vmem>>, vector<8x1xf32>
    %28 = vector.broadcast %27 : vector<8x1xf32> to vector<8x384xf32>
    %29 = arith.addf %26, %28 : vector<8x384xf32>
    %c0_34 = arith.constant 0 : index
    %c0_35 = arith.constant 0 : index
    %c0_36 = arith.constant 0 : index
    %30 = vector.load %arg7[%c0_34, %c0_35, %c0_36] : memref<1x8x384xf32, #tpu.memory_space<vmem>>, vector<1x8x384xf32>
    %31 = vector.shape_cast %30 : vector<1x8x384xf32> to vector<8x384xf32>
    %32 = vector.shape_cast %29 : vector<8x384xf32> to vector<1x8x384xf32>
    tpu.vector_store %arg7[%c0_34, %c0_35, %c0_36], %32 {strides = array<i32>} : memref<1x8x384xf32, #tpu.memory_space<vmem>>, vector<1x8x384xf32>,
    %c0_37 = arith.constant 0 : index
    %c0_38 = arith.constant 0 : index
    %33 = vector.load %arg6[%c0_37, %c0_38] : memref<1x384xf32, #tpu.memory_space<vmem>>, vector<1x384xf32>
    %34 = vector.broadcast %33 : vector<1x384xf32> to vector<8x384xf32>
    %35 = arith.mulf %29, %34 : vector<8x384xf32>
    %cst_39 = arith.constant dense<0.000000e+00> : vector<8xf32>
    %36 = vector.multi_reduction <add>, %35, %cst_39 [1] : vector<8x384xf32> to vector<8xf32>
    %37 = vector.shape_cast %36 : vector<8xf32> to vector<8x1xf32>
    %38 = arith.mulf %35, %35 : vector<8x384xf32>
    %cst_40 = arith.constant dense<0.000000e+00> : vector<8xf32>
    %39 = vector.multi_reduction <add>, %38, %cst_40 [1] : vector<8x384xf32> to vector<8xf32>
    %40 = vector.shape_cast %39 : vector<8xf32> to vector<8x1xf32>
    %41 = tpu.concatenate %37, %40 in 1 : vector<8x1xf32>, vector<8x1xf32> -> vector<8x2xf32>
    %42 = vector.shape_cast %41 : vector<8x2xf32> to vector<1x1x8x2xf32>
    %c0_41 = arith.constant 0 : index
    %c0_42 = arith.constant 0 : index
    %c0_43 = arith.constant 0 : index
    %c0_44 = arith.constant 0 : index
    %43 = vector.load %arg8[%c0_41, %c0_42, %c0_43, %c0_44] : memref<1x1x8x2xf32, #tpu.memory_space<vmem>>, vector<1x1x8x2xf32>
    tpu.vector_store %arg8[%c0_41, %c0_42, %c0_43, %c0_44], %42 {strides = array<i32>} : memref<1x1x8x2xf32, #tpu.memory_space<vmem>>, vector<1x1x8x2xf32>,
    return
  }
  func.func @transform_0(%arg0: i32, %arg1: i32) -> (i32, i32, i32) {
    %c0_i32 = arith.constant 0 : i32
    %c0_i32_0 = arith.constant 0 : i32
    return %arg0, %c0_i32, %arg1 : i32, i32, i32
  }
  func.func @transform_1(%arg0: i32, %arg1: i32) -> (i32, i32, i32) {
    %c1_i32 = arith.constant 1 : i32
    %0 = arith.addi %arg1, %c1_i32 : i32
    %c3_i32 = arith.constant 3 : i32
    %1 = arith.muli %0, %c3_i32 : i32
    %c0_i32 = arith.constant 0 : i32
    %c0_i32_0 = arith.constant 0 : i32
    return %arg0, %c0_i32, %1 : i32, i32, i32
  }
  func.func @transform_2(%arg0: i32, %arg1: i32) -> (i32, i32) {
    %c0_i32 = arith.constant 0 : i32
    %c0_i32_0 = arith.constant 0 : i32
    %c0_i32_1 = arith.constant 0 : i32
    return %c0_i32, %c0_i32_0 : i32, i32
  }
  func.func @transform_3(%arg0: i32, %arg1: i32) -> (i32, i32) {
    %c0_i32 = arith.constant 0 : i32
    %c0_i32_0 = arith.constant 0 : i32
    %c0_i32_1 = arith.constant 0 : i32
    return %c0_i32, %c0_i32_0 : i32, i32
  }
  func.func @transform_4(%arg0: i32, %arg1: i32) -> (i32, i32) {
    %c0_i32 = arith.constant 0 : i32
    %c0_i32_0 = arith.constant 0 : i32
    return %c0_i32, %arg1 : i32, i32
  }
  func.func @transform_5(%arg0: i32, %arg1: i32) -> (i32, i32, i32) {
    %c0_i32 = arith.constant 0 : i32
    %c0_i32_0 = arith.constant 0 : i32
    return %arg0, %c0_i32, %arg1 : i32, i32, i32
  }
  func.func @transform_6(%arg0: i32, %arg1: i32) -> (i32, i32, i32, i32) {
    %c0_i32 = arith.constant 0 : i32
    %c0_i32_0 = arith.constant 0 : i32
    %c0_i32_1 = arith.constant 0 : i32
    return %arg0, %arg1, %c0_i32, %c0_i32_0 : i32, i32, i32, i32
  }
}

module attributes {stable_mosaic.version = 11 : i64} {
  func.func @kernel(%arg0: i32, %arg1: i32, %arg2: memref<1x8x256xf32, #tpu.memory_space<vmem>>, %arg3: memref<8x1xf32, #tpu.memory_space<vmem>>, %arg4: memref<8x1xf32, #tpu.memory_space<vmem>>, %arg5: memref<1x8x256xf32, #tpu.memory_space<vmem>>) attributes {dimension_semantics = [#tpu.dimension_semantics<parallel>, #tpu.dimension_semantics<parallel>], iteration_bounds = array<i64: 2, 1>, scalar_prefetch = 0 : i64, scratch_operands = 0 : i64, tpu.core_type = #tpu.core_type<tc>, window_params = [{transform_indices = @transform_0, window_bounds = array<i64: 1, 8, 256>}, {pipeline_mode = #tpu.pipeline_mode<synchronous>, transform_indices = @transform_1, window_bounds = array<i64: 8, 1>}, {pipeline_mode = #tpu.pipeline_mode<synchronous>, transform_indices = @transform_2, window_bounds = array<i64: 8, 1>}, {transform_indices = @transform_3, window_bounds = array<i64: 1, 8, 256>}]} {
    %c0 = arith.constant 0 : index
    %c0_0 = arith.constant 0 : index
    %c0_1 = arith.constant 0 : index
    %0 = vector.load %arg2[%c0, %c0_0, %c0_1] : memref<1x8x256xf32, #tpu.memory_space<vmem>>, vector<1x8x256xf32>
    %1 = vector.shape_cast %0 : vector<1x8x256xf32> to vector<8x256xf32>
    %c0_2 = arith.constant 0 : index
    %c0_3 = arith.constant 0 : index
    %2 = vector.load %arg3[%c0_2, %c0_3] : memref<8x1xf32, #tpu.memory_space<vmem>>, vector<8x1xf32>
    %3 = vector.broadcast %2 : vector<8x1xf32> to vector<8x256xf32>
    %4 = arith.mulf %1, %3 : vector<8x256xf32>
    %c0_4 = arith.constant 0 : index
    %c0_5 = arith.constant 0 : index
    %5 = vector.load %arg4[%c0_4, %c0_5] : memref<8x1xf32, #tpu.memory_space<vmem>>, vector<8x1xf32>
    %6 = vector.broadcast %5 : vector<8x1xf32> to vector<8x256xf32>
    %7 = arith.addf %4, %6 : vector<8x256xf32>
    %cst = arith.constant 0.000000e+00 : f32
    %8 = vector.broadcast %cst : f32 to vector<8x256xf32>
    %9 = arith.maximumf %7, %8 : vector<8x256xf32>
    %c0_6 = arith.constant 0 : index
    %c0_7 = arith.constant 0 : index
    %c0_8 = arith.constant 0 : index
    %10 = vector.load %arg5[%c0_6, %c0_7, %c0_8] : memref<1x8x256xf32, #tpu.memory_space<vmem>>, vector<1x8x256xf32>
    %11 = vector.shape_cast %10 : vector<1x8x256xf32> to vector<8x256xf32>
    %12 = vector.shape_cast %9 : vector<8x256xf32> to vector<1x8x256xf32>
    tpu.vector_store %arg5[%c0_6, %c0_7, %c0_8], %12 {strides = array<i32>} : memref<1x8x256xf32, #tpu.memory_space<vmem>>, vector<1x8x256xf32>,
    return
  }
  func.func @transform_0(%arg0: i32, %arg1: i32) -> (i32, i32, i32) {
    %c0_i32 = arith.constant 0 : i32
    %c0_i32_0 = arith.constant 0 : i32
    return %arg0, %c0_i32, %arg1 : i32, i32, i32
  }
  func.func @transform_1(%arg0: i32, %arg1: i32) -> (i32, i32) {
    %c0_i32 = arith.constant 0 : i32
    %c0_i32_0 = arith.constant 0 : i32
    %c0_i32_1 = arith.constant 0 : i32
    return %c0_i32, %c0_i32_0 : i32, i32
  }
  func.func @transform_2(%arg0: i32, %arg1: i32) -> (i32, i32) {
    %c0_i32 = arith.constant 0 : i32
    %c0_i32_0 = arith.constant 0 : i32
    %c0_i32_1 = arith.constant 0 : i32
    return %c0_i32, %c0_i32_0 : i32, i32
  }
  func.func @transform_3(%arg0: i32, %arg1: i32) -> (i32, i32, i32) {
    %c0_i32 = arith.constant 0 : i32
    %c0_i32_0 = arith.constant 0 : i32
    return %arg0, %c0_i32, %arg1 : i32, i32, i32
  }
}

module attributes {stable_mosaic.version = 11 : i64} {
  func.func @kernel(%arg0: i32, %arg1: i32, %arg2: memref<1x8x256xf32, #tpu.memory_space<vmem>>, %arg3: memref<8x1xf32, #tpu.memory_space<vmem>>, %arg4: memref<8x1xf32, #tpu.memory_space<vmem>>, %arg5: memref<1x8x256xf32, #tpu.memory_space<vmem>>, %arg6: memref<1x8x256xf32, #tpu.memory_space<vmem>>) attributes {dimension_semantics = [#tpu.dimension_semantics<parallel>, #tpu.dimension_semantics<parallel>], iteration_bounds = array<i64: 2, 1>, scalar_prefetch = 0 : i64, scratch_operands = 0 : i64, tpu.core_type = #tpu.core_type<tc>, window_params = [{transform_indices = @transform_0, window_bounds = array<i64: 1, 8, 256>}, {pipeline_mode = #tpu.pipeline_mode<synchronous>, transform_indices = @transform_1, window_bounds = array<i64: 8, 1>}, {pipeline_mode = #tpu.pipeline_mode<synchronous>, transform_indices = @transform_2, window_bounds = array<i64: 8, 1>}, {transform_indices = @transform_3, window_bounds = array<i64: 1, 8, 256>}, {transform_indices = @transform_4, window_bounds = array<i64: 1, 8, 256>}]} {
    %c0 = arith.constant 0 : index
    %c0_0 = arith.constant 0 : index
    %c0_1 = arith.constant 0 : index
    %0 = vector.load %arg2[%c0, %c0_0, %c0_1] : memref<1x8x256xf32, #tpu.memory_space<vmem>>, vector<1x8x256xf32>
    %1 = vector.shape_cast %0 : vector<1x8x256xf32> to vector<8x256xf32>
    %c0_2 = arith.constant 0 : index
    %c0_3 = arith.constant 0 : index
    %2 = vector.load %arg3[%c0_2, %c0_3] : memref<8x1xf32, #tpu.memory_space<vmem>>, vector<8x1xf32>
    %3 = vector.broadcast %2 : vector<8x1xf32> to vector<8x256xf32>
    %4 = arith.mulf %1, %3 : vector<8x256xf32>
    %c0_4 = arith.constant 0 : index
    %c0_5 = arith.constant 0 : index
    %5 = vector.load %arg4[%c0_4, %c0_5] : memref<8x1xf32, #tpu.memory_space<vmem>>, vector<8x1xf32>
    %6 = vector.broadcast %5 : vector<8x1xf32> to vector<8x256xf32>
    %7 = arith.addf %4, %6 : vector<8x256xf32>
    %c0_6 = arith.constant 0 : index
    %c0_7 = arith.constant 0 : index
    %c0_8 = arith.constant 0 : index
    %8 = vector.load %arg5[%c0_6, %c0_7, %c0_8] : memref<1x8x256xf32, #tpu.memory_space<vmem>>, vector<1x8x256xf32>
    %9 = vector.shape_cast %8 : vector<1x8x256xf32> to vector<8x256xf32>
    %10 = arith.addf %7, %9 : vector<8x256xf32>
    %c0_9 = arith.constant 0 : index
    %c0_10 = arith.constant 0 : index
    %c0_11 = arith.constant 0 : index
    %11 = vector.load %arg6[%c0_9, %c0_10, %c0_11] : memref<1x8x256xf32, #tpu.memory_space<vmem>>, vector<1x8x256xf32>
    %12 = vector.shape_cast %11 : vector<1x8x256xf32> to vector<8x256xf32>
    %13 = vector.shape_cast %10 : vector<8x256xf32> to vector<1x8x256xf32>
    tpu.vector_store %arg6[%c0_9, %c0_10, %c0_11], %13 {strides = array<i32>} : memref<1x8x256xf32, #tpu.memory_space<vmem>>, vector<1x8x256xf32>,
    return
  }
  func.func @transform_0(%arg0: i32, %arg1: i32) -> (i32, i32, i32) {
    %c0_i32 = arith.constant 0 : i32
    %c0_i32_0 = arith.constant 0 : i32
    return %arg0, %c0_i32, %arg1 : i32, i32, i32
  }
  func.func @transform_1(%arg0: i32, %arg1: i32) -> (i32, i32) {
    %c0_i32 = arith.constant 0 : i32
    %c0_i32_0 = arith.constant 0 : i32
    %c0_i32_1 = arith.constant 0 : i32
    return %c0_i32, %c0_i32_0 : i32, i32
  }
  func.func @transform_2(%arg0: i32, %arg1: i32) -> (i32, i32) {
    %c0_i32 = arith.constant 0 : i32
    %c0_i32_0 = arith.constant 0 : i32
    %c0_i32_1 = arith.constant 0 : i32
    return %c0_i32, %c0_i32_0 : i32, i32
  }
  func.func @transform_3(%arg0: i32, %arg1: i32) -> (i32, i32, i32) {
    %c0_i32 = arith.constant 0 : i32
    %c0_i32_0 = arith.constant 0 : i32
    return %arg0, %c0_i32, %arg1 : i32, i32, i32
  }
  func.func @transform_4(%arg0: i32, %arg1: i32) -> (i32, i32, i32) {
    %c0_i32 = arith.constant 0 : i32
    %c0_i32_0 = arith.constant 0 : i32
    return %arg0, %c0_i32, %arg1 : i32, i32, i32
  }
}

module attributes {stable_mosaic.version = 11 : i64} {
  func.func @kernel(%arg0: i32, %arg1: i32, %arg2: memref<1x8x384xf32, #tpu.memory_space<vmem>>, %arg3: memref<1x8x128xf32, #tpu.memory_space<vmem>>, %arg4: memref<8x72xf32, #tpu.memory_space<vmem>>, %arg5: memref<8x1xf32, #tpu.memory_space<vmem>>, %arg6: memref<1x8x384xf32, #tpu.memory_space<vmem>>, %arg7: memref<8x512xf32, #tpu.memory_space<vmem>>, %arg8: memref<72x384xf32, #tpu.memory_space<vmem>>) attributes {dimension_semantics = [#tpu.dimension_semantics<parallel>, #tpu.dimension_semantics<parallel>], iteration_bounds = array<i64: 2, 1>, scalar_prefetch = 0 : i64, scratch_operands = 2 : i64, tpu.core_type = #tpu.core_type<tc>, window_params = [{transform_indices = @transform_0, window_bounds = array<i64: 1, 8, 384>}, {transform_indices = @transform_1, window_bounds = array<i64: 1, 8, 128>}, {pipeline_mode = #tpu.pipeline_mode<synchronous>, transform_indices = @transform_2, window_bounds = array<i64: 8, 72>}, {pipeline_mode = #tpu.pipeline_mode<synchronous>, transform_indices = @transform_3, window_bounds = array<i64: 8, 1>}, {transform_indices = @transform_4, window_bounds = array<i64: 1, 8, 384>}]} {
    %c0 = arith.constant 0 : index
    %c0_0 = arith.constant 0 : index
    %c0_1 = arith.constant 0 : index
    %0 = vector.load %arg2[%c0, %c0_0, %c0_1] : memref<1x8x384xf32, #tpu.memory_space<vmem>>, vector<1x8x384xf32>
    %1 = vector.shape_cast %0 : vector<1x8x384xf32> to vector<8x384xf32>
    %c0_2 = arith.constant 0 : index
    %c0_3 = arith.constant 0 : index
    %2 = vector.load %arg7[%c0_2, %c0_3] : memref<8x512xf32, #tpu.memory_space<vmem>>, vector<8x384xf32>
    tpu.vector_store %arg7[%c0_2, %c0_3], %1 {strides = array<i32>} : memref<8x512xf32, #tpu.memory_space<vmem>>, vector<8x384xf32>,
    %c0_4 = arith.constant 0 : index
    %c0_5 = arith.constant 0 : index
    %c0_6 = arith.constant 0 : index
    %3 = vector.load %arg3[%c0_4, %c0_5, %c0_6] : memref<1x8x128xf32, #tpu.memory_space<vmem>>, vector<1x8x128xf32>
    %4 = vector.shape_cast %3 : vector<1x8x128xf32> to vector<8x128xf32>
    %c0_7 = arith.constant 0 : index
    %c384 = arith.constant 384 : index
    %5 = vector.load %arg7[%c0_7, %c384] : memref<8x512xf32, #tpu.memory_space<vmem>>, vector<8x128xf32>
    tpu.vector_store %arg7[%c0_7, %c384], %4 {strides = array<i32>} : memref<8x512xf32, #tpu.memory_space<vmem>>, vector<8x128xf32>,
    %c0_8 = arith.constant 0 : index
    %c0_9 = arith.constant 0 : index
    %6 = vector.load %arg7[%c0_8, %c0_9] : memref<8x512xf32, #tpu.memory_space<vmem>>, vector<8x384xf32>
    %c0_10 = arith.constant 0 : index
    %c0_11 = arith.constant 0 : index
    %7 = vector.load %arg8[%c0_10, %c0_11] : memref<72x384xf32, #tpu.memory_space<vmem>>, vector<8x384xf32>
    tpu.vector_store %arg8[%c0_10, %c0_11], %6 {strides = array<i32>} : memref<72x384xf32, #tpu.memory_space<vmem>>, vector<8x384xf32>,
    %c0_12 = arith.constant 0 : index
    %c1 = arith.constant 1 : index
    %8 = vector.load %arg7[%c0_12, %c1] : memref<8x512xf32, #tpu.memory_space<vmem>>, vector<8x384xf32>
    %c8 = arith.constant 8 : index
    %c0_13 = arith.constant 0 : index
    %9 = vector.load %arg8[%c8, %c0_13] : memref<72x384xf32, #tpu.memory_space<vmem>>, vector<8x384xf32>
    tpu.vector_store %arg8[%c8, %c0_13], %8 {strides = array<i32>} : memref<72x384xf32, #tpu.memory_space<vmem>>, vector<8x384xf32>,
    %c0_14 = arith.constant 0 : index
    %c2 = arith.constant 2 : index
    %10 = vector.load %arg7[%c0_14, %c2] : memref<8x512xf32, #tpu.memory_space<vmem>>, vector<8x384xf32>
    %c16 = arith.constant 16 : index
    %c0_15 = arith.constant 0 : index
    %11 = vector.load %arg8[%c16, %c0_15] : memref<72x384xf32, #tpu.memory_space<vmem>>, vector<8x384xf32>
    tpu.vector_store %arg8[%c16, %c0_15], %10 {strides = array<i32>} : memref<72x384xf32, #tpu.memory_space<vmem>>, vector<8x384xf32>,
    %c0_16 = arith.constant 0 : index
    %c18 = arith.constant 18 : index
    %12 = vector.load %arg7[%c0_16, %c18] : memref<8x512xf32, #tpu.memory_space<vmem>>, vector<8x384xf32>
    %c24 = arith.constant 24 : index
    %c0_17 = arith.constant 0 : index
    %13 = vector.load %arg8[%c24, %c0_17] : memref<72x384xf32, #tpu.memory_space<vmem>>, vector<8x384xf32>
    tpu.vector_store %arg8[%c24, %c0_17], %12 {strides = array<i32>} : memref<72x384xf32, #tpu.memory_space<vmem>>, vector<8x384xf32>,
    %c0_18 = arith.constant 0 : index
    %c19 = arith.constant 19 : index
    %14 = vector.load %arg7[%c0_18, %c19] : memref<8x512xf32, #tpu.memory_space<vmem>>, vector<8x384xf32>
    %c32 = arith.constant 32 : index
    %c0_19 = arith.constant 0 : index
    %15 = vector.load %arg8[%c32, %c0_19] : memref<72x384xf32, #tpu.memory_space<vmem>>, vector<8x384xf32>
    tpu.vector_store %arg8[%c32, %c0_19], %14 {strides = array<i32>} : memref<72x384xf32, #tpu.memory_space<vmem>>, vector<8x384xf32>,
    %c0_20 = arith.constant 0 : index
    %c20 = arith.constant 20 : index
    %16 = vector.load %arg7[%c0_20, %c20] : memref<8x512xf32, #tpu.memory_space<vmem>>, vector<8x384xf32>
    %c40 = arith.constant 40 : index
    %c0_21 = arith.constant 0 : index
    %17 = vector.load %arg8[%c40, %c0_21] : memref<72x384xf32, #tpu.memory_space<vmem>>, vector<8x384xf32>
    tpu.vector_store %arg8[%c40, %c0_21], %16 {strides = array<i32>} : memref<72x384xf32, #tpu.memory_space<vmem>>, vector<8x384xf32>,
    %c0_22 = arith.constant 0 : index
    %c36 = arith.constant 36 : index
    %18 = vector.load %arg7[%c0_22, %c36] : memref<8x512xf32, #tpu.memory_space<vmem>>, vector<8x384xf32>
    %c48 = arith.constant 48 : index
    %c0_23 = arith.constant 0 : index
    %19 = vector.load %arg8[%c48, %c0_23] : memref<72x384xf32, #tpu.memory_space<vmem>>, vector<8x384xf32>
    tpu.vector_store %arg8[%c48, %c0_23], %18 {strides = array<i32>} : memref<72x384xf32, #tpu.memory_space<vmem>>, vector<8x384xf32>,
    %c0_24 = arith.constant 0 : index
    %c37 = arith.constant 37 : index
    %20 = vector.load %arg7[%c0_24, %c37] : memref<8x512xf32, #tpu.memory_space<vmem>>, vector<8x384xf32>
    %c56 = arith.constant 56 : index
    %c0_25 = arith.constant 0 : index
    %21 = vector.load %arg8[%c56, %c0_25] : memref<72x384xf32, #tpu.memory_space<vmem>>, vector<8x384xf32>
    tpu.vector_store %arg8[%c56, %c0_25], %20 {strides = array<i32>} : memref<72x384xf32, #tpu.memory_space<vmem>>, vector<8x384xf32>,
    %c0_26 = arith.constant 0 : index
    %c38 = arith.constant 38 : index
    %22 = vector.load %arg7[%c0_26, %c38] : memref<8x512xf32, #tpu.memory_space<vmem>>, vector<8x384xf32>
    %c64 = arith.constant 64 : index
    %c0_27 = arith.constant 0 : index
    %23 = vector.load %arg8[%c64, %c0_27] : memref<72x384xf32, #tpu.memory_space<vmem>>, vector<8x384xf32>
    tpu.vector_store %arg8[%c64, %c0_27], %22 {strides = array<i32>} : memref<72x384xf32, #tpu.memory_space<vmem>>, vector<8x384xf32>,
    %c0_28 = arith.constant 0 : index
    %c0_29 = arith.constant 0 : index
    %24 = vector.load %arg4[%c0_28, %c0_29] : memref<8x72xf32, #tpu.memory_space<vmem>>, vector<8x72xf32>
    %c0_30 = arith.constant 0 : index
    %c0_31 = arith.constant 0 : index
    %25 = vector.load %arg8[%c0_30, %c0_31] : memref<72x384xf32, #tpu.memory_space<vmem>>, vector<72x384xf32>
    %cst = arith.constant dense<0.000000e+00> : vector<8x384xf32>
    %26 = tpu.matmul %24, %25, %cst {dimension_numbers = #tpu.dot_dimension_numbers<[1], [0], [0], [1], [0, 0, 1, 1], [], []>} : vector<8x72xf32>, vector<72x384xf32>, vector<8x384xf32> -> vector<8x384xf32>
    %c0_32 = arith.constant 0 : index
    %c0_33 = arith.constant 0 : index
    %27 = vector.load %arg5[%c0_32, %c0_33] : memref<8x1xf32, #tpu.memory_space<vmem>>, vector<8x1xf32>
    %28 = vector.broadcast %27 : vector<8x1xf32> to vector<8x384xf32>
    %29 = arith.addf %26, %28 : vector<8x384xf32>
    %cst_34 = arith.constant 0.000000e+00 : f32
    %30 = vector.broadcast %cst_34 : f32 to vector<8x384xf32>
    %31 = arith.maximumf %29, %30 : vector<8x384xf32>
    %c0_35 = arith.constant 0 : index
    %c0_36 = arith.constant 0 : index
    %c0_37 = arith.constant 0 : index
    %32 = vector.load %arg6[%c0_35, %c0_36, %c0_37] : memref<1x8x384xf32, #tpu.memory_space<vmem>>, vector<1x8x384xf32>
    %33 = vector.shape_cast %32 : vector<1x8x384xf32> to vector<8x384xf32>
    %34 = vector.shape_cast %31 : vector<8x384xf32> to vector<1x8x384xf32>
    tpu.vector_store %arg6[%c0_35, %c0_36, %c0_37], %34 {strides = array<i32>} : memref<1x8x384xf32, #tpu.memory_space<vmem>>, vector<1x8x384xf32>,
    return
  }
  func.func @transform_0(%arg0: i32, %arg1: i32) -> (i32, i32, i32) {
    %c0_i32 = arith.constant 0 : i32
    %c0_i32_0 = arith.constant 0 : i32
    return %arg0, %c0_i32, %arg1 : i32, i32, i32
  }
  func.func @transform_1(%arg0: i32, %arg1: i32) -> (i32, i32, i32) {
    %c1_i32 = arith.constant 1 : i32
    %0 = arith.addi %arg1, %c1_i32 : i32
    %c3_i32 = arith.constant 3 : i32
    %1 = arith.muli %0, %c3_i32 : i32
    %c0_i32 = arith.constant 0 : i32
    %c0_i32_0 = arith.constant 0 : i32
    return %arg0, %c0_i32, %1 : i32, i32, i32
  }
  func.func @transform_2(%arg0: i32, %arg1: i32) -> (i32, i32) {
    %c0_i32 = arith.constant 0 : i32
    %c0_i32_0 = arith.constant 0 : i32
    %c0_i32_1 = arith.constant 0 : i32
    return %c0_i32, %c0_i32_0 : i32, i32
  }
  func.func @transform_3(%arg0: i32, %arg1: i32) -> (i32, i32) {
    %c0_i32 = arith.constant 0 : i32
    %c0_i32_0 = arith.constant 0 : i32
    %c0_i32_1 = arith.constant 0 : i32
    return %c0_i32, %c0_i32_0 : i32, i32
  }
  func.func @transform_4(%arg0: i32, %arg1: i32) -> (i32, i32, i32) {
    %c0_i32 = arith.constant 0 : i32
    %c0_i32_0 = arith.constant 0 : i32
    return %arg0, %c0_i32, %arg1 : i32, i32, i32
  }
}

module attributes {stable_mosaic.version = 11 : i64} {
  func.func @kernel(%arg0: i32, %arg1: i32, %arg2: memref<1x32x128xf32, #tpu.memory_space<vmem>>, %arg3: memref<1x32x128xf32, #tpu.memory_space<vmem>>, %arg4: memref<8x288xf32, #tpu.memory_space<vmem>>, %arg5: memref<8x1xf32, #tpu.memory_space<vmem>>, %arg6: memref<1x8x128xf32, #tpu.memory_space<vmem>>, %arg7: memref<32x256xf32, #tpu.memory_space<vmem>>, %arg8: memref<288x128xf32, #tpu.memory_space<vmem>>) attributes {dimension_semantics = [#tpu.dimension_semantics<parallel>, #tpu.dimension_semantics<parallel>], iteration_bounds = array<i64: 2, 1>, scalar_prefetch = 0 : i64, scratch_operands = 2 : i64, tpu.core_type = #tpu.core_type<tc>, window_params = [{transform_indices = @transform_0, window_bounds = array<i64: 1, 32, 128>}, {transform_indices = @transform_1, window_bounds = array<i64: 1, 32, 128>}, {pipeline_mode = #tpu.pipeline_mode<synchronous>, transform_indices = @transform_2, window_bounds = array<i64: 8, 288>}, {pipeline_mode = #tpu.pipeline_mode<synchronous>, transform_indices = @transform_3, window_bounds = array<i64: 8, 1>}, {transform_indices = @transform_4, window_bounds = array<i64: 1, 8, 128>}]} {
    %c0 = arith.constant 0 : index
    %c0_0 = arith.constant 0 : index
    %c0_1 = arith.constant 0 : index
    %0 = vector.load %arg2[%c0, %c0_0, %c0_1] : memref<1x32x128xf32, #tpu.memory_space<vmem>>, vector<1x32x128xf32>
    %1 = vector.shape_cast %0 : vector<1x32x128xf32> to vector<32x128xf32>
    %c0_2 = arith.constant 0 : index
    %c0_3 = arith.constant 0 : index
    %2 = vector.load %arg7[%c0_2, %c0_3] : memref<32x256xf32, #tpu.memory_space<vmem>>, vector<32x128xf32>
    tpu.vector_store %arg7[%c0_2, %c0_3], %1 {strides = array<i32>} : memref<32x256xf32, #tpu.memory_space<vmem>>, vector<32x128xf32>,
    %c0_4 = arith.constant 0 : index
    %c0_5 = arith.constant 0 : index
    %c0_6 = arith.constant 0 : index
    %3 = vector.load %arg3[%c0_4, %c0_5, %c0_6] : memref<1x32x128xf32, #tpu.memory_space<vmem>>, vector<1x32x128xf32>
    %4 = vector.shape_cast %3 : vector<1x32x128xf32> to vector<32x128xf32>
    %c0_7 = arith.constant 0 : index
    %c128 = arith.constant 128 : index
    %5 = vector.load %arg7[%c0_7, %c128] : memref<32x256xf32, #tpu.memory_space<vmem>>, vector<32x128xf32>
    tpu.vector_store %arg7[%c0_7, %c128], %4 {strides = array<i32>} : memref<32x256xf32, #tpu.memory_space<vmem>>, vector<32x128xf32>,
    %c0_8 = arith.constant 0 : index
    %c0_9 = arith.constant 0 : index
    %6 = vector.load %arg7[%c0_8, %c0_9] : memref<32x256xf32, #tpu.memory_space<vmem>>, vector<32x128xf32>
    %c0_10 = arith.constant 0 : index
    %c0_11 = arith.constant 0 : index
    %7 = vector.load %arg8[%c0_10, %c0_11] : memref<288x128xf32, #tpu.memory_space<vmem>>, vector<32x128xf32>
    tpu.vector_store %arg8[%c0_10, %c0_11], %6 {strides = array<i32>} : memref<288x128xf32, #tpu.memory_space<vmem>>, vector<32x128xf32>,
    %c0_12 = arith.constant 0 : index
    %c1 = arith.constant 1 : index
    %8 = vector.load %arg7[%c0_12, %c1] : memref<32x256xf32, #tpu.memory_space<vmem>>, vector<32x128xf32>
    %c32 = arith.constant 32 : index
    %c0_13 = arith.constant 0 : index
    %9 = vector.load %arg8[%c32, %c0_13] : memref<288x128xf32, #tpu.memory_space<vmem>>, vector<32x128xf32>
    tpu.vector_store %arg8[%c32, %c0_13], %8 {strides = array<i32>} : memref<288x128xf32, #tpu.memory_space<vmem>>, vector<32x128xf32>,
    %c0_14 = arith.constant 0 : index
    %c2 = arith.constant 2 : index
    %10 = vector.load %arg7[%c0_14, %c2] : memref<32x256xf32, #tpu.memory_space<vmem>>, vector<32x128xf32>
    %c64 = arith.constant 64 : index
    %c0_15 = arith.constant 0 : index
    %11 = vector.load %arg8[%c64, %c0_15] : memref<288x128xf32, #tpu.memory_space<vmem>>, vector<32x128xf32>
    tpu.vector_store %arg8[%c64, %c0_15], %10 {strides = array<i32>} : memref<288x128xf32, #tpu.memory_space<vmem>>, vector<32x128xf32>,
    %c0_16 = arith.constant 0 : index
    %c10 = arith.constant 10 : index
    %12 = vector.load %arg7[%c0_16, %c10] : memref<32x256xf32, #tpu.memory_space<vmem>>, vector<32x128xf32>
    %c96 = arith.constant 96 : index
    %c0_17 = arith.constant 0 : index
    %13 = vector.load %arg8[%c96, %c0_17] : memref<288x128xf32, #tpu.memory_space<vmem>>, vector<32x128xf32>
    tpu.vector_store %arg8[%c96, %c0_17], %12 {strides = array<i32>} : memref<288x128xf32, #tpu.memory_space<vmem>>, vector<32x128xf32>,
    %c0_18 = arith.constant 0 : index
    %c11 = arith.constant 11 : index
    %14 = vector.load %arg7[%c0_18, %c11] : memref<32x256xf32, #tpu.memory_space<vmem>>, vector<32x128xf32>
    %c128_19 = arith.constant 128 : index
    %c0_20 = arith.constant 0 : index
    %15 = vector.load %arg8[%c128_19, %c0_20] : memref<288x128xf32, #tpu.memory_space<vmem>>, vector<32x128xf32>
    tpu.vector_store %arg8[%c128_19, %c0_20], %14 {strides = array<i32>} : memref<288x128xf32, #tpu.memory_space<vmem>>, vector<32x128xf32>,
    %c0_21 = arith.constant 0 : index
    %c12 = arith.constant 12 : index
    %16 = vector.load %arg7[%c0_21, %c12] : memref<32x256xf32, #tpu.memory_space<vmem>>, vector<32x128xf32>
    %c160 = arith.constant 160 : index
    %c0_22 = arith.constant 0 : index
    %17 = vector.load %arg8[%c160, %c0_22] : memref<288x128xf32, #tpu.memory_space<vmem>>, vector<32x128xf32>
    tpu.vector_store %arg8[%c160, %c0_22], %16 {strides = array<i32>} : memref<288x128xf32, #tpu.memory_space<vmem>>, vector<32x128xf32>,
    %c0_23 = arith.constant 0 : index
    %c20 = arith.constant 20 : index
    %18 = vector.load %arg7[%c0_23, %c20] : memref<32x256xf32, #tpu.memory_space<vmem>>, vector<32x128xf32>
    %c192 = arith.constant 192 : index
    %c0_24 = arith.constant 0 : index
    %19 = vector.load %arg8[%c192, %c0_24] : memref<288x128xf32, #tpu.memory_space<vmem>>, vector<32x128xf32>
    tpu.vector_store %arg8[%c192, %c0_24], %18 {strides = array<i32>} : memref<288x128xf32, #tpu.memory_space<vmem>>, vector<32x128xf32>,
    %c0_25 = arith.constant 0 : index
    %c21 = arith.constant 21 : index
    %20 = vector.load %arg7[%c0_25, %c21] : memref<32x256xf32, #tpu.memory_space<vmem>>, vector<32x128xf32>
    %c224 = arith.constant 224 : index
    %c0_26 = arith.constant 0 : index
    %21 = vector.load %arg8[%c224, %c0_26] : memref<288x128xf32, #tpu.memory_space<vmem>>, vector<32x128xf32>
    tpu.vector_store %arg8[%c224, %c0_26], %20 {strides = array<i32>} : memref<288x128xf32, #tpu.memory_space<vmem>>, vector<32x128xf32>,
    %c0_27 = arith.constant 0 : index
    %c22 = arith.constant 22 : index
    %22 = vector.load %arg7[%c0_27, %c22] : memref<32x256xf32, #tpu.memory_space<vmem>>, vector<32x128xf32>
    %c256 = arith.constant 256 : index
    %c0_28 = arith.constant 0 : index
    %23 = vector.load %arg8[%c256, %c0_28] : memref<288x128xf32, #tpu.memory_space<vmem>>, vector<32x128xf32>
    tpu.vector_store %arg8[%c256, %c0_28], %22 {strides = array<i32>} : memref<288x128xf32, #tpu.memory_space<vmem>>, vector<32x128xf32>,
    %c0_29 = arith.constant 0 : index
    %c0_30 = arith.constant 0 : index
    %24 = vector.load %arg4[%c0_29, %c0_30] : memref<8x288xf32, #tpu.memory_space<vmem>>, vector<8x288xf32>
    %c0_31 = arith.constant 0 : index
    %c0_32 = arith.constant 0 : index
    %25 = vector.load %arg8[%c0_31, %c0_32] : memref<288x128xf32, #tpu.memory_space<vmem>>, vector<288x128xf32>
    %cst = arith.constant dense<0.000000e+00> : vector<8x128xf32>
    %26 = tpu.matmul %24, %25, %cst {dimension_numbers = #tpu.dot_dimension_numbers<[1], [0], [0], [1], [0, 0, 1, 1], [], []>} : vector<8x288xf32>, vector<288x128xf32>, vector<8x128xf32> -> vector<8x128xf32>
    %c0_33 = arith.constant 0 : index
    %c0_34 = arith.constant 0 : index
    %27 = vector.load %arg5[%c0_33, %c0_34] : memref<8x1xf32, #tpu.memory_space<vmem>>, vector<8x1xf32>
    %28 = vector.broadcast %27 : vector<8x1xf32> to vector<8x128xf32>
    %29 = arith.addf %26, %28 : vector<8x128xf32>
    %cst_35 = arith.constant 0.000000e+00 : f32
    %30 = vector.broadcast %cst_35 : f32 to vector<8x128xf32>
    %31 = arith.maximumf %29, %30 : vector<8x128xf32>
    %c0_36 = arith.constant 0 : index
    %c0_37 = arith.constant 0 : index
    %c0_38 = arith.constant 0 : index
    %32 = vector.load %arg6[%c0_36, %c0_37, %c0_38] : memref<1x8x128xf32, #tpu.memory_space<vmem>>, vector<1x8x128xf32>
    %33 = vector.shape_cast %32 : vector<1x8x128xf32> to vector<8x128xf32>
    %34 = vector.shape_cast %31 : vector<8x128xf32> to vector<1x8x128xf32>
    tpu.vector_store %arg6[%c0_36, %c0_37, %c0_38], %34 {strides = array<i32>} : memref<1x8x128xf32, #tpu.memory_space<vmem>>, vector<1x8x128xf32>,
    return
  }
  func.func @transform_0(%arg0: i32, %arg1: i32) -> (i32, i32, i32) {
    %c0_i32 = arith.constant 0 : i32
    %c0_i32_0 = arith.constant 0 : i32
    return %arg0, %c0_i32, %arg1 : i32, i32, i32
  }
  func.func @transform_1(%arg0: i32, %arg1: i32) -> (i32, i32, i32) {
    %c1_i32 = arith.constant 1 : i32
    %0 = arith.addi %arg1, %c1_i32 : i32
    %c1_i32_0 = arith.constant 1 : i32
    %1 = arith.muli %0, %c1_i32_0 : i32
    %c0_i32 = arith.constant 0 : i32
    %c0_i32_1 = arith.constant 0 : i32
    return %arg0, %c0_i32, %1 : i32, i32, i32
  }
  func.func @transform_2(%arg0: i32, %arg1: i32) -> (i32, i32) {
    %c0_i32 = arith.constant 0 : i32
    %c0_i32_0 = arith.constant 0 : i32
    %c0_i32_1 = arith.constant 0 : i32
    return %c0_i32, %c0_i32_0 : i32, i32
  }
  func.func @transform_3(%arg0: i32, %arg1: i32) -> (i32, i32) {
    %c0_i32 = arith.constant 0 : i32
    %c0_i32_0 = arith.constant 0 : i32
    %c0_i32_1 = arith.constant 0 : i32
    return %c0_i32, %c0_i32_0 : i32, i32
  }
  func.func @transform_4(%arg0: i32, %arg1: i32) -> (i32, i32, i32) {
    %c0_i32 = arith.constant 0 : i32
    %c0_i32_0 = arith.constant 0 : i32
    return %arg0, %c0_i32, %arg1 : i32, i32, i32
  }
}

module attributes {stable_mosaic.version = 11 : i64} {
  func.func @kernel(%arg0: i32, %arg1: i32, %arg2: memref<1x32x256xf32, #tpu.memory_space<vmem>>, %arg3: memref<1x32x128xf32, #tpu.memory_space<vmem>>, %arg4: memref<8x2592xf32, #tpu.memory_space<vmem>>, %arg5: memref<8x1xf32, #tpu.memory_space<vmem>>, %arg6: memref<1x8x256xf32, #tpu.memory_space<vmem>>, %arg7: memref<32x384xf32, #tpu.memory_space<vmem>>, %arg8: memref<2592x256xf32, #tpu.memory_space<vmem>>) attributes {dimension_semantics = [#tpu.dimension_semantics<parallel>, #tpu.dimension_semantics<parallel>], iteration_bounds = array<i64: 2, 1>, scalar_prefetch = 0 : i64, scratch_operands = 2 : i64, tpu.core_type = #tpu.core_type<tc>, window_params = [{transform_indices = @transform_0, window_bounds = array<i64: 1, 32, 256>}, {transform_indices = @transform_1, window_bounds = array<i64: 1, 32, 128>}, {pipeline_mode = #tpu.pipeline_mode<synchronous>, transform_indices = @transform_2, window_bounds = array<i64: 8, 2592>}, {pipeline_mode = #tpu.pipeline_mode<synchronous>, transform_indices = @transform_3, window_bounds = array<i64: 8, 1>}, {transform_indices = @transform_4, window_bounds = array<i64: 1, 8, 256>}]} {
    %c0 = arith.constant 0 : index
    %c0_0 = arith.constant 0 : index
    %c0_1 = arith.constant 0 : index
    %0 = vector.load %arg2[%c0, %c0_0, %c0_1] : memref<1x32x256xf32, #tpu.memory_space<vmem>>, vector<1x32x256xf32>
    %1 = vector.shape_cast %0 : vector<1x32x256xf32> to vector<32x256xf32>
    %c0_2 = arith.constant 0 : index
    %c0_3 = arith.constant 0 : index
    %2 = vector.load %arg7[%c0_2, %c0_3] : memref<32x384xf32, #tpu.memory_space<vmem>>, vector<32x256xf32>
    tpu.vector_store %arg7[%c0_2, %c0_3], %1 {strides = array<i32>} : memref<32x384xf32, #tpu.memory_space<vmem>>, vector<32x256xf32>,
    %c0_4 = arith.constant 0 : index
    %c0_5 = arith.constant 0 : index
    %c0_6 = arith.constant 0 : index
    %3 = vector.load %arg3[%c0_4, %c0_5, %c0_6] : memref<1x32x128xf32, #tpu.memory_space<vmem>>, vector<1x32x128xf32>
    %4 = vector.shape_cast %3 : vector<1x32x128xf32> to vector<32x128xf32>
    %c0_7 = arith.constant 0 : index
    %c256 = arith.constant 256 : index
    %5 = vector.load %arg7[%c0_7, %c256] : memref<32x384xf32, #tpu.memory_space<vmem>>, vector<32x128xf32>
    tpu.vector_store %arg7[%c0_7, %c256], %4 {strides = array<i32>} : memref<32x384xf32, #tpu.memory_space<vmem>>, vector<32x128xf32>,
    %c0_8 = arith.constant 0 : index
    %c0_9 = arith.constant 0 : index
    %6 = vector.load %arg7[%c0_8, %c0_9] : memref<32x384xf32, #tpu.memory_space<vmem>>, vector<32x256xf32>
    %c0_10 = arith.constant 0 : index
    %c0_11 = arith.constant 0 : index
    %7 = vector.load %arg8[%c0_10, %c0_11] : memref<2592x256xf32, #tpu.memory_space<vmem>>, vector<32x256xf32>
    tpu.vector_store %arg8[%c0_10, %c0_11], %6 {strides = array<i32>} : memref<2592x256xf32, #tpu.memory_space<vmem>>, vector<32x256xf32>,
    %c0_12 = arith.constant 0 : index
    %c1 = arith.constant 1 : index
    %8 = vector.load %arg7[%c0_12, %c1] : memref<32x384xf32, #tpu.memory_space<vmem>>, vector<32x256xf32>
    %c32 = arith.constant 32 : index
    %c0_13 = arith.constant 0 : index
    %9 = vector.load %arg8[%c32, %c0_13] : memref<2592x256xf32, #tpu.memory_space<vmem>>, vector<32x256xf32>
    tpu.vector_store %arg8[%c32, %c0_13], %8 {strides = array<i32>} : memref<2592x256xf32, #tpu.memory_space<vmem>>, vector<32x256xf32>,
    %c0_14 = arith.constant 0 : index
    %c2 = arith.constant 2 : index
    %10 = vector.load %arg7[%c0_14, %c2] : memref<32x384xf32, #tpu.memory_space<vmem>>, vector<32x256xf32>
    %c64 = arith.constant 64 : index
    %c0_15 = arith.constant 0 : index
    %11 = vector.load %arg8[%c64, %c0_15] : memref<2592x256xf32, #tpu.memory_space<vmem>>, vector<32x256xf32>
    tpu.vector_store %arg8[%c64, %c0_15], %10 {strides = array<i32>} : memref<2592x256xf32, #tpu.memory_space<vmem>>, vector<32x256xf32>,
    %c0_16 = arith.constant 0 : index
    %c3 = arith.constant 3 : index
    %12 = vector.load %arg7[%c0_16, %c3] : memref<32x384xf32, #tpu.memory_space<vmem>>, vector<32x256xf32>
    %c96 = arith.constant 96 : index
    %c0_17 = arith.constant 0 : index
    %13 = vector.load %arg8[%c96, %c0_17] : memref<2592x256xf32, #tpu.memory_space<vmem>>, vector<32x256xf32>
    tpu.vector_store %arg8[%c96, %c0_17], %12 {strides = array<i32>} : memref<2592x256xf32, #tpu.memory_space<vmem>>, vector<32x256xf32>,
    %c0_18 = arith.constant 0 : index
    %c4 = arith.constant 4 : index
    %14 = vector.load %arg7[%c0_18, %c4] : memref<32x384xf32, #tpu.memory_space<vmem>>, vector<32x256xf32>
    %c128 = arith.constant 128 : index
    %c0_19 = arith.constant 0 : index
    %15 = vector.load %arg8[%c128, %c0_19] : memref<2592x256xf32, #tpu.memory_space<vmem>>, vector<32x256xf32>
    tpu.vector_store %arg8[%c128, %c0_19], %14 {strides = array<i32>} : memref<2592x256xf32, #tpu.memory_space<vmem>>, vector<32x256xf32>,
    %c0_20 = arith.constant 0 : index
    %c5 = arith.constant 5 : index
    %16 = vector.load %arg7[%c0_20, %c5] : memref<32x384xf32, #tpu.memory_space<vmem>>, vector<32x256xf32>
    %c160 = arith.constant 160 : index
    %c0_21 = arith.constant 0 : index
    %17 = vector.load %arg8[%c160, %c0_21] : memref<2592x256xf32, #tpu.memory_space<vmem>>, vector<32x256xf32>
    tpu.vector_store %arg8[%c160, %c0_21], %16 {strides = array<i32>} : memref<2592x256xf32, #tpu.memory_space<vmem>>, vector<32x256xf32>,
    %c0_22 = arith.constant 0 : index
    %c6 = arith.constant 6 : index
    %18 = vector.load %arg7[%c0_22, %c6] : memref<32x384xf32, #tpu.memory_space<vmem>>, vector<32x256xf32>
    %c192 = arith.constant 192 : index
    %c0_23 = arith.constant 0 : index
    %19 = vector.load %arg8[%c192, %c0_23] : memref<2592x256xf32, #tpu.memory_space<vmem>>, vector<32x256xf32>
    tpu.vector_store %arg8[%c192, %c0_23], %18 {strides = array<i32>} : memref<2592x256xf32, #tpu.memory_space<vmem>>, vector<32x256xf32>,
    %c0_24 = arith.constant 0 : index
    %c7 = arith.constant 7 : index
    %20 = vector.load %arg7[%c0_24, %c7] : memref<32x384xf32, #tpu.memory_space<vmem>>, vector<32x256xf32>
    %c224 = arith.constant 224 : index
    %c0_25 = arith.constant 0 : index
    %21 = vector.load %arg8[%c224, %c0_25] : memref<2592x256xf32, #tpu.memory_space<vmem>>, vector<32x256xf32>
    tpu.vector_store %arg8[%c224, %c0_25], %20 {strides = array<i32>} : memref<2592x256xf32, #tpu.memory_space<vmem>>, vector<32x256xf32>,
    %c0_26 = arith.constant 0 : index
    %c8 = arith.constant 8 : index
    %22 = vector.load %arg7[%c0_26, %c8] : memref<32x384xf32, #tpu.memory_space<vmem>>, vector<32x256xf32>
    %c256_27 = arith.constant 256 : index
    %c0_28 = arith.constant 0 : index
    %23 = vector.load %arg8[%c256_27, %c0_28] : memref<2592x256xf32, #tpu.memory_space<vmem>>, vector<32x256xf32>
    tpu.vector_store %arg8[%c256_27, %c0_28], %22 {strides = array<i32>} : memref<2592x256xf32, #tpu.memory_space<vmem>>, vector<32x256xf32>,
    %c0_29 = arith.constant 0 : index
    %c12 = arith.constant 12 : index
    %24 = vector.load %arg7[%c0_29, %c12] : memref<32x384xf32, #tpu.memory_space<vmem>>, vector<32x256xf32>
    %c288 = arith.constant 288 : index
    %c0_30 = arith.constant 0 : index
    %25 = vector.load %arg8[%c288, %c0_30] : memref<2592x256xf32, #tpu.memory_space<vmem>>, vector<32x256xf32>
    tpu.vector_store %arg8[%c288, %c0_30], %24 {strides = array<i32>} : memref<2592x256xf32, #tpu.memory_space<vmem>>, vector<32x256xf32>,
    %c0_31 = arith.constant 0 : index
    %c13 = arith.constant 13 : index
    %26 = vector.load %arg7[%c0_31, %c13] : memref<32x384xf32, #tpu.memory_space<vmem>>, vector<32x256xf32>
    %c320 = arith.constant 320 : index
    %c0_32 = arith.constant 0 : index
    %27 = vector.load %arg8[%c320, %c0_32] : memref<2592x256xf32, #tpu.memory_space<vmem>>, vector<32x256xf32>
    tpu.vector_store %arg8[%c320, %c0_32], %26 {strides = array<i32>} : memref<2592x256xf32, #tpu.memory_space<vmem>>, vector<32x256xf32>,
    %c0_33 = arith.constant 0 : index
    %c14 = arith.constant 14 : index
    %28 = vector.load %arg7[%c0_33, %c14] : memref<32x384xf32, #tpu.memory_space<vmem>>, vector<32x256xf32>
    %c352 = arith.constant 352 : index
    %c0_34 = arith.constant 0 : index
    %29 = vector.load %arg8[%c352, %c0_34] : memref<2592x256xf32, #tpu.memory_space<vmem>>, vector<32x256xf32>
    tpu.vector_store %arg8[%c352, %c0_34], %28 {strides = array<i32>} : memref<2592x256xf32, #tpu.memory_space<vmem>>, vector<32x256xf32>,
    %c0_35 = arith.constant 0 : index
    %c15 = arith.constant 15 : index
    %30 = vector.load %arg7[%c0_35, %c15] : memref<32x384xf32, #tpu.memory_space<vmem>>, vector<32x256xf32>
    %c384 = arith.constant 384 : index
    %c0_36 = arith.constant 0 : index
    %31 = vector.load %arg8[%c384, %c0_36] : memref<2592x256xf32, #tpu.memory_space<vmem>>, vector<32x256xf32>
    tpu.vector_store %arg8[%c384, %c0_36], %30 {strides = array<i32>} : memref<2592x256xf32, #tpu.memory_space<vmem>>, vector<32x256xf32>,
    %c0_37 = arith.constant 0 : index
    %c16 = arith.constant 16 : index
    %32 = vector.load %arg7[%c0_37, %c16] : memref<32x384xf32, #tpu.memory_space<vmem>>, vector<32x256xf32>
    %c416 = arith.constant 416 : index
    %c0_38 = arith.constant 0 : index
    %33 = vector.load %arg8[%c416, %c0_38] : memref<2592x256xf32, #tpu.memory_space<vmem>>, vector<32x256xf32>
    tpu.vector_store %arg8[%c416, %c0_38], %32 {strides = array<i32>} : memref<2592x256xf32, #tpu.memory_space<vmem>>, vector<32x256xf32>,
    %c0_39 = arith.constant 0 : index
    %c17 = arith.constant 17 : index
    %34 = vector.load %arg7[%c0_39, %c17] : memref<32x384xf32, #tpu.memory_space<vmem>>, vector<32x256xf32>
    %c448 = arith.constant 448 : index
    %c0_40 = arith.constant 0 : index
    %35 = vector.load %arg8[%c448, %c0_40] : memref<2592x256xf32, #tpu.memory_space<vmem>>, vector<32x256xf32>
    tpu.vector_store %arg8[%c448, %c0_40], %34 {strides = array<i32>} : memref<2592x256xf32, #tpu.memory_space<vmem>>, vector<32x256xf32>,
    %c0_41 = arith.constant 0 : index
    %c18 = arith.constant 18 : index
    %36 = vector.load %arg7[%c0_41, %c18] : memref<32x384xf32, #tpu.memory_space<vmem>>, vector<32x256xf32>
    %c480 = arith.constant 480 : index
    %c0_42 = arith.constant 0 : index
    %37 = vector.load %arg8[%c480, %c0_42] : memref<2592x256xf32, #tpu.memory_space<vmem>>, vector<32x256xf32>
    tpu.vector_store %arg8[%c480, %c0_42], %36 {strides = array<i32>} : memref<2592x256xf32, #tpu.memory_space<vmem>>, vector<32x256xf32>,
    %c0_43 = arith.constant 0 : index
    %c19 = arith.constant 19 : index
    %38 = vector.load %arg7[%c0_43, %c19] : memref<32x384xf32, #tpu.memory_space<vmem>>, vector<32x256xf32>
    %c512 = arith.constant 512 : index
    %c0_44 = arith.constant 0 : index
    %39 = vector.load %arg8[%c512, %c0_44] : memref<2592x256xf32, #tpu.memory_space<vmem>>, vector<32x256xf32>
    tpu.vector_store %arg8[%c512, %c0_44], %38 {strides = array<i32>} : memref<2592x256xf32, #tpu.memory_space<vmem>>, vector<32x256xf32>,
    %c0_45 = arith.constant 0 : index
    %c20 = arith.constant 20 : index
    %40 = vector.load %arg7[%c0_45, %c20] : memref<32x384xf32, #tpu.memory_space<vmem>>, vector<32x256xf32>
    %c544 = arith.constant 544 : index
    %c0_46 = arith.constant 0 : index
    %41 = vector.load %arg8[%c544, %c0_46] : memref<2592x256xf32, #tpu.memory_space<vmem>>, vector<32x256xf32>
    tpu.vector_store %arg8[%c544, %c0_46], %40 {strides = array<i32>} : memref<2592x256xf32, #tpu.memory_space<vmem>>, vector<32x256xf32>,
    %c0_47 = arith.constant 0 : index
    %c24 = arith.constant 24 : index
    %42 = vector.load %arg7[%c0_47, %c24] : memref<32x384xf32, #tpu.memory_space<vmem>>, vector<32x256xf32>
    %c576 = arith.constant 576 : index
    %c0_48 = arith.constant 0 : index
    %43 = vector.load %arg8[%c576, %c0_48] : memref<2592x256xf32, #tpu.memory_space<vmem>>, vector<32x256xf32>
    tpu.vector_store %arg8[%c576, %c0_48], %42 {strides = array<i32>} : memref<2592x256xf32, #tpu.memory_space<vmem>>, vector<32x256xf32>,
    %c0_49 = arith.constant 0 : index
    %c25 = arith.constant 25 : index
    %44 = vector.load %arg7[%c0_49, %c25] : memref<32x384xf32, #tpu.memory_space<vmem>>, vector<32x256xf32>
    %c608 = arith.constant 608 : index
    %c0_50 = arith.constant 0 : index
    %45 = vector.load %arg8[%c608, %c0_50] : memref<2592x256xf32, #tpu.memory_space<vmem>>, vector<32x256xf32>
    tpu.vector_store %arg8[%c608, %c0_50], %44 {strides = array<i32>} : memref<2592x256xf32, #tpu.memory_space<vmem>>, vector<32x256xf32>,
    %c0_51 = arith.constant 0 : index
    %c26 = arith.constant 26 : index
    %46 = vector.load %arg7[%c0_51, %c26] : memref<32x384xf32, #tpu.memory_space<vmem>>, vector<32x256xf32>
    %c640 = arith.constant 640 : index
    %c0_52 = arith.constant 0 : index
    %47 = vector.load %arg8[%c640, %c0_52] : memref<2592x256xf32, #tpu.memory_space<vmem>>, vector<32x256xf32>
    tpu.vector_store %arg8[%c640, %c0_52], %46 {strides = array<i32>} : memref<2592x256xf32, #tpu.memory_space<vmem>>, vector<32x256xf32>,
    %c0_53 = arith.constant 0 : index
    %c27 = arith.constant 27 : index
    %48 = vector.load %arg7[%c0_53, %c27] : memref<32x384xf32, #tpu.memory_space<vmem>>, vector<32x256xf32>
    %c672 = arith.constant 672 : index
    %c0_54 = arith.constant 0 : index
    %49 = vector.load %arg8[%c672, %c0_54] : memref<2592x256xf32, #tpu.memory_space<vmem>>, vector<32x256xf32>
    tpu.vector_store %arg8[%c672, %c0_54], %48 {strides = array<i32>} : memref<2592x256xf32, #tpu.memory_space<vmem>>, vector<32x256xf32>,
    %c0_55 = arith.constant 0 : index
    %c28 = arith.constant 28 : index
    %50 = vector.load %arg7[%c0_55, %c28] : memref<32x384xf32, #tpu.memory_space<vmem>>, vector<32x256xf32>
    %c704 = arith.constant 704 : index
    %c0_56 = arith.constant 0 : index
    %51 = vector.load %arg8[%c704, %c0_56] : memref<2592x256xf32, #tpu.memory_space<vmem>>, vector<32x256xf32>
    tpu.vector_store %arg8[%c704, %c0_56], %50 {strides = array<i32>} : memref<2592x256xf32, #tpu.memory_space<vmem>>, vector<32x256xf32>,
    %c0_57 = arith.constant 0 : index
    %c29 = arith.constant 29 : index
    %52 = vector.load %arg7[%c0_57, %c29] : memref<32x384xf32, #tpu.memory_space<vmem>>, vector<32x256xf32>
    %c736 = arith.constant 736 : index
    %c0_58 = arith.constant 0 : index
    %53 = vector.load %arg8[%c736, %c0_58] : memref<2592x256xf32, #tpu.memory_space<vmem>>, vector<32x256xf32>
    tpu.vector_store %arg8[%c736, %c0_58], %52 {strides = array<i32>} : memref<2592x256xf32, #tpu.memory_space<vmem>>, vector<32x256xf32>,
    %c0_59 = arith.constant 0 : index
    %c30 = arith.constant 30 : index
    %54 = vector.load %arg7[%c0_59, %c30] : memref<32x384xf32, #tpu.memory_space<vmem>>, vector<32x256xf32>
    %c768 = arith.constant 768 : index
    %c0_60 = arith.constant 0 : index
    %55 = vector.load %arg8[%c768, %c0_60] : memref<2592x256xf32, #tpu.memory_space<vmem>>, vector<32x256xf32>
    tpu.vector_store %arg8[%c768, %c0_60], %54 {strides = array<i32>} : memref<2592x256xf32, #tpu.memory_space<vmem>>, vector<32x256xf32>,
    %c0_61 = arith.constant 0 : index
    %c31 = arith.constant 31 : index
    %56 = vector.load %arg7[%c0_61, %c31] : memref<32x384xf32, #tpu.memory_space<vmem>>, vector<32x256xf32>
    %c800 = arith.constant 800 : index
    %c0_62 = arith.constant 0 : index
    %57 = vector.load %arg8[%c800, %c0_62] : memref<2592x256xf32, #tpu.memory_space<vmem>>, vector<32x256xf32>
    tpu.vector_store %arg8[%c800, %c0_62], %56 {strides = array<i32>} : memref<2592x256xf32, #tpu.memory_space<vmem>>, vector<32x256xf32>,
    %c0_63 = arith.constant 0 : index
    %c32_64 = arith.constant 32 : index
    %58 = vector.load %arg7[%c0_63, %c32_64] : memref<32x384xf32, #tpu.memory_space<vmem>>, vector<32x256xf32>
    %c832 = arith.constant 832 : index
    %c0_65 = arith.constant 0 : index
    %59 = vector.load %arg8[%c832, %c0_65] : memref<2592x256xf32, #tpu.memory_space<vmem>>, vector<32x256xf32>
    tpu.vector_store %arg8[%c832, %c0_65], %58 {strides = array<i32>} : memref<2592x256xf32, #tpu.memory_space<vmem>>, vector<32x256xf32>,
    %c0_66 = arith.constant 0 : index
    %c36 = arith.constant 36 : index
    %60 = vector.load %arg7[%c0_66, %c36] : memref<32x384xf32, #tpu.memory_space<vmem>>, vector<32x256xf32>
    %c864 = arith.constant 864 : index
    %c0_67 = arith.constant 0 : index
    %61 = vector.load %arg8[%c864, %c0_67] : memref<2592x256xf32, #tpu.memory_space<vmem>>, vector<32x256xf32>
    tpu.vector_store %arg8[%c864, %c0_67], %60 {strides = array<i32>} : memref<2592x256xf32, #tpu.memory_space<vmem>>, vector<32x256xf32>,
    %c0_68 = arith.constant 0 : index
    %c37 = arith.constant 37 : index
    %62 = vector.load %arg7[%c0_68, %c37] : memref<32x384xf32, #tpu.memory_space<vmem>>, vector<32x256xf32>
    %c896 = arith.constant 896 : index
    %c0_69 = arith.constant 0 : index
    %63 = vector.load %arg8[%c896, %c0_69] : memref<2592x256xf32, #tpu.memory_space<vmem>>, vector<32x256xf32>
    tpu.vector_store %arg8[%c896, %c0_69], %62 {strides = array<i32>} : memref<2592x256xf32, #tpu.memory_space<vmem>>, vector<32x256xf32>,
    %c0_70 = arith.constant 0 : index
    %c38 = arith.constant 38 : index
    %64 = vector.load %arg7[%c0_70, %c38] : memref<32x384xf32, #tpu.memory_space<vmem>>, vector<32x256xf32>
    %c928 = arith.constant 928 : index
    %c0_71 = arith.constant 0 : index
    %65 = vector.load %arg8[%c928, %c0_71] : memref<2592x256xf32, #tpu.memory_space<vmem>>, vector<32x256xf32>
    tpu.vector_store %arg8[%c928, %c0_71], %64 {strides = array<i32>} : memref<2592x256xf32, #tpu.memory_space<vmem>>, vector<32x256xf32>,
    %c0_72 = arith.constant 0 : index
    %c39 = arith.constant 39 : index
    %66 = vector.load %arg7[%c0_72, %c39] : memref<32x384xf32, #tpu.memory_space<vmem>>, vector<32x256xf32>
    %c960 = arith.constant 960 : index
    %c0_73 = arith.constant 0 : index
    %67 = vector.load %arg8[%c960, %c0_73] : memref<2592x256xf32, #tpu.memory_space<vmem>>, vector<32x256xf32>
    tpu.vector_store %arg8[%c960, %c0_73], %66 {strides = array<i32>} : memref<2592x256xf32, #tpu.memory_space<vmem>>, vector<32x256xf32>,
    %c0_74 = arith.constant 0 : index
    %c40 = arith.constant 40 : index
    %68 = vector.load %arg7[%c0_74, %c40] : memref<32x384xf32, #tpu.memory_space<vmem>>, vector<32x256xf32>
    %c992 = arith.constant 992 : index
    %c0_75 = arith.constant 0 : index
    %69 = vector.load %arg8[%c992, %c0_75] : memref<2592x256xf32, #tpu.memory_space<vmem>>, vector<32x256xf32>
    tpu.vector_store %arg8[%c992, %c0_75], %68 {strides = array<i32>} : memref<2592x256xf32, #tpu.memory_space<vmem>>, vector<32x256xf32>,
    %c0_76 = arith.constant 0 : index
    %c41 = arith.constant 41 : index
    %70 = vector.load %arg7[%c0_76, %c41] : memref<32x384xf32, #tpu.memory_space<vmem>>, vector<32x256xf32>
    %c1024 = arith.constant 1024 : index
    %c0_77 = arith.constant 0 : index
    %71 = vector.load %arg8[%c1024, %c0_77] : memref<2592x256xf32, #tpu.memory_space<vmem>>, vector<32x256xf32>
    tpu.vector_store %arg8[%c1024, %c0_77], %70 {strides = array<i32>} : memref<2592x256xf32, #tpu.memory_space<vmem>>, vector<32x256xf32>,
    %c0_78 = arith.constant 0 : index
    %c42 = arith.constant 42 : index
    %72 = vector.load %arg7[%c0_78, %c42] : memref<32x384xf32, #tpu.memory_space<vmem>>, vector<32x256xf32>
    %c1056 = arith.constant 1056 : index
    %c0_79 = arith.constant 0 : index
    %73 = vector.load %arg8[%c1056, %c0_79] : memref<2592x256xf32, #tpu.memory_space<vmem>>, vector<32x256xf32>
    tpu.vector_store %arg8[%c1056, %c0_79], %72 {strides = array<i32>} : memref<2592x256xf32, #tpu.memory_space<vmem>>, vector<32x256xf32>,
    %c0_80 = arith.constant 0 : index
    %c43 = arith.constant 43 : index
    %74 = vector.load %arg7[%c0_80, %c43] : memref<32x384xf32, #tpu.memory_space<vmem>>, vector<32x256xf32>
    %c1088 = arith.constant 1088 : index
    %c0_81 = arith.constant 0 : index
    %75 = vector.load %arg8[%c1088, %c0_81] : memref<2592x256xf32, #tpu.memory_space<vmem>>, vector<32x256xf32>
    tpu.vector_store %arg8[%c1088, %c0_81], %74 {strides = array<i32>} : memref<2592x256xf32, #tpu.memory_space<vmem>>, vector<32x256xf32>,
    %c0_82 = arith.constant 0 : index
    %c44 = arith.constant 44 : index
    %76 = vector.load %arg7[%c0_82, %c44] : memref<32x384xf32, #tpu.memory_space<vmem>>, vector<32x256xf32>
    %c1120 = arith.constant 1120 : index
    %c0_83 = arith.constant 0 : index
    %77 = vector.load %arg8[%c1120, %c0_83] : memref<2592x256xf32, #tpu.memory_space<vmem>>, vector<32x256xf32>
    tpu.vector_store %arg8[%c1120, %c0_83], %76 {strides = array<i32>} : memref<2592x256xf32, #tpu.memory_space<vmem>>, vector<32x256xf32>,
    %c0_84 = arith.constant 0 : index
    %c48 = arith.constant 48 : index
    %78 = vector.load %arg7[%c0_84, %c48] : memref<32x384xf32, #tpu.memory_space<vmem>>, vector<32x256xf32>
    %c1152 = arith.constant 1152 : index
    %c0_85 = arith.constant 0 : index
    %79 = vector.load %arg8[%c1152, %c0_85] : memref<2592x256xf32, #tpu.memory_space<vmem>>, vector<32x256xf32>
    tpu.vector_store %arg8[%c1152, %c0_85], %78 {strides = array<i32>} : memref<2592x256xf32, #tpu.memory_space<vmem>>, vector<32x256xf32>,
    %c0_86 = arith.constant 0 : index
    %c49 = arith.constant 49 : index
    %80 = vector.load %arg7[%c0_86, %c49] : memref<32x384xf32, #tpu.memory_space<vmem>>, vector<32x256xf32>
    %c1184 = arith.constant 1184 : index
    %c0_87 = arith.constant 0 : index
    %81 = vector.load %arg8[%c1184, %c0_87] : memref<2592x256xf32, #tpu.memory_space<vmem>>, vector<32x256xf32>
    tpu.vector_store %arg8[%c1184, %c0_87], %80 {strides = array<i32>} : memref<2592x256xf32, #tpu.memory_space<vmem>>, vector<32x256xf32>,
    %c0_88 = arith.constant 0 : index
    %c50 = arith.constant 50 : index
    %82 = vector.load %arg7[%c0_88, %c50] : memref<32x384xf32, #tpu.memory_space<vmem>>, vector<32x256xf32>
    %c1216 = arith.constant 1216 : index
    %c0_89 = arith.constant 0 : index
    %83 = vector.load %arg8[%c1216, %c0_89] : memref<2592x256xf32, #tpu.memory_space<vmem>>, vector<32x256xf32>
    tpu.vector_store %arg8[%c1216, %c0_89], %82 {strides = array<i32>} : memref<2592x256xf32, #tpu.memory_space<vmem>>, vector<32x256xf32>,
    %c0_90 = arith.constant 0 : index
    %c51 = arith.constant 51 : index
    %84 = vector.load %arg7[%c0_90, %c51] : memref<32x384xf32, #tpu.memory_space<vmem>>, vector<32x256xf32>
    %c1248 = arith.constant 1248 : index
    %c0_91 = arith.constant 0 : index
    %85 = vector.load %arg8[%c1248, %c0_91] : memref<2592x256xf32, #tpu.memory_space<vmem>>, vector<32x256xf32>
    tpu.vector_store %arg8[%c1248, %c0_91], %84 {strides = array<i32>} : memref<2592x256xf32, #tpu.memory_space<vmem>>, vector<32x256xf32>,
    %c0_92 = arith.constant 0 : index
    %c52 = arith.constant 52 : index
    %86 = vector.load %arg7[%c0_92, %c52] : memref<32x384xf32, #tpu.memory_space<vmem>>, vector<32x256xf32>
    %c1280 = arith.constant 1280 : index
    %c0_93 = arith.constant 0 : index
    %87 = vector.load %arg8[%c1280, %c0_93] : memref<2592x256xf32, #tpu.memory_space<vmem>>, vector<32x256xf32>
    tpu.vector_store %arg8[%c1280, %c0_93], %86 {strides = array<i32>} : memref<2592x256xf32, #tpu.memory_space<vmem>>, vector<32x256xf32>,
    %c0_94 = arith.constant 0 : index
    %c53 = arith.constant 53 : index
    %88 = vector.load %arg7[%c0_94, %c53] : memref<32x384xf32, #tpu.memory_space<vmem>>, vector<32x256xf32>
    %c1312 = arith.constant 1312 : index
    %c0_95 = arith.constant 0 : index
    %89 = vector.load %arg8[%c1312, %c0_95] : memref<2592x256xf32, #tpu.memory_space<vmem>>, vector<32x256xf32>
    tpu.vector_store %arg8[%c1312, %c0_95], %88 {strides = array<i32>} : memref<2592x256xf32, #tpu.memory_space<vmem>>, vector<32x256xf32>,
    %c0_96 = arith.constant 0 : index
    %c54 = arith.constant 54 : index
    %90 = vector.load %arg7[%c0_96, %c54] : memref<32x384xf32, #tpu.memory_space<vmem>>, vector<32x256xf32>
    %c1344 = arith.constant 1344 : index
    %c0_97 = arith.constant 0 : index
    %91 = vector.load %arg8[%c1344, %c0_97] : memref<2592x256xf32, #tpu.memory_space<vmem>>, vector<32x256xf32>
    tpu.vector_store %arg8[%c1344, %c0_97], %90 {strides = array<i32>} : memref<2592x256xf32, #tpu.memory_space<vmem>>, vector<32x256xf32>,
    %c0_98 = arith.constant 0 : index
    %c55 = arith.constant 55 : index
    %92 = vector.load %arg7[%c0_98, %c55] : memref<32x384xf32, #tpu.memory_space<vmem>>, vector<32x256xf32>
    %c1376 = arith.constant 1376 : index
    %c0_99 = arith.constant 0 : index
    %93 = vector.load %arg8[%c1376, %c0_99] : memref<2592x256xf32, #tpu.memory_space<vmem>>, vector<32x256xf32>
    tpu.vector_store %arg8[%c1376, %c0_99], %92 {strides = array<i32>} : memref<2592x256xf32, #tpu.memory_space<vmem>>, vector<32x256xf32>,
    %c0_100 = arith.constant 0 : index
    %c56 = arith.constant 56 : index
    %94 = vector.load %arg7[%c0_100, %c56] : memref<32x384xf32, #tpu.memory_space<vmem>>, vector<32x256xf32>
    %c1408 = arith.constant 1408 : index
    %c0_101 = arith.constant 0 : index
    %95 = vector.load %arg8[%c1408, %c0_101] : memref<2592x256xf32, #tpu.memory_space<vmem>>, vector<32x256xf32>
    tpu.vector_store %arg8[%c1408, %c0_101], %94 {strides = array<i32>} : memref<2592x256xf32, #tpu.memory_space<vmem>>, vector<32x256xf32>,
    %c0_102 = arith.constant 0 : index
    %c60 = arith.constant 60 : index
    %96 = vector.load %arg7[%c0_102, %c60] : memref<32x384xf32, #tpu.memory_space<vmem>>, vector<32x256xf32>
    %c1440 = arith.constant 1440 : index
    %c0_103 = arith.constant 0 : index
    %97 = vector.load %arg8[%c1440, %c0_103] : memref<2592x256xf32, #tpu.memory_space<vmem>>, vector<32x256xf32>
    tpu.vector_store %arg8[%c1440, %c0_103], %96 {strides = array<i32>} : memref<2592x256xf32, #tpu.memory_space<vmem>>, vector<32x256xf32>,
    %c0_104 = arith.constant 0 : index
    %c61 = arith.constant 61 : index
    %98 = vector.load %arg7[%c0_104, %c61] : memref<32x384xf32, #tpu.memory_space<vmem>>, vector<32x256xf32>
    %c1472 = arith.constant 1472 : index
    %c0_105 = arith.constant 0 : index
    %99 = vector.load %arg8[%c1472, %c0_105] : memref<2592x256xf32, #tpu.memory_space<vmem>>, vector<32x256xf32>
    tpu.vector_store %arg8[%c1472, %c0_105], %98 {strides = array<i32>} : memref<2592x256xf32, #tpu.memory_space<vmem>>, vector<32x256xf32>,
    %c0_106 = arith.constant 0 : index
    %c62 = arith.constant 62 : index
    %100 = vector.load %arg7[%c0_106, %c62] : memref<32x384xf32, #tpu.memory_space<vmem>>, vector<32x256xf32>
    %c1504 = arith.constant 1504 : index
    %c0_107 = arith.constant 0 : index
    %101 = vector.load %arg8[%c1504, %c0_107] : memref<2592x256xf32, #tpu.memory_space<vmem>>, vector<32x256xf32>
    tpu.vector_store %arg8[%c1504, %c0_107], %100 {strides = array<i32>} : memref<2592x256xf32, #tpu.memory_space<vmem>>, vector<32x256xf32>,
    %c0_108 = arith.constant 0 : index
    %c63 = arith.constant 63 : index
    %102 = vector.load %arg7[%c0_108, %c63] : memref<32x384xf32, #tpu.memory_space<vmem>>, vector<32x256xf32>
    %c1536 = arith.constant 1536 : index
    %c0_109 = arith.constant 0 : index
    %103 = vector.load %arg8[%c1536, %c0_109] : memref<2592x256xf32, #tpu.memory_space<vmem>>, vector<32x256xf32>
    tpu.vector_store %arg8[%c1536, %c0_109], %102 {strides = array<i32>} : memref<2592x256xf32, #tpu.memory_space<vmem>>, vector<32x256xf32>,
    %c0_110 = arith.constant 0 : index
    %c64_111 = arith.constant 64 : index
    %104 = vector.load %arg7[%c0_110, %c64_111] : memref<32x384xf32, #tpu.memory_space<vmem>>, vector<32x256xf32>
    %c1568 = arith.constant 1568 : index
    %c0_112 = arith.constant 0 : index
    %105 = vector.load %arg8[%c1568, %c0_112] : memref<2592x256xf32, #tpu.memory_space<vmem>>, vector<32x256xf32>
    tpu.vector_store %arg8[%c1568, %c0_112], %104 {strides = array<i32>} : memref<2592x256xf32, #tpu.memory_space<vmem>>, vector<32x256xf32>,
    %c0_113 = arith.constant 0 : index
    %c65 = arith.constant 65 : index
    %106 = vector.load %arg7[%c0_113, %c65] : memref<32x384xf32, #tpu.memory_space<vmem>>, vector<32x256xf32>
    %c1600 = arith.constant 1600 : index
    %c0_114 = arith.constant 0 : index
    %107 = vector.load %arg8[%c1600, %c0_114] : memref<2592x256xf32, #tpu.memory_space<vmem>>, vector<32x256xf32>
    tpu.vector_store %arg8[%c1600, %c0_114], %106 {strides = array<i32>} : memref<2592x256xf32, #tpu.memory_space<vmem>>, vector<32x256xf32>,
    %c0_115 = arith.constant 0 : index
    %c66 = arith.constant 66 : index
    %108 = vector.load %arg7[%c0_115, %c66] : memref<32x384xf32, #tpu.memory_space<vmem>>, vector<32x256xf32>
    %c1632 = arith.constant 1632 : index
    %c0_116 = arith.constant 0 : index
    %109 = vector.load %arg8[%c1632, %c0_116] : memref<2592x256xf32, #tpu.memory_space<vmem>>, vector<32x256xf32>
    tpu.vector_store %arg8[%c1632, %c0_116], %108 {strides = array<i32>} : memref<2592x256xf32, #tpu.memory_space<vmem>>, vector<32x256xf32>,
    %c0_117 = arith.constant 0 : index
    %c67 = arith.constant 67 : index
    %110 = vector.load %arg7[%c0_117, %c67] : memref<32x384xf32, #tpu.memory_space<vmem>>, vector<32x256xf32>
    %c1664 = arith.constant 1664 : index
    %c0_118 = arith.constant 0 : index
    %111 = vector.load %arg8[%c1664, %c0_118] : memref<2592x256xf32, #tpu.memory_space<vmem>>, vector<32x256xf32>
    tpu.vector_store %arg8[%c1664, %c0_118], %110 {strides = array<i32>} : memref<2592x256xf32, #tpu.memory_space<vmem>>, vector<32x256xf32>,
    %c0_119 = arith.constant 0 : index
    %c68 = arith.constant 68 : index
    %112 = vector.load %arg7[%c0_119, %c68] : memref<32x384xf32, #tpu.memory_space<vmem>>, vector<32x256xf32>
    %c1696 = arith.constant 1696 : index
    %c0_120 = arith.constant 0 : index
    %113 = vector.load %arg8[%c1696, %c0_120] : memref<2592x256xf32, #tpu.memory_space<vmem>>, vector<32x256xf32>
    tpu.vector_store %arg8[%c1696, %c0_120], %112 {strides = array<i32>} : memref<2592x256xf32, #tpu.memory_space<vmem>>, vector<32x256xf32>,
    %c0_121 = arith.constant 0 : index
    %c72 = arith.constant 72 : index
    %114 = vector.load %arg7[%c0_121, %c72] : memref<32x384xf32, #tpu.memory_space<vmem>>, vector<32x256xf32>
    %c1728 = arith.constant 1728 : index
    %c0_122 = arith.constant 0 : index
    %115 = vector.load %arg8[%c1728, %c0_122] : memref<2592x256xf32, #tpu.memory_space<vmem>>, vector<32x256xf32>
    tpu.vector_store %arg8[%c1728, %c0_122], %114 {strides = array<i32>} : memref<2592x256xf32, #tpu.memory_space<vmem>>, vector<32x256xf32>,
    %c0_123 = arith.constant 0 : index
    %c73 = arith.constant 73 : index
    %116 = vector.load %arg7[%c0_123, %c73] : memref<32x384xf32, #tpu.memory_space<vmem>>, vector<32x256xf32>
    %c1760 = arith.constant 1760 : index
    %c0_124 = arith.constant 0 : index
    %117 = vector.load %arg8[%c1760, %c0_124] : memref<2592x256xf32, #tpu.memory_space<vmem>>, vector<32x256xf32>
    tpu.vector_store %arg8[%c1760, %c0_124], %116 {strides = array<i32>} : memref<2592x256xf32, #tpu.memory_space<vmem>>, vector<32x256xf32>,
    %c0_125 = arith.constant 0 : index
    %c74 = arith.constant 74 : index
    %118 = vector.load %arg7[%c0_125, %c74] : memref<32x384xf32, #tpu.memory_space<vmem>>, vector<32x256xf32>
    %c1792 = arith.constant 1792 : index
    %c0_126 = arith.constant 0 : index
    %119 = vector.load %arg8[%c1792, %c0_126] : memref<2592x256xf32, #tpu.memory_space<vmem>>, vector<32x256xf32>
    tpu.vector_store %arg8[%c1792, %c0_126], %118 {strides = array<i32>} : memref<2592x256xf32, #tpu.memory_space<vmem>>, vector<32x256xf32>,
    %c0_127 = arith.constant 0 : index
    %c75 = arith.constant 75 : index
    %120 = vector.load %arg7[%c0_127, %c75] : memref<32x384xf32, #tpu.memory_space<vmem>>, vector<32x256xf32>
    %c1824 = arith.constant 1824 : index
    %c0_128 = arith.constant 0 : index
    %121 = vector.load %arg8[%c1824, %c0_128] : memref<2592x256xf32, #tpu.memory_space<vmem>>, vector<32x256xf32>
    tpu.vector_store %arg8[%c1824, %c0_128], %120 {strides = array<i32>} : memref<2592x256xf32, #tpu.memory_space<vmem>>, vector<32x256xf32>,
    %c0_129 = arith.constant 0 : index
    %c76 = arith.constant 76 : index
    %122 = vector.load %arg7[%c0_129, %c76] : memref<32x384xf32, #tpu.memory_space<vmem>>, vector<32x256xf32>
    %c1856 = arith.constant 1856 : index
    %c0_130 = arith.constant 0 : index
    %123 = vector.load %arg8[%c1856, %c0_130] : memref<2592x256xf32, #tpu.memory_space<vmem>>, vector<32x256xf32>
    tpu.vector_store %arg8[%c1856, %c0_130], %122 {strides = array<i32>} : memref<2592x256xf32, #tpu.memory_space<vmem>>, vector<32x256xf32>,
    %c0_131 = arith.constant 0 : index
    %c77 = arith.constant 77 : index
    %124 = vector.load %arg7[%c0_131, %c77] : memref<32x384xf32, #tpu.memory_space<vmem>>, vector<32x256xf32>
    %c1888 = arith.constant 1888 : index
    %c0_132 = arith.constant 0 : index
    %125 = vector.load %arg8[%c1888, %c0_132] : memref<2592x256xf32, #tpu.memory_space<vmem>>, vector<32x256xf32>
    tpu.vector_store %arg8[%c1888, %c0_132], %124 {strides = array<i32>} : memref<2592x256xf32, #tpu.memory_space<vmem>>, vector<32x256xf32>,
    %c0_133 = arith.constant 0 : index
    %c78 = arith.constant 78 : index
    %126 = vector.load %arg7[%c0_133, %c78] : memref<32x384xf32, #tpu.memory_space<vmem>>, vector<32x256xf32>
    %c1920 = arith.constant 1920 : index
    %c0_134 = arith.constant 0 : index
    %127 = vector.load %arg8[%c1920, %c0_134] : memref<2592x256xf32, #tpu.memory_space<vmem>>, vector<32x256xf32>
    tpu.vector_store %arg8[%c1920, %c0_134], %126 {strides = array<i32>} : memref<2592x256xf32, #tpu.memory_space<vmem>>, vector<32x256xf32>,
    %c0_135 = arith.constant 0 : index
    %c79 = arith.constant 79 : index
    %128 = vector.load %arg7[%c0_135, %c79] : memref<32x384xf32, #tpu.memory_space<vmem>>, vector<32x256xf32>
    %c1952 = arith.constant 1952 : index
    %c0_136 = arith.constant 0 : index
    %129 = vector.load %arg8[%c1952, %c0_136] : memref<2592x256xf32, #tpu.memory_space<vmem>>, vector<32x256xf32>
    tpu.vector_store %arg8[%c1952, %c0_136], %128 {strides = array<i32>} : memref<2592x256xf32, #tpu.memory_space<vmem>>, vector<32x256xf32>,
    %c0_137 = arith.constant 0 : index
    %c80 = arith.constant 80 : index
    %130 = vector.load %arg7[%c0_137, %c80] : memref<32x384xf32, #tpu.memory_space<vmem>>, vector<32x256xf32>
    %c1984 = arith.constant 1984 : index
    %c0_138 = arith.constant 0 : index
    %131 = vector.load %arg8[%c1984, %c0_138] : memref<2592x256xf32, #tpu.memory_space<vmem>>, vector<32x256xf32>
    tpu.vector_store %arg8[%c1984, %c0_138], %130 {strides = array<i32>} : memref<2592x256xf32, #tpu.memory_space<vmem>>, vector<32x256xf32>,
    %c0_139 = arith.constant 0 : index
    %c84 = arith.constant 84 : index
    %132 = vector.load %arg7[%c0_139, %c84] : memref<32x384xf32, #tpu.memory_space<vmem>>, vector<32x256xf32>
    %c2016 = arith.constant 2016 : index
    %c0_140 = arith.constant 0 : index
    %133 = vector.load %arg8[%c2016, %c0_140] : memref<2592x256xf32, #tpu.memory_space<vmem>>, vector<32x256xf32>
    tpu.vector_store %arg8[%c2016, %c0_140], %132 {strides = array<i32>} : memref<2592x256xf32, #tpu.memory_space<vmem>>, vector<32x256xf32>,
    %c0_141 = arith.constant 0 : index
    %c85 = arith.constant 85 : index
    %134 = vector.load %arg7[%c0_141, %c85] : memref<32x384xf32, #tpu.memory_space<vmem>>, vector<32x256xf32>
    %c2048 = arith.constant 2048 : index
    %c0_142 = arith.constant 0 : index
    %135 = vector.load %arg8[%c2048, %c0_142] : memref<2592x256xf32, #tpu.memory_space<vmem>>, vector<32x256xf32>
    tpu.vector_store %arg8[%c2048, %c0_142], %134 {strides = array<i32>} : memref<2592x256xf32, #tpu.memory_space<vmem>>, vector<32x256xf32>,
    %c0_143 = arith.constant 0 : index
    %c86 = arith.constant 86 : index
    %136 = vector.load %arg7[%c0_143, %c86] : memref<32x384xf32, #tpu.memory_space<vmem>>, vector<32x256xf32>
    %c2080 = arith.constant 2080 : index
    %c0_144 = arith.constant 0 : index
    %137 = vector.load %arg8[%c2080, %c0_144] : memref<2592x256xf32, #tpu.memory_space<vmem>>, vector<32x256xf32>
    tpu.vector_store %arg8[%c2080, %c0_144], %136 {strides = array<i32>} : memref<2592x256xf32, #tpu.memory_space<vmem>>, vector<32x256xf32>,
    %c0_145 = arith.constant 0 : index
    %c87 = arith.constant 87 : index
    %138 = vector.load %arg7[%c0_145, %c87] : memref<32x384xf32, #tpu.memory_space<vmem>>, vector<32x256xf32>
    %c2112 = arith.constant 2112 : index
    %c0_146 = arith.constant 0 : index
    %139 = vector.load %arg8[%c2112, %c0_146] : memref<2592x256xf32, #tpu.memory_space<vmem>>, vector<32x256xf32>
    tpu.vector_store %arg8[%c2112, %c0_146], %138 {strides = array<i32>} : memref<2592x256xf32, #tpu.memory_space<vmem>>, vector<32x256xf32>,
    %c0_147 = arith.constant 0 : index
    %c88 = arith.constant 88 : index
    %140 = vector.load %arg7[%c0_147, %c88] : memref<32x384xf32, #tpu.memory_space<vmem>>, vector<32x256xf32>
    %c2144 = arith.constant 2144 : index
    %c0_148 = arith.constant 0 : index
    %141 = vector.load %arg8[%c2144, %c0_148] : memref<2592x256xf32, #tpu.memory_space<vmem>>, vector<32x256xf32>
    tpu.vector_store %arg8[%c2144, %c0_148], %140 {strides = array<i32>} : memref<2592x256xf32, #tpu.memory_space<vmem>>, vector<32x256xf32>,
    %c0_149 = arith.constant 0 : index
    %c89 = arith.constant 89 : index
    %142 = vector.load %arg7[%c0_149, %c89] : memref<32x384xf32, #tpu.memory_space<vmem>>, vector<32x256xf32>
    %c2176 = arith.constant 2176 : index
    %c0_150 = arith.constant 0 : index
    %143 = vector.load %arg8[%c2176, %c0_150] : memref<2592x256xf32, #tpu.memory_space<vmem>>, vector<32x256xf32>
    tpu.vector_store %arg8[%c2176, %c0_150], %142 {strides = array<i32>} : memref<2592x256xf32, #tpu.memory_space<vmem>>, vector<32x256xf32>,
    %c0_151 = arith.constant 0 : index
    %c90 = arith.constant 90 : index
    %144 = vector.load %arg7[%c0_151, %c90] : memref<32x384xf32, #tpu.memory_space<vmem>>, vector<32x256xf32>
    %c2208 = arith.constant 2208 : index
    %c0_152 = arith.constant 0 : index
    %145 = vector.load %arg8[%c2208, %c0_152] : memref<2592x256xf32, #tpu.memory_space<vmem>>, vector<32x256xf32>
    tpu.vector_store %arg8[%c2208, %c0_152], %144 {strides = array<i32>} : memref<2592x256xf32, #tpu.memory_space<vmem>>, vector<32x256xf32>,
    %c0_153 = arith.constant 0 : index
    %c91 = arith.constant 91 : index
    %146 = vector.load %arg7[%c0_153, %c91] : memref<32x384xf32, #tpu.memory_space<vmem>>, vector<32x256xf32>
    %c2240 = arith.constant 2240 : index
    %c0_154 = arith.constant 0 : index
    %147 = vector.load %arg8[%c2240, %c0_154] : memref<2592x256xf32, #tpu.memory_space<vmem>>, vector<32x256xf32>
    tpu.vector_store %arg8[%c2240, %c0_154], %146 {strides = array<i32>} : memref<2592x256xf32, #tpu.memory_space<vmem>>, vector<32x256xf32>,
    %c0_155 = arith.constant 0 : index
    %c92 = arith.constant 92 : index
    %148 = vector.load %arg7[%c0_155, %c92] : memref<32x384xf32, #tpu.memory_space<vmem>>, vector<32x256xf32>
    %c2272 = arith.constant 2272 : index
    %c0_156 = arith.constant 0 : index
    %149 = vector.load %arg8[%c2272, %c0_156] : memref<2592x256xf32, #tpu.memory_space<vmem>>, vector<32x256xf32>
    tpu.vector_store %arg8[%c2272, %c0_156], %148 {strides = array<i32>} : memref<2592x256xf32, #tpu.memory_space<vmem>>, vector<32x256xf32>,
    %c0_157 = arith.constant 0 : index
    %c96_158 = arith.constant 96 : index
    %150 = vector.load %arg7[%c0_157, %c96_158] : memref<32x384xf32, #tpu.memory_space<vmem>>, vector<32x256xf32>
    %c2304 = arith.constant 2304 : index
    %c0_159 = arith.constant 0 : index
    %151 = vector.load %arg8[%c2304, %c0_159] : memref<2592x256xf32, #tpu.memory_space<vmem>>, vector<32x256xf32>
    tpu.vector_store %arg8[%c2304, %c0_159], %150 {strides = array<i32>} : memref<2592x256xf32, #tpu.memory_space<vmem>>, vector<32x256xf32>,
    %c0_160 = arith.constant 0 : index
    %c97 = arith.constant 97 : index
    %152 = vector.load %arg7[%c0_160, %c97] : memref<32x384xf32, #tpu.memory_space<vmem>>, vector<32x256xf32>
    %c2336 = arith.constant 2336 : index
    %c0_161 = arith.constant 0 : index
    %153 = vector.load %arg8[%c2336, %c0_161] : memref<2592x256xf32, #tpu.memory_space<vmem>>, vector<32x256xf32>
    tpu.vector_store %arg8[%c2336, %c0_161], %152 {strides = array<i32>} : memref<2592x256xf32, #tpu.memory_space<vmem>>, vector<32x256xf32>,
    %c0_162 = arith.constant 0 : index
    %c98 = arith.constant 98 : index
    %154 = vector.load %arg7[%c0_162, %c98] : memref<32x384xf32, #tpu.memory_space<vmem>>, vector<32x256xf32>
    %c2368 = arith.constant 2368 : index
    %c0_163 = arith.constant 0 : index
    %155 = vector.load %arg8[%c2368, %c0_163] : memref<2592x256xf32, #tpu.memory_space<vmem>>, vector<32x256xf32>
    tpu.vector_store %arg8[%c2368, %c0_163], %154 {strides = array<i32>} : memref<2592x256xf32, #tpu.memory_space<vmem>>, vector<32x256xf32>,
    %c0_164 = arith.constant 0 : index
    %c99 = arith.constant 99 : index
    %156 = vector.load %arg7[%c0_164, %c99] : memref<32x384xf32, #tpu.memory_space<vmem>>, vector<32x256xf32>
    %c2400 = arith.constant 2400 : index
    %c0_165 = arith.constant 0 : index
    %157 = vector.load %arg8[%c2400, %c0_165] : memref<2592x256xf32, #tpu.memory_space<vmem>>, vector<32x256xf32>
    tpu.vector_store %arg8[%c2400, %c0_165], %156 {strides = array<i32>} : memref<2592x256xf32, #tpu.memory_space<vmem>>, vector<32x256xf32>,
    %c0_166 = arith.constant 0 : index
    %c100 = arith.constant 100 : index
    %158 = vector.load %arg7[%c0_166, %c100] : memref<32x384xf32, #tpu.memory_space<vmem>>, vector<32x256xf32>
    %c2432 = arith.constant 2432 : index
    %c0_167 = arith.constant 0 : index
    %159 = vector.load %arg8[%c2432, %c0_167] : memref<2592x256xf32, #tpu.memory_space<vmem>>, vector<32x256xf32>
    tpu.vector_store %arg8[%c2432, %c0_167], %158 {strides = array<i32>} : memref<2592x256xf32, #tpu.memory_space<vmem>>, vector<32x256xf32>,
    %c0_168 = arith.constant 0 : index
    %c101 = arith.constant 101 : index
    %160 = vector.load %arg7[%c0_168, %c101] : memref<32x384xf32, #tpu.memory_space<vmem>>, vector<32x256xf32>
    %c2464 = arith.constant 2464 : index
    %c0_169 = arith.constant 0 : index
    %161 = vector.load %arg8[%c2464, %c0_169] : memref<2592x256xf32, #tpu.memory_space<vmem>>, vector<32x256xf32>
    tpu.vector_store %arg8[%c2464, %c0_169], %160 {strides = array<i32>} : memref<2592x256xf32, #tpu.memory_space<vmem>>, vector<32x256xf32>,
    %c0_170 = arith.constant 0 : index
    %c102 = arith.constant 102 : index
    %162 = vector.load %arg7[%c0_170, %c102] : memref<32x384xf32, #tpu.memory_space<vmem>>, vector<32x256xf32>
    %c2496 = arith.constant 2496 : index
    %c0_171 = arith.constant 0 : index
    %163 = vector.load %arg8[%c2496, %c0_171] : memref<2592x256xf32, #tpu.memory_space<vmem>>, vector<32x256xf32>
    tpu.vector_store %arg8[%c2496, %c0_171], %162 {strides = array<i32>} : memref<2592x256xf32, #tpu.memory_space<vmem>>, vector<32x256xf32>,
    %c0_172 = arith.constant 0 : index
    %c103 = arith.constant 103 : index
    %164 = vector.load %arg7[%c0_172, %c103] : memref<32x384xf32, #tpu.memory_space<vmem>>, vector<32x256xf32>
    %c2528 = arith.constant 2528 : index
    %c0_173 = arith.constant 0 : index
    %165 = vector.load %arg8[%c2528, %c0_173] : memref<2592x256xf32, #tpu.memory_space<vmem>>, vector<32x256xf32>
    tpu.vector_store %arg8[%c2528, %c0_173], %164 {strides = array<i32>} : memref<2592x256xf32, #tpu.memory_space<vmem>>, vector<32x256xf32>,
    %c0_174 = arith.constant 0 : index
    %c104 = arith.constant 104 : index
    %166 = vector.load %arg7[%c0_174, %c104] : memref<32x384xf32, #tpu.memory_space<vmem>>, vector<32x256xf32>
    %c2560 = arith.constant 2560 : index
    %c0_175 = arith.constant 0 : index
    %167 = vector.load %arg8[%c2560, %c0_175] : memref<2592x256xf32, #tpu.memory_space<vmem>>, vector<32x256xf32>
    tpu.vector_store %arg8[%c2560, %c0_175], %166 {strides = array<i32>} : memref<2592x256xf32, #tpu.memory_space<vmem>>, vector<32x256xf32>,
    %c0_176 = arith.constant 0 : index
    %c0_177 = arith.constant 0 : index
    %168 = vector.load %arg4[%c0_176, %c0_177] : memref<8x2592xf32, #tpu.memory_space<vmem>>, vector<8x2592xf32>
    %c0_178 = arith.constant 0 : index
    %c0_179 = arith.constant 0 : index
    %169 = vector.load %arg8[%c0_178, %c0_179] : memref<2592x256xf32, #tpu.memory_space<vmem>>, vector<2592x256xf32>
    %cst = arith.constant dense<0.000000e+00> : vector<8x256xf32>
    %170 = tpu.matmul %168, %169, %cst {dimension_numbers = #tpu.dot_dimension_numbers<[1], [0], [0], [1], [0, 0, 1, 1], [], []>} : vector<8x2592xf32>, vector<2592x256xf32>, vector<8x256xf32> -> vector<8x256xf32>
    %c0_180 = arith.constant 0 : index
    %c0_181 = arith.constant 0 : index
    %171 = vector.load %arg5[%c0_180, %c0_181] : memref<8x1xf32, #tpu.memory_space<vmem>>, vector<8x1xf32>
    %172 = vector.broadcast %171 : vector<8x1xf32> to vector<8x256xf32>
    %173 = arith.addf %170, %172 : vector<8x256xf32>
    %c0_182 = arith.constant 0 : index
    %c0_183 = arith.constant 0 : index
    %c0_184 = arith.constant 0 : index
    %174 = vector.load %arg6[%c0_182, %c0_183, %c0_184] : memref<1x8x256xf32, #tpu.memory_space<vmem>>, vector<1x8x256xf32>
    %175 = vector.shape_cast %174 : vector<1x8x256xf32> to vector<8x256xf32>
    %176 = vector.shape_cast %173 : vector<8x256xf32> to vector<1x8x256xf32>
    tpu.vector_store %arg6[%c0_182, %c0_183, %c0_184], %176 {strides = array<i32>} : memref<1x8x256xf32, #tpu.memory_space<vmem>>, vector<1x8x256xf32>,
    return
  }
  func.func @transform_0(%arg0: i32, %arg1: i32) -> (i32, i32, i32) {
    %c0_i32 = arith.constant 0 : i32
    %c0_i32_0 = arith.constant 0 : i32
    return %arg0, %c0_i32, %arg1 : i32, i32, i32
  }
  func.func @transform_1(%arg0: i32, %arg1: i32) -> (i32, i32, i32) {
    %c1_i32 = arith.constant 1 : i32
    %0 = arith.addi %arg1, %c1_i32 : i32
    %c2_i32 = arith.constant 2 : i32
    %1 = arith.muli %0, %c2_i32 : i32
    %c0_i32 = arith.constant 0 : i32
    %c0_i32_0 = arith.constant 0 : i32
    return %arg0, %c0_i32, %1 : i32, i32, i32
  }
  func.func @transform_2(%arg0: i32, %arg1: i32) -> (i32, i32) {
    %c0_i32 = arith.constant 0 : i32
    %c0_i32_0 = arith.constant 0 : i32
    %c0_i32_1 = arith.constant 0 : i32
    return %c0_i32, %c0_i32_0 : i32, i32
  }
  func.func @transform_3(%arg0: i32, %arg1: i32) -> (i32, i32) {
    %c0_i32 = arith.constant 0 : i32
    %c0_i32_0 = arith.constant 0 : i32
    %c0_i32_1 = arith.constant 0 : i32
    return %c0_i32, %c0_i32_0 : i32, i32
  }
  func.func @transform_4(%arg0: i32, %arg1: i32) -> (i32, i32, i32) {
    %c0_i32 = arith.constant 0 : i32
    %c0_i32_0 = arith.constant 0 : i32
    return %arg0, %c0_i32, %arg1 : i32, i32, i32
  }
}

</mosaic_0001>

<bundles_post_ra>
// kernel: srresnet_forward.15
= control target key start
LH: loop header
LB: loop body
LE: loop exit
PB: predicated region body
PF: predicated region fallthrough
CT: control target
= control target key end

     0   :  { %s1249_s21 = smov 0   ;;  %s1251_s22 = smov 0   ;;  %s1343_s0 = inlined_call_operand.vmem [shape: f32[2,8,512], index: 0, kind: input, shape index: {}, may-alias: {0,1}]   ;;  %s1344_s1 = inlined_call_operand.vmem [shape: f32[2,8,512], index: 1, kind: input, shape index: {}, may-alias: {0,1}]   ;;  %s1345_s2 = inlined_call_operand.vmem [shape: f32[8,72], index: 2, kind: input, shape index: {}]   ;;  %s1346_s3 = inlined_call_operand.vmem [shape: f32[8,1], index: 3, kind: input, shape index: {}]   ;;  %s1347_s4 = inlined_call_operand.vmem [shape: f32[1,384], index: 4, kind: input, shape index: {}]   ;;  %s1348_s5 = inlined_call_operand.vmem [shape: f32[2,8,384], index: 5, kind: output, shape index: {0}]   ;;  %s1349_s6 = inlined_call_operand.vmem [shape: f32[2,1,8,2], index: 6, kind: output, shape index: {1}]  }
   0x1   :  { %s1253_s23 = smov 0  }
   0x2 LB: > { %s29_s24 = sadd.s32 1, %s1196_s22  ;;  %p996_p0 = scmp.ge.s32.totalorder %s1200_s23, 1  ;;  %s1200_s23 = sphi %s1253_s23, %s17_s23   ;;  %s1196_s22 = sphi %s1251_s22, %s1351_s22   ;;  %s1192_s21 = sphi %s1249_s21, %s1350_s21  }
   0x3   : > { %p31_p1 = scmp.ge.s32.totalorder %s29_s24, 2  ;;  %p279_p2 = scmp.lt.s32.totalorder %s1200_s23, 3 }
   0x5   : > { %s1353_s24 = smov (%p31_p1, %s29_s24), 0  ;;  %p280_p3 = pnand %p996_p0, %p279_p2 }
   0x6   : > { %p347_p4 = scmp.lt.s32.totalorder (!%p280_p3), %s1192_s21, 1  ;;  %v1202_v0 = vmov (!%p280_p3), 0.0|0.0   ;;  %s1203_s9 = smov (!%p280_p3), 126   ;;  %v1208_v7 = vmov (!%p280_p3), 0.0   ;;  %vm1211_vm0 = vmmov (!%p280_p3), 0   ;;  %v1212_v8 = vmov (!%p280_p3), 0  }
   0x7   : > { %283 = sbr.rel (%p280_p3) target bundleno = 536 (0x218), region = 40  ;;  %1058 = vmatprep.subr.bf16.mxu1 (!%p280_p3), %v1202_v0  ;;  %s1204_s10 = smov (!%p280_p3), 127   ;;  %718 = vmatprep.mubr.f32.mxu0 (!%p280_p3), %v1208_v7  ;;  %v644_v9 = vld [vmem:[%s1346_s3] sm:$0xff] (!%p280_p3)  ;;  %vm424_vm1 = vcmask (!%p280_p3), 1039360   ;;  %vm450_vm2 = vcmask (!%p280_p3), 1031168   ;;  %vm476_vm3 = vcmask (!%p280_p3), 900096  }
   0x8   : > { %s1205_s11 = smov (!%p280_p3), 110   ;;  %s1206_s12 = smov (!%p280_p3), 108   ;;  %1039 = vmatprep.mubr.msk.f32.mxu1 (!%p280_p3), %vm1211_vm0, %v1208_v7  ;;  %1177 = vset.pattern.permute.xlu0 (!%p280_p3), %v1212_v8  ;;  %vm502_vm4 = vcmask (!%p280_p3), 891904   ;;  %vm528_vm5 = vcmask (!%p280_p3), 883712   ;;  %vm554_vm6 = vcmask (!%p280_p3), 752640   ;;  %vm580_vm7 = vcmask (!%p280_p3), 744448  }
   0x9   : > { %s1207_s13 = smov (!%p280_p3), 109   ;;  %s1209_s14 = smov (!%p280_p3), 91   ;;  %vm606_vm8 = vcmask (!%p280_p3), 736256   ;;  %vm650_vm9 = vcmask (!%p280_p3), 588800   ;;  %vm829_vm10 = vcmask (!%p280_p3), 7168   ;;  %vm831_vm11 = vcmask (!%p280_p3), 15360  }
   0xa   : > { %s1210_s15 = smov (!%p280_p3), 92   ;;  %s1213_s16 = smov (!%p280_p3), 90  }
   0xe   : > { %s1355_s21 = smov (!%p347_p4, %s1192_s21), 1 }
   0xf   : > { %s1007_s25 = sshll.u32 %s1355_s21, 5  ;;  %s1002_s7 = sshll.u32 %s1355_s21, 3 }
  0x10   : > { %s354_s28 = scalar_lea.vmem %s1343_s0, %s1007_s25  ;;  %s1009_s29 = sadd.s32 24, %s1007_s25 }
  0x11   : > { %v395_v1 = vld [vmem:[%s354_s28 + $0x8] sm:$0xff]  ;;  %v1274_v2 = vld [vmem:[%s354_s28 + $0x10] sm:$0xff]  ;;  %s369_s8 = scalar_lea.vmem %s1344_s1, %s1009_s29  ;;  %v1279_v3 = vld [vmem:[%s354_s28] sm:$0xff]  ;;  %s1070_s25 = smul.u32 24, %s1355_s21 }
  0x12   : > { %v1112_v4 = vpack.i.bf16 %v1274_v2, %v395_v1  ;;  %v400_v5 = vld [vmem:[%s369_s8] sm:$0xff] }
  0x13   : > { %v1122_v6 = vpack.i.bf16 %v400_v5, %v1279_v3  ;;  %s385_s30 = scalar_lea.vmem %s1348_s5, %s1070_s25 }
  0x14   : > { %1113 = vrot.lane.b32.xlu1 %v1112_v4, %s1203_s9  ;;  %1108 = vrot.lane.b32.xlu0 %v1112_v4, %s1204_s10 }
  0x18   : > { %1118 = vrot.lane.b32.xlu1 %v1112_v4, %s1205_s11  ;;  %1123 = vrot.lane.b32.xlu0 %v1122_v6, %s1204_s10  ;;  %s393_s10 = scalar_lea.vmem %s1349_s6, %s1002_s7 }
  0x1c   : > { %1138 = vrot.lane.b32.xlu1 %v1122_v6, %s1205_s11  ;;  %1128 = vrot.lane.b32.xlu0 %v1122_v6, %s1203_s9 }
  0x20   : > { %1143 = vrot.lane.b32.xlu1 %v1112_v4, %s1206_s12  ;;  %1133 = vrot.lane.b32.xlu0 %v1112_v4, %s1207_s13 }
  0x24   : > { %1153 = vrot.lane.b32.xlu1 %v1122_v6, %s1206_s12  ;;  %1148 = vrot.lane.b32.xlu0 %v1122_v6, %s1207_s13 }
  0x28   : > { %1163 = vrot.lane.b32.xlu1 %v1112_v4, %s1209_s14  ;;  %1158 = vrot.lane.b32.xlu0 %v1112_v4, %s1210_s15 }
  0x2c   : > { %1173 = vrot.lane.b32.xlu1 %v1122_v6, %s1209_s14  ;;  %1168 = vrot.lane.b32.xlu0 %v1122_v6, %s1210_s15 }
  0x30   : > { %602 = vrot.lane.b32.xlu1 %v1274_v2, %s1213_s16  ;;  %600 = vrot.lane.b32.xlu0 %v395_v1, %s1213_s16 }
  0x34   : > { %604 = vrot.lane.b32.xlu1 %v400_v5, %s1213_s16  ;;  %598 = vrot.lane.b32.xlu0 %v1279_v3, %s1213_s16 }
  0x38   : > { %647 = vperm.xlu0 %1177, %v644_v9  }
  0x86   : > { %v1114_v10 = vpop.permute.xlu1 %1113  ;;  %v1109_v11 = vpop.permute.xlu0 %1108 }
  0x87   : > { %v1111_v12 = vunpack.i.h.bf16 %v1109_v11  ;;  %v1110_v13 = vunpack.i.l.bf16 %v1109_v11  ;;  %v1116_v14 = vunpack.i.h.bf16 %v1114_v10  ;;  %v1115_v15 = vunpack.i.l.bf16 %v1114_v10 }
  0x89   : > { %v426_v16 = vsel %vm424_vm1, %v1110_v13, %v1111_v12  ;;  %v452_v26 = vsel %vm450_vm2, %v1115_v15, %v1116_v14 }
  0x8a   : > { %v1119_v17 = vpop.permute.xlu1 %1118  ;;  %v1124_v18 = vpop.permute.xlu0 %1123  ;;  %v1042_v19 = vpack.c.bf16 %v426_v16, %v395_v1 }
  0x8b   : > { %v1121_v20 = vunpack.i.h.bf16 %v1119_v17  ;;  %v1120_v21 = vunpack.i.l.bf16 %v1119_v17  ;;  %v1126_v22 = vunpack.i.h.bf16 %v1124_v18  ;;  %v1125_v23 = vunpack.i.l.bf16 %v1124_v18 }
  0x8c   : > { %1043 = vmatprep.subr.bf16.mxu0 %v1042_v19 }
  0x8d   : > { %v425_v24 = vsel %vm424_vm1, %v1125_v23, %v1110_v13  ;;  %v427_v25 = vsel %vm424_vm1, %v1111_v12, %v1126_v22  ;;  %v478_v27 = vsel %vm476_vm3, %v1120_v21, %v1121_v20 }
  0x8e   : > { %v1139_v28 = vpop.permute.xlu1 %1138  ;;  %v1129_v29 = vpop.permute.xlu0 %1128  ;;  %v1044_v30 = vpack.c.bf16 %v425_v24, %v1279_v3  ;;  %v1059_v31 = vpack.c.bf16 %v427_v25, %v1274_v2  ;;  %v1046_v32 = vpack.c.bf16 %v478_v27, %v452_v26  ;;  %v616_v27 = vld [vmem:[%s1345_s2] sm:$0xff] }
  0x8f   : > { %v1141_v33 = vunpack.i.h.bf16 %v1139_v28  ;;  %v1140_v34 = vunpack.i.l.bf16 %v1139_v28  ;;  %v1131_v35 = vunpack.i.h.bf16 %v1129_v29  ;;  %v1130_v36 = vunpack.i.l.bf16 %v1129_v29 }
  0x90   : > { %1045 = vmatpush1.bf16.msra.mxu0 %v1044_v30  ;;  %1060 = vmatpush3.bf16.msra.mxu1 %v1059_v31  ;;  %v800_v30 = vlaneseq }
  0x91   : > { %1047 = vmatprep.subr.bf16.mxu0 %v1046_v32  ;;  %1061 = vmatprep.subr.bf16.mxu1 %v1202_v0  ;;  %v451_v37 = vsel %vm450_vm2, %v1130_v36, %v1115_v15  ;;  %v477_v38 = vsel %vm476_vm3, %v1140_v34, %v1120_v21  ;;  %v453_v39 = vsel %vm450_vm2, %v1116_v14, %v1131_v35 }
  0x92   : > { %v1144_v40 = vpop.permute.xlu1 %1143  ;;  %v1134_v41 = vpop.permute.xlu0 %1133  ;;  %v1048_v42 = vpack.c.bf16 %v477_v38, %v451_v37  ;;  %v479_v43 = vsel %vm476_vm3, %v1121_v20, %v1141_v33  ;;  %v801_v31 = vshrl.u32 %v800_v30, 7 }
  0x93   : > { %v1146_v44 = vunpack.i.h.bf16 %v1144_v40  ;;  %v1145_v45 = vunpack.i.l.bf16 %v1144_v40  ;;  %v1136_v46 = vunpack.i.h.bf16 %v1134_v41  ;;  %v1135_v47 = vunpack.i.l.bf16 %v1134_v41 }
  0x94   : > { %1049 = vmatpush1.bf16.msra.mxu0 %v1048_v42  ;;  %v1062_v48 = vpack.c.bf16 %v479_v43, %v453_v39  ;;  %v802_v32 = vsub.s32 0, %v801_v31  ;;  %v806_v33 = vsub.s32 1, %v801_v31  ;;  %v810_v34 = vsub.s32 2, %v801_v31 }
  0x95   : > { %v504_v49 = vsel %vm502_vm4, %v1135_v47, %v1136_v46  ;;  %v530_v50 = vsel %vm528_vm5, %v1145_v45, %v1146_v44 }
  0x96   : > { %1063 = vmatpush3.bf16.msra.mxu1 %v1062_v48  ;;  %v1154_v51 = vpop.permute.xlu1 %1153  ;;  %v1149_v52 = vpop.permute.xlu0 %1148  ;;  %v1050_v53 = vpack.c.bf16 %v530_v50, %v504_v49 }
  0x97   : > { %v1156_v54 = vunpack.i.h.bf16 %v1154_v51  ;;  %v1155_v55 = vunpack.i.l.bf16 %v1154_v51  ;;  %v1151_v56 = vunpack.i.h.bf16 %v1149_v52  ;;  %v1150_v57 = vunpack.i.l.bf16 %v1149_v52  ;;  %1064 = vmatprep.subr.bf16.mxu1 %v1202_v0 }
  0x98   : > { %1051 = vmatprep.subr.bf16.mxu0 %v1050_v53 }
  0x99   : > { %v503_v58 = vsel %vm502_vm4, %v1150_v57, %v1135_v47  ;;  %v529_v59 = vsel %vm528_vm5, %v1155_v55, %v1145_v45  ;;  %v505_v60 = vsel %vm502_vm4, %v1136_v46, %v1151_v56  ;;  %v531_v61 = vsel %vm528_vm5, %v1146_v44, %v1156_v54 }
  0x9a   : > { %v1164_v62 = vpop.permute.xlu1 %1163  ;;  %v1159_v63 = vpop.permute.xlu0 %1158  ;;  %v1052_v1 = vpack.c.bf16 %v529_v59, %v503_v58  ;;  %v1065_v2 = vpack.c.bf16 %v531_v61, %v505_v60 }
  0x9b   : > { %v1166_v3 = vunpack.i.h.bf16 %v1164_v62  ;;  %v1165_v4 = vunpack.i.l.bf16 %v1164_v62  ;;  %v1161_v5 = vunpack.i.h.bf16 %v1159_v63  ;;  %v1160_v6 = vunpack.i.l.bf16 %v1159_v63 }
  0x9c   : > { %1053 = vmatpush1.bf16.msra.mxu0 %v1052_v1  ;;  %1066 = vmatpush3.bf16.msra.mxu1 %v1065_v2 }
  0x9d   : > { %v556_v8 = vsel %vm554_vm6, %v1160_v6, %v1161_v5  ;;  %v582_v9 = vsel %vm580_vm7, %v1165_v4, %v1166_v3  ;;  %1067 = vmatprep.subr.bf16.mxu1 %v1202_v0 }
  0x9e   : > { %v1174_v10 = vpop.permute.xlu1 %1173  ;;  %v1169_v11 = vpop.permute.xlu0 %1168  ;;  %v1054_v12 = vpack.c.bf16 %v582_v9, %v556_v8 }
  0x9f   : > { %v1176_v13 = vunpack.i.h.bf16 %v1174_v10  ;;  %v1175_v14 = vunpack.i.l.bf16 %v1174_v10  ;;  %v1171_v15 = vunpack.i.h.bf16 %v1169_v11  ;;  %v1170_v16 = vunpack.i.l.bf16 %v1169_v11 }
  0xa0   : > { %1055 = vmatprep.subr.bf16.mxu0 %v1054_v12 }
  0xa1   : > { %v555_v17 = vsel %vm554_vm6, %v1170_v16, %v1160_v6  ;;  %v581_v18 = vsel %vm580_vm7, %v1175_v14, %v1165_v4  ;;  %v557_v19 = vsel %vm554_vm6, %v1161_v5, %v1171_v15  ;;  %v583_v20 = vsel %vm580_vm7, %v1166_v3, %v1176_v13 }
  0xa2   : > { %v603_v21 = vpop.permute.xlu1 %602  ;;  %v601_v22 = vpop.permute.xlu0 %600  ;;  %v1056_v0 = vpack.c.bf16 %v581_v18, %v555_v17  ;;  %v1068_v23 = vpack.c.bf16 %v583_v20, %v557_v19 }
  0xa3   : > { %v608_v24 = vsel %vm606_vm8, %v601_v22, %v603_v21 }
  0xa4   : > { %1057 = vmatpush1.bf16.msra.mxu0 %v1056_v0  ;;  %1069 = vmatpush3.bf16.msra.mxu1 %v1068_v23 }
  0xa5   : > { %670 = vmatprep.subr.mxu0 %v608_v24  ;;  %1037 = vmatprep.subr.mxu1 %v1208_v7  ;;  %v798_v7 = vld [vmem:[%s1347_s4] sm:$0x7] }
  0xa6   : > { %v605_v25 = vpop.permute.xlu1 %604  ;;  %v599_v26 = vpop.permute.xlu0 %598  ;;  %v803_v36 = vrot.slane %v798_v7, %v802_v32  ;;  %v807_v38 = vrot.slane %v798_v7, %v806_v33  ;;  %v811_v40 = vrot.slane %v798_v7, %v810_v34 }
  0xa7   : > { %v607_v28 = vsel %vm606_vm8, %v599_v26, %v601_v22  ;;  %v609_v29 = vsel %vm606_vm8, %v603_v21, %v605_v25 }
  0xa8   : > { %671 = vmatpush1.msra.mxu0 %v607_v28  ;;  %1038 = vmatpush3.msra.mxu1 %v609_v29 }
  0xa9   : > { %1003 = vmatmul.mubr.msk.f32.vlgmr.msra.gmra.mrb[0].mxu0 %vm650_vm9, %v616_v27  ;;  %1040 = vmatmul.mubr.msk.f32.vlgmr.msra.gmra.mrb[0].mxu1 %vm650_vm9, %v616_v27 }
  0xb7   : > { %v648_v35 = vpop.permute.xlu0 %647 }
 0x17c   : > { %v720_v37 = vpop.f32.mrb[0].mxu0  ;;  %v791_v39 = vpop.f32.mrb[0].mxu1 }
 0x17d   : > { %v721_v41 = vadd.f32 %v720_v37, %v648_v35  ;;  %v722_v42 = vpop.f32.mrb[1].mxu0  ;;  %v792_v43 = vadd.f32 %v791_v39, %v648_v35  ;;  %v1041_v44 = vpop.f32.mrb[1].mxu1 }
 0x17e   : > { %v723_v45 = vadd.f32 %v722_v42, %v648_v35 }
 0x17f   : > { %795 = vst [vmem:[%s385_s30] sm:$0xff] %v721_v41  ;;  %v815_v46 = vmul.f32 %v803_v36, %v721_v41  ;;  %797 = vst [vmem:[%s385_s30 + $0x10] sm:$0xff] %v792_v43  ;;  %v817_v48 = vmul.f32 %v811_v40, %v792_v43 }
 0x180   : > { %796 = vst [vmem:[%s385_s30 + $0x8] sm:$0xff] %v723_v45  ;;  %v816_v47 = vmul.f32 %v807_v38, %v723_v45 }
 0x181   : > { %v822_v49 = vmul.f32 %v815_v46, %v815_v46  ;;  %v824_v53 = vmul.f32 %v817_v48, %v817_v48 }
 0x182   : > { %v823_v50 = vmul.f32 %v816_v47, %v816_v47  ;;  %v818_v51 = vadd.f32 %v816_v47, %v815_v46 }
 0x184   : > { %v819_v52 = vadd.f32 %v818_v51, %v817_v48  ;;  %v825_v54 = vadd.f32 %v823_v50, %v822_v49 }
 0x186   : > { %820 = vadd.xlane.f32.xlu1 %v819_v52  ;;  %v826_v55 = vadd.f32 %v825_v54, %v824_v53 }
 0x188   : > { %827 = vadd.xlane.f32.xlu0 %v826_v55 }
 0x213   : > { %v821_v56 = vpop.xlane.xlu1 %820 }
 0x215   : > { %v828_v57 = vpop.xlane.xlu0 %827 }
 0x216   : > { %v830_v58 = vsel %vm829_vm10, %v821_v56, %v828_v57 }
 0x217   : > { %832 = vst.msk [vmem:[%s393_s10] sm:$0xff] %vm831_vm11, %v830_v58 }
 0x218 PF: > { %s17_s23 = sadd.s32 1, %s1200_s23   ;;  %s1350_s21 = smov %s1196_s22 }
 0x219   : > { %p14_p5 = scmp.ge.s32.totalorder %s17_s23, 4   ;;  %s1351_s22 = smov %s1353_s24 }
 0x21b   :  { %16 = sbr.rel (!%p14_p5) target bundleno = 2 (0x2), region = 88 }

// kernel: srresnet_forward.16
= control target key start
LH: loop header
LB: loop body
LE: loop exit
PB: predicated region body
PF: predicated region fallthrough
CT: control target
= control target key end

     0   :  { %s403_s12 = smov 0   ;;  %s405_s13 = smov 0   ;;  %s442_s0 = inlined_call_operand.vmem [shape: f32[2,8,256], index: 0, kind: input, shape index: {}]   ;;  %s443_s1 = inlined_call_operand.vmem [shape: f32[8,1], index: 1, kind: input, shape index: {}]   ;;  %s444_s2 = inlined_call_operand.vmem [shape: f32[8,1], index: 2, kind: input, shape index: {}]   ;;  %s445_s3 = inlined_call_operand.vmem [shape: f32[2,8,256], index: 3, kind: output, shape index: {}]  }
   0x1   :  { %s407_s14 = smov 0  }
   0x2 LB: > { %s25_s15 = sadd.s32 1, %s376_s13  ;;  %p323_p0 = scmp.ge.s32.totalorder %s380_s14, 1  ;;  %s380_s14 = sphi %s407_s14, %s13_s14   ;;  %s376_s13 = sphi %s405_s13, %s447_s13   ;;  %s372_s12 = sphi %s403_s12, %s446_s12  }
   0x3   : > { %p27_p1 = scmp.ge.s32.totalorder %s25_s15, 2  ;;  %p158_p2 = scmp.lt.s32.totalorder %s380_s14, 3 }
   0x5   : > { %s449_s15 = smov (%p27_p1, %s25_s15), 0  ;;  %p159_p3 = pnand %p323_p0, %p158_p2 }
   0x6   : > { %v212_v0 = vld [vmem:[%s443_s1] sm:$0xff] (!%p159_p3)  ;;  %v382_v1 = vmov (!%p159_p3), 0   ;;  %p191_p4 = scmp.lt.s32.totalorder (!%p159_p3), %s372_s12, 1 }
   0x7   : > { %162 = sbr.rel (%p159_p3) target bundleno = 145 (0x91), region = 32  ;;  %357 = vset.pattern.permute.xlu0 (!%p159_p3), %v382_v1  ;;  %v220_v2 = vld [vmem:[%s444_s2] sm:$0xff] (!%p159_p3) }
   0x8   : > { %215 = vperm.xlu0 (!%p159_p3), %357, %v212_v0  }
   0xc   : > { %223 = vperm.xlu0 (!%p159_p3), %357, %v220_v2  }
   0xe   : > { %s451_s12 = smov (!%p191_p4, %s372_s12), 1 }
   0xf   : > { %s330_s20 = sshll.u32 %s451_s12, 4 }
  0x10   : > { %s198_s23 = scalar_lea.vmem %s442_s0, %s330_s20  ;;  %s208_s26 = scalar_lea.vmem %s445_s3, %s330_s20 }
  0x11   : > { %v210_v4 = vld [vmem:[%s198_s23] sm:$0xff]  ;;  %v211_v5 = vld [vmem:[%s198_s23 + $0x8] sm:$0xff] }
  0x87   : > { %v216_v3 = vpop.permute.xlu0 %215 }
  0x88   : > { %v218_v6 = vmul.f32 %v216_v3, %v210_v4  ;;  %v219_v7 = vmul.f32 %v216_v3, %v211_v5 }
  0x8b   : > { %v224_v8 = vpop.permute.xlu0 %223 }
  0x8c   : > { %v226_v9 = vadd.f32 %v224_v8, %v218_v6  ;;  %v227_v10 = vadd.f32 %v224_v8, %v219_v7 }
  0x8e   : > { %v228_v11 = vmax.f32 %v226_v9, 0.0  ;;  %v229_v12 = vmax.f32 %v227_v10, 0.0 }
  0x90   : > { %230 = vst [vmem:[%s208_s26] sm:$0xff] %v228_v11  ;;  %231 = vst [vmem:[%s208_s26 + $0x8] sm:$0xff] %v229_v12 }
  0x91 PF: > { %s13_s14 = sadd.s32 1, %s380_s14   ;;  %s446_s12 = smov %s376_s13 }
  0x92   : > { %p10_p5 = scmp.ge.s32.totalorder %s13_s14, 4   ;;  %s447_s13 = smov %s449_s15 }
  0x94   :  { %12 = sbr.rel (!%p10_p5) target bundleno = 2 (0x2), region = 62 }

// kernel: srresnet_forward.14
= control target key start
LH: loop header
LB: loop body
LE: loop exit
PB: predicated region body
PF: predicated region fallthrough
CT: control target
= control target key end

     0   :  { %s1914_s15 = smov 0   ;;  %s1916_s16 = smov 0   ;;  %s2319_s0 = inlined_call_operand.vmem [shape: f32[2,1,1024], index: 0, kind: input, shape index: {}, may-alias: {0,1}]   ;;  %s2320_s1 = inlined_call_operand.vmem [shape: f32[2,1,1024], index: 1, kind: input, shape index: {}, may-alias: {0,1}]   ;;  %s2321_s2 = inlined_call_operand.vmem [shape: f32[8,81], index: 2, kind: input, shape index: {}]   ;;  %s2322_s3 = inlined_call_operand.vmem [shape: f32[8,1], index: 3, kind: input, shape index: {}]   ;;  %s2323_s4 = inlined_call_operand.vmem [shape: f32[2,8,768], index: 4, kind: output, shape index: {}]  }
   0x1   :  { %s1918_s17 = smov 0  }
   0x2 LB: > { %s26_s18 = sadd.s32 1, %s1805_s16  ;;  %p1607_p0 = scmp.ge.s32.totalorder %s1809_s17, 1  ;;  %s1809_s17 = sphi %s1918_s17, %s14_s17   ;;  %s1805_s16 = sphi %s1916_s16, %s2327_s16   ;;  %s1801_s15 = sphi %s1914_s15, %s2326_s15  }
   0x3   : > { %p28_p1 = scmp.ge.s32.totalorder %s26_s18, 2  ;;  %p214_p2 = scmp.lt.s32.totalorder %s1809_s17, 3 }
   0x5   : > { %s2329_s18 = smov (%p28_p1, %s26_s18), 0  ;;  %p215_p3 = pnand %p1607_p0, %p214_p2 }
   0x6   : > { %p266_p4 = scmp.lt.s32.totalorder (!%p215_p3), %s1801_s15, 1  ;;  %v302_v0 = vlaneseq (!%p215_p3)  ;;  %s1811_s27 = smov (!%p215_p3), 125   ;;  %vm341_vm2 = vcmask (!%p215_p3), 1022976   ;;  %vm319_vm3 = vcmask (!%p215_p3), 1039360   ;;  %vm352_vm4 = vcmask (!%p215_p3), 1014784  }
   0x7   : > { %218 = sbr.rel (%p215_p3) target bundleno = 556 (0x22c), region = 36  ;;  %s1812_s28 = smov (!%p215_p3), 127   ;;  %vm330_vm5 = vcmask (!%p215_p3), 1031168   ;;  %vm374_vm6 = vcmask (!%p215_p3), 998400   ;;  %vm363_vm7 = vcmask (!%p215_p3), 1006592   ;;  %vm396_vm8 = vcmask (!%p215_p3), 982016  }
   0x8   : > { %vm1935_vm0 = vcmp.lt.s32.totalorder (!%p215_p3), %v302_v0, 768  ;;  %vm308_vm1 = vcmp.lt.s32.totalorder (!%p215_p3), %v302_v0, 256  ;;  %s1813_s29 = smov (!%p215_p3), 124   ;;  %s1814_s30 = smov (!%p215_p3), 126   ;;  %vm385_vm9 = vcmask (!%p215_p3), 990208   ;;  %vm418_vm10 = vcmask (!%p215_p3), 842752  }
   0x9   : > { %s1815_s5 = smov (!%p215_p3), 122   ;;  %s1816_s6 = smov (!%p215_p3), 123   ;;  %vm407_vm11 = vcmask (!%p215_p3), 850944   ;;  %vm440_vm12 = vcmask (!%p215_p3), 826368   ;;  %vm429_vm13 = vcmask (!%p215_p3), 834560   ;;  %vm462_vm14 = vcmask (!%p215_p3), 809984  }
   0xa   : > { %s1817_s7 = smov (!%p215_p3), 120   ;;  %s1818_s8 = smov (!%p215_p3), 121   ;;  %vm451_vm15 = vcmask (!%p215_p3), 818176  }
   0xb   : > { %s1819_s9 = smov (!%p215_p3), 103   ;;  %s1820_s10 = smov (!%p215_p3), 104  }
   0xc   : > { %s1821_s11 = smov (!%p215_p3), 101   ;;  %s1822_s12 = smov (!%p215_p3), 102  }
   0xd   : > { %s1823_s13 = smov (!%p215_p3), 99   ;;  %s1824_s14 = smov (!%p215_p3), 100  }
   0xe   : > { %s2331_s15 = smov (!%p266_p4, %s1801_s15), 1  ;;  %s1826_s20 = smov 98  }
   0xf   : > { %s1608_s19 = sshll.u32 %s2331_s15, 3  ;;  %s1827_s21 = smov 80  }
  0x10   : > { %s272_s22 = scalar_lea.vmem %s2319_s0, %s1608_s19  ;;  %s286_s23 = sadd.s32 6, %s1608_s19 }
  0x11   : > { %s287_s26 = scalar_lea.vmem %s2320_s1, %s286_s23  ;;  %v301_v2 = vld [vmem:[%s272_s22] sm:$0x3f]  ;;  %s1825_s19 = smov 97  }
  0x12   : > { %306 = vst.msk [vmem:[#allocation2] sm:$0x3f] %vm1935_vm0, %v301_v2  ;;  %v307_v3 = vld [vmem:[%s287_s26] sm:$0x3]  ;;  %s1828_s22 = smov 96   ;;  %s1829_s23 = smov 78  }
  0x13   : > { %310 = vst.msk [vmem:[#allocation2 + $0x6] sm:$0x3] %vm308_vm1, %v307_v3  ;;  %s1830_s24 = smov 79   ;;  %s1831_s25 = smov 76   ;;  %vm484_vm1 = vcmask 793600  }
  0x14   : > { %s1832_s26 = smov 77  }
  0x19   : > { %v311_v24 = vld [vmem:[#allocation2] sm:$0x3f] }
  0x1a   : > { %v336_v4 = vld [vmem:[#allocation2] sm:$0x7f]  ;;  %312 = vst.msk [vmem:[#allocation3] ss:$8 sm:$0xf] %vm1935_vm0, %v311_v24 }
  0x1b   : > { %v314_v5 = vld [vmem:[#allocation2] sm:$0x7f]  ;;  %338 = vrot.lane.b32.xlu1 %v336_v4, %s1811_s27  ;;  %313 = vst.msk [vmem:[#allocation3] ss:$8 sm:$0x30] %vm1935_vm0, %v311_v24  ;;  %s1833_s27 = smov 74  }
  0x1c   : > { %316 = vrot.lane.b32.xlu0 %v314_v5, %s1812_s28  ;;  %v347_v6 = vld [vmem:[#allocation2] sm:$0x7f]  ;;  %s1834_s28 = smov 75  }
  0x1d   : > { %v325_v7 = vld [vmem:[#allocation2] sm:$0x7f] }
  0x1e   : > { %v369_v8 = vld [vmem:[#allocation2] sm:$0x7f] }
  0x1f   : > { %349 = vrot.lane.b32.xlu1 %v347_v6, %s1813_s29  ;;  %v358_v9 = vld [vmem:[#allocation2] sm:$0x7f]  ;;  %s1835_s29 = smov 72  }
  0x20   : > { %327 = vrot.lane.b32.xlu0 %v325_v7, %s1814_s30  ;;  %v391_v10 = vld [vmem:[#allocation2] sm:$0x7f]  ;;  %s1836_s30 = smov 73  }
  0x21   : > { %v380_v11 = vld [vmem:[#allocation2] sm:$0x7f] }
  0x22   : > { %v413_v12 = vld [vmem:[#allocation2] sm:$0x7f] }
  0x23   : > { %371 = vrot.lane.b32.xlu1 %v369_v8, %s1815_s5  ;;  %v402_v13 = vld [vmem:[#allocation2] sm:$0x7f]  ;;  %s1837_s5 = smov 55  }
  0x24   : > { %360 = vrot.lane.b32.xlu0 %v358_v9, %s1816_s6  ;;  %v435_v14 = vld [vmem:[#allocation2] sm:$0x7f]  ;;  %s1838_s6 = smov 56  }
  0x25   : > { %v424_v15 = vld [vmem:[#allocation2] sm:$0x7f] }
  0x26   : > { %v457_v16 = vld [vmem:[#allocation2] sm:$0x7f] }
  0x27   : > { %393 = vrot.lane.b32.xlu1 %v391_v10, %s1817_s7  ;;  %v446_v17 = vld [vmem:[#allocation2] sm:$0x7f]  ;;  %s1839_s7 = smov 53  }
  0x28   : > { %382 = vrot.lane.b32.xlu0 %v380_v11, %s1818_s8  ;;  %v479_v18 = vld [vmem:[#allocation2] sm:$0x7f]  ;;  %s1840_s8 = smov 54  }
  0x29   : > { %v468_v19 = vld [vmem:[#allocation2] sm:$0x7f] }
  0x2a   : > { %v501_v20 = vld [vmem:[#allocation2] sm:$0x7f] }
  0x2b   : > { %415 = vrot.lane.b32.xlu1 %v413_v12, %s1819_s9  ;;  %v490_v21 = vld [vmem:[#allocation2] sm:$0x7f]  ;;  %s1841_s9 = smov 51  }
  0x2c   : > { %404 = vrot.lane.b32.xlu0 %v402_v13, %s1820_s10  ;;  %v523_v22 = vld [vmem:[#allocation2] sm:$0x7f] }
  0x2d   : > { %v512_v23 = vld [vmem:[#allocation2] sm:$0x7f] }
  0x2e   : > { %v545_v25 = vld [vmem:[#allocation2] sm:$0x7f] }
  0x2f   : > { %437 = vrot.lane.b32.xlu1 %v435_v14, %s1821_s11  ;;  %v534_v26 = vld [vmem:[#allocation2] sm:$0x7f]  ;;  %s1842_s11 = smov 52  }
  0x30   : > { %426 = vrot.lane.b32.xlu0 %v424_v15, %s1822_s12  ;;  %v567_v27 = vld [vmem:[#allocation2] sm:$0x7f]  ;;  %s1843_s12 = smov 49  }
  0x31   : > { %v556_v28 = vld [vmem:[#allocation2] sm:$0x7f] }
  0x32   : > { %v589_v29 = vld [vmem:[#allocation2] sm:$0x7f] }
  0x33   : > { %459 = vrot.lane.b32.xlu1 %v457_v16, %s1823_s13  ;;  %v578_v30 = vld [vmem:[#allocation2] sm:$0x7f]  ;;  %s1844_s13 = smov 50  }
  0x34   : > { %448 = vrot.lane.b32.xlu0 %v446_v17, %s1824_s14  ;;  %v611_v31 = vld [vmem:[#allocation2] sm:$0x7f]  ;;  %s1845_s14 = smov 32  }
  0x35   : > { %v600_v32 = vld [vmem:[#allocation2] sm:$0x7f] }
  0x36   : > { %v633_v33 = vld [vmem:[#allocation2] sm:$0x7f] }
  0x37   : > { %481 = vrot.lane.b32.xlu1 %v479_v18, %s1825_s19  ;;  %v622_v34 = vld [vmem:[#allocation2] sm:$0x7f]  ;;  %s1846_s19 = smov 48  }
  0x38   : > { %470 = vrot.lane.b32.xlu0 %v468_v19, %s1826_s20  ;;  %v655_v35 = vld [vmem:[#allocation2] sm:$0x7f]  ;;  %s1847_s20 = smov 30  }
  0x39   : > { %v644_v36 = vld [vmem:[#allocation2] sm:$0x7f] }
  0x3a   : > { %v677_v37 = vld [vmem:[#allocation2] sm:$0x7f] }
  0x3b   : > { %503 = vrot.lane.b32.xlu1 %v501_v20, %s1827_s21  ;;  %v666_v38 = vld [vmem:[#allocation2] sm:$0x7f] }
  0x3c   : > { %492 = vrot.lane.b32.xlu0 %v490_v21, %s1828_s22  ;;  %v699_v39 = vld [vmem:[#allocation2] sm:$0x7f]  ;;  %s1848_s22 = smov 31  }
  0x3d   : > { %v688_v40 = vld [vmem:[#allocation2] sm:$0x7f] }
  0x3e   : > { %v721_v41 = vld [vmem:[#allocation2] sm:$0x7f] }
  0x3f   : > { %525 = vrot.lane.b32.xlu1 %v523_v22, %s1829_s23  ;;  %v710_v42 = vld [vmem:[#allocation2] sm:$0x7f]  ;;  %s1849_s23 = smov 28  }
  0x40   : > { %514 = vrot.lane.b32.xlu0 %v512_v23, %s1830_s24  ;;  %v743_v43 = vld [vmem:[#allocation2] sm:$0x7f]  ;;  %s1850_s24 = smov 29  }
  0x41   : > { %v732_v44 = vld [vmem:[#allocation2] sm:$0x7f] }
  0x42   : > { %v765_v45 = vld [vmem:[#allocation2] sm:$0x7f] }
  0x43   : > { %547 = vrot.lane.b32.xlu1 %v545_v25, %s1831_s25  ;;  %v754_v46 = vld [vmem:[#allocation2] sm:$0x7f]  ;;  %s1851_s25 = smov 26  }
  0x44   : > { %536 = vrot.lane.b32.xlu0 %v534_v26, %s1832_s26  ;;  %s1852_s26 = smov 27   ;;  %v787_v47 = vld [vmem:[#allocation2] sm:$0x7f] }
  0x45   : > { %v776_v48 = vld [vmem:[#allocation2] sm:$0x7f] }
  0x46   : > { %v809_v49 = vld [vmem:[#allocation2] sm:$0x7f] }
  0x47   : > { %569 = vrot.lane.b32.xlu1 %v567_v27, %s1833_s27  ;;  %s1853_s27 = smov 24   ;;  %v798_v50 = vld [vmem:[#allocation2] sm:$0x7f] }
  0x48   : > { %558 = vrot.lane.b32.xlu0 %v556_v28, %s1834_s28  ;;  %s1854_s28 = smov 25   ;;  %v831_v51 = vld [vmem:[#allocation2] sm:$0x7f] }
  0x49   : > { %v820_v52 = vld [vmem:[#allocation2] sm:$0x7f] }
  0x4a   : > { %v853_v53 = vld [vmem:[#allocation2] sm:$0x7f] }
  0x4b   : > { %591 = vrot.lane.b32.xlu1 %v589_v29, %s1835_s29  ;;  %s1855_s29 = smov 7   ;;  %v842_v54 = vld [vmem:[#allocation2] sm:$0x7f] }
  0x4c   : > { %580 = vrot.lane.b32.xlu0 %v578_v30, %s1836_s30  ;;  %s1856_s30 = smov 8   ;;  %v886_v55 = vld [vmem:[#allocation2 + $0x1] sm:$0x3f] }
  0x4d   : > { %888 = vst.msk [vmem:[#allocation3 + $0x125] ss:$8 sm:$0xf] %vm1935_vm0, %v886_v55  ;;  %889 = vst.msk [vmem:[#allocation3 + $0x125] ss:$8 sm:$0x30] %vm1935_vm0, %v886_v55 }
  0x4e   : > { %v875_v56 = vld [vmem:[#allocation2] sm:$0x7f] }
  0x4f   : > { %613 = vrot.lane.b32.xlu1 %v611_v31, %s1837_s5  ;;  %s1857_s5 = smov 5   ;;  %v864_v57 = vld [vmem:[#allocation2] sm:$0x7f] }
  0x50   : > { %602 = vrot.lane.b32.xlu0 %v600_v32, %s1838_s6  ;;  %v901_v58 = vld [vmem:[#allocation2 + $0x1] sm:$0x7f] }
  0x51   : > { %v890_v59 = vld [vmem:[#allocation2 + $0x1] sm:$0x7f] }
  0x52   : > { %v923_v60 = vld [vmem:[#allocation2 + $0x1] sm:$0x7f] }
  0x53   : > { %635 = vrot.lane.b32.xlu1 %v633_v33, %s1839_s7  ;;  %s1858_s7 = smov 6   ;;  %v912_v61 = vld [vmem:[#allocation2 + $0x1] sm:$0x7f] }
  0x54   : > { %624 = vrot.lane.b32.xlu0 %v622_v34, %s1840_s8  ;;  %s1859_s8 = smov 3   ;;  %v945_v62 = vld [vmem:[#allocation2 + $0x1] sm:$0x7f] }
  0x55   : > { %v934_v63 = vld [vmem:[#allocation2 + $0x1] sm:$0x7f] }
  0x56   : > { %v967_v0 = vld [vmem:[#allocation2 + $0x1] sm:$0x7f] }
  0x57   : > { %657 = vrot.lane.b32.xlu1 %v655_v35, %s1841_s9  ;;  %s1860_s9 = smov 4   ;;  %v956_v2 = vld [vmem:[#allocation2 + $0x1] sm:$0x7f] }
  0x58   : > { %646 = vrot.lane.b32.xlu0 %v644_v36, %s1842_s11  ;;  %s1861_s11 = smov 1   ;;  %v988_v9 = vld [vmem:[#allocation2 + $0x1] sm:$0x7f] }
  0x59   : > { %v978_v10 = vld [vmem:[#allocation2 + $0x1] sm:$0x7f] }
  0x5a   : > { %v1010_v17 = vld [vmem:[#allocation2 + $0x1] sm:$0x7f] }
  0x5b   : > { %679 = vrot.lane.b32.xlu1 %v677_v37, %s1843_s12  ;;  %s1862_s12 = smov 2   ;;  %v999_v18 = vld [vmem:[#allocation2 + $0x1] sm:$0x7f] }
  0x5c   : > { %668 = vrot.lane.b32.xlu0 %v666_v38, %s1844_s13  ;;  %s1863_s13 = smov 111   ;;  %v1032_v25 = vld [vmem:[#allocation2 + $0x1] sm:$0x7f] }
  0x5d   : > { %v1021_v26 = vld [vmem:[#allocation2 + $0x1] sm:$0x7f] }
  0x5e   : > { %v1054_v33 = vld [vmem:[#allocation2 + $0x1] sm:$0x7f] }
  0x5f   : > { %701 = vrot.lane.b32.xlu1 %v699_v39, %s1845_s14  ;;  %s1864_s14 = smov 112   ;;  %v1043_v34 = vld [vmem:[#allocation2 + $0x1] sm:$0x7f] }
  0x60   : > { %690 = vrot.lane.b32.xlu0 %v688_v40, %s1846_s19  ;;  %s1865_s19 = smov 109  }
  0x63   : > { %723 = vrot.lane.b32.xlu1 %v721_v41, %s1847_s20  ;;  %s1866_s20 = smov 110   ;;  %v1076_v41 = vld [vmem:[#allocation2 + $0x1] sm:$0x7f] }
  0x64   : > { %712 = vrot.lane.b32.xlu0 %v710_v42, %s1848_s22  ;;  %s1867_s22 = smov 107   ;;  %v1065_v42 = vld [vmem:[#allocation2 + $0x1] sm:$0x7f] }
  0x67   : > { %745 = vrot.lane.b32.xlu1 %v743_v43, %s1849_s23  ;;  %s1868_s23 = smov 108  }
  0x68   : > { %734 = vrot.lane.b32.xlu0 %v732_v44, %s1850_s24  ;;  %s1869_s24 = smov 105  }
  0x6b   : > { %767 = vrot.lane.b32.xlu1 %v765_v45, %s1851_s25  ;;  %s1870_s25 = smov 106  }
  0x6c   : > { %756 = vrot.lane.b32.xlu0 %v754_v46, %s1852_s26  ;;  %s1871_s26 = smov 88  }
  0x6f   : > { %789 = vrot.lane.b32.xlu1 %v787_v47, %s1853_s27  ;;  %s1873_s27 = smov 87  }
  0x70   : > { %778 = vrot.lane.b32.xlu0 %v776_v48, %s1854_s28  ;;  %s1874_s28 = smov 84  }
  0x73   : > { %811 = vrot.lane.b32.xlu1 %v809_v49, %s1855_s29  ;;  %s1875_s29 = smov 85   ;;  %v1097_v49 = vld [vmem:[#allocation2 + $0x1] sm:$0x7f] }
  0x74   : > { %800 = vrot.lane.b32.xlu0 %v798_v50, %s1856_s30  ;;  %s1876_s30 = smov 82   ;;  %v1086_v50 = vld [vmem:[#allocation2 + $0x1] sm:$0x7f] }
  0x77   : > { %833 = vrot.lane.b32.xlu1 %v831_v51, %s1857_s5  ;;  %s1877_s5 = smov 83  }
  0x78   : > { %822 = vrot.lane.b32.xlu0 %v820_v52, %s1858_s7  ;;  %s1878_s7 = smov 81  }
  0x7b   : > { %855 = vrot.lane.b32.xlu1 %v853_v53, %s1859_s8  ;;  %s1880_s8 = smov 64  }
  0x7c   : > { %844 = vrot.lane.b32.xlu0 %v842_v54, %s1860_s9  ;;  %s1881_s9 = smov 61  }
  0x7f   : > { %877 = vrot.lane.b32.xlu1 %v875_v56, %s1861_s11  ;;  %s1882_s11 = smov 62  }
  0x80   : > { %866 = vrot.lane.b32.xlu0 %v864_v57, %s1862_s12  ;;  %v1119_v57 = vld [vmem:[#allocation2 + $0x1] sm:$0x7f]  ;;  %s1883_s12 = smov 59  }
  0x83   : > { %903 = vrot.lane.b32.xlu1 %v901_v58, %s1863_s13  ;;  %v1108_v58 = vld [vmem:[#allocation2 + $0x1] sm:$0x7f]  ;;  %s1884_s13 = smov 60  }
  0x84   : > { %892 = vrot.lane.b32.xlu0 %v890_v59, %s1864_s14  ;;  %s1885_s14 = smov 57  }
  0x87   : > { %925 = vrot.lane.b32.xlu1 %v923_v60, %s1865_s19  ;;  %s1886_s19 = smov 58  }
  0x88   : > { %914 = vrot.lane.b32.xlu0 %v912_v61, %s1866_s20 }
  0x8b   : > { %947 = vrot.lane.b32.xlu1 %v945_v62, %s1867_s22 }
  0x8c   : > { %936 = vrot.lane.b32.xlu0 %v934_v63, %s1868_s23 }
  0x8d   : > { %v339_v3 = vpop.permute.xlu1 %338 }
  0x8e   : > { %v317_v4 = vpop.permute.xlu0 %316  ;;  %v340_v5 = vrot.slane %v339_v3, 1 }
  0x8f   : > { %v318_v6 = vrot.slane %v317_v4, 1  ;;  %969 = vrot.lane.b32.xlu1 %v967_v0, %s1869_s24  ;;  %s1682_s24 = smul.u32 48, %s2331_s15 }
  0x90   : > { %958 = vrot.lane.b32.xlu0 %v956_v2, %s1870_s25  ;;  %v342_v7 = vsel %vm341_vm2, %v339_v3, %v340_v5  ;;  %vm473_vm2 = vcmask 801792   ;;  %v1141_v2 = vld [vmem:[#allocation2 + $0x1] sm:$0x7f] }
  0x91   : > { %v320_v8 = vsel %vm319_vm3, %v317_v4, %v318_v6  ;;  %345 = vst.msk [vmem:[#allocation3 + $0x3] ss:$8 sm:$0xf] %vm1935_vm0, %v342_v7  ;;  %346 = vst.msk [vmem:[#allocation3 + $0x3] ss:$8 sm:$0x30] %vm1935_vm0, %v342_v7  ;;  %v350_v11 = vpop.permute.xlu1 %349 }
  0x92   : > { %323 = vst.msk [vmem:[#allocation3 + $0x1] ss:$8 sm:$0xf] %vm1935_vm0, %v320_v8  ;;  %324 = vst.msk [vmem:[#allocation3 + $0x1] ss:$8 sm:$0x30] %vm1935_vm0, %v320_v8  ;;  %v328_v12 = vpop.permute.xlu0 %327 }
  0x93   : > { %v351_v13 = vrot.slane %v350_v11, 1  ;;  %v329_v14 = vrot.slane %v328_v12, 1  ;;  %990 = vrot.lane.b32.xlu1 %v988_v9, %s1871_s26  ;;  %v1130_v3 = vld [vmem:[#allocation2 + $0x1] sm:$0x7f]  ;;  %vm506_vm3 = vcmask 654336  }
  0x94   : > { %980 = vrot.lane.b32.xlu0 %v978_v10, %s1820_s10  ;;  %s1872_s10 = smov 86   ;;  %v1163_v10 = vld [vmem:[#allocation2 + $0x1] sm:$0x7f] }
  0x95   : > { %v353_v15 = vsel %vm352_vm4, %v350_v11, %v351_v13  ;;  %v331_v16 = vsel %vm330_vm5, %v328_v12, %v329_v14  ;;  %v372_v19 = vpop.permute.xlu1 %371  ;;  %vm495_vm4 = vcmask 785408   ;;  %v1152_v11 = vld [vmem:[#allocation2 + $0x1] sm:$0x7f]  ;;  %vm528_vm5 = vcmask 637952  }
  0x96   : > { %356 = vst.msk [vmem:[#allocation3 + $0x4] ss:$8 sm:$0xf] %vm1935_vm0, %v353_v15  ;;  %357 = vst.msk [vmem:[#allocation3 + $0x4] ss:$8 sm:$0x30] %vm1935_vm0, %v353_v15  ;;  %v361_v20 = vpop.permute.xlu0 %360 }
  0x97   : > { %334 = vst.msk [vmem:[#allocation3 + $0x2] ss:$8 sm:$0xf] %vm1935_vm0, %v331_v16  ;;  %335 = vst.msk [vmem:[#allocation3 + $0x2] ss:$8 sm:$0x30] %vm1935_vm0, %v331_v16  ;;  %1012 = vrot.lane.b32.xlu1 %v1010_v17, %s1872_s10  ;;  %s299_s10 = scalar_lea.vmem %s2323_s4, %s1682_s24 }
  0x98   : > { %v373_v21 = vrot.slane %v372_v19, 1  ;;  %v362_v22 = vrot.slane %v361_v20, 1  ;;  %1001 = vrot.lane.b32.xlu0 %v999_v18, %s1873_s27  ;;  %v1174_v16 = vld [vmem:[#allocation2 + $0x1] sm:$0x7f] }
  0x99   : > { %v394_v27 = vpop.permute.xlu1 %393 }
  0x9a   : > { %v375_v23 = vsel %vm374_vm6, %v372_v19, %v373_v21  ;;  %v364_v24 = vsel %vm363_vm7, %v361_v20, %v362_v22  ;;  %v383_v28 = vpop.permute.xlu0 %382  ;;  %v395_v29 = vrot.slane %v394_v27, 1  ;;  %vm517_vm6 = vcmask 646144  }
  0x9b   : > { %378 = vst.msk [vmem:[#allocation3 + $0x6] ss:$8 sm:$0xf] %vm1935_vm0, %v375_v23  ;;  %379 = vst.msk [vmem:[#allocation3 + $0x6] ss:$8 sm:$0x30] %vm1935_vm0, %v375_v23  ;;  %1034 = vrot.lane.b32.xlu1 %v1032_v25, %s1874_s28 }
  0x9c   : > { %367 = vst.msk [vmem:[#allocation3 + $0x5] ss:$8 sm:$0xf] %vm1935_vm0, %v364_v24  ;;  %368 = vst.msk [vmem:[#allocation3 + $0x5] ss:$8 sm:$0x30] %vm1935_vm0, %v364_v24  ;;  %1023 = vrot.lane.b32.xlu0 %v1021_v26, %s1875_s29  ;;  %v397_v31 = vsel %vm396_vm8, %v394_v27, %v395_v29 }
  0x9d   : > { %v384_v30 = vrot.slane %v383_v28, 1  ;;  %400 = vst.msk [vmem:[#allocation3 + $0x30] ss:$8 sm:$0xf] %vm1935_vm0, %v397_v31  ;;  %v416_v35 = vpop.permute.xlu1 %415  ;;  %vm550_vm7 = vcmask 621568   ;;  %vm539_vm8 = vcmask 629760  }
  0x9e   : > { %401 = vst.msk [vmem:[#allocation3 + $0x30] ss:$8 sm:$0x30] %vm1935_vm0, %v397_v31  ;;  %v405_v36 = vpop.permute.xlu0 %404  ;;  %v417_v37 = vrot.slane %v416_v35, 1 }
  0x9f   : > { %v386_v32 = vsel %vm385_vm9, %v383_v28, %v384_v30  ;;  %v406_v38 = vrot.slane %v405_v36, 1  ;;  %1056 = vrot.lane.b32.xlu1 %v1054_v33, %s1876_s30  ;;  %vm572_vm9 = vcmask 605184  }
  0xa0   : > { %389 = vst.msk [vmem:[#allocation3 + $0x7] ss:$8 sm:$0xf] %vm1935_vm0, %v386_v32  ;;  %390 = vst.msk [vmem:[#allocation3 + $0x7] ss:$8 sm:$0x30] %vm1935_vm0, %v386_v32  ;;  %1045 = vrot.lane.b32.xlu0 %v1043_v34, %s1877_s5  ;;  %v419_v39 = vsel %vm418_vm10, %v416_v35, %v417_v37 }
  0xa1   : > { %v408_v40 = vsel %vm407_vm11, %v405_v36, %v406_v38  ;;  %422 = vst.msk [vmem:[#allocation3 + $0x32] ss:$8 sm:$0xf] %vm1935_vm0, %v419_v39  ;;  %423 = vst.msk [vmem:[#allocation3 + $0x32] ss:$8 sm:$0x30] %vm1935_vm0, %v419_v39  ;;  %v438_v43 = vpop.permute.xlu1 %437 }
  0xa2   : > { %411 = vst.msk [vmem:[#allocation3 + $0x31] ss:$8 sm:$0xf] %vm1935_vm0, %v408_v40  ;;  %412 = vst.msk [vmem:[#allocation3 + $0x31] ss:$8 sm:$0x30] %vm1935_vm0, %v408_v40  ;;  %v427_v44 = vpop.permute.xlu0 %426 }
  0xa3   : > { %v439_v45 = vrot.slane %v438_v43, 1  ;;  %v428_v46 = vrot.slane %v427_v44, 1  ;;  %1078 = vrot.lane.b32.xlu1 %v1076_v41, %s1827_s21  ;;  %s1879_s21 = smov 63   ;;  %vm561_vm10 = vcmask 613376   ;;  %v1887_v39 = vmov 0.0  }
  0xa4   : > { %1067 = vrot.lane.b32.xlu0 %v1065_v42, %s1878_s7  ;;  %1343 = vmatprep.mubr.f32.mxu0 %v1887_v39 }
  0xa5   : > { %v441_v47 = vsel %vm440_vm12, %v438_v43, %v439_v45  ;;  %v430_v48 = vsel %vm429_vm13, %v427_v44, %v428_v46  ;;  %v460_v51 = vpop.permute.xlu1 %459  ;;  %1414 = vmatprep.mubr.f32.mxu1 %v1887_v39  ;;  %vm594_vm12 = vcmask 588800   ;;  %vm583_vm13 = vcmask 596992  }
  0xa6   : > { %444 = vst.msk [vmem:[#allocation3 + $0x34] ss:$8 sm:$0xf] %vm1935_vm0, %v441_v47  ;;  %445 = vst.msk [vmem:[#allocation3 + $0x34] ss:$8 sm:$0x30] %vm1935_vm0, %v441_v47  ;;  %v449_v52 = vpop.permute.xlu0 %448 }
  0xa7   : > { %433 = vst.msk [vmem:[#allocation3 + $0x33] ss:$8 sm:$0xf] %vm1935_vm0, %v430_v48  ;;  %434 = vst.msk [vmem:[#allocation3 + $0x33] ss:$8 sm:$0x30] %vm1935_vm0, %v430_v48  ;;  %1099 = vrot.lane.b32.xlu1 %v1097_v49, %s1879_s21 }
  0xa8   : > { %v461_v53 = vrot.slane %v460_v51, 1  ;;  %v450_v54 = vrot.slane %v449_v52, 1  ;;  %1088 = vrot.lane.b32.xlu0 %v1086_v50, %s1880_s8  ;;  %v1186_v17 = vld [vmem:[#allocation3 + $0x8] sm:$0xff]  ;;  %v1188_v18 = vld [vmem:[#allocation3 + $0x18] sm:$0xff]  ;;  %v1185_v19 = vld [vmem:[#allocation3] sm:$0xff] }
  0xa9   : > { %v482_v59 = vpop.permute.xlu1 %481  ;;  %v1187_v30 = vld [vmem:[#allocation3 + $0x10] sm:$0xff] }
  0xaa   : > { %v463_v55 = vsel %vm462_vm14, %v460_v51, %v461_v53  ;;  %v452_v56 = vsel %vm451_vm15, %v449_v52, %v450_v54  ;;  %v471_v60 = vpop.permute.xlu0 %470  ;;  %v483_v61 = vrot.slane %v482_v59, 1  ;;  %vm616_vm14 = vcmask 449536  }
  0xab   : > { %466 = vst.msk [vmem:[#allocation3 + $0x36] ss:$8 sm:$0xf] %vm1935_vm0, %v463_v55  ;;  %467 = vst.msk [vmem:[#allocation3 + $0x36] ss:$8 sm:$0x30] %vm1935_vm0, %v463_v55  ;;  %1121 = vrot.lane.b32.xlu1 %v1119_v57, %s1881_s9 }
  0xac   : > { %455 = vst.msk [vmem:[#allocation3 + $0x35] ss:$8 sm:$0xf] %vm1935_vm0, %v452_v56  ;;  %456 = vst.msk [vmem:[#allocation3 + $0x35] ss:$8 sm:$0x30] %vm1935_vm0, %v452_v56  ;;  %1110 = vrot.lane.b32.xlu0 %v1108_v58, %s1882_s11  ;;  %v485_v63 = vsel %vm484_vm1, %v482_v59, %v483_v61 }
  0xad   : > { %v472_v62 = vrot.slane %v471_v60, 1  ;;  %488 = vst.msk [vmem:[#allocation3 + $0x60] ss:$8 sm:$0xf] %vm1935_vm0, %v485_v63  ;;  %v504_v4 = vpop.permute.xlu1 %503  ;;  %vm605_vm15 = vcmask 457728   ;;  %vm638_vm1 = vcmask 433152  }
  0xae   : > { %489 = vst.msk [vmem:[#allocation3 + $0x60] ss:$8 sm:$0x30] %vm1935_vm0, %v485_v63  ;;  %v493_v5 = vpop.permute.xlu0 %492  ;;  %v505_v6 = vrot.slane %v504_v4, 1 }
  0xaf   : > { %v474_v0 = vsel %vm473_vm2, %v471_v60, %v472_v62  ;;  %v494_v7 = vrot.slane %v493_v5, 1  ;;  %1143 = vrot.lane.b32.xlu1 %v1141_v2, %s1883_s12  ;;  %vm627_vm2 = vcmask 441344  }
  0xb0   : > { %477 = vst.msk [vmem:[#allocation3 + $0x37] ss:$8 sm:$0xf] %vm1935_vm0, %v474_v0  ;;  %478 = vst.msk [vmem:[#allocation3 + $0x37] ss:$8 sm:$0x30] %vm1935_vm0, %v474_v0  ;;  %1132 = vrot.lane.b32.xlu0 %v1130_v3, %s1884_s13  ;;  %v507_v8 = vsel %vm506_vm3, %v504_v4, %v505_v6 }
  0xb1   : > { %v496_v9 = vsel %vm495_vm4, %v493_v5, %v494_v7  ;;  %510 = vst.msk [vmem:[#allocation3 + $0x62] ss:$8 sm:$0xf] %vm1935_vm0, %v507_v8  ;;  %511 = vst.msk [vmem:[#allocation3 + $0x62] ss:$8 sm:$0x30] %vm1935_vm0, %v507_v8  ;;  %v526_v12 = vpop.permute.xlu1 %525 }
  0xb2   : > { %499 = vst.msk [vmem:[#allocation3 + $0x61] ss:$8 sm:$0xf] %vm1935_vm0, %v496_v9  ;;  %500 = vst.msk [vmem:[#allocation3 + $0x61] ss:$8 sm:$0x30] %vm1935_vm0, %v496_v9  ;;  %v515_v13 = vpop.permute.xlu0 %514 }
  0xb3   : > { %v527_v14 = vrot.slane %v526_v12, 1  ;;  %v516_v15 = vrot.slane %v515_v13, 1  ;;  %1165 = vrot.lane.b32.xlu1 %v1163_v10, %s1885_s14  ;;  %vm660_vm4 = vcmask 416768   ;;  %v1251_v9 = vld [vmem:[%s2322_s3] sm:$0xff] }
  0xb4   : > { %1154 = vrot.lane.b32.xlu0 %v1152_v11, %s1886_s19 }
  0xb5   : > { %v529_v20 = vsel %vm528_vm5, %v526_v12, %v527_v14  ;;  %v518_v21 = vsel %vm517_vm6, %v515_v13, %v516_v15  ;;  %v548_v25 = vpop.permute.xlu1 %547  ;;  %vm649_vm5 = vcmask 424960   ;;  %vm682_vm6 = vcmask 400384  }
  0xb6   : > { %532 = vst.msk [vmem:[#allocation3 + $0x64] ss:$8 sm:$0xf] %vm1935_vm0, %v529_v20  ;;  %533 = vst.msk [vmem:[#allocation3 + $0x64] ss:$8 sm:$0x30] %vm1935_vm0, %v529_v20  ;;  %v537_v26 = vpop.permute.xlu0 %536 }
  0xb7   : > { %v1192_v22 = vld [vmem:[#allocation3 + $0x38] sm:$0xff]  ;;  %v1194_v23 = vld [vmem:[#allocation3 + $0x48] sm:$0xff]  ;;  %v1191_v24 = vld [vmem:[#allocation3 + $0x30] sm:$0xff]  ;;  %521 = vst.msk [vmem:[#allocation3 + $0x63] ss:$8 sm:$0xf] %vm1935_vm0, %v518_v21 }
  0xb8   : > { %522 = vst.msk [vmem:[#allocation3 + $0x63] ss:$8 sm:$0x30] %vm1935_vm0, %v518_v21  ;;  %v1622_v27 = vpack.c.bf16 %v1192_v22, %v1186_v17  ;;  %v1642_v28 = vpack.c.bf16 %v1194_v23, %v1188_v18  ;;  %v1624_v29 = vpack.c.bf16 %v1191_v24, %v1185_v19  ;;  %v1193_v31 = vld [vmem:[#allocation3 + $0x40] sm:$0xff]  ;;  %v549_v32 = vrot.slane %v548_v25, 1  ;;  %1176 = vrot.lane.b32.xlu0 %v1174_v16, %s1838_s6 }
  0xb9   : > { %v538_v33 = vrot.slane %v537_v26, 1  ;;  %v1644_v34 = vpack.c.bf16 %v1193_v31, %v1187_v30  ;;  %v570_v37 = vpop.permute.xlu1 %569  ;;  %v1888_v12 = vmov 0  }
  0xba   : > { %1623 = vmatprep.subr.bf16.mxu0 %v1622_v27  ;;  %v551_v35 = vsel %vm550_vm7, %v548_v25, %v549_v32  ;;  %1643 = vmatprep.subr.bf16.mxu1 %v1642_v28  ;;  %v559_v38 = vpop.permute.xlu0 %558  ;;  %v571_v40 = vrot.slane %v570_v37, 1  ;;  %vm671_vm7 = vcmask 408576  }
  0xbb   : > { %v540_v36 = vsel %vm539_vm8, %v537_v26, %v538_v33  ;;  %1625 = vmatpush1.bf16.msra.mxu0 %v1624_v29  ;;  %554 = vst.msk [vmem:[#allocation3 + $0x66] ss:$8 sm:$0xf] %vm1935_vm0, %v551_v35  ;;  %555 = vst.msk [vmem:[#allocation3 + $0x66] ss:$8 sm:$0x30] %vm1935_vm0, %v551_v35  ;;  %1645 = vmatpush1.bf16.msra.mxu1 %v1644_v34 }
  0xbc   : > { %543 = vst.msk [vmem:[#allocation3 + $0x65] ss:$8 sm:$0xf] %vm1935_vm0, %v540_v36  ;;  %544 = vst.msk [vmem:[#allocation3 + $0x65] ss:$8 sm:$0x30] %vm1935_vm0, %v540_v36  ;;  %v573_v42 = vsel %vm572_vm9, %v570_v37, %v571_v40  ;;  %1785 = vset.pattern.permute.xlu1 %v1888_v12  ;;  %1786 = vset.pattern.permute.xlu0 %v1888_v12 }
  0xbd   : > { %v560_v41 = vrot.slane %v559_v38, 1  ;;  %576 = vst.msk [vmem:[#allocation3 + $0x90] ss:$8 sm:$0xf] %vm1935_vm0, %v573_v42  ;;  %v592_v44 = vpop.permute.xlu1 %591  ;;  %vm704_vm8 = vcmask 261120   ;;  %vm693_vm9 = vcmask 392192   ;;  %1254 = vperm.xlu1 %1785, %v1251_v9  }
  0xbe   : > { %577 = vst.msk [vmem:[#allocation3 + $0x90] ss:$8 sm:$0x30] %vm1935_vm0, %v573_v42  ;;  %v581_v45 = vpop.permute.xlu0 %580  ;;  %v593_v46 = vrot.slane %v592_v44, 1 }
  0xbf   : > { %v562_v43 = vsel %vm561_vm10, %v559_v38, %v560_v41  ;;  %v582_v47 = vrot.slane %v581_v45, 1  ;;  %vm726_vm10 = vcmask 244736  }
  0xc0   : > { %565 = vst.msk [vmem:[#allocation3 + $0x67] ss:$8 sm:$0xf] %vm1935_vm0, %v562_v43  ;;  %566 = vst.msk [vmem:[#allocation3 + $0x67] ss:$8 sm:$0x30] %vm1935_vm0, %v562_v43  ;;  %v595_v48 = vsel %vm594_vm12, %v592_v44, %v593_v46 }
  0xc1   : > { %v584_v49 = vsel %vm583_vm13, %v581_v45, %v582_v47  ;;  %598 = vst.msk [vmem:[#allocation3 + $0x92] ss:$8 sm:$0xf] %vm1935_vm0, %v595_v48  ;;  %599 = vst.msk [vmem:[#allocation3 + $0x92] ss:$8 sm:$0x30] %vm1935_vm0, %v595_v48  ;;  %v614_v50 = vpop.permute.xlu1 %613 }
  0xc2   : > { %587 = vst.msk [vmem:[#allocation3 + $0x91] ss:$8 sm:$0xf] %vm1935_vm0, %v584_v49  ;;  %588 = vst.msk [vmem:[#allocation3 + $0x91] ss:$8 sm:$0x30] %vm1935_vm0, %v584_v49  ;;  %v603_v51 = vpop.permute.xlu0 %602 }
  0xc3   : > { %v615_v52 = vrot.slane %v614_v50, 1  ;;  %v604_v53 = vrot.slane %v603_v51, 1  ;;  %vm715_vm12 = vcmask 252928   ;;  %vm748_vm13 = vcmask 228352  }
  0xc5   : > { %v617_v54 = vsel %vm616_vm14, %v614_v50, %v615_v52  ;;  %v606_v55 = vsel %vm605_vm15, %v603_v51, %v604_v53  ;;  %v636_v56 = vpop.permute.xlu1 %635  ;;  %vm737_vm14 = vcmask 236544  }
  0xc6   : > { %620 = vst.msk [vmem:[#allocation3 + $0x94] ss:$8 sm:$0xf] %vm1935_vm0, %v617_v54  ;;  %621 = vst.msk [vmem:[#allocation3 + $0x94] ss:$8 sm:$0x30] %vm1935_vm0, %v617_v54  ;;  %v625_v57 = vpop.permute.xlu0 %624 }
  0xc7   : > { %609 = vst.msk [vmem:[#allocation3 + $0x93] ss:$8 sm:$0xf] %vm1935_vm0, %v606_v55  ;;  %610 = vst.msk [vmem:[#allocation3 + $0x93] ss:$8 sm:$0x30] %vm1935_vm0, %v606_v55 }
  0xc8   : > { %v637_v58 = vrot.slane %v636_v56, 1  ;;  %v626_v59 = vrot.slane %v625_v57, 1  ;;  %v1198_v17 = vld [vmem:[#allocation3 + $0x68] sm:$0xff]  ;;  %v1200_v18 = vld [vmem:[#allocation3 + $0x78] sm:$0xff]  ;;  %v1197_v19 = vld [vmem:[#allocation3 + $0x60] sm:$0xff] }
  0xc9   : > { %v658_v62 = vpop.permute.xlu1 %657  ;;  %v1199_v30 = vld [vmem:[#allocation3 + $0x70] sm:$0xff] }
  0xca   : > { %v639_v60 = vsel %vm638_vm1, %v636_v56, %v637_v58  ;;  %v628_v61 = vsel %vm627_vm2, %v625_v57, %v626_v59  ;;  %v647_v63 = vpop.permute.xlu0 %646  ;;  %v659_v0 = vrot.slane %v658_v62, 1  ;;  %vm770_vm1 = vcmask 211968  }
  0xcb   : > { %642 = vst.msk [vmem:[#allocation3 + $0x96] ss:$8 sm:$0xf] %vm1935_vm0, %v639_v60  ;;  %643 = vst.msk [vmem:[#allocation3 + $0x96] ss:$8 sm:$0x30] %vm1935_vm0, %v639_v60 }
  0xcc   : > { %631 = vst.msk [vmem:[#allocation3 + $0x95] ss:$8 sm:$0xf] %vm1935_vm0, %v628_v61  ;;  %632 = vst.msk [vmem:[#allocation3 + $0x95] ss:$8 sm:$0x30] %vm1935_vm0, %v628_v61  ;;  %v661_v3 = vsel %vm660_vm4, %v658_v62, %v659_v0 }
  0xcd   : > { %v648_v2 = vrot.slane %v647_v63, 1  ;;  %664 = vst.msk [vmem:[#allocation3 + $0xc0] ss:$8 sm:$0xf] %vm1935_vm0, %v661_v3  ;;  %v680_v5 = vpop.permute.xlu1 %679  ;;  %vm759_vm2 = vcmask 220160   ;;  %vm792_vm4 = vcmask 195584  }
  0xce   : > { %665 = vst.msk [vmem:[#allocation3 + $0xc0] ss:$8 sm:$0x30] %vm1935_vm0, %v661_v3  ;;  %v669_v6 = vpop.permute.xlu0 %668  ;;  %v681_v7 = vrot.slane %v680_v5, 1 }
  0xcf   : > { %v650_v4 = vsel %vm649_vm5, %v647_v63, %v648_v2  ;;  %v670_v8 = vrot.slane %v669_v6, 1  ;;  %vm781_vm5 = vcmask 203776  }
  0xd0   : > { %653 = vst.msk [vmem:[#allocation3 + $0x97] ss:$8 sm:$0xf] %vm1935_vm0, %v650_v4  ;;  %654 = vst.msk [vmem:[#allocation3 + $0x97] ss:$8 sm:$0x30] %vm1935_vm0, %v650_v4  ;;  %v683_v10 = vsel %vm682_vm6, %v680_v5, %v681_v7 }
  0xd1   : > { %v672_v11 = vsel %vm671_vm7, %v669_v6, %v670_v8  ;;  %686 = vst.msk [vmem:[#allocation3 + $0xc2] ss:$8 sm:$0xf] %vm1935_vm0, %v683_v10  ;;  %687 = vst.msk [vmem:[#allocation3 + $0xc2] ss:$8 sm:$0x30] %vm1935_vm0, %v683_v10  ;;  %v702_v13 = vpop.permute.xlu1 %701 }
  0xd2   : > { %675 = vst.msk [vmem:[#allocation3 + $0xc1] ss:$8 sm:$0xf] %vm1935_vm0, %v672_v11  ;;  %676 = vst.msk [vmem:[#allocation3 + $0xc1] ss:$8 sm:$0x30] %vm1935_vm0, %v672_v11  ;;  %v691_v14 = vpop.permute.xlu0 %690 }
  0xd3   : > { %v703_v15 = vrot.slane %v702_v13, 1  ;;  %v692_v16 = vrot.slane %v691_v14, 1  ;;  %vm814_vm6 = vcmask 56320   ;;  %vm803_vm7 = vcmask 64512  }
  0xd5   : > { %v705_v20 = vsel %vm704_vm8, %v702_v13, %v703_v15  ;;  %v694_v21 = vsel %vm693_vm9, %v691_v14, %v692_v16  ;;  %v724_v25 = vpop.permute.xlu1 %723  ;;  %vm836_vm8 = vcmask 39936   ;;  %vm825_vm9 = vcmask 48128  }
  0xd6   : > { %708 = vst.msk [vmem:[#allocation3 + $0xc4] ss:$8 sm:$0xf] %vm1935_vm0, %v705_v20  ;;  %709 = vst.msk [vmem:[#allocation3 + $0xc4] ss:$8 sm:$0x30] %vm1935_vm0, %v705_v20  ;;  %v713_v26 = vpop.permute.xlu0 %712 }
  0xd7   : > { %v1204_v22 = vld [vmem:[#allocation3 + $0x98] sm:$0xff]  ;;  %v1206_v23 = vld [vmem:[#allocation3 + $0xa8] sm:$0xff]  ;;  %v1203_v24 = vld [vmem:[#allocation3 + $0x90] sm:$0xff]  ;;  %697 = vst.msk [vmem:[#allocation3 + $0xc3] ss:$8 sm:$0xf] %vm1935_vm0, %v694_v21 }
  0xd8   : > { %698 = vst.msk [vmem:[#allocation3 + $0xc3] ss:$8 sm:$0x30] %vm1935_vm0, %v694_v21  ;;  %v1626_v27 = vpack.c.bf16 %v1204_v22, %v1198_v17  ;;  %v1646_v28 = vpack.c.bf16 %v1206_v23, %v1200_v18  ;;  %v1628_v29 = vpack.c.bf16 %v1203_v24, %v1197_v19  ;;  %v1205_v31 = vld [vmem:[#allocation3 + $0xa0] sm:$0xff]  ;;  %v725_v32 = vrot.slane %v724_v25, 1 }
  0xd9   : > { %v714_v33 = vrot.slane %v713_v26, 1  ;;  %v1648_v34 = vpack.c.bf16 %v1205_v31, %v1199_v30  ;;  %v746_v37 = vpop.permute.xlu1 %745 }
  0xda   : > { %1627 = vmatprep.subr.bf16.mxu0 %v1626_v27  ;;  %1647 = vmatprep.subr.bf16.mxu1 %v1646_v28  ;;  %v727_v35 = vsel %vm726_vm10, %v724_v25, %v725_v32  ;;  %v735_v38 = vpop.permute.xlu0 %734  ;;  %v747_v40 = vrot.slane %v746_v37, 1  ;;  %vm858_vm10 = vcmask 23552  }
  0xdb   : > { %v716_v36 = vsel %vm715_vm12, %v713_v26, %v714_v33  ;;  %1629 = vmatpush1.bf16.msra.mxu0 %v1628_v29  ;;  %1649 = vmatpush1.bf16.msra.mxu1 %v1648_v34  ;;  %730 = vst.msk [vmem:[#allocation3 + $0xc6] ss:$8 sm:$0xf] %vm1935_vm0, %v727_v35  ;;  %731 = vst.msk [vmem:[#allocation3 + $0xc6] ss:$8 sm:$0x30] %vm1935_vm0, %v727_v35 }
  0xdc   : > { %719 = vst.msk [vmem:[#allocation3 + $0xc5] ss:$8 sm:$0xf] %vm1935_vm0, %v716_v36  ;;  %720 = vst.msk [vmem:[#allocation3 + $0xc5] ss:$8 sm:$0x30] %vm1935_vm0, %v716_v36  ;;  %v749_v42 = vsel %vm748_vm13, %v746_v37, %v747_v40 }
  0xdd   : > { %v736_v41 = vrot.slane %v735_v38, 1  ;;  %752 = vst.msk [vmem:[#allocation3 + $0xf0] ss:$8 sm:$0xf] %vm1935_vm0, %v749_v42  ;;  %v768_v44 = vpop.permute.xlu1 %767  ;;  %vm847_vm12 = vcmask 31744   ;;  %vm880_vm13 = vcmask 7168  }
  0xde   : > { %753 = vst.msk [vmem:[#allocation3 + $0xf0] ss:$8 sm:$0x30] %vm1935_vm0, %v749_v42  ;;  %v757_v45 = vpop.permute.xlu0 %756  ;;  %v769_v46 = vrot.slane %v768_v44, 1 }
  0xdf   : > { %v738_v43 = vsel %vm737_vm14, %v735_v38, %v736_v41  ;;  %v758_v47 = vrot.slane %v757_v45, 1  ;;  %vm869_vm14 = vcmask 15360  }
  0xe0   : > { %741 = vst.msk [vmem:[#allocation3 + $0xc7] ss:$8 sm:$0xf] %vm1935_vm0, %v738_v43  ;;  %742 = vst.msk [vmem:[#allocation3 + $0xc7] ss:$8 sm:$0x30] %vm1935_vm0, %v738_v43  ;;  %v771_v48 = vsel %vm770_vm1, %v768_v44, %v769_v46 }
  0xe1   : > { %v760_v49 = vsel %vm759_vm2, %v757_v45, %v758_v47  ;;  %774 = vst.msk [vmem:[#allocation3 + $0xf2] ss:$8 sm:$0xf] %vm1935_vm0, %v771_v48  ;;  %775 = vst.msk [vmem:[#allocation3 + $0xf2] ss:$8 sm:$0x30] %vm1935_vm0, %v771_v48  ;;  %v790_v50 = vpop.permute.xlu1 %789 }
  0xe2   : > { %763 = vst.msk [vmem:[#allocation3 + $0xf1] ss:$8 sm:$0xf] %vm1935_vm0, %v760_v49  ;;  %764 = vst.msk [vmem:[#allocation3 + $0xf1] ss:$8 sm:$0x30] %vm1935_vm0, %v760_v49  ;;  %v779_v51 = vpop.permute.xlu0 %778 }
  0xe3   : > { %v791_v52 = vrot.slane %v790_v50, 1  ;;  %v780_v53 = vrot.slane %v779_v51, 1  ;;  %vm906_vm1 = vcmask 908288   ;;  %vm895_vm2 = vcmask 916480  }
  0xe5   : > { %v793_v54 = vsel %vm792_vm4, %v790_v50, %v791_v52  ;;  %v782_v55 = vsel %vm781_vm5, %v779_v51, %v780_v53  ;;  %v812_v56 = vpop.permute.xlu1 %811  ;;  %vm928_vm4 = vcmask 891904   ;;  %vm917_vm5 = vcmask 900096  }
  0xe6   : > { %796 = vst.msk [vmem:[#allocation3 + $0xf4] ss:$8 sm:$0xf] %vm1935_vm0, %v793_v54  ;;  %797 = vst.msk [vmem:[#allocation3 + $0xf4] ss:$8 sm:$0x30] %vm1935_vm0, %v793_v54  ;;  %v801_v57 = vpop.permute.xlu0 %800 }
  0xe7   : > { %785 = vst.msk [vmem:[#allocation3 + $0xf3] ss:$8 sm:$0xf] %vm1935_vm0, %v782_v55  ;;  %786 = vst.msk [vmem:[#allocation3 + $0xf3] ss:$8 sm:$0x30] %vm1935_vm0, %v782_v55 }
  0xe8   : > { %v813_v58 = vrot.slane %v812_v56, 1  ;;  %v802_v59 = vrot.slane %v801_v57, 1  ;;  %v1210_v15 = vld [vmem:[#allocation3 + $0xc8] sm:$0xff]  ;;  %v1212_v16 = vld [vmem:[#allocation3 + $0xd8] sm:$0xff]  ;;  %v1209_v17 = vld [vmem:[#allocation3 + $0xc0] sm:$0xff] }
  0xe9   : > { %v834_v62 = vpop.permute.xlu1 %833  ;;  %v1211_v28 = vld [vmem:[#allocation3 + $0xd0] sm:$0xff] }
  0xea   : > { %v815_v60 = vsel %vm814_vm6, %v812_v56, %v813_v58  ;;  %v804_v61 = vsel %vm803_vm7, %v801_v57, %v802_v59  ;;  %v823_v63 = vpop.permute.xlu0 %822  ;;  %v835_v0 = vrot.slane %v834_v62, 1  ;;  %vm950_vm6 = vcmask 875520  }
  0xeb   : > { %818 = vst.msk [vmem:[#allocation3 + $0xf6] ss:$8 sm:$0xf] %vm1935_vm0, %v815_v60  ;;  %819 = vst.msk [vmem:[#allocation3 + $0xf6] ss:$8 sm:$0x30] %vm1935_vm0, %v815_v60 }
  0xec   : > { %807 = vst.msk [vmem:[#allocation3 + $0xf5] ss:$8 sm:$0xf] %vm1935_vm0, %v804_v61  ;;  %808 = vst.msk [vmem:[#allocation3 + $0xf5] ss:$8 sm:$0x30] %vm1935_vm0, %v804_v61  ;;  %v837_v3 = vsel %vm836_vm8, %v834_v62, %v835_v0 }
  0xed   : > { %v824_v2 = vrot.slane %v823_v63, 1  ;;  %840 = vst.msk [vmem:[#allocation3 + $0x120] ss:$8 sm:$0xf] %vm1935_vm0, %v837_v3  ;;  %v856_v5 = vpop.permute.xlu1 %855  ;;  %vm939_vm7 = vcmask 883712   ;;  %vm972_vm8 = vcmask 859136  }
  0xee   : > { %841 = vst.msk [vmem:[#allocation3 + $0x120] ss:$8 sm:$0x30] %vm1935_vm0, %v837_v3  ;;  %v845_v6 = vpop.permute.xlu0 %844  ;;  %v857_v7 = vrot.slane %v856_v5, 1 }
  0xef   : > { %v826_v4 = vsel %vm825_vm9, %v823_v63, %v824_v2  ;;  %v846_v8 = vrot.slane %v845_v6, 1  ;;  %vm961_vm9 = vcmask 867328  }
  0xf0   : > { %829 = vst.msk [vmem:[#allocation3 + $0xf7] ss:$8 sm:$0xf] %vm1935_vm0, %v826_v4  ;;  %830 = vst.msk [vmem:[#allocation3 + $0xf7] ss:$8 sm:$0x30] %vm1935_vm0, %v826_v4  ;;  %v859_v9 = vsel %vm858_vm10, %v856_v5, %v857_v7 }
  0xf1   : > { %v848_v10 = vsel %vm847_vm12, %v845_v6, %v846_v8  ;;  %862 = vst.msk [vmem:[#allocation3 + $0x122] ss:$8 sm:$0xf] %vm1935_vm0, %v859_v9  ;;  %863 = vst.msk [vmem:[#allocation3 + $0x122] ss:$8 sm:$0x30] %vm1935_vm0, %v859_v9  ;;  %v878_v11 = vpop.permute.xlu1 %877 }
  0xf2   : > { %851 = vst.msk [vmem:[#allocation3 + $0x121] ss:$8 sm:$0xf] %vm1935_vm0, %v848_v10  ;;  %852 = vst.msk [vmem:[#allocation3 + $0x121] ss:$8 sm:$0x30] %vm1935_vm0, %v848_v10  ;;  %v867_v12 = vpop.permute.xlu0 %866 }
  0xf3   : > { %v879_v13 = vrot.slane %v878_v11, 1  ;;  %v868_v14 = vrot.slane %v867_v12, 1  ;;  %vm993_vm10 = vcmask 719872   ;;  %vm1015_vm12 = vcmask 703488  }
  0xf5   : > { %v881_v18 = vsel %vm880_vm13, %v878_v11, %v879_v13  ;;  %v870_v19 = vsel %vm869_vm14, %v867_v12, %v868_v14  ;;  %v904_v23 = vpop.permute.xlu1 %903  ;;  %vm1004_vm13 = vcmask 711680   ;;  %vm1026_vm14 = vcmask 695296  }
  0xf6   : > { %884 = vst.msk [vmem:[#allocation3 + $0x124] ss:$8 sm:$0xf] %vm1935_vm0, %v881_v18  ;;  %885 = vst.msk [vmem:[#allocation3 + $0x124] ss:$8 sm:$0x30] %vm1935_vm0, %v881_v18  ;;  %v893_v24 = vpop.permute.xlu0 %892 }
  0xf7   : > { %v1216_v20 = vld [vmem:[#allocation3 + $0xf8] sm:$0xff]  ;;  %v1218_v21 = vld [vmem:[#allocation3 + $0x108] sm:$0xff]  ;;  %v1215_v22 = vld [vmem:[#allocation3 + $0xf0] sm:$0xff]  ;;  %873 = vst.msk [vmem:[#allocation3 + $0x123] ss:$8 sm:$0xf] %vm1935_vm0, %v870_v19 }
  0xf8   : > { %874 = vst.msk [vmem:[#allocation3 + $0x123] ss:$8 sm:$0x30] %vm1935_vm0, %v870_v19  ;;  %v1630_v25 = vpack.c.bf16 %v1216_v20, %v1210_v15  ;;  %v1650_v26 = vpack.c.bf16 %v1218_v21, %v1212_v16  ;;  %v1632_v27 = vpack.c.bf16 %v1215_v22, %v1209_v17  ;;  %v1217_v29 = vld [vmem:[#allocation3 + $0x100] sm:$0xff]  ;;  %v905_v30 = vrot.slane %v904_v23, 1 }
  0xf9   : > { %v894_v31 = vrot.slane %v893_v24, 1  ;;  %v1652_v32 = vpack.c.bf16 %v1217_v29, %v1211_v28  ;;  %v926_v35 = vpop.permute.xlu1 %925 }
  0xfa   : > { %1631 = vmatprep.subr.bf16.mxu0 %v1630_v25  ;;  %1651 = vmatprep.subr.bf16.mxu1 %v1650_v26  ;;  %v907_v33 = vsel %vm906_vm1, %v904_v23, %v905_v30  ;;  %v915_v36 = vpop.permute.xlu0 %914  ;;  %v927_v37 = vrot.slane %v926_v35, 1  ;;  %vm1059_vm1 = vcmask 670720  }
  0xfb   : > { %v896_v34 = vsel %vm895_vm2, %v893_v24, %v894_v31  ;;  %1633 = vmatpush1.bf16.msra.mxu0 %v1632_v27  ;;  %1653 = vmatpush1.bf16.msra.mxu1 %v1652_v32  ;;  %910 = vst.msk [vmem:[#allocation3 + $0x127] ss:$8 sm:$0xf] %vm1935_vm0, %v907_v33  ;;  %911 = vst.msk [vmem:[#allocation3 + $0x127] ss:$8 sm:$0x30] %vm1935_vm0, %v907_v33 }
  0xfc   : > { %899 = vst.msk [vmem:[#allocation3 + $0x126] ss:$8 sm:$0xf] %vm1935_vm0, %v896_v34  ;;  %900 = vst.msk [vmem:[#allocation3 + $0x126] ss:$8 sm:$0x30] %vm1935_vm0, %v896_v34  ;;  %v929_v40 = vsel %vm928_vm4, %v926_v35, %v927_v37 }
  0xfd   : > { %v916_v38 = vrot.slane %v915_v36, 1  ;;  %932 = vst.msk [vmem:[#allocation3 + $0x151] ss:$8 sm:$0xf] %vm1935_vm0, %v929_v40  ;;  %v948_v42 = vpop.permute.xlu1 %947  ;;  %vm1048_vm2 = vcmask 678912   ;;  %vm1070_vm4 = vcmask 662528  }
  0xfe   : > { %933 = vst.msk [vmem:[#allocation3 + $0x151] ss:$8 sm:$0x30] %vm1935_vm0, %v929_v40  ;;  %v937_v43 = vpop.permute.xlu0 %936  ;;  %v949_v44 = vrot.slane %v948_v42, 1 }
  0xff   : > { %v918_v41 = vsel %vm917_vm5, %v915_v36, %v916_v38  ;;  %v938_v45 = vrot.slane %v937_v43, 1  ;;  %vm1102_vm5 = vcmask 515072  }
 0x100   : > { %921 = vst.msk [vmem:[#allocation3 + $0x150] ss:$8 sm:$0xf] %vm1935_vm0, %v918_v41  ;;  %922 = vst.msk [vmem:[#allocation3 + $0x150] ss:$8 sm:$0x30] %vm1935_vm0, %v918_v41  ;;  %v951_v46 = vsel %vm950_vm6, %v948_v42, %v949_v44 }
 0x101   : > { %v940_v47 = vsel %vm939_vm7, %v937_v43, %v938_v45  ;;  %954 = vst.msk [vmem:[#allocation3 + $0x153] ss:$8 sm:$0xf] %vm1935_vm0, %v951_v46  ;;  %955 = vst.msk [vmem:[#allocation3 + $0x153] ss:$8 sm:$0x30] %vm1935_vm0, %v951_v46  ;;  %v970_v48 = vpop.permute.xlu1 %969 }
 0x102   : > { %943 = vst.msk [vmem:[#allocation3 + $0x152] ss:$8 sm:$0xf] %vm1935_vm0, %v940_v47  ;;  %944 = vst.msk [vmem:[#allocation3 + $0x152] ss:$8 sm:$0x30] %vm1935_vm0, %v940_v47  ;;  %v959_v49 = vpop.permute.xlu0 %958 }
 0x103   : > { %v971_v50 = vrot.slane %v970_v48, 1  ;;  %v960_v51 = vrot.slane %v959_v49, 1  ;;  %v1222_v7 = vld [vmem:[#allocation3 + $0x128] sm:$0xff]  ;;  %v1224_v8 = vld [vmem:[#allocation3 + $0x138] sm:$0xff]  ;;  %v1221_v9 = vld [vmem:[#allocation3 + $0x120] sm:$0xff]  ;;  %vm1091_vm6 = vcmask 523264  }
 0x104   : > { %v1223_v20 = vld [vmem:[#allocation3 + $0x130] sm:$0xff]  ;;  %vm1113_vm7 = vcmask 506880  }
 0x105   : > { %v973_v52 = vsel %vm972_vm8, %v970_v48, %v971_v50  ;;  %v962_v53 = vsel %vm961_vm9, %v959_v49, %v960_v51  ;;  %v991_v54 = vpop.permute.xlu1 %990  ;;  %vm1146_vm8 = vcmask 482304   ;;  %vm1135_vm9 = vcmask 490496  }
 0x106   : > { %976 = vst.msk [vmem:[#allocation3 + $0x155] ss:$8 sm:$0xf] %vm1935_vm0, %v973_v52  ;;  %977 = vst.msk [vmem:[#allocation3 + $0x155] ss:$8 sm:$0x30] %vm1935_vm0, %v973_v52  ;;  %v981_v55 = vpop.permute.xlu0 %980 }
 0x107   : > { %965 = vst.msk [vmem:[#allocation3 + $0x154] ss:$8 sm:$0xf] %vm1935_vm0, %v962_v53  ;;  %966 = vst.msk [vmem:[#allocation3 + $0x154] ss:$8 sm:$0x30] %vm1935_vm0, %v962_v53 }
 0x108   : > { %v992_v56 = vrot.slane %v991_v54, 1  ;;  %v982_v57 = vrot.slane %v981_v55, 1 }
 0x109   : > { %v1013_v60 = vpop.permute.xlu1 %1012 }
 0x10a   : > { %v994_v58 = vsel %vm993_vm10, %v991_v54, %v992_v56  ;;  %v983_v59 = vsel %vm407_vm11, %v981_v55, %v982_v57  ;;  %v1002_v61 = vpop.permute.xlu0 %1001  ;;  %v1014_v62 = vrot.slane %v1013_v60, 1  ;;  %vm1037_vm11 = vcmask 687104  }
 0x10b   : > { %997 = vst.msk [vmem:[#allocation3 + $0x157] ss:$8 sm:$0xf] %vm1935_vm0, %v994_v58  ;;  %998 = vst.msk [vmem:[#allocation3 + $0x157] ss:$8 sm:$0x30] %vm1935_vm0, %v994_v58 }
 0x10c   : > { %986 = vst.msk [vmem:[#allocation3 + $0x156] ss:$8 sm:$0xf] %vm1935_vm0, %v983_v59  ;;  %987 = vst.msk [vmem:[#allocation3 + $0x156] ss:$8 sm:$0x30] %vm1935_vm0, %v983_v59  ;;  %v1016_v0 = vsel %vm1015_vm12, %v1013_v60, %v1014_v62 }
 0x10d   : > { %v1003_v63 = vrot.slane %v1002_v61, 1  ;;  %1019 = vst.msk [vmem:[#allocation3 + $0x181] ss:$8 sm:$0xf] %vm1935_vm0, %v1016_v0  ;;  %v1035_v3 = vpop.permute.xlu1 %1034  ;;  %vm1168_vm10 = vcmask 465920   ;;  %vm1157_vm12 = vcmask 474112  }
 0x10e   : > { %1020 = vst.msk [vmem:[#allocation3 + $0x181] ss:$8 sm:$0x30] %vm1935_vm0, %v1016_v0  ;;  %v1024_v4 = vpop.permute.xlu0 %1023  ;;  %v1036_v5 = vrot.slane %v1035_v3, 1 }
 0x10f   : > { %v1005_v2 = vsel %vm1004_vm13, %v1002_v61, %v1003_v63  ;;  %v1025_v6 = vrot.slane %v1024_v4, 1  ;;  %vm1260_vm13 = vcmask 1040384  }
 0x110   : > { %1008 = vst.msk [vmem:[#allocation3 + $0x180] ss:$8 sm:$0xf] %vm1935_vm0, %v1005_v2  ;;  %1009 = vst.msk [vmem:[#allocation3 + $0x180] ss:$8 sm:$0x30] %vm1935_vm0, %v1005_v2  ;;  %v1038_v10 = vsel %vm1037_vm11, %v1035_v3, %v1036_v5 }
 0x111   : > { %v1027_v11 = vsel %vm1026_vm14, %v1024_v4, %v1025_v6  ;;  %1041 = vst.msk [vmem:[#allocation3 + $0x183] ss:$8 sm:$0xf] %vm1935_vm0, %v1038_v10  ;;  %1042 = vst.msk [vmem:[#allocation3 + $0x183] ss:$8 sm:$0x30] %vm1935_vm0, %v1038_v10  ;;  %v1057_v15 = vpop.permute.xlu1 %1056 }
 0x112   : > { %1030 = vst.msk [vmem:[#allocation3 + $0x182] ss:$8 sm:$0xf] %vm1935_vm0, %v1027_v11  ;;  %1031 = vst.msk [vmem:[#allocation3 + $0x182] ss:$8 sm:$0x30] %vm1935_vm0, %v1027_v11  ;;  %v1046_v16 = vpop.permute.xlu0 %1045 }
 0x113   : > { %v1228_v12 = vld [vmem:[#allocation3 + $0x158] sm:$0xff]  ;;  %v1230_v13 = vld [vmem:[#allocation3 + $0x168] sm:$0xff]  ;;  %v1227_v14 = vld [vmem:[#allocation3 + $0x150] sm:$0xff]  ;;  %v1058_v22 = vrot.slane %v1057_v15, 1  ;;  %v1047_v23 = vrot.slane %v1046_v16, 1 }
 0x114   : > { %v1634_v17 = vpack.c.bf16 %v1228_v12, %v1222_v7  ;;  %v1654_v18 = vpack.c.bf16 %v1230_v13, %v1224_v8  ;;  %v1636_v19 = vpack.c.bf16 %v1227_v14, %v1221_v9  ;;  %v1229_v21 = vld [vmem:[#allocation3 + $0x160] sm:$0xff]  ;;  %v1196_v11 = vld [vmem:[#allocation3 + $0x58] sm:$0xff]  ;;  %v1195_v12 = vld [vmem:[#allocation3 + $0x50] sm:$0xff] }
 0x115   : > { %v1656_v24 = vpack.c.bf16 %v1229_v21, %v1223_v20  ;;  %v1060_v25 = vsel %vm1059_vm1, %v1057_v15, %v1058_v22  ;;  %v1049_v26 = vsel %vm1048_vm2, %v1046_v16, %v1047_v23  ;;  %v1079_v27 = vpop.permute.xlu1 %1078  ;;  %v1184_v13 = vld [vmem:[%s2321_s2] sm:$0xff]  ;;  %v1190_v14 = vld [vmem:[#allocation3 + $0x28] sm:$0xff]  ;;  %v1207_v23 = vld [vmem:[#allocation3 + $0xb0] sm:$0xff] }
 0x116   : > { %1635 = vmatprep.subr.bf16.mxu0 %v1634_v17  ;;  %1655 = vmatprep.subr.bf16.mxu1 %v1654_v18  ;;  %1063 = vst.msk [vmem:[#allocation3 + $0x185] ss:$8 sm:$0xf] %vm1935_vm0, %v1060_v25  ;;  %1064 = vst.msk [vmem:[#allocation3 + $0x185] ss:$8 sm:$0x30] %vm1935_vm0, %v1060_v25  ;;  %v1068_v28 = vpop.permute.xlu0 %1067  ;;  %v1662_v18 = vpack.c.bf16 %v1196_v11, %v1190_v14 }
 0x117   : > { %1637 = vmatpush1.bf16.msra.mxu0 %v1636_v19  ;;  %1657 = vmatpush1.bf16.msra.mxu1 %v1656_v24  ;;  %1052 = vst.msk [vmem:[#allocation3 + $0x184] ss:$8 sm:$0xf] %vm1935_vm0, %v1049_v26  ;;  %1053 = vst.msk [vmem:[#allocation3 + $0x184] ss:$8 sm:$0x30] %vm1935_vm0, %v1049_v26 }
 0x118   : > { %v1080_v29 = vrot.slane %v1079_v27, 1  ;;  %v1069_v30 = vrot.slane %v1068_v28, 1  ;;  %v1208_v15 = vld [vmem:[#allocation3 + $0xb8] sm:$0xff]  ;;  %v1189_v19 = vld [vmem:[#allocation3 + $0x20] sm:$0xff]  ;;  %v1202_v21 = vld [vmem:[#allocation3 + $0x88] sm:$0xff] }
 0x119   : > { %v1100_v33 = vpop.permute.xlu1 %1099  ;;  %v1664_v20 = vpack.c.bf16 %v1195_v12, %v1189_v19  ;;  %v1666_v22 = vpack.c.bf16 %v1208_v15, %v1202_v21  ;;  %v1220_v24 = vld [vmem:[#allocation3 + $0x118] sm:$0xff]  ;;  %v1201_v25 = vld [vmem:[#allocation3 + $0x80] sm:$0xff] }
 0x11a   : > { %v1081_v31 = vsel %vm506_vm3, %v1079_v27, %v1080_v29  ;;  %v1071_v32 = vsel %vm1070_vm4, %v1068_v28, %v1069_v30  ;;  %v1089_v34 = vpop.permute.xlu0 %1088  ;;  %v1101_v35 = vrot.slane %v1100_v33, 1  ;;  %vm1124_vm3 = vcmask 498688   ;;  %v1214_v27 = vld [vmem:[#allocation3 + $0xe8] sm:$0xff]  ;;  %v1219_v29 = vld [vmem:[#allocation3 + $0x110] sm:$0xff]  ;;  %v1232_v30 = vld [vmem:[#allocation3 + $0x178] sm:$0xff] }
 0x11b   : > { %1084 = vst.msk [vmem:[#allocation3 + $0x187] ss:$8 sm:$0xf] %vm1935_vm0, %v1081_v31  ;;  %1085 = vst.msk [vmem:[#allocation3 + $0x187] ss:$8 sm:$0x30] %vm1935_vm0, %v1081_v31  ;;  %v1668_v26 = vpack.c.bf16 %v1207_v23, %v1201_v25  ;;  %v1670_v28 = vpack.c.bf16 %v1220_v24, %v1214_v27 }
 0x11c   : > { %1074 = vst.msk [vmem:[#allocation3 + $0x186] ss:$8 sm:$0xf] %vm1935_vm0, %v1071_v32  ;;  %1075 = vst.msk [vmem:[#allocation3 + $0x186] ss:$8 sm:$0x30] %vm1935_vm0, %v1071_v32  ;;  %v1103_v37 = vsel %vm1102_vm5, %v1100_v33, %v1101_v35 }
 0x11d   : > { %v1090_v36 = vrot.slane %v1089_v34, 1  ;;  %1106 = vst.msk [vmem:[#allocation3 + $0x1b1] ss:$8 sm:$0xf] %vm1935_vm0, %v1103_v37  ;;  %v1122_v40 = vpop.permute.xlu1 %1121  ;;  %v1213_v31 = vld [vmem:[#allocation3 + $0xe0] sm:$0xff]  ;;  %v1226_v33 = vld [vmem:[#allocation3 + $0x148] sm:$0xff] }
 0x11e   : > { %1107 = vst.msk [vmem:[#allocation3 + $0x1b1] ss:$8 sm:$0x30] %vm1935_vm0, %v1103_v37  ;;  %v1111_v41 = vpop.permute.xlu0 %1110  ;;  %v1123_v42 = vrot.slane %v1122_v40, 1  ;;  %v1672_v32 = vpack.c.bf16 %v1219_v29, %v1213_v31  ;;  %v1231_v35 = vld [vmem:[#allocation3 + $0x170] sm:$0xff]  ;;  %v1225_v37 = vld [vmem:[#allocation3 + $0x140] sm:$0xff] }
 0x11f   : > { %v1092_v38 = vsel %vm1091_vm6, %v1089_v34, %v1090_v36  ;;  %v1112_v43 = vrot.slane %v1111_v41, 1  ;;  %v1674_v34 = vpack.c.bf16 %v1232_v30, %v1226_v33 }
 0x120   : > { %1095 = vst.msk [vmem:[#allocation3 + $0x1b0] ss:$8 sm:$0xf] %vm1935_vm0, %v1092_v38  ;;  %1096 = vst.msk [vmem:[#allocation3 + $0x1b0] ss:$8 sm:$0x30] %vm1935_vm0, %v1092_v38  ;;  %v1125_v44 = vsel %vm1124_vm3, %v1122_v40, %v1123_v42  ;;  %v1676_v38 = vpack.c.bf16 %v1231_v35, %v1225_v37 }
 0x121   : > { %v1114_v45 = vsel %vm1113_vm7, %v1111_v41, %v1112_v43  ;;  %1128 = vst.msk [vmem:[#allocation3 + $0x1b3] ss:$8 sm:$0xf] %vm1935_vm0, %v1125_v44  ;;  %1129 = vst.msk [vmem:[#allocation3 + $0x1b3] ss:$8 sm:$0x30] %vm1935_vm0, %v1125_v44  ;;  %v1144_v46 = vpop.permute.xlu1 %1143 }
 0x122   : > { %1117 = vst.msk [vmem:[#allocation3 + $0x1b2] ss:$8 sm:$0xf] %vm1935_vm0, %v1114_v45  ;;  %1118 = vst.msk [vmem:[#allocation3 + $0x1b2] ss:$8 sm:$0x30] %vm1935_vm0, %v1114_v45  ;;  %v1133_v47 = vpop.permute.xlu0 %1132 }
 0x123   : > { %v1145_v48 = vrot.slane %v1144_v46, 1  ;;  %v1134_v49 = vrot.slane %v1133_v47, 1  ;;  %v1234_v61 = vld [vmem:[#allocation3 + $0x188] sm:$0xff]  ;;  %v1236_v62 = vld [vmem:[#allocation3 + $0x198] sm:$0xff]  ;;  %v1233_v63 = vld [vmem:[#allocation3 + $0x180] sm:$0xff] }
 0x124   : > { %v1235_v7 = vld [vmem:[#allocation3 + $0x190] sm:$0xff]  ;;  %v1238_v40 = vld [vmem:[#allocation3 + $0x1a8] sm:$0xff]  ;;  %v1237_v42 = vld [vmem:[#allocation3 + $0x1a0] sm:$0xff] }
 0x125   : > { %v1147_v50 = vsel %vm1146_vm8, %v1144_v46, %v1145_v48  ;;  %v1136_v51 = vsel %vm1135_vm9, %v1133_v47, %v1134_v49  ;;  %v1166_v52 = vpop.permute.xlu1 %1165 }
 0x126   : > { %1150 = vst.msk [vmem:[#allocation3 + $0x1b5] ss:$8 sm:$0xf] %vm1935_vm0, %v1147_v50  ;;  %1151 = vst.msk [vmem:[#allocation3 + $0x1b5] ss:$8 sm:$0x30] %vm1935_vm0, %v1147_v50  ;;  %v1155_v53 = vpop.permute.xlu0 %1154 }
 0x127   : > { %1139 = vst.msk [vmem:[#allocation3 + $0x1b4] ss:$8 sm:$0xf] %vm1935_vm0, %v1136_v51  ;;  %1140 = vst.msk [vmem:[#allocation3 + $0x1b4] ss:$8 sm:$0x30] %vm1935_vm0, %v1136_v51 }
 0x128   : > { %v1167_v54 = vrot.slane %v1166_v52, 1  ;;  %v1156_v55 = vrot.slane %v1155_v53, 1 }
 0x12a   : > { %v1169_v56 = vsel %vm1168_vm10, %v1166_v52, %v1167_v54  ;;  %v1158_v57 = vsel %vm1157_vm12, %v1155_v53, %v1156_v55  ;;  %v1177_v58 = vpop.permute.xlu0 %1176 }
 0x12b   : > { %1172 = vst.msk [vmem:[#allocation3 + $0x1b7] ss:$8 sm:$0xf] %vm1935_vm0, %v1169_v56  ;;  %1173 = vst.msk [vmem:[#allocation3 + $0x1b7] ss:$8 sm:$0x30] %vm1935_vm0, %v1169_v56 }
 0x12c   : > { %1161 = vst.msk [vmem:[#allocation3 + $0x1b6] ss:$8 sm:$0xf] %vm1935_vm0, %v1158_v57  ;;  %1162 = vst.msk [vmem:[#allocation3 + $0x1b6] ss:$8 sm:$0x30] %vm1935_vm0, %v1158_v57 }
 0x12d   : > { %v1178_v59 = vrot.slane %v1177_v58, 1 }
 0x12f   : > { %v1179_v60 = vsel %vm605_vm15, %v1177_v58, %v1178_v59 }
 0x130   : > { %1182 = vst.msk [vmem:[#allocation3 + $0x1e0] ss:$8 sm:$0xf] %vm1935_vm0, %v1179_v60  ;;  %1183 = vst.msk [vmem:[#allocation3 + $0x1e0] ss:$8 sm:$0x30] %vm1935_vm0, %v1179_v60 }
 0x133   : > { %v1240_v0 = vld [vmem:[#allocation3 + $0x1b8] sm:$0xff]  ;;  %v1242_v2 = vld [vmem:[#allocation3 + $0x1c8] sm:$0xff]  ;;  %v1239_v3 = vld [vmem:[#allocation3 + $0x1b0] sm:$0xff] }
 0x134   : > { %v1638_v4 = vpack.c.bf16 %v1240_v0, %v1234_v61  ;;  %v1658_v5 = vpack.c.bf16 %v1242_v2, %v1236_v62  ;;  %v1640_v6 = vpack.c.bf16 %v1239_v3, %v1233_v63  ;;  %v1241_v8 = vld [vmem:[#allocation3 + $0x1c0] sm:$0xff]  ;;  %v1244_v36 = vld [vmem:[#allocation3 + $0x1d8] sm:$0xff]  ;;  %v1243_v41 = vld [vmem:[#allocation3 + $0x1d0] sm:$0xff] }
 0x135   : > { %v1660_v9 = vpack.c.bf16 %v1241_v8, %v1235_v7  ;;  %v1680_v43 = vpack.c.bf16 %v1243_v41, %v1237_v42 }
 0x136   : > { %1639 = vmatprep.subr.bf16.mxu0 %v1638_v4  ;;  %1659 = vmatprep.subr.bf16.mxu1 %v1658_v5 }
 0x137   : > { %1641 = vmatpush1.bf16.msra.mxu0 %v1640_v6  ;;  %1661 = vmatpush1.bf16.msra.mxu1 %v1660_v9  ;;  %v1246_v10 = vld [vmem:[#allocation3 + $0x1e8] sm:$0x1]  ;;  %v1248_v1 = vld [vmem:[#allocation3 + $0x1f8] sm:$0x1]  ;;  %v1245_v16 = vld [vmem:[#allocation3 + $0x1e0] sm:$0x1] }
 0x138   : > { %1611 = vmatprep.subr.msk.mxu0 %vm1260_vm13, %v1246_v10  ;;  %1614 = vmatprep.subr.msk.mxu1 %vm1260_vm13, %v1248_v1  ;;  %v1247_v17 = vld [vmem:[#allocation3 + $0x1f0] sm:$0x1]  ;;  %v1250_v44 = vld [vmem:[#allocation3 + $0x208] sm:$0x1]  ;;  %v1249_v45 = vld [vmem:[#allocation3 + $0x200] sm:$0x1] }
 0x13b   : > { %1612 = vmatpush1.msk.msra.mxu0 %vm1260_vm13, %v1245_v16  ;;  %1615 = vmatpush1.msk.msra.mxu1 %vm1260_vm13, %v1247_v17 }
 0x13c   : > { %1613 = vmatmul.mubr.msk.f32.vlgmr.msra.gmra.mrb[0].mxu0 %vm1070_vm4, %v1184_v13  ;;  %1663 = vmatprep.subr.bf16.mxu0 %v1662_v18  ;;  %v1255_v46 = vpop.permute.xlu1 %1254 }
 0x13d   : > { %1665 = vmatpush1.bf16.msra.mxu0 %v1664_v20  ;;  %1616 = vmatmul.mubr.msk.f32.vlgmr.msra.gmra.mrb[0].mxu1 %vm1070_vm4, %v1184_v13 }
 0x13e   : > { %1667 = vmatprep.subr.bf16.mxu0 %v1666_v22  ;;  %1485 = vmatprep.mubr.f32.mxu0 %v1887_v39  ;;  %v1678_v39 = vpack.c.bf16 %v1244_v36, %v1238_v40 }
 0x141   : > { %1669 = vmatpush1.bf16.msra.mxu0 %v1668_v26 }
 0x142   : > { %1671 = vmatprep.subr.bf16.mxu0 %v1670_v28 }
 0x145   : > { %1673 = vmatpush1.bf16.msra.mxu0 %v1672_v32 }
 0x146   : > { %1675 = vmatprep.subr.bf16.mxu0 %v1674_v34 }
 0x149   : > { %1677 = vmatpush1.bf16.msra.mxu0 %v1676_v38 }
 0x14a   : > { %1679 = vmatprep.subr.bf16.mxu0 %v1678_v39 }
 0x14d   : > { %1681 = vmatpush1.bf16.msra.mxu0 %v1680_v43 }
 0x14e   : > { %1617 = vmatprep.subr.msk.mxu0 %vm1260_vm13, %v1250_v44 }
 0x151   : > { %1618 = vmatpush1.msk.msra.mxu0 %vm1260_vm13, %v1249_v45 }
 0x152   : > { %1619 = vmatmul.mubr.msk.f32.vlgmr.msra.gmra.mrb[2].mxu0 %vm1070_vm4, %v1184_v13 }
 0x20f   : > { %v1345_v47 = vpop.f32.mrb[0].mxu0 }
 0x210   : > { %v1346_v48 = vadd.f32 %v1345_v47, %v1255_v46  ;;  %v1347_v49 = vpop.f32.mrb[1].mxu0  ;;  %v1416_v50 = vpop.f32.mrb[0].mxu1 }
 0x211   : > { %v1348_v51 = vadd.f32 %v1347_v49, %v1255_v46  ;;  %v1417_v52 = vadd.f32 %v1416_v50, %v1255_v46  ;;  %v1418_v53 = vpop.f32.mrb[1].mxu1 }
 0x212   : > { %v1492_v54 = vmax.f32 %v1346_v48, 0.0  ;;  %v1419_v55 = vadd.f32 %v1418_v53, %v1255_v46 }
 0x213   : > { %v1493_v56 = vmax.f32 %v1348_v51, 0.0  ;;  %v1494_v57 = vmax.f32 %v1417_v52, 0.0 }
 0x214   : > { %1498 = vst [vmem:[%s299_s10] sm:$0xff] %v1492_v54  ;;  %v1495_v58 = vmax.f32 %v1419_v55, 0.0 }
 0x215   : > { %1499 = vst [vmem:[%s299_s10 + $0x8] sm:$0xff] %v1493_v56  ;;  %1500 = vst [vmem:[%s299_s10 + $0x10] sm:$0xff] %v1494_v57 }
 0x216   : > { %1501 = vst [vmem:[%s299_s10 + $0x18] sm:$0xff] %v1495_v58 }
 0x225   : > { %v1487_v59 = vpop.f32.mrb[2].mxu0 }
 0x226   : > { %v1488_v60 = vadd.f32 %v1487_v59, %v1255_v46  ;;  %v1489_v61 = vpop.f32.mrb[3].mxu0 }
 0x227   : > { %v1490_v62 = vadd.f32 %v1489_v61, %v1255_v46 }
 0x228   : > { %v1496_v63 = vmax.f32 %v1488_v60, 0.0 }
 0x229   : > { %v1497_v0 = vmax.f32 %v1490_v62, 0.0 }
 0x22a   : > { %1502 = vst [vmem:[%s299_s10 + $0x20] sm:$0xff] %v1496_v63 }
 0x22b   : > { %1503 = vst [vmem:[%s299_s10 + $0x28] sm:$0xff] %v1497_v0 }
 0x22c PF: > { %s14_s17 = sadd.s32 1, %s1809_s17   ;;  %s2326_s15 = smov %s1805_s16 }
 0x22d   : > { %p11_p5 = scmp.ge.s32.totalorder %s14_s17, 4   ;;  %s2327_s16 = smov %s2329_s18 }
 0x22f   :  { %13 = sbr.rel (!%p11_p5) target bundleno = 2 (0x2), region = 149 }

// kernel: srresnet_forward.18
= control target key start
LH: loop header
LB: loop body
LE: loop exit
PB: predicated region body
PF: predicated region fallthrough
CT: control target
= control target key end

     0   :  { %s494_s15 = smov 0   ;;  %s496_s16 = smov 0   ;;  %s536_s0 = inlined_call_operand.vmem [shape: f32[2,8,256], index: 0, kind: input, shape index: {}]   ;;  %s537_s1 = inlined_call_operand.vmem [shape: f32[8,1], index: 1, kind: input, shape index: {}]   ;;  %s538_s2 = inlined_call_operand.vmem [shape: f32[8,1], index: 2, kind: input, shape index: {}]   ;;  %s539_s3 = inlined_call_operand.vmem [shape: f32[2,8,256], index: 3, kind: input, shape index: {}]   ;;  %s540_s4 = inlined_call_operand.vmem [shape: f32[2,8,256], index: 4, kind: output, shape index: {}]  }
   0x1   :  { %s498_s17 = smov 0  }
   0x2 LB: > { %s26_s18 = sadd.s32 1, %s462_s16  ;;  %p406_p0 = scmp.ge.s32.totalorder %s466_s17, 1  ;;  %s466_s17 = sphi %s498_s17, %s14_s17   ;;  %s462_s16 = sphi %s496_s16, %s542_s16   ;;  %s458_s15 = sphi %s494_s15, %s541_s15  }
   0x3   : > { %p28_p1 = scmp.ge.s32.totalorder %s26_s18, 2  ;;  %p200_p2 = scmp.lt.s32.totalorder %s466_s17, 3 }
   0x5   : > { %s544_s18 = smov (%p28_p1, %s26_s18), 0  ;;  %p201_p3 = pnand %p406_p0, %p200_p2 }
   0x6   : > { %v275_v0 = vld [vmem:[%s537_s1] sm:$0xff] (!%p201_p3)  ;;  %v468_v1 = vmov (!%p201_p3), 0   ;;  %p244_p4 = scmp.lt.s32.totalorder (!%p201_p3), %s458_s15, 1 }
   0x7   : > { %204 = sbr.rel (%p201_p3) target bundleno = 145 (0x91), region = 36  ;;  %443 = vset.pattern.permute.xlu0 (!%p201_p3), %v468_v1  ;;  %v283_v2 = vld [vmem:[%s538_s2] sm:$0xff] (!%p201_p3) }
   0x8   : > { %278 = vperm.xlu0 (!%p201_p3), %443, %v275_v0  }
   0xc   : > { %286 = vperm.xlu0 (!%p201_p3), %443, %v283_v2  }
   0xe   : > { %s546_s15 = smov (!%p244_p4, %s458_s15), 1 }
   0xf   : > { %s415_s23 = sshll.u32 %s546_s15, 4 }
  0x10   : > { %s251_s26 = scalar_lea.vmem %s536_s0, %s415_s23  ;;  %s261_s29 = scalar_lea.vmem %s539_s3, %s415_s23 }
  0x11   : > { %v273_v4 = vld [vmem:[%s251_s26] sm:$0xff]  ;;  %v274_v5 = vld [vmem:[%s251_s26 + $0x8] sm:$0xff]  ;;  %s271_s6 = scalar_lea.vmem %s540_s4, %s415_s23 }
  0x12   : > { %v291_v9 = vld [vmem:[%s261_s29] sm:$0xff]  ;;  %v292_v10 = vld [vmem:[%s261_s29 + $0x8] sm:$0xff] }
  0x87   : > { %v279_v3 = vpop.permute.xlu0 %278 }
  0x88   : > { %v281_v6 = vmul.f32 %v279_v3, %v273_v4  ;;  %v282_v7 = vmul.f32 %v279_v3, %v274_v5 }
  0x8b   : > { %v287_v8 = vpop.permute.xlu0 %286 }
  0x8c   : > { %v289_v11 = vadd.f32 %v287_v8, %v281_v6  ;;  %v290_v12 = vadd.f32 %v287_v8, %v282_v7 }
  0x8e   : > { %v293_v13 = vadd.f32 %v291_v9, %v289_v11  ;;  %v294_v14 = vadd.f32 %v292_v10, %v290_v12 }
  0x90   : > { %295 = vst [vmem:[%s271_s6] sm:$0xff] %v293_v13  ;;  %296 = vst [vmem:[%s271_s6 + $0x8] sm:$0xff] %v294_v14 }
  0x91 PF: > { %s14_s17 = sadd.s32 1, %s466_s17   ;;  %s541_s15 = smov %s462_s16 }
  0x92   : > { %p11_p5 = scmp.ge.s32.totalorder %s14_s17, 4   ;;  %s542_s16 = smov %s544_s18 }
  0x94   :  { %13 = sbr.rel (!%p11_p5) target bundleno = 2 (0x2), region = 69 }

// kernel: srresnet_forward.25
= control target key start
LH: loop header
LB: loop body
LE: loop exit
PB: predicated region body
PF: predicated region fallthrough
CT: control target
= control target key end

     0   :  { %s1060_s15 = smov 0   ;;  %s1062_s16 = smov 0   ;;  %s1147_s0 = inlined_call_operand.vmem [shape: f32[2,8,512], index: 0, kind: input, shape index: {}, may-alias: {0,1}]   ;;  %s1148_s1 = inlined_call_operand.vmem [shape: f32[2,8,512], index: 1, kind: input, shape index: {}, may-alias: {0,1}]   ;;  %s1149_s2 = inlined_call_operand.vmem [shape: f32[8,72], index: 2, kind: input, shape index: {}]   ;;  %s1150_s3 = inlined_call_operand.vmem [shape: f32[8,1], index: 3, kind: input, shape index: {}]   ;;  %s1151_s4 = inlined_call_operand.vmem [shape: f32[2,8,384], index: 4, kind: output, shape index: {}]  }
   0x1   :  { %s1064_s17 = smov 0  }
   0x2 LB: > { %s26_s18 = sadd.s32 1, %s1017_s16  ;;  %p818_p0 = scmp.ge.s32.totalorder %s1021_s17, 1  ;;  %s1021_s17 = sphi %s1064_s17, %s14_s17   ;;  %s1017_s16 = sphi %s1062_s16, %s1153_s16   ;;  %s1013_s15 = sphi %s1060_s15, %s1152_s15  }
   0x3   : > { %p28_p1 = scmp.ge.s32.totalorder %s26_s18, 2  ;;  %p214_p2 = scmp.lt.s32.totalorder %s1021_s17, 3 }
   0x5   : > { %s1155_s18 = smov (%p28_p1, %s26_s18), 0  ;;  %p215_p3 = pnand %p818_p0, %p214_p2 }
   0x6   : > { %p267_p4 = scmp.lt.s32.totalorder (!%p215_p3), %s1013_s15, 1  ;;  %v1023_v0 = vmov (!%p215_p3), 0.0|0.0   ;;  %s1024_s27 = smov (!%p215_p3), 126   ;;  %v1029_v7 = vmov (!%p215_p3), 0.0   ;;  %vm1032_vm0 = vmmov (!%p215_p3), 0   ;;  %v1033_v8 = vmov (!%p215_p3), 0  }
   0x7   : > { %218 = sbr.rel (%p215_p3) target bundleno = 387 (0x183), region = 36  ;;  %879 = vmatprep.subr.bf16.mxu1 (!%p215_p3), %v1023_v0  ;;  %s1025_s28 = smov (!%p215_p3), 127   ;;  %626 = vmatprep.mubr.f32.mxu0 (!%p215_p3), %v1029_v7  ;;  %v552_v9 = vld [vmem:[%s1150_s3] sm:$0xff] (!%p215_p3)  ;;  %vm332_vm1 = vcmask (!%p215_p3), 1039360   ;;  %vm358_vm2 = vcmask (!%p215_p3), 1031168   ;;  %vm384_vm3 = vcmask (!%p215_p3), 900096  }
   0x8   : > { %s1026_s29 = smov (!%p215_p3), 110   ;;  %s1027_s30 = smov (!%p215_p3), 108   ;;  %860 = vmatprep.mubr.msk.f32.mxu1 (!%p215_p3), %vm1032_vm0, %v1029_v7  ;;  %998 = vset.pattern.permute.xlu0 (!%p215_p3), %v1033_v8  ;;  %vm410_vm4 = vcmask (!%p215_p3), 891904   ;;  %vm436_vm5 = vcmask (!%p215_p3), 883712   ;;  %vm462_vm6 = vcmask (!%p215_p3), 752640   ;;  %vm488_vm7 = vcmask (!%p215_p3), 744448  }
   0x9   : > { %s1028_s5 = smov (!%p215_p3), 109   ;;  %s1030_s6 = smov (!%p215_p3), 91   ;;  %vm514_vm8 = vcmask (!%p215_p3), 736256   ;;  %vm558_vm9 = vcmask (!%p215_p3), 588800  }
   0xa   : > { %s1031_s7 = smov (!%p215_p3), 92   ;;  %s1034_s8 = smov (!%p215_p3), 90  }
   0xe   : > { %s1157_s15 = smov (!%p267_p4, %s1013_s15), 1 }
   0xf   : > { %s828_s19 = sshll.u32 %s1157_s15, 5  ;;  %s891_s13 = smul.u32 24, %s1157_s15 }
  0x10   : > { %s274_s22 = scalar_lea.vmem %s1147_s0, %s828_s19  ;;  %s830_s23 = sadd.s32 24, %s828_s19 }
  0x11   : > { %v303_v1 = vld [vmem:[%s274_s22 + $0x8] sm:$0xff]  ;;  %v1085_v2 = vld [vmem:[%s274_s22 + $0x10] sm:$0xff]  ;;  %s289_s26 = scalar_lea.vmem %s1148_s1, %s830_s23  ;;  %v1090_v3 = vld [vmem:[%s274_s22] sm:$0xff]  ;;  %s300_s20 = scalar_lea.vmem %s1151_s4, %s891_s13 }
  0x12   : > { %v933_v4 = vpack.i.bf16 %v1085_v2, %v303_v1  ;;  %v308_v5 = vld [vmem:[%s289_s26] sm:$0xff] }
  0x13   : > { %v943_v6 = vpack.i.bf16 %v308_v5, %v1090_v3 }
  0x14   : > { %934 = vrot.lane.b32.xlu1 %v933_v4, %s1024_s27  ;;  %929 = vrot.lane.b32.xlu0 %v933_v4, %s1025_s28 }
  0x18   : > { %939 = vrot.lane.b32.xlu1 %v933_v4, %s1026_s29  ;;  %944 = vrot.lane.b32.xlu0 %v943_v6, %s1025_s28 }
  0x1c   : > { %959 = vrot.lane.b32.xlu1 %v943_v6, %s1026_s29  ;;  %949 = vrot.lane.b32.xlu0 %v943_v6, %s1024_s27 }
  0x20   : > { %964 = vrot.lane.b32.xlu1 %v933_v4, %s1027_s30  ;;  %954 = vrot.lane.b32.xlu0 %v933_v4, %s1028_s5 }
  0x24   : > { %974 = vrot.lane.b32.xlu1 %v943_v6, %s1027_s30  ;;  %969 = vrot.lane.b32.xlu0 %v943_v6, %s1028_s5 }
  0x28   : > { %984 = vrot.lane.b32.xlu1 %v933_v4, %s1030_s6  ;;  %979 = vrot.lane.b32.xlu0 %v933_v4, %s1031_s7 }
  0x2c   : > { %994 = vrot.lane.b32.xlu1 %v943_v6, %s1030_s6  ;;  %989 = vrot.lane.b32.xlu0 %v943_v6, %s1031_s7 }
  0x30   : > { %510 = vrot.lane.b32.xlu1 %v1085_v2, %s1034_s8  ;;  %508 = vrot.lane.b32.xlu0 %v303_v1, %s1034_s8 }
  0x34   : > { %512 = vrot.lane.b32.xlu1 %v308_v5, %s1034_s8  ;;  %506 = vrot.lane.b32.xlu0 %v1090_v3, %s1034_s8 }
  0x38   : > { %555 = vperm.xlu0 %998, %v552_v9  }
  0x86   : > { %v935_v10 = vpop.permute.xlu1 %934  ;;  %v930_v11 = vpop.permute.xlu0 %929 }
  0x87   : > { %v932_v12 = vunpack.i.h.bf16 %v930_v11  ;;  %v931_v13 = vunpack.i.l.bf16 %v930_v11  ;;  %v937_v14 = vunpack.i.h.bf16 %v935_v10  ;;  %v936_v15 = vunpack.i.l.bf16 %v935_v10 }
  0x89   : > { %v334_v16 = vsel %vm332_vm1, %v931_v13, %v932_v12  ;;  %v360_v26 = vsel %vm358_vm2, %v936_v15, %v937_v14 }
  0x8a   : > { %v940_v17 = vpop.permute.xlu1 %939  ;;  %v945_v18 = vpop.permute.xlu0 %944  ;;  %v863_v19 = vpack.c.bf16 %v334_v16, %v303_v1 }
  0x8b   : > { %v942_v20 = vunpack.i.h.bf16 %v940_v17  ;;  %v941_v21 = vunpack.i.l.bf16 %v940_v17  ;;  %v947_v22 = vunpack.i.h.bf16 %v945_v18  ;;  %v946_v23 = vunpack.i.l.bf16 %v945_v18 }
  0x8c   : > { %864 = vmatprep.subr.bf16.mxu0 %v863_v19 }
  0x8d   : > { %v333_v24 = vsel %vm332_vm1, %v946_v23, %v931_v13  ;;  %v335_v25 = vsel %vm332_vm1, %v932_v12, %v947_v22  ;;  %v386_v27 = vsel %vm384_vm3, %v941_v21, %v942_v20 }
  0x8e   : > { %v960_v28 = vpop.permute.xlu1 %959  ;;  %v950_v29 = vpop.permute.xlu0 %949  ;;  %v865_v30 = vpack.c.bf16 %v333_v24, %v1090_v3  ;;  %v880_v31 = vpack.c.bf16 %v335_v25, %v1085_v2  ;;  %v867_v32 = vpack.c.bf16 %v386_v27, %v360_v26  ;;  %v524_v27 = vld [vmem:[%s1149_s2] sm:$0xff] }
  0x8f   : > { %v962_v33 = vunpack.i.h.bf16 %v960_v28  ;;  %v961_v34 = vunpack.i.l.bf16 %v960_v28  ;;  %v952_v35 = vunpack.i.h.bf16 %v950_v29  ;;  %v951_v36 = vunpack.i.l.bf16 %v950_v29 }
  0x90   : > { %866 = vmatpush1.bf16.msra.mxu0 %v865_v30  ;;  %881 = vmatpush3.bf16.msra.mxu1 %v880_v31 }
  0x91   : > { %868 = vmatprep.subr.bf16.mxu0 %v867_v32  ;;  %882 = vmatprep.subr.bf16.mxu1 %v1023_v0  ;;  %v359_v37 = vsel %vm358_vm2, %v951_v36, %v936_v15  ;;  %v385_v38 = vsel %vm384_vm3, %v961_v34, %v941_v21  ;;  %v361_v39 = vsel %vm358_vm2, %v937_v14, %v952_v35 }
  0x92   : > { %v965_v40 = vpop.permute.xlu1 %964  ;;  %v955_v41 = vpop.permute.xlu0 %954  ;;  %v869_v42 = vpack.c.bf16 %v385_v38, %v359_v37  ;;  %v387_v43 = vsel %vm384_vm3, %v942_v20, %v962_v33 }
  0x93   : > { %v967_v44 = vunpack.i.h.bf16 %v965_v40  ;;  %v966_v45 = vunpack.i.l.bf16 %v965_v40  ;;  %v957_v46 = vunpack.i.h.bf16 %v955_v41  ;;  %v956_v47 = vunpack.i.l.bf16 %v955_v41 }
  0x94   : > { %870 = vmatpush1.bf16.msra.mxu0 %v869_v42  ;;  %v883_v48 = vpack.c.bf16 %v387_v43, %v361_v39 }
  0x95   : > { %v412_v49 = vsel %vm410_vm4, %v956_v47, %v957_v46  ;;  %v438_v50 = vsel %vm436_vm5, %v966_v45, %v967_v44 }
  0x96   : > { %884 = vmatpush3.bf16.msra.mxu1 %v883_v48  ;;  %v975_v51 = vpop.permute.xlu1 %974  ;;  %v970_v52 = vpop.permute.xlu0 %969  ;;  %v871_v53 = vpack.c.bf16 %v438_v50, %v412_v49 }
  0x97   : > { %v977_v54 = vunpack.i.h.bf16 %v975_v51  ;;  %v976_v55 = vunpack.i.l.bf16 %v975_v51  ;;  %v972_v56 = vunpack.i.h.bf16 %v970_v52  ;;  %v971_v57 = vunpack.i.l.bf16 %v970_v52  ;;  %885 = vmatprep.subr.bf16.mxu1 %v1023_v0 }
  0x98   : > { %872 = vmatprep.subr.bf16.mxu0 %v871_v53 }
  0x99   : > { %v411_v58 = vsel %vm410_vm4, %v971_v57, %v956_v47  ;;  %v437_v59 = vsel %vm436_vm5, %v976_v55, %v966_v45  ;;  %v413_v60 = vsel %vm410_vm4, %v957_v46, %v972_v56  ;;  %v439_v61 = vsel %vm436_vm5, %v967_v44, %v977_v54 }
  0x9a   : > { %v985_v62 = vpop.permute.xlu1 %984  ;;  %v980_v63 = vpop.permute.xlu0 %979  ;;  %v873_v1 = vpack.c.bf16 %v437_v59, %v411_v58  ;;  %v886_v2 = vpack.c.bf16 %v439_v61, %v413_v60 }
  0x9b   : > { %v987_v3 = vunpack.i.h.bf16 %v985_v62  ;;  %v986_v4 = vunpack.i.l.bf16 %v985_v62  ;;  %v982_v5 = vunpack.i.h.bf16 %v980_v63  ;;  %v981_v6 = vunpack.i.l.bf16 %v980_v63 }
  0x9c   : > { %874 = vmatpush1.bf16.msra.mxu0 %v873_v1  ;;  %887 = vmatpush3.bf16.msra.mxu1 %v886_v2 }
  0x9d   : > { %v464_v8 = vsel %vm462_vm6, %v981_v6, %v982_v5  ;;  %v490_v9 = vsel %vm488_vm7, %v986_v4, %v987_v3  ;;  %888 = vmatprep.subr.bf16.mxu1 %v1023_v0 }
  0x9e   : > { %v995_v10 = vpop.permute.xlu1 %994  ;;  %v990_v11 = vpop.permute.xlu0 %989  ;;  %v875_v12 = vpack.c.bf16 %v490_v9, %v464_v8 }
  0x9f   : > { %v997_v13 = vunpack.i.h.bf16 %v995_v10  ;;  %v996_v14 = vunpack.i.l.bf16 %v995_v10  ;;  %v992_v15 = vunpack.i.h.bf16 %v990_v11  ;;  %v991_v16 = vunpack.i.l.bf16 %v990_v11 }
  0xa0   : > { %876 = vmatprep.subr.bf16.mxu0 %v875_v12 }
  0xa1   : > { %v463_v17 = vsel %vm462_vm6, %v991_v16, %v981_v6  ;;  %v489_v18 = vsel %vm488_vm7, %v996_v14, %v986_v4  ;;  %v465_v19 = vsel %vm462_vm6, %v982_v5, %v992_v15  ;;  %v491_v20 = vsel %vm488_vm7, %v987_v3, %v997_v13 }
  0xa2   : > { %v511_v21 = vpop.permute.xlu1 %510  ;;  %v509_v22 = vpop.permute.xlu0 %508  ;;  %v877_v0 = vpack.c.bf16 %v489_v18, %v463_v17  ;;  %v889_v23 = vpack.c.bf16 %v491_v20, %v465_v19 }
  0xa3   : > { %v516_v24 = vsel %vm514_vm8, %v509_v22, %v511_v21 }
  0xa4   : > { %878 = vmatpush1.bf16.msra.mxu0 %v877_v0  ;;  %890 = vmatpush3.bf16.msra.mxu1 %v889_v23 }
  0xa5   : > { %578 = vmatprep.subr.mxu0 %v516_v24  ;;  %858 = vmatprep.subr.mxu1 %v1029_v7 }
  0xa6   : > { %v513_v25 = vpop.permute.xlu1 %512  ;;  %v507_v26 = vpop.permute.xlu0 %506 }
  0xa7   : > { %v515_v28 = vsel %vm514_vm8, %v507_v26, %v509_v22  ;;  %v517_v29 = vsel %vm514_vm8, %v511_v21, %v513_v25 }
  0xa8   : > { %579 = vmatpush1.msra.mxu0 %v515_v28  ;;  %859 = vmatpush3.msra.mxu1 %v517_v29 }
  0xa9   : > { %824 = vmatmul.mubr.msk.f32.vlgmr.msra.gmra.mrb[0].mxu0 %vm558_vm9, %v524_v27  ;;  %861 = vmatmul.mubr.msk.f32.vlgmr.msra.gmra.mrb[0].mxu1 %vm558_vm9, %v524_v27 }
  0xb7   : > { %v556_v30 = vpop.permute.xlu0 %555 }
 0x17c   : > { %v628_v31 = vpop.f32.mrb[0].mxu0  ;;  %v699_v32 = vpop.f32.mrb[0].mxu1 }
 0x17d   : > { %v629_v7 = vadd.f32 %v628_v31, %v556_v30  ;;  %v700_v33 = vadd.f32 %v699_v32, %v556_v30  ;;  %v630_v34 = vpop.f32.mrb[1].mxu0  ;;  %v862_v35 = vpop.f32.mrb[1].mxu1 }
 0x17e   : > { %v631_v36 = vadd.f32 %v630_v34, %v556_v30 }
 0x17f   : > { %v703_v37 = vmax.f32 %v629_v7, 0.0  ;;  %v705_v38 = vmax.f32 %v700_v33, 0.0 }
 0x180   : > { %v704_v39 = vmax.f32 %v631_v36, 0.0 }
 0x181   : > { %706 = vst [vmem:[%s300_s20] sm:$0xff] %v703_v37  ;;  %708 = vst [vmem:[%s300_s20 + $0x10] sm:$0xff] %v705_v38 }
 0x182   : > { %707 = vst [vmem:[%s300_s20 + $0x8] sm:$0xff] %v704_v39 }
 0x183 PF: > { %s14_s17 = sadd.s32 1, %s1021_s17   ;;  %s1152_s15 = smov %s1017_s16 }
 0x184   : > { %p11_p5 = scmp.ge.s32.totalorder %s14_s17, 4   ;;  %s1153_s16 = smov %s1155_s18 }
 0x186   :  { %13 = sbr.rel (!%p11_p5) target bundleno = 2 (0x2), region = 69 }

// kernel: srresnet_forward.26
= control target key start
LH: loop header
LB: loop body
LE: loop exit
PB: predicated region body
PF: predicated region fallthrough
CT: control target
= control target key end

     0   :  { %s1417_s15 = smov 0   ;;  %s1419_s16 = smov 0   ;;  %s1564_s0 = inlined_call_operand.vmem [shape: f32[2,32,256], index: 0, kind: input, shape index: {}, may-alias: {0,1}]   ;;  %s1565_s1 = inlined_call_operand.vmem [shape: f32[2,32,256], index: 1, kind: input, shape index: {}, may-alias: {0,1}]   ;;  %s1566_s2 = inlined_call_operand.vmem [shape: f32[8,288], index: 2, kind: input, shape index: {}]   ;;  %s1567_s3 = inlined_call_operand.vmem [shape: f32[8,1], index: 3, kind: input, shape index: {}]   ;;  %s1568_s4 = inlined_call_operand.vmem [shape: f32[2,8,128], index: 4, kind: output, shape index: {}]  }
   0x1   :  { %s1421_s17 = smov 0   ;;  %s1423_s18 = smov 0  }
   0x2   :  { %s1425_s19 = smov 0  }
   0x3 LB: > { %s26_s20 = sadd.s32 1, %s1374_s18  ;;  %p42_p1 = scmp.ne.s32.totalorder %s1366_s16, %s1362_s15  ;;  %s1378_s19 = sphi %s1425_s19, %s14_s19   ;;  %s1374_s18 = sphi %s1423_s18, %s1573_s18   ;;  %s1370_s17 = sphi %s1421_s17, %s1572_s17   ;;  %s1366_s16 = sphi %s1419_s16, %s1571_s16   ;;  %s1362_s15 = sphi %s1417_s15, %s1570_s15  }
   0x4   : > { %p28_p0 = scmp.ge.s32.totalorder %s26_s20, 2  ;;  %p43_p2 = scmp.eq.s32.totalorder %s1378_s19, 0 }
   0x5   : > { %s35_s23 = sadd.s32 1, %s1366_s16  ;;  %p1018_p5 = scmp.ge.s32.totalorder %s1378_s19, 2 }
   0x6   : > { %s1575_s20 = smov (%p28_p0, %s26_s20), 0  ;;  %p1448_p3 = por %p43_p2, %p42_p1 }
   0x7   : > { %s30_s22 = ssub.s32 %s1374_s18, %s1575_s20  ;;  %174 = sbr.rel (%p1018_p5) target bundleno = 28 (0x1c), region = 24 }
   0x8   : > { %p33_p4 = scmp.eq.s32.totalorder %s30_s22, 0 }
   0xa   : > { %s1456_s24 = scalar_select %p33_p4, %s1366_s16, %s35_s23  }
   0xe   : > { %177 = sbr.rel (!%p1448_p3) target bundleno = 21 (0x15), region = 28  ;;  %s179_s25 = sand.u32 (%p1448_p3), 1, %s1366_s16  }
   0xf   : > { %s1036_s26 = sshll.u32 (%p1448_p3), %s1374_s18, 6  ;;  %s1019_s27 = sshll.u32 (%p1448_p3), %s179_s25, 5 }
  0x10   : > { %s185_s30 = scalar_lea.vmem (%p1448_p3), %s1564_s0, %s1036_s26  ;;  %s181_s5 = scalar_lea.vmem (%p1448_p3), [#allocation4], %s1019_s27 }
  0x11   : > { %v219_v0 = vld [vmem:[%s185_s30] sm:$0xff] (%p1448_p3)  ;;  %v221_v1 = vld [vmem:[%s185_s30 + $0x10] sm:$0xff] (%p1448_p3) }
  0x12   : > { %v223_v2 = vld [vmem:[%s185_s30 + $0x20] sm:$0xff] (%p1448_p3)  ;;  %220 = vst [vmem:[%s181_s5] sm:$0xff] (%p1448_p3), %v219_v0  ;;  %222 = vst [vmem:[%s181_s5 + $0x8] sm:$0xff] (%p1448_p3), %v221_v1  ;;  %v225_v3 = vld [vmem:[%s185_s30 + $0x30] sm:$0xff] (%p1448_p3) }
  0x13   : > { %224 = vst [vmem:[%s181_s5 + $0x10] sm:$0xff] (%p1448_p3), %v223_v2  ;;  %226 = vst [vmem:[%s181_s5 + $0x18] sm:$0xff] (%p1448_p3), %v225_v3 }
  0x15 PF: > { %232 = sbr.rel (!%p1448_p3) target bundleno = 28 (0x1c), region = 66  ;;  %s234_s6 = sand.u32 (%p1448_p3), 1, %s1366_s16  }
  0x16   : > { %s1037_s7 = sshll.u32 (%p1448_p3), %s1374_s18, 6  ;;  %s1022_s8 = sshll.u32 (%p1448_p3), %s234_s6, 5 }
  0x17   : > { %s951_s11 = scalar_lea.vmem (%p1448_p3), %s1565_s1, %s1037_s7  ;;  %s236_s12 = scalar_lea.vmem (%p1448_p3), [#allocation5], %s1022_s8 }
  0x18   : > { %v1025_v4 = vld [vmem:[%s951_s11 + $0x8] sm:$0xff] (%p1448_p3)  ;;  %v1026_v5 = vld [vmem:[%s951_s11 + $0x18] sm:$0xff] (%p1448_p3) }
  0x19   : > { %v1027_v6 = vld [vmem:[%s951_s11 + $0x28] sm:$0xff] (%p1448_p3)  ;;  %276 = vst [vmem:[%s236_s12] sm:$0xff] (%p1448_p3), %v1025_v4  ;;  %278 = vst [vmem:[%s236_s12 + $0x8] sm:$0xff] (%p1448_p3), %v1026_v5  ;;  %v1028_v7 = vld [vmem:[%s951_s11 + $0x38] sm:$0xff] (%p1448_p3) }
  0x1a   : > { %280 = vst [vmem:[%s236_s12 + $0x10] sm:$0xff] (%p1448_p3), %v1027_v6  ;;  %282 = vst [vmem:[%s236_s12 + $0x18] sm:$0xff] (%p1448_p3), %v1028_v7 }
  0x1c PF: > { %p1029_p6 = scmp.ge.s32.totalorder %s1378_s19, 1  ;;  %p287_p7 = scmp.lt.s32.totalorder %s1378_s19, 3 }
  0x1e   : > { %p288_p8 = pnand %p1029_p6, %p287_p7 }
  0x1f   : > { %s294_s13 = sand.u32 (!%p288_p8), 1, %s1362_s15   ;;  %s1380_s15 = smov (!%p288_p8), 117   ;;  %v1387_v22 = vmov (!%p288_p8), 0.0|0.0   ;;  %v725_v23 = vld [vmem:[%s1566_s2 + $0x8] sm:$0xff] (!%p288_p8)  ;;  %vm1388_vm0 = vmmov (!%p288_p8), 0   ;;  %v1389_v24 = vmov (!%p288_p8), 0.0  }
  0x20   : > { %291 = sbr.rel (%p288_p8) target bundleno = 438 (0x1b6), region = 104  ;;  %s1030_s14 = sshll.u32 (!%p288_p8), %s294_s13, 5  ;;  %1121 = vmatprep.subr.bf16.mxu1 (!%p288_p8), %v1387_v22  ;;  %837 = vmatprep.mubr.f32.mxu0 (!%p288_p8), %v725_v23  ;;  %v1391_v25 = vmov (!%p288_p8), 0   ;;  %v763_v26 = vld [vmem:[%s1567_s3] sm:$0xff] (!%p288_p8)  ;;  %vm531_vm1 = vcmask (!%p288_p8), 957440   ;;  %vm576_vm2 = vcmask (!%p288_p8), 949248  }
  0x21   : > { %s296_s21 = scalar_lea.vmem (!%p288_p8), [#allocation4], %s1030_s14  ;;  %s303_s22 = scalar_lea.vmem (!%p288_p8), [#allocation5], %s1030_s14  ;;  %1086 = vmatprep.mubr.msk.f32.mxu1 (!%p288_p8), %vm1388_vm0, %v1389_v24  ;;  %1339 = vset.pattern.permute.xlu0 (!%p288_p8), %v1391_v25  ;;  %vm396_vm3 = vcmask (!%p288_p8), 1039360   ;;  %vm621_vm4 = vcmask (!%p288_p8), 883712   ;;  %vm441_vm5 = vcmask (!%p288_p8), 1031168   ;;  %vm666_vm6 = vcmask (!%p288_p8), 875520  }
  0x22   : > { %v1476_v8 = vld [vmem:[%s296_s21 + $0x10] sm:$0xff] (!%p288_p8)  ;;  %v1478_v10 = vld [vmem:[%s296_s21] sm:$0xff] (!%p288_p8)  ;;  %v1481_v13 = vld [vmem:[%s296_s21 + $0x18] sm:$0xff] (!%p288_p8)  ;;  %s1381_s23 = smov (!%p288_p8), 116   ;;  %s1382_s25 = smov (!%p288_p8), 127   ;;  %vm486_vm7 = vcmask (!%p288_p8), 965632  }
  0x23   : > { %v350_v9 = vld [vmem:[%s303_s22 + $0x10] sm:$0xff] (!%p288_p8)  ;;  %v348_v12 = vld [vmem:[%s303_s22] sm:$0xff] (!%p288_p8)  ;;  %v351_v14 = vld [vmem:[%s303_s22 + $0x18] sm:$0xff] (!%p288_p8)  ;;  %v1095_v21 = vpack.c.bf16 (!%p288_p8), %v1481_v13, %v1476_v8  ;;  %s1383_s26 = smov (!%p288_p8), 108   ;;  %s1384_s27 = smov (!%p288_p8), 126   ;;  %vm711_vm8 = vcmask (!%p288_p8), 867328  }
  0x24   : > { %v1189_v11 = vpack.i.bf16 (!%p288_p8), %v350_v9, %v1476_v8  ;;  %v1179_v15 = vpack.i.bf16 (!%p288_p8), %v348_v12, %v1478_v10  ;;  %v1484_v16 = vld [vmem:[%s296_s21 + $0x8] sm:$0xff] (!%p288_p8)  ;;  %v1194_v18 = vpack.i.bf16 (!%p288_p8), %v351_v14, %v1481_v13  ;;  %s1385_s28 = smov (!%p288_p8), 107   ;;  %s1386_s29 = smov (!%p288_p8), 118   ;;  %vm769_vm9 = vcmask (!%p288_p8), 261120  }
  0x25   : > { %v349_v17 = vld [vmem:[%s303_s22 + $0x8] sm:$0xff] (!%p288_p8)  ;;  %v1091_v20 = vpack.c.bf16 (!%p288_p8), %v1484_v16, %v1478_v10  ;;  %s1390_s6 = smov (!%p288_p8), 106   ;;  %p333_p9 = scmp.lt.s32.totalorder (!%p288_p8), %s1370_s17, 1 }
  0x26   : > { %1190 = vrot.lane.b32.xlu1 (!%p288_p8), %v1189_v11, %s1380_s15  ;;  %1180 = vrot.lane.b32.xlu0 (!%p288_p8), %v1179_v15, %s1380_s15  ;;  %v1184_v19 = vpack.i.bf16 (!%p288_p8), %v349_v17, %v1484_v16 }
  0x27   : > { %s1577_s17 = smov (!%p333_p9, %s1370_s17), 1 }
  0x28   : > { %s1032_s13 = sshll.u32 %s1577_s17, 3 }
  0x29   : > { %s339_s22 = scalar_lea.vmem %s1568_s4, %s1032_s13 }
  0x2a   : > { %1195 = vrot.lane.b32.xlu1 %v1194_v18, %s1380_s15  ;;  %1185 = vrot.lane.b32.xlu0 %v1184_v19, %s1380_s15 }
  0x2e   : > { %1205 = vrot.lane.b32.xlu1 %v1184_v19, %s1381_s23  ;;  %1200 = vrot.lane.b32.xlu0 %v1179_v15, %s1381_s23 }
  0x32   : > { %1215 = vrot.lane.b32.xlu1 %v1184_v19, %s1382_s25  ;;  %1210 = vrot.lane.b32.xlu0 %v1179_v15, %s1382_s25 }
  0x36   : > { %1225 = vrot.lane.b32.xlu1 %v1194_v18, %s1381_s23  ;;  %1220 = vrot.lane.b32.xlu0 %v1189_v11, %s1381_s23 }
  0x3a   : > { %1235 = vrot.lane.b32.xlu1 %v1194_v18, %s1382_s25  ;;  %1230 = vrot.lane.b32.xlu0 %v1189_v11, %s1382_s25 }
  0x3e   : > { %1245 = vrot.lane.b32.xlu1 %v1184_v19, %s1383_s26  ;;  %1240 = vrot.lane.b32.xlu0 %v1179_v15, %s1383_s26 }
  0x42   : > { %1255 = vrot.lane.b32.xlu1 %v1184_v19, %s1384_s27  ;;  %1250 = vrot.lane.b32.xlu0 %v1179_v15, %s1384_s27 }
  0x46   : > { %1265 = vrot.lane.b32.xlu1 %v1194_v18, %s1383_s26  ;;  %1260 = vrot.lane.b32.xlu0 %v1189_v11, %s1383_s26 }
  0x4a   : > { %1275 = vrot.lane.b32.xlu1 %v1194_v18, %s1384_s27  ;;  %1270 = vrot.lane.b32.xlu0 %v1189_v11, %s1384_s27 }
  0x4e   : > { %1285 = vrot.lane.b32.xlu1 %v1184_v19, %s1385_s28  ;;  %1280 = vrot.lane.b32.xlu0 %v1179_v15, %s1385_s28 }
  0x52   : > { %1295 = vrot.lane.b32.xlu1 %v1184_v19, %s1386_s29  ;;  %1290 = vrot.lane.b32.xlu0 %v1179_v15, %s1386_s29 }
  0x56   : > { %1305 = vrot.lane.b32.xlu1 %v1194_v18, %s1385_s28  ;;  %1300 = vrot.lane.b32.xlu0 %v1189_v11, %s1385_s28 }
  0x5a   : > { %1315 = vrot.lane.b32.xlu1 %v1194_v18, %s1386_s29  ;;  %1310 = vrot.lane.b32.xlu0 %v1189_v11, %s1386_s29 }
  0x5e   : > { %1325 = vrot.lane.b32.xlu1 %v1184_v19, %s1390_s6  ;;  %1320 = vrot.lane.b32.xlu0 %v1179_v15, %s1390_s6 }
  0x62   : > { %1335 = vrot.lane.b32.xlu1 %v1194_v18, %s1390_s6  ;;  %1330 = vrot.lane.b32.xlu0 %v1189_v11, %s1390_s6 }
  0x66   : > { %766 = vperm.xlu0 %1339, %v763_v26  }
  0x98   : > { %v1191_v27 = vpop.permute.xlu1 %1190  ;;  %v1181_v28 = vpop.permute.xlu0 %1180 }
  0x99   : > { %v1183_v29 = vunpack.i.h.bf16 %v1181_v28  ;;  %v1182_v30 = vunpack.i.l.bf16 %v1181_v28  ;;  %v1193_v35 = vunpack.i.h.bf16 %v1191_v27  ;;  %v1192_v36 = vunpack.i.l.bf16 %v1191_v27 }
  0x9b   : > { %v532_v40 = vsel %vm531_vm1, %v1182_v30, %v1183_v29  ;;  %v534_v49 = vsel %vm531_vm1, %v1192_v36, %v1193_v35 }
  0x9c   : > { %v1196_v31 = vpop.permute.xlu1 %1195  ;;  %v1186_v34 = vpop.permute.xlu0 %1185 }
  0x9d   : > { %v1198_v32 = vunpack.i.h.bf16 %v1196_v31  ;;  %v1197_v33 = vunpack.i.l.bf16 %v1196_v31  ;;  %v1188_v37 = vunpack.i.h.bf16 %v1186_v34  ;;  %v1187_v38 = vunpack.i.l.bf16 %v1186_v34 }
  0x9f   : > { %v533_v41 = vsel %vm531_vm1, %v1187_v38, %v1188_v37  ;;  %v535_v42 = vsel %vm531_vm1, %v1197_v33, %v1198_v32 }
  0xa0   : > { %v1206_v39 = vpop.permute.xlu1 %1205  ;;  %v1201_v45 = vpop.permute.xlu0 %1200  ;;  %v1089_v46 = vpack.c.bf16 %v533_v41, %v532_v40  ;;  %v1093_v50 = vpack.c.bf16 %v535_v42, %v534_v49 }
  0xa1   : > { %v1208_v43 = vunpack.i.h.bf16 %v1206_v39  ;;  %v1207_v44 = vunpack.i.l.bf16 %v1206_v39  ;;  %v1203_v47 = vunpack.i.h.bf16 %v1201_v45  ;;  %v1202_v48 = vunpack.i.l.bf16 %v1201_v45 }
  0xa2   : > { %1090 = vmatprep.subr.bf16.mxu0 %v1089_v46 }
  0xa3   : > { %1092 = vmatpush3.bf16.msra.mxu0 %v1091_v20  ;;  %v577_v52 = vsel %vm576_vm2, %v1202_v48, %v1203_v47  ;;  %v578_v53 = vsel %vm576_vm2, %v1207_v44, %v1208_v43 }
  0xa4   : > { %v1216_v51 = vpop.permute.xlu1 %1215  ;;  %v1211_v56 = vpop.permute.xlu0 %1210  ;;  %1094 = vmatprep.subr.bf16.mxu0 %v1093_v50  ;;  %v1097_v59 = vpack.c.bf16 %v578_v53, %v577_v52 }
  0xa5   : > { %v1218_v54 = vunpack.i.h.bf16 %v1216_v51  ;;  %v1217_v55 = vunpack.i.l.bf16 %v1216_v51  ;;  %v1213_v57 = vunpack.i.h.bf16 %v1211_v56  ;;  %v1212_v58 = vunpack.i.l.bf16 %v1211_v56 }
  0xa7   : > { %v398_v60 = vsel %vm396_vm3, %v1217_v55, %v1218_v54  ;;  %1096 = vmatpush3.bf16.msra.mxu0 %v1095_v21  ;;  %v397_v62 = vsel %vm396_vm3, %v1212_v58, %v1213_v57 }
  0xa8   : > { %v1226_v61 = vpop.permute.xlu1 %1225  ;;  %v1221_v1 = vpop.permute.xlu0 %1220  ;;  %1098 = vmatprep.subr.bf16.mxu0 %v1097_v59  ;;  %v1099_v2 = vpack.c.bf16 %v398_v60, %v397_v62 }
  0xa9   : > { %v1228_v63 = vunpack.i.h.bf16 %v1226_v61  ;;  %v1227_v0 = vunpack.i.l.bf16 %v1226_v61  ;;  %v1223_v3 = vunpack.i.h.bf16 %v1221_v1  ;;  %v1222_v4 = vunpack.i.l.bf16 %v1221_v1 }
  0xab   : > { %v580_v5 = vsel %vm576_vm2, %v1227_v0, %v1228_v63  ;;  %1100 = vmatpush3.bf16.msra.mxu0 %v1099_v2  ;;  %v579_v7 = vsel %vm576_vm2, %v1222_v4, %v1223_v3 }
  0xac   : > { %v1236_v6 = vpop.permute.xlu1 %1235  ;;  %v1231_v8 = vpop.permute.xlu0 %1230  ;;  %v1101_v11 = vpack.c.bf16 %v580_v5, %v579_v7 }
  0xad   : > { %v1238_v9 = vunpack.i.h.bf16 %v1236_v6  ;;  %v1237_v10 = vunpack.i.l.bf16 %v1236_v6  ;;  %v1233_v12 = vunpack.i.h.bf16 %v1231_v8  ;;  %v1232_v13 = vunpack.i.l.bf16 %v1231_v8 }
  0xae   : > { %1102 = vmatprep.subr.bf16.mxu0 %v1101_v11 }
  0xaf   : > { %v400_v14 = vsel %vm396_vm3, %v1237_v10, %v1238_v9  ;;  %v399_v16 = vsel %vm396_vm3, %v1232_v13, %v1233_v12 }
  0xb0   : > { %v1246_v15 = vpop.permute.xlu1 %1245  ;;  %v1241_v19 = vpop.permute.xlu0 %1240  ;;  %v1103_v20 = vpack.c.bf16 %v400_v14, %v399_v16 }
  0xb1   : > { %v1248_v17 = vunpack.i.h.bf16 %v1246_v15  ;;  %v1247_v18 = vunpack.i.l.bf16 %v1246_v15  ;;  %v1243_v21 = vunpack.i.h.bf16 %v1241_v19  ;;  %v1242_v23 = vunpack.i.l.bf16 %v1241_v19 }
  0xb2   : > { %1104 = vmatpush3.bf16.msra.mxu0 %v1103_v20 }
  0xb3   : > { %v623_v24 = vsel %vm621_vm4, %v1247_v18, %v1248_v17  ;;  %v622_v26 = vsel %vm621_vm4, %v1242_v23, %v1243_v21 }
  0xb4   : > { %v1256_v25 = vpop.permute.xlu1 %1255  ;;  %v1251_v29 = vpop.permute.xlu0 %1250  ;;  %v1105_v30 = vpack.c.bf16 %v623_v24, %v622_v26 }
  0xb5   : > { %v1258_v27 = vunpack.i.h.bf16 %v1256_v25  ;;  %v1257_v28 = vunpack.i.l.bf16 %v1256_v25  ;;  %v1253_v31 = vunpack.i.h.bf16 %v1251_v29  ;;  %v1252_v32 = vunpack.i.l.bf16 %v1251_v29 }
  0xb6   : > { %1106 = vmatprep.subr.bf16.mxu0 %v1105_v30 }
  0xb7   : > { %v443_v33 = vsel %vm441_vm5, %v1257_v28, %v1258_v27  ;;  %v442_v35 = vsel %vm441_vm5, %v1252_v32, %v1253_v31 }
  0xb8   : > { %v1266_v34 = vpop.permute.xlu1 %1265  ;;  %v1261_v38 = vpop.permute.xlu0 %1260  ;;  %v1107_v39 = vpack.c.bf16 %v443_v33, %v442_v35 }
  0xb9   : > { %v1268_v36 = vunpack.i.h.bf16 %v1266_v34  ;;  %v1267_v37 = vunpack.i.l.bf16 %v1266_v34  ;;  %v1263_v40 = vunpack.i.h.bf16 %v1261_v38  ;;  %v1262_v41 = vunpack.i.l.bf16 %v1261_v38  ;;  %v724_v34 = vld [vmem:[%s1566_s2] sm:$0xff] }
  0xba   : > { %1108 = vmatpush3.bf16.msra.mxu0 %v1107_v39 }
  0xbb   : > { %v625_v42 = vsel %vm621_vm4, %v1267_v37, %v1268_v36  ;;  %v624_v44 = vsel %vm621_vm4, %v1262_v41, %v1263_v40 }
  0xbc   : > { %v1276_v43 = vpop.permute.xlu1 %1275  ;;  %v1271_v47 = vpop.permute.xlu0 %1270  ;;  %v1109_v48 = vpack.c.bf16 %v625_v42, %v624_v44 }
  0xbd   : > { %v1278_v45 = vunpack.i.h.bf16 %v1276_v43  ;;  %v1277_v46 = vunpack.i.l.bf16 %v1276_v43  ;;  %v1273_v49 = vunpack.i.h.bf16 %v1271_v47  ;;  %v1272_v50 = vunpack.i.l.bf16 %v1271_v47 }
  0xbe   : > { %1110 = vmatprep.subr.bf16.mxu0 %v1109_v48 }
  0xbf   : > { %v445_v51 = vsel %vm441_vm5, %v1277_v46, %v1278_v45  ;;  %v444_v53 = vsel %vm441_vm5, %v1272_v50, %v1273_v49  ;;  %v726_v46 = vld [vmem:[%s1566_s2 + $0x10] sm:$0xff] }
  0xc0   : > { %v1286_v52 = vpop.permute.xlu1 %1285  ;;  %v1281_v56 = vpop.permute.xlu0 %1280  ;;  %v1111_v57 = vpack.c.bf16 %v445_v51, %v444_v53 }
  0xc1   : > { %v1288_v54 = vunpack.i.h.bf16 %v1286_v52  ;;  %v1287_v55 = vunpack.i.l.bf16 %v1286_v52  ;;  %v1283_v58 = vunpack.i.h.bf16 %v1281_v56  ;;  %v1282_v59 = vunpack.i.l.bf16 %v1281_v56 }
  0xc2   : > { %1112 = vmatpush3.bf16.msra.mxu0 %v1111_v57 }
  0xc3   : > { %v668_v60 = vsel %vm666_vm6, %v1287_v55, %v1288_v54  ;;  %v667_v62 = vsel %vm666_vm6, %v1282_v59, %v1283_v58 }
  0xc4   : > { %v1296_v61 = vpop.permute.xlu1 %1295  ;;  %v1291_v1 = vpop.permute.xlu0 %1290  ;;  %v1113_v2 = vpack.c.bf16 %v668_v60, %v667_v62 }
  0xc5   : > { %v1298_v63 = vunpack.i.h.bf16 %v1296_v61  ;;  %v1297_v0 = vunpack.i.l.bf16 %v1296_v61  ;;  %v1293_v3 = vunpack.i.h.bf16 %v1291_v1  ;;  %v1292_v4 = vunpack.i.l.bf16 %v1291_v1 }
  0xc6   : > { %1114 = vmatprep.subr.bf16.mxu0 %v1113_v2 }
  0xc7   : > { %v488_v5 = vsel %vm486_vm7, %v1297_v0, %v1298_v63  ;;  %v487_v7 = vsel %vm486_vm7, %v1292_v4, %v1293_v3 }
  0xc8   : > { %v1306_v6 = vpop.permute.xlu1 %1305  ;;  %v1301_v8 = vpop.permute.xlu0 %1300  ;;  %v1115_v11 = vpack.c.bf16 %v488_v5, %v487_v7 }
  0xc9   : > { %v1308_v9 = vunpack.i.h.bf16 %v1306_v6  ;;  %v1307_v10 = vunpack.i.l.bf16 %v1306_v6  ;;  %v1303_v12 = vunpack.i.h.bf16 %v1301_v8  ;;  %v1302_v13 = vunpack.i.l.bf16 %v1301_v8 }
  0xca   : > { %1116 = vmatpush3.bf16.msra.mxu0 %v1115_v11 }
  0xcb   : > { %v670_v14 = vsel %vm666_vm6, %v1307_v10, %v1308_v9  ;;  %v669_v16 = vsel %vm666_vm6, %v1302_v13, %v1303_v12 }
  0xcc   : > { %v1316_v15 = vpop.permute.xlu1 %1315  ;;  %v1311_v19 = vpop.permute.xlu0 %1310  ;;  %v1117_v20 = vpack.c.bf16 %v670_v14, %v669_v16 }
  0xcd   : > { %v1318_v17 = vunpack.i.h.bf16 %v1316_v15  ;;  %v1317_v18 = vunpack.i.l.bf16 %v1316_v15  ;;  %v1313_v21 = vunpack.i.h.bf16 %v1311_v19  ;;  %v1312_v23 = vunpack.i.l.bf16 %v1311_v19 }
  0xce   : > { %1118 = vmatprep.subr.bf16.mxu0 %v1117_v20 }
  0xcf   : > { %v490_v24 = vsel %vm486_vm7, %v1317_v18, %v1318_v17  ;;  %v489_v26 = vsel %vm486_vm7, %v1312_v23, %v1313_v21 }
  0xd0   : > { %v1326_v25 = vpop.permute.xlu1 %1325  ;;  %v1321_v29 = vpop.permute.xlu0 %1320  ;;  %v1119_v30 = vpack.c.bf16 %v490_v24, %v489_v26 }
  0xd1   : > { %v1328_v27 = vunpack.i.h.bf16 %v1326_v25  ;;  %v1327_v28 = vunpack.i.l.bf16 %v1326_v25  ;;  %v1323_v31 = vunpack.i.h.bf16 %v1321_v29  ;;  %v1322_v32 = vunpack.i.l.bf16 %v1321_v29 }
  0xd2   : > { %1120 = vmatpush3.bf16.msra.mxu0 %v1119_v30 }
  0xd3   : > { %v713_v33 = vsel %vm711_vm8, %v1327_v28, %v1328_v27  ;;  %v712_v36 = vsel %vm711_vm8, %v1322_v32, %v1323_v31 }
  0xd4   : > { %v1336_v35 = vpop.permute.xlu1 %1335  ;;  %v1331_v39 = vpop.permute.xlu0 %1330  ;;  %v1122_v40 = vpack.c.bf16 %v713_v33, %v712_v36 }
  0xd5   : > { %v1338_v37 = vunpack.i.h.bf16 %v1336_v35  ;;  %v1337_v38 = vunpack.i.l.bf16 %v1336_v35  ;;  %v1333_v41 = vunpack.i.h.bf16 %v1331_v39  ;;  %v1332_v42 = vunpack.i.l.bf16 %v1331_v39  ;;  %838 = vmatmul.mubr.f32.vlgmr.msra.gmra.mrb[0].mxu0 %v724_v34 }
  0xd6   : > { %1123 = vmatpush3.bf16.msra.mxu1 %v1122_v40 }
  0xd7   : > { %v715_v43 = vsel %vm711_vm8, %v1337_v38, %v1338_v37  ;;  %1124 = vmatprep.subr.bf16.mxu1 %v1387_v22  ;;  %v714_v44 = vsel %vm711_vm8, %v1332_v42, %v1333_v41 }
  0xd8   : > { %v1125_v45 = vpack.c.bf16 %v715_v43, %v714_v44 }
  0xda   : > { %1126 = vmatpush3.bf16.msra.mxu1 %v1125_v45 }
  0xdd   : > { %1087 = vmatmul.mubr.msk.f32.vlgmr.msra.gmra.mrb[0].mxu1 %vm769_vm9, %v726_v46 }
  0xe5   : > { %v767_v50 = vpop.permute.xlu0 %766 }
 0x1a8   : > { %v1070_v47 = vpop.f32.mrb[0].mxu0 }
 0x1a9   : > { %v1071_v48 = vpop.f32.mrb[1].mxu0 }
 0x1aa   : > { %v1072_v49 = vadd.f32 %v1071_v48, %v1070_v47 }
 0x1ac   : > { %v840_v51 = vadd.f32 %v1072_v49, %v767_v50 }
 0x1b0   : > { %v909_v52 = vpop.f32.mrb[0].mxu1 }
 0x1b1   : > { %v910_v22 = vadd.f32 %v909_v52, %v840_v51  ;;  %v1088_v53 = vpop.f32.mrb[1].mxu1 }
 0x1b3   : > { %v913_v54 = vmax.f32 %v910_v22, 0.0 }
 0x1b5   : > { %914 = vst [vmem:[%s339_s22] sm:$0xff] %v913_v54 }
 0x1b6 PF: > { %s14_s19 = sadd.s32 1, %s1378_s19   ;;  %s1570_s15 = smov %s1366_s16 }
 0x1b7   : > { %p11_p10 = scmp.ge.s32.totalorder %s14_s19, 4   ;;  %s1571_s16 = smov %s1456_s24 }
 0x1b8   : > { %s1572_s17 = smov %s1374_s18  ;;  %s1573_s18 = smov %s1575_s20 }
 0x1b9   :  { %13 = sbr.rel (!%p11_p10) target bundleno = 3 (0x3), region = 155 }

// kernel: srresnet_forward.27
= control target key start
LH: loop header
LB: loop body
LE: loop exit
PB: predicated region body
PF: predicated region fallthrough
CT: control target
= control target key end

     0   :  { %s11786_s15 = smov 0   ;;  %s11788_s16 = smov 0   ;;  %s13710_s0 = inlined_call_operand.vmem [shape: f32[2,32,384], index: 0, kind: input, shape index: {}, may-alias: {0,1}]   ;;  %s13711_s1 = inlined_call_operand.vmem [shape: f32[2,32,384], index: 1, kind: input, shape index: {}, may-alias: {0,1}]   ;;  %s13712_s2 = inlined_call_operand.vmem [shape: f32[8,2592], index: 2, kind: input, shape index: {}]   ;;  %s13713_s3 = inlined_call_operand.vmem [shape: f32[8,1], index: 3, kind: input, shape index: {}]   ;;  %s13714_s4 = inlined_call_operand.vmem [shape: f32[2,8,256], index: 4, kind: output, shape index: {}]  }
   0x1   :  { %s11790_s17 = smov 0   ;;  %s11792_s18 = smov 0  }
   0x2   :  { %s11794_s19 = smov 0  }
   0x3 LB: > { %s26_s20 = sadd.s32 1, %s11657_s18  ;;  %p42_p1 = scmp.ne.s32.totalorder %s11649_s16, %s11645_s15  ;;  %s11661_s19 = sphi %s11794_s19, %s14_s19   ;;  %s11657_s18 = sphi %s11792_s18, %s13722_s18   ;;  %s11653_s17 = sphi %s11790_s17, %s13721_s17   ;;  %s11649_s16 = sphi %s11788_s16, %s13720_s16   ;;  %s11645_s15 = sphi %s11786_s15, %s13719_s15  }
   0x4   : > { %p28_p0 = scmp.ge.s32.totalorder %s26_s20, 2  ;;  %p43_p2 = scmp.eq.s32.totalorder %s11661_s19, 0 }
   0x5   : > { %s35_s23 = sadd.s32 1, %s11649_s16  ;;  %p8279_p5 = scmp.ge.s32.totalorder %s11661_s19, 2 }
   0x6   : > { %s13724_s20 = smov (%p28_p0, %s26_s20), 0  ;;  %p11817_p3 = por %p43_p2, %p42_p1 }
   0x7   : > { %s30_s22 = ssub.s32 %s11657_s18, %s13724_s20  ;;  %176 = sbr.rel (%p8279_p5) target bundleno = 38 (0x26), region = 24 }
   0x8   : > { %p33_p4 = scmp.eq.s32.totalorder %s30_s22, 0 }
   0xa   : > { %s11825_s24 = scalar_select %p33_p4, %s11649_s16, %s35_s23  }
   0xe   : > { %179 = sbr.rel (!%p11817_p3) target bundleno = 31 (0x1f), region = 28  ;;  %s181_s25 = sand.u32 (%p11817_p3), 1, %s11649_s16  }
   0xf   : > { %s8979_s26 = smul.u32 (%p11817_p3), 96, %s11657_s18  ;;  %s11832_s27 = sshll.u32 (%p11817_p3), %s181_s25, 6 }
  0x10   : > { %s183_s5 = scalar_lea.vmem (%p11817_p3), [#allocation4], %s11832_s27   ;;  %s11847_s8 = smov (%p11817_p3), 0  }
  0x11   : > { %s11837_s30 = scalar_lea.vmem (%p11817_p3), %s13710_s0, %s8979_s26   ;;  %s13716_s6 = smov (%p11817_p3), %s183_s5 }
  0x12   : > { %s13717_s7 = smov (%p11817_p3), %s11837_s30  ;;  %s11675_s9 = smov (%p11817_p3), 0  }
  0x15 LB: >> { %v395_v0 = vld [vmem:[%s11669_s7] sm:$0xff]  ;;  %v397_v1 = vld [vmem:[%s11669_s7 + $0x18] sm:$0xff]  ;;  %v399_v2 = vld [vmem:[%s11669_s7 + $0x30] sm:$0xff]  ;;  %s403_s10 = sadd.s32 1, %s11673_s8  ;;  %s389_s9 = sadd.s32 1, %s11677_s9   ;;  %s11677_s9 = sphi %s11675_s9, %s389_s9   ;;  %s11673_s8 = sphi %s11847_s8, %s13718_s8   ;;  %s11669_s7 = sphi %s13717_s7, %s408_s7   ;;  %s11665_s6 = sphi %s13716_s6, %s409_s6  }
  0x16   : >> { %396 = vst [vmem:[%s11665_s6] sm:$0xff] %v395_v0  ;;  %398 = vst [vmem:[%s11665_s6 + $0x10] sm:$0xff] %v397_v1  ;;  %v401_v3 = vld [vmem:[%s11669_s7 + $0x48] sm:$0xff]  ;;  %p404_p6 = scmp.ge.s32.totalorder %s403_s10, 2  ;;  %p388_p7 = scmp.ge.s32.totalorder %s389_s9, 2 }
  0x17   : >> { %400 = vst [vmem:[%s11665_s6 + $0x20] sm:$0xff] %v399_v2  ;;  %402 = vst [vmem:[%s11665_s6 + $0x30] sm:$0xff] %v401_v3 }
  0x18   : >> { %s13726_s10 = smov (%p404_p6, %s403_s10), 0  ;;  %391 = sbr.rel (!%p388_p7) target bundleno = 21 (0x15), region = 212 }
  0x19   : >> { %s8284_s11 = sshll.u32 %s13726_s10, 3  ;;  %s13718_s8 = smov %s13726_s10 }
  0x1a   : >> { %s408_s7 = scalar_lea.vmem %s11837_s30, %s8284_s11   ;;  %s409_s6 = scalar_lea.vmem %s183_s5, %s8284_s11 [#allocation4]  }
  0x1f PF: > { %621 = sbr.rel (!%p11817_p3) target bundleno = 38 (0x26), region = 94  ;;  %s623_s12 = sand.u32 (%p11817_p3), 1, %s11649_s16  }
  0x20   : > { %s8295_s13 = smul.u32 (%p11817_p3), 96, %s11657_s18  ;;  %s8294_s14 = sshll.u32 (%p11817_p3), %s623_s12, 5 }
  0x21   : > { %s625_s26 = scalar_lea.vmem (%p11817_p3), [#allocation5], %s8294_s14 }
  0x22   : > { %s8147_s25 = scalar_lea.vmem (%p11817_p3), %s13711_s1, %s8295_s13 }
  0x23   : > { %v8296_v4 = vld [vmem:[%s8147_s25 + $0x10] sm:$0xff] (%p11817_p3)  ;;  %v8297_v5 = vld [vmem:[%s8147_s25 + $0x28] sm:$0xff] (%p11817_p3)  ;;  %v8298_v6 = vld [vmem:[%s8147_s25 + $0x40] sm:$0xff] (%p11817_p3) }
  0x24   : > { %666 = vst [vmem:[%s625_s26] sm:$0xff] (%p11817_p3), %v8296_v4  ;;  %668 = vst [vmem:[%s625_s26 + $0x8] sm:$0xff] (%p11817_p3), %v8297_v5  ;;  %v8299_v7 = vld [vmem:[%s8147_s25 + $0x58] sm:$0xff] (%p11817_p3) }
  0x25   : > { %670 = vst [vmem:[%s625_s26 + $0x10] sm:$0xff] (%p11817_p3), %v8298_v6  ;;  %672 = vst [vmem:[%s625_s26 + $0x18] sm:$0xff] (%p11817_p3), %v8299_v7 }
  0x26 PF: > { %p8300_p8 = scmp.ge.s32.totalorder %s11661_s19, 1  ;;  %p677_p9 = scmp.lt.s32.totalorder %s11661_s19, 3 }
  0x28   : > { %p678_p10 = pnand %p8300_p8, %p677_p9 }
  0x29   : > { %s684_s21 = sand.u32 (!%p678_p10), 1, %s11645_s15   ;;  %s11679_s15 = smov (!%p678_p10), 127   ;;  %v6622_v30 = vld [vmem:[%s13712_s2 + $0x8] sm:$0xff] (!%p678_p10)  ;;  %vm829_vm0 = vcmask (!%p678_p10), 1039360   ;;  %vm902_vm1 = vcmask (!%p678_p10), 1031168   ;;  %vm975_vm2 = vcmask (!%p678_p10), 1022976  }
  0x2a   : > { %681 = sbr.rel (%p678_p10) target bundleno = 1345 (0x541), region = 132  ;;  %s8301_s27 = sshll.u32 (!%p678_p10), %s684_s21, 6  ;;  %7363 = vmatprep.mubr.f32.mxu1 (!%p678_p10), %v6622_v30  ;;  %vm1048_vm3 = vcmask (!%p678_p10), 1014784   ;;  %vm1121_vm4 = vcmask (!%p678_p10), 1006592   ;;  %vm1194_vm5 = vcmask (!%p678_p10), 998400   ;;  %vm1267_vm6 = vcmask (!%p678_p10), 990208  }
  0x2b   : > { %s8302_s28 = sshll.u32 (!%p678_p10), %s684_s21, 5  ;;  %s11871_s29 = scalar_lea.vmem (!%p678_p10), [#allocation4], %s8301_s27  ;;  %vm1340_vm7 = vcmask (!%p678_p10), 982016   ;;  %vm1413_vm8 = vcmask (!%p678_p10), 949248   ;;  %vm1486_vm9 = vcmask (!%p678_p10), 941056   ;;  %vm1559_vm10 = vcmask (!%p678_p10), 932864  }
  0x2c   : > { %v744_v8 = vld [vmem:[%s11871_s29 + $0x18] sm:$0xff] (!%p678_p10)  ;;  %v745_v9 = vld [vmem:[%s11871_s29 + $0x20] sm:$0xff] (!%p678_p10)  ;;  %v746_v10 = vld [vmem:[%s11871_s29 + $0x28] sm:$0xff] (!%p678_p10)  ;;  %s11876_s30 = scalar_lea.vmem (!%p678_p10), [#allocation5], %s8302_s28  ;;  %s11680_s5 = smov (!%p678_p10), 126   ;;  %vm1632_vm11 = vcmask (!%p678_p10), 924672  }
  0x2d   : > { %v758_v11 = vld [vmem:[%s11876_s30 + $0x8] sm:$0xff] (!%p678_p10)  ;;  %v741_v13 = vld [vmem:[%s11871_s29] sm:$0xff] (!%p678_p10)  ;;  %v743_v15 = vld [vmem:[%s11871_s29 + $0x10] sm:$0xff] (!%p678_p10)  ;;  %v11888_v18 = vpack.i.bf16 (!%p678_p10), %v746_v10, %v745_v9  ;;  %s11681_s6 = smov (!%p678_p10), 125   ;;  %s11682_s7 = smov (!%p678_p10), 124   ;;  %vm1705_vm12 = vcmask (!%p678_p10), 916480  }
  0x2e   : > { %v11879_v12 = vpack.i.bf16 (!%p678_p10), %v758_v11, %v744_v8  ;;  %v742_v14 = vld [vmem:[%s11871_s29 + $0x8] sm:$0xff] (!%p678_p10)  ;;  %v757_v17 = vld [vmem:[%s11876_s30] sm:$0xff] (!%p678_p10)  ;;  %v748_v19 = vld [vmem:[%s11871_s29 + $0x38] sm:$0xff] (!%p678_p10)  ;;  %v8311_v27 = vpack.c.bf16 (!%p678_p10), %v743_v15, %v741_v13  ;;  %s11683_s8 = smov (!%p678_p10), 123   ;;  %s11684_s9 = smov (!%p678_p10), 122   ;;  %vm1778_vm13 = vcmask (!%p678_p10), 908288  }
  0x2f   : > { %v11884_v16 = vpack.i.bf16 (!%p678_p10), %v742_v14, %v741_v13  ;;  %v11892_v20 = vpack.i.bf16 (!%p678_p10), %v743_v15, %v757_v17  ;;  %v11895_v21 = vld [vmem:[%s11876_s30 + $0x18] sm:$0xff] (!%p678_p10)  ;;  %v747_v22 = vld [vmem:[%s11871_s29 + $0x30] sm:$0xff] (!%p678_p10)  ;;  %v8309_v26 = vpack.c.bf16 (!%p678_p10), %v744_v8, %v742_v14  ;;  %v8313_v28 = vpack.c.bf16 (!%p678_p10), %v748_v19, %v746_v10  ;;  %s11685_s10 = smov (!%p678_p10), 121   ;;  %s11686_s13 = smov (!%p678_p10), 120  }
  0x30   : > { %9145 = vrot.lane.b32.xlu1 (!%p678_p10), %v11879_v12, %s11679_s15  ;;  %v759_v23 = vld [vmem:[%s11876_s30 + $0x10] sm:$0xff] (!%p678_p10)  ;;  %v11901_v24 = vpack.i.bf16 (!%p678_p10), %v11895_v21, %v748_v19  ;;  %v8315_v29 = vpack.c.bf16 (!%p678_p10), %v747_v22, %v745_v9  ;;  %s11687_s14 = smov (!%p678_p10), 116   ;;  %s11688_s22 = smov (!%p678_p10), 115   ;;  %vm1851_vm14 = vcmask (!%p678_p10), 900096   ;;  %vm1924_vm15 = vcmask (!%p678_p10), 891904  }
  0x31   : > { %9135 = vrot.lane.b32.xlu0 %v11884_v16, %s11679_s15  ;;  %v11904_v25 = vpack.i.bf16 %v747_v22, %v759_v23  ;;  %8310 = vmatprep.subr.bf16.mxu1 %v8309_v26  ;;  %s11689_s23 = smov 114   ;;  %s11690_s25 = smov 113  }
  0x32   : > { %8312 = vmatpush1.bf16.msra.mxu1 %v8311_v27  ;;  %s11691_s26 = smov 112   ;;  %s11692_s21 = smov 111  }
  0x33   : > { %8314 = vmatprep.subr.bf16.mxu1 %v8313_v28  ;;  %s11693_s27 = smov 110   ;;  %s11694_s28 = smov 109  }
  0x34   : > { %9150 = vrot.lane.b32.xlu1 %v11888_v18, %s11679_s15  ;;  %s11698_s11 = smov 102   ;;  %s11699_s12 = smov 101  }
  0x35   : > { %9140 = vrot.lane.b32.xlu0 %v11892_v20, %s11679_s15  ;;  %p732_p11 = scmp.lt.s32.totalorder %s11653_s17, 1 }
  0x36   : > { %8316 = vmatpush1.bf16.msra.mxu1 %v8315_v29 }
  0x37   : > { %s13728_s17 = smov (!%p732_p11, %s11653_s17), 1 }
  0x38   : > { %9160 = vrot.lane.b32.xlu1 %v11901_v24, %s11679_s15 }
  0x39   : > { %9155 = vrot.lane.b32.xlu0 %v11904_v25, %s11679_s15  ;;  %s11695_s15 = smov 108  }
  0x3c   : > { %9170 = vrot.lane.b32.xlu1 %v11892_v20, %s11680_s5 }
  0x3d   : > { %9165 = vrot.lane.b32.xlu0 %v11884_v16, %s11680_s5 }
  0x40   : > { %9180 = vrot.lane.b32.xlu1 %v11888_v18, %s11680_s5 }
  0x41   : > { %9175 = vrot.lane.b32.xlu0 %v11879_v12, %s11680_s5 }
  0x44   : > { %9190 = vrot.lane.b32.xlu1 %v11901_v24, %s11680_s5 }
  0x45   : > { %9185 = vrot.lane.b32.xlu0 %v11904_v25, %s11680_s5  ;;  %s11706_s5 = smov 91  }
  0x48   : > { %9200 = vrot.lane.b32.xlu1 %v11892_v20, %s11681_s6 }
  0x49   : > { %9195 = vrot.lane.b32.xlu0 %v11884_v16, %s11681_s6 }
  0x4c   : > { %9210 = vrot.lane.b32.xlu1 %v11888_v18, %s11681_s6 }
  0x4d   : > { %9205 = vrot.lane.b32.xlu0 %v11879_v12, %s11681_s6 }
  0x50   : > { %9220 = vrot.lane.b32.xlu1 %v11901_v24, %s11681_s6 }
  0x51   : > { %9215 = vrot.lane.b32.xlu0 %v11904_v25, %s11681_s6  ;;  %s11707_s6 = smov 90  }
  0x54   : > { %9230 = vrot.lane.b32.xlu1 %v11892_v20, %s11682_s7 }
  0x55   : > { %9225 = vrot.lane.b32.xlu0 %v11884_v16, %s11682_s7 }
  0x58   : > { %9240 = vrot.lane.b32.xlu1 %v11888_v18, %s11682_s7 }
  0x59   : > { %9235 = vrot.lane.b32.xlu0 %v11879_v12, %s11682_s7 }
  0x5c   : > { %9250 = vrot.lane.b32.xlu1 %v11901_v24, %s11682_s7 }
  0x5d   : > { %9245 = vrot.lane.b32.xlu0 %v11904_v25, %s11682_s7  ;;  %s11708_s7 = smov 89  }
  0x60   : > { %9260 = vrot.lane.b32.xlu1 %v11892_v20, %s11683_s8 }
  0x61   : > { %9255 = vrot.lane.b32.xlu0 %v11884_v16, %s11683_s8 }
  0x64   : > { %9270 = vrot.lane.b32.xlu1 %v11888_v18, %s11683_s8 }
  0x65   : > { %9265 = vrot.lane.b32.xlu0 %v11879_v12, %s11683_s8 }
  0x68   : > { %9280 = vrot.lane.b32.xlu1 %v11901_v24, %s11683_s8 }
  0x69   : > { %9275 = vrot.lane.b32.xlu0 %v11904_v25, %s11683_s8  ;;  %s11709_s8 = smov 88  }
  0x6c   : > { %9290 = vrot.lane.b32.xlu1 %v11892_v20, %s11684_s9 }
  0x6d   : > { %9285 = vrot.lane.b32.xlu0 %v11884_v16, %s11684_s9 }
  0x70   : > { %9300 = vrot.lane.b32.xlu1 %v11888_v18, %s11684_s9 }
  0x71   : > { %9295 = vrot.lane.b32.xlu0 %v11879_v12, %s11684_s9 }
  0x74   : > { %9310 = vrot.lane.b32.xlu1 %v11901_v24, %s11684_s9 }
  0x75   : > { %9305 = vrot.lane.b32.xlu0 %v11904_v25, %s11684_s9  ;;  %s11696_s9 = smov 104  }
  0x78   : > { %9320 = vrot.lane.b32.xlu1 %v11892_v20, %s11685_s10 }
  0x79   : > { %9315 = vrot.lane.b32.xlu0 %v11884_v16, %s11685_s10 }
  0x7c   : > { %9330 = vrot.lane.b32.xlu1 %v11888_v18, %s11685_s10 }
  0x7d   : > { %9325 = vrot.lane.b32.xlu0 %v11879_v12, %s11685_s10 }
  0x80   : > { %9340 = vrot.lane.b32.xlu1 %v11901_v24, %s11685_s10 }
  0x81   : > { %9335 = vrot.lane.b32.xlu0 %v11904_v25, %s11685_s10  ;;  %s11697_s10 = smov 103  }
  0x84   : > { %9350 = vrot.lane.b32.xlu1 %v11892_v20, %s11686_s13 }
  0x85   : > { %9345 = vrot.lane.b32.xlu0 %v11884_v16, %s11686_s13 }
  0x88   : > { %9360 = vrot.lane.b32.xlu1 %v11888_v18, %s11686_s13 }
  0x89   : > { %9355 = vrot.lane.b32.xlu0 %v11879_v12, %s11686_s13 }
  0x8c   : > { %9370 = vrot.lane.b32.xlu1 %v11901_v24, %s11686_s13 }
  0x8d   : > { %9365 = vrot.lane.b32.xlu0 %v11904_v25, %s11686_s13  ;;  %s11700_s13 = smov 100  }
  0x90   : > { %9380 = vrot.lane.b32.xlu1 %v11892_v20, %s11687_s14 }
  0x91   : > { %9375 = vrot.lane.b32.xlu0 %v11884_v16, %s11687_s14 }
  0x94   : > { %9390 = vrot.lane.b32.xlu1 %v11888_v18, %s11687_s14 }
  0x95   : > { %9385 = vrot.lane.b32.xlu0 %v11879_v12, %s11687_s14 }
  0x98   : > { %9400 = vrot.lane.b32.xlu1 %v11901_v24, %s11687_s14 }
  0x99   : > { %9395 = vrot.lane.b32.xlu0 %v11904_v25, %s11687_s14  ;;  %s11701_s14 = smov 99  }
  0x9c   : > { %9410 = vrot.lane.b32.xlu1 %v11892_v20, %s11688_s22 }
  0x9d   : > { %9405 = vrot.lane.b32.xlu0 %v11884_v16, %s11688_s22 }
  0xa0   : > { %9420 = vrot.lane.b32.xlu1 %v11888_v18, %s11688_s22 }
  0xa1   : > { %9415 = vrot.lane.b32.xlu0 %v11879_v12, %s11688_s22 }
  0xa2   : > { %v9146_v31 = vpop.permute.xlu1 %9145 }
  0xa3   : > { %v9136_v32 = vpop.permute.xlu0 %9135  ;;  %v9148_v33 = vunpack.i.h.bf16 %v9146_v31  ;;  %v9147_v34 = vunpack.i.l.bf16 %v9146_v31 }
  0xa4   : > { %9430 = vrot.lane.b32.xlu1 %v11901_v24, %s11688_s22  ;;  %v9138_v35 = vunpack.i.h.bf16 %v9136_v32  ;;  %v9137_v36 = vunpack.i.l.bf16 %v9136_v32 }
  0xa5   : > { %9425 = vrot.lane.b32.xlu0 %v11904_v25, %s11688_s22  ;;  %v833_v41 = vsel %vm829_vm0, %v9147_v34, %v9148_v33  ;;  %s11702_s22 = smov 98  }
  0xa6   : > { %v9151_v37 = vpop.permute.xlu1 %9150  ;;  %v830_v42 = vsel %vm829_vm0, %v9137_v36, %v9138_v35 }
  0xa7   : > { %v9141_v38 = vpop.permute.xlu0 %9140  ;;  %v9153_v43 = vunpack.i.h.bf16 %v9151_v37  ;;  %v9152_v44 = vunpack.i.l.bf16 %v9151_v37 }
  0xa8   : > { %v9143_v39 = vunpack.i.h.bf16 %v9141_v38  ;;  %v9142_v40 = vunpack.i.l.bf16 %v9141_v38  ;;  %9440 = vrot.lane.b32.xlu1 %v11892_v20, %s11689_s23 }
  0xa9   : > { %9435 = vrot.lane.b32.xlu0 %v11884_v16, %s11689_s23  ;;  %v834_v58 = vsel %vm829_vm0, %v9152_v44, %v9153_v43 }
  0xaa   : > { %v9161_v45 = vpop.permute.xlu1 %9160  ;;  %v831_v46 = vsel %vm829_vm0, %v9138_v35, %v9142_v40  ;;  %v832_v47 = vsel %vm829_vm0, %v9143_v39, %v9147_v34 }
  0xab   : > { %v9163_v48 = vunpack.i.h.bf16 %v9161_v45  ;;  %v9162_v49 = vunpack.i.l.bf16 %v9161_v45  ;;  %v9156_v50 = vpop.permute.xlu0 %9155  ;;  %v8317_v51 = vpack.c.bf16 %v833_v41, %v831_v46  ;;  %v8319_v52 = vpack.c.bf16 %v832_v47, %v830_v42 }
  0xac   : > { %v9158_v53 = vunpack.i.h.bf16 %v9156_v50  ;;  %v9157_v54 = vunpack.i.l.bf16 %v9156_v50  ;;  %9450 = vrot.lane.b32.xlu1 %v11888_v18, %s11689_s23 }
  0xad   : > { %9445 = vrot.lane.b32.xlu0 %v11879_v12, %s11689_s23  ;;  %8318 = vmatprep.subr.bf16.mxu1 %v8317_v51  ;;  %v837_v55 = vsel %vm829_vm0, %v9162_v49, %v9163_v48 }
  0xae   : > { %8320 = vmatpush1.bf16.msra.mxu1 %v8319_v52  ;;  %v9171_v56 = vpop.permute.xlu1 %9170  ;;  %v835_v57 = vsel %vm829_vm0, %v9153_v43, %v9157_v54  ;;  %v836_v59 = vsel %vm829_vm0, %v9158_v53, %v9162_v49  ;;  %vm1997_vm0 = vcmask 883712  }
  0xaf   : > { %v9166_v60 = vpop.permute.xlu0 %9165  ;;  %v8321_v61 = vpack.c.bf16 %v837_v55, %v835_v57  ;;  %v8323_v62 = vpack.c.bf16 %v836_v59, %v834_v58  ;;  %v9172_v63 = vunpack.i.l.bf16 %v9171_v56  ;;  %v9173_v4 = vunpack.i.h.bf16 %v9171_v56 }
  0xb0   : > { %9460 = vrot.lane.b32.xlu1 %v11901_v24, %s11689_s23  ;;  %v9168_v0 = vunpack.i.h.bf16 %v9166_v60  ;;  %v9167_v1 = vunpack.i.l.bf16 %v9166_v60 }
  0xb1   : > { %9455 = vrot.lane.b32.xlu0 %v11904_v25, %s11689_s23  ;;  %8322 = vmatprep.subr.bf16.mxu1 %v8321_v61  ;;  %s11703_s23 = smov 97  }
  0xb2   : > { %8324 = vmatpush1.bf16.msra.mxu1 %v8323_v62  ;;  %v9181_v2 = vpop.permute.xlu1 %9180  ;;  %v904_v7 = vsel %vm902_vm1, %v9168_v0, %v9172_v63  ;;  %v903_v8 = vsel %vm902_vm1, %v9167_v1, %v9168_v0 }
  0xb3   : > { %v9176_v3 = vpop.permute.xlu0 %9175  ;;  %v9183_v9 = vunpack.i.h.bf16 %v9181_v2  ;;  %v9182_v10 = vunpack.i.l.bf16 %v9181_v2 }
  0xb4   : > { %v9178_v5 = vunpack.i.h.bf16 %v9176_v3  ;;  %v9177_v6 = vunpack.i.l.bf16 %v9176_v3  ;;  %9470 = vrot.lane.b32.xlu1 %v11892_v20, %s11690_s25 }
  0xb5   : > { %9465 = vrot.lane.b32.xlu0 %v11884_v16, %s11690_s25  ;;  %v907_v31 = vsel %vm902_vm1, %v9182_v10, %v9183_v9 }
  0xb6   : > { %v9191_v11 = vpop.permute.xlu1 %9190  ;;  %v906_v13 = vsel %vm902_vm1, %v9177_v6, %v9178_v5  ;;  %v905_v14 = vsel %vm902_vm1, %v9173_v4, %v9177_v6 }
  0xb7   : > { %v9193_v15 = vunpack.i.h.bf16 %v9191_v11  ;;  %v9192_v17 = vunpack.i.l.bf16 %v9191_v11  ;;  %v9186_v19 = vpop.permute.xlu0 %9185  ;;  %v8325_v22 = vpack.c.bf16 %v906_v13, %v904_v7  ;;  %v8327_v23 = vpack.c.bf16 %v905_v14, %v903_v8 }
  0xb8   : > { %v9188_v26 = vunpack.i.h.bf16 %v9186_v19  ;;  %v9187_v27 = vunpack.i.l.bf16 %v9186_v19  ;;  %9480 = vrot.lane.b32.xlu1 %v11888_v18, %s11690_s25 }
  0xb9   : > { %9475 = vrot.lane.b32.xlu0 %v11879_v12, %s11690_s25  ;;  %8326 = vmatprep.subr.bf16.mxu1 %v8325_v22  ;;  %v910_v28 = vsel %vm902_vm1, %v9192_v17, %v9193_v15 }
  0xba   : > { %8328 = vmatpush1.bf16.msra.mxu1 %v8327_v23  ;;  %v9201_v29 = vpop.permute.xlu1 %9200  ;;  %v908_v30 = vsel %vm902_vm1, %v9183_v9, %v9187_v27  ;;  %v909_v32 = vsel %vm902_vm1, %v9188_v26, %v9192_v17  ;;  %vm2070_vm1 = vcmask 850944  }
  0xbb   : > { %v9196_v33 = vpop.permute.xlu0 %9195  ;;  %v8329_v34 = vpack.c.bf16 %v910_v28, %v908_v30  ;;  %v8331_v35 = vpack.c.bf16 %v909_v32, %v907_v31  ;;  %v9202_v36 = vunpack.i.l.bf16 %v9201_v29  ;;  %v9203_v41 = vunpack.i.h.bf16 %v9201_v29 }
  0xbc   : > { %9490 = vrot.lane.b32.xlu1 %v11901_v24, %s11690_s25  ;;  %v9198_v37 = vunpack.i.h.bf16 %v9196_v33  ;;  %v9197_v38 = vunpack.i.l.bf16 %v9196_v33 }
  0xbd   : > { %9485 = vrot.lane.b32.xlu0 %v11904_v25, %s11690_s25  ;;  %8330 = vmatprep.subr.bf16.mxu1 %v8329_v34  ;;  %s11714_s25 = smov 80  }
  0xbe   : > { %8332 = vmatpush1.bf16.msra.mxu1 %v8331_v35  ;;  %v9211_v39 = vpop.permute.xlu1 %9210  ;;  %v977_v44 = vsel %vm975_vm2, %v9198_v37, %v9202_v36  ;;  %v976_v45 = vsel %vm975_vm2, %v9197_v38, %v9198_v37 }
  0xbf   : > { %v9206_v40 = vpop.permute.xlu0 %9205  ;;  %v9213_v46 = vunpack.i.h.bf16 %v9211_v39  ;;  %v9212_v47 = vunpack.i.l.bf16 %v9211_v39 }
  0xc0   : > { %v9208_v42 = vunpack.i.h.bf16 %v9206_v40  ;;  %v9207_v43 = vunpack.i.l.bf16 %v9206_v40  ;;  %9500 = vrot.lane.b32.xlu1 %v11892_v20, %s11691_s26 }
  0xc1   : > { %9495 = vrot.lane.b32.xlu0 %v11884_v16, %s11691_s26  ;;  %v980_v61 = vsel %vm975_vm2, %v9212_v47, %v9213_v46 }
  0xc2   : > { %v9221_v48 = vpop.permute.xlu1 %9220  ;;  %v979_v49 = vsel %vm975_vm2, %v9207_v43, %v9208_v42  ;;  %v978_v50 = vsel %vm975_vm2, %v9203_v41, %v9207_v43 }
  0xc3   : > { %v9223_v51 = vunpack.i.h.bf16 %v9221_v48  ;;  %v9222_v52 = vunpack.i.l.bf16 %v9221_v48  ;;  %v9216_v53 = vpop.permute.xlu0 %9215  ;;  %v8333_v54 = vpack.c.bf16 %v979_v49, %v977_v44  ;;  %v8335_v55 = vpack.c.bf16 %v978_v50, %v976_v45 }
  0xc4   : > { %v9218_v56 = vunpack.i.h.bf16 %v9216_v53  ;;  %v9217_v57 = vunpack.i.l.bf16 %v9216_v53  ;;  %9510 = vrot.lane.b32.xlu1 %v11888_v18, %s11691_s26 }
  0xc5   : > { %9505 = vrot.lane.b32.xlu0 %v11879_v12, %s11691_s26  ;;  %8334 = vmatprep.subr.bf16.mxu1 %v8333_v54  ;;  %v983_v58 = vsel %vm975_vm2, %v9222_v52, %v9223_v51 }
  0xc6   : > { %8336 = vmatpush1.bf16.msra.mxu1 %v8335_v55  ;;  %v9231_v59 = vpop.permute.xlu1 %9230  ;;  %v981_v60 = vsel %vm975_vm2, %v9213_v46, %v9217_v57  ;;  %v982_v62 = vsel %vm975_vm2, %v9218_v56, %v9222_v52  ;;  %vm2143_vm2 = vcmask 842752  }
  0xc7   : > { %v9226_v63 = vpop.permute.xlu0 %9225  ;;  %v8337_v0 = vpack.c.bf16 %v983_v58, %v981_v60  ;;  %v8339_v1 = vpack.c.bf16 %v982_v62, %v980_v61  ;;  %v9232_v2 = vunpack.i.l.bf16 %v9231_v59  ;;  %v9233_v7 = vunpack.i.h.bf16 %v9231_v59 }
  0xc8   : > { %9520 = vrot.lane.b32.xlu1 %v11901_v24, %s11691_s26  ;;  %v9228_v3 = vunpack.i.h.bf16 %v9226_v63  ;;  %v9227_v4 = vunpack.i.l.bf16 %v9226_v63 }
  0xc9   : > { %9515 = vrot.lane.b32.xlu0 %v11904_v25, %s11691_s26  ;;  %8338 = vmatprep.subr.bf16.mxu1 %v8337_v0  ;;  %s11715_s26 = smov 79  }
  0xca   : > { %8340 = vmatpush1.bf16.msra.mxu1 %v8339_v1  ;;  %v9241_v5 = vpop.permute.xlu1 %9240  ;;  %v1050_v10 = vsel %vm1048_vm3, %v9228_v3, %v9232_v2  ;;  %v1049_v11 = vsel %vm1048_vm3, %v9227_v4, %v9228_v3 }
  0xcb   : > { %v9236_v6 = vpop.permute.xlu0 %9235  ;;  %v9243_v13 = vunpack.i.h.bf16 %v9241_v5  ;;  %v9242_v14 = vunpack.i.l.bf16 %v9241_v5 }
  0xcc   : > { %v9238_v8 = vunpack.i.h.bf16 %v9236_v6  ;;  %v9237_v9 = vunpack.i.l.bf16 %v9236_v6  ;;  %9530 = vrot.lane.b32.xlu1 %v11892_v20, %s11692_s21 }
  0xcd   : > { %9525 = vrot.lane.b32.xlu0 %v11884_v16, %s11692_s21  ;;  %v1053_v34 = vsel %vm1048_vm3, %v9242_v14, %v9243_v13 }
  0xce   : > { %v9251_v15 = vpop.permute.xlu1 %9250  ;;  %v1052_v17 = vsel %vm1048_vm3, %v9237_v9, %v9238_v8  ;;  %v1051_v19 = vsel %vm1048_vm3, %v9233_v7, %v9237_v9 }
  0xcf   : > { %v9253_v22 = vunpack.i.h.bf16 %v9251_v15  ;;  %v9252_v23 = vunpack.i.l.bf16 %v9251_v15  ;;  %v9246_v26 = vpop.permute.xlu0 %9245  ;;  %v8341_v27 = vpack.c.bf16 %v1052_v17, %v1050_v10  ;;  %v8343_v28 = vpack.c.bf16 %v1051_v19, %v1049_v11 }
  0xd0   : > { %v9248_v29 = vunpack.i.h.bf16 %v9246_v26  ;;  %v9247_v30 = vunpack.i.l.bf16 %v9246_v26  ;;  %9540 = vrot.lane.b32.xlu1 %v11888_v18, %s11692_s21 }
  0xd1   : > { %9535 = vrot.lane.b32.xlu0 %v11879_v12, %s11692_s21  ;;  %8342 = vmatprep.subr.bf16.mxu1 %v8341_v27  ;;  %v1056_v31 = vsel %vm1048_vm3, %v9252_v23, %v9253_v22 }
  0xd2   : > { %8344 = vmatpush1.bf16.msra.mxu1 %v8343_v28  ;;  %v9261_v32 = vpop.permute.xlu1 %9260  ;;  %v1054_v33 = vsel %vm1048_vm3, %v9243_v13, %v9247_v30  ;;  %v1055_v35 = vsel %vm1048_vm3, %v9248_v29, %v9252_v23  ;;  %vm2216_vm3 = vcmask 834560  }
  0xd3   : > { %v9256_v36 = vpop.permute.xlu0 %9255  ;;  %v8345_v37 = vpack.c.bf16 %v1056_v31, %v1054_v33  ;;  %v8347_v38 = vpack.c.bf16 %v1055_v35, %v1053_v34  ;;  %v9262_v39 = vunpack.i.l.bf16 %v9261_v32  ;;  %v9263_v44 = vunpack.i.h.bf16 %v9261_v32 }
  0xd4   : > { %9550 = vrot.lane.b32.xlu1 %v11901_v24, %s11692_s21  ;;  %v9258_v40 = vunpack.i.h.bf16 %v9256_v36  ;;  %v9257_v41 = vunpack.i.l.bf16 %v9256_v36 }
  0xd5   : > { %9545 = vrot.lane.b32.xlu0 %v11904_v25, %s11692_s21  ;;  %8346 = vmatprep.subr.bf16.mxu1 %v8345_v37  ;;  %s11716_s21 = smov 78  }
  0xd6   : > { %8348 = vmatpush1.bf16.msra.mxu1 %v8347_v38  ;;  %v9271_v42 = vpop.permute.xlu1 %9270  ;;  %v1123_v47 = vsel %vm1121_vm4, %v9258_v40, %v9262_v39  ;;  %v1122_v48 = vsel %vm1121_vm4, %v9257_v41, %v9258_v40 }
  0xd7   : > { %v9266_v43 = vpop.permute.xlu0 %9265  ;;  %v9273_v49 = vunpack.i.h.bf16 %v9271_v42  ;;  %v9272_v50 = vunpack.i.l.bf16 %v9271_v42 }
  0xd8   : > { %v9268_v45 = vunpack.i.h.bf16 %v9266_v43  ;;  %v9267_v46 = vunpack.i.l.bf16 %v9266_v43  ;;  %9560 = vrot.lane.b32.xlu1 %v11892_v20, %s11693_s27 }
  0xd9   : > { %9555 = vrot.lane.b32.xlu0 %v11884_v16, %s11693_s27  ;;  %v1126_v0 = vsel %vm1121_vm4, %v9272_v50, %v9273_v49 }
  0xda   : > { %v9281_v51 = vpop.permute.xlu1 %9280  ;;  %v1125_v52 = vsel %vm1121_vm4, %v9267_v46, %v9268_v45  ;;  %v1124_v53 = vsel %vm1121_vm4, %v9263_v44, %v9267_v46 }
  0xdb   : > { %v9283_v54 = vunpack.i.h.bf16 %v9281_v51  ;;  %v9282_v55 = vunpack.i.l.bf16 %v9281_v51  ;;  %v9276_v56 = vpop.permute.xlu0 %9275  ;;  %v8349_v57 = vpack.c.bf16 %v1125_v52, %v1123_v47  ;;  %v8351_v58 = vpack.c.bf16 %v1124_v53, %v1122_v48 }
  0xdc   : > { %v9278_v59 = vunpack.i.h.bf16 %v9276_v56  ;;  %v9277_v60 = vunpack.i.l.bf16 %v9276_v56  ;;  %9570 = vrot.lane.b32.xlu1 %v11888_v18, %s11693_s27 }
  0xdd   : > { %9565 = vrot.lane.b32.xlu0 %v11879_v12, %s11693_s27  ;;  %8350 = vmatprep.subr.bf16.mxu1 %v8349_v57  ;;  %v1129_v61 = vsel %vm1121_vm4, %v9282_v55, %v9283_v54 }
  0xde   : > { %8352 = vmatpush1.bf16.msra.mxu1 %v8351_v58  ;;  %v9291_v62 = vpop.permute.xlu1 %9290  ;;  %v1127_v63 = vsel %vm1121_vm4, %v9273_v49, %v9277_v60  ;;  %v1128_v1 = vsel %vm1121_vm4, %v9278_v59, %v9282_v55  ;;  %vm2289_vm4 = vcmask 826368  }
  0xdf   : > { %v9286_v2 = vpop.permute.xlu0 %9285  ;;  %v8353_v3 = vpack.c.bf16 %v1129_v61, %v1127_v63  ;;  %v8355_v4 = vpack.c.bf16 %v1128_v1, %v1126_v0  ;;  %v9292_v5 = vunpack.i.l.bf16 %v9291_v62  ;;  %v9293_v10 = vunpack.i.h.bf16 %v9291_v62 }
  0xe0   : > { %9580 = vrot.lane.b32.xlu1 %v11901_v24, %s11693_s27  ;;  %v9288_v6 = vunpack.i.h.bf16 %v9286_v2  ;;  %v9287_v7 = vunpack.i.l.bf16 %v9286_v2 }
  0xe1   : > { %9575 = vrot.lane.b32.xlu0 %v11904_v25, %s11693_s27  ;;  %8354 = vmatprep.subr.bf16.mxu1 %v8353_v3  ;;  %s11717_s27 = smov 77  }
  0xe2   : > { %8356 = vmatpush1.bf16.msra.mxu1 %v8355_v4  ;;  %v9301_v8 = vpop.permute.xlu1 %9300  ;;  %v1196_v14 = vsel %vm1194_vm5, %v9288_v6, %v9292_v5  ;;  %v1195_v15 = vsel %vm1194_vm5, %v9287_v7, %v9288_v6 }
  0xe3   : > { %v9296_v9 = vpop.permute.xlu0 %9295  ;;  %v9303_v17 = vunpack.i.h.bf16 %v9301_v8  ;;  %v9302_v19 = vunpack.i.l.bf16 %v9301_v8 }
  0xe4   : > { %v9298_v11 = vunpack.i.h.bf16 %v9296_v9  ;;  %v9297_v13 = vunpack.i.l.bf16 %v9296_v9  ;;  %9590 = vrot.lane.b32.xlu1 %v11892_v20, %s11694_s28 }
  0xe5   : > { %9585 = vrot.lane.b32.xlu0 %v11884_v16, %s11694_s28  ;;  %v1199_v37 = vsel %vm1194_vm5, %v9302_v19, %v9303_v17 }
  0xe6   : > { %v9311_v22 = vpop.permute.xlu1 %9310  ;;  %v1198_v23 = vsel %vm1194_vm5, %v9297_v13, %v9298_v11  ;;  %v1197_v26 = vsel %vm1194_vm5, %v9293_v10, %v9297_v13  ;;  %v6621_v13 = vld [vmem:[%s13712_s2] sm:$0xff] }
  0xe7   : > { %v9313_v27 = vunpack.i.h.bf16 %v9311_v22  ;;  %v9312_v28 = vunpack.i.l.bf16 %v9311_v22  ;;  %v9306_v29 = vpop.permute.xlu0 %9305  ;;  %v8357_v30 = vpack.c.bf16 %v1198_v23, %v1196_v14  ;;  %v8359_v31 = vpack.c.bf16 %v1197_v26, %v1195_v15  ;;  %v6624_v15 = vld [vmem:[%s13712_s2 + $0x18] sm:$0xff] }
  0xe8   : > { %v9308_v32 = vunpack.i.h.bf16 %v9306_v29  ;;  %v9307_v33 = vunpack.i.l.bf16 %v9306_v29  ;;  %9600 = vrot.lane.b32.xlu1 %v11888_v18, %s11694_s28 }
  0xe9   : > { %9595 = vrot.lane.b32.xlu0 %v11879_v12, %s11694_s28  ;;  %8358 = vmatprep.subr.bf16.mxu1 %v8357_v30  ;;  %v1202_v34 = vsel %vm1194_vm5, %v9312_v28, %v9313_v27 }
  0xea   : > { %8360 = vmatpush1.bf16.msra.mxu1 %v8359_v31  ;;  %v9321_v35 = vpop.permute.xlu1 %9320  ;;  %v1200_v36 = vsel %vm1194_vm5, %v9303_v17, %v9307_v33  ;;  %v1201_v38 = vsel %vm1194_vm5, %v9308_v32, %v9312_v28  ;;  %vm2362_vm5 = vcmask 818176  }
  0xeb   : > { %v9316_v39 = vpop.permute.xlu0 %9315  ;;  %v8361_v40 = vpack.c.bf16 %v1202_v34, %v1200_v36  ;;  %v8363_v41 = vpack.c.bf16 %v1201_v38, %v1199_v37  ;;  %v9322_v42 = vunpack.i.l.bf16 %v9321_v35  ;;  %v9323_v47 = vunpack.i.h.bf16 %v9321_v35 }
  0xec   : > { %9610 = vrot.lane.b32.xlu1 %v11901_v24, %s11694_s28  ;;  %v9318_v43 = vunpack.i.h.bf16 %v9316_v39  ;;  %v9317_v44 = vunpack.i.l.bf16 %v9316_v39 }
  0xed   : > { %9605 = vrot.lane.b32.xlu0 %v11904_v25, %s11694_s28  ;;  %8362 = vmatprep.subr.bf16.mxu1 %v8361_v40  ;;  %s11704_s28 = smov 96  }
  0xee   : > { %8364 = vmatpush1.bf16.msra.mxu1 %v8363_v41  ;;  %v9331_v45 = vpop.permute.xlu1 %9330  ;;  %v1269_v50 = vsel %vm1267_vm6, %v9318_v43, %v9322_v42  ;;  %v1268_v51 = vsel %vm1267_vm6, %v9317_v44, %v9318_v43 }
  0xef   : > { %v9326_v46 = vpop.permute.xlu0 %9325  ;;  %v9333_v52 = vunpack.i.h.bf16 %v9331_v45  ;;  %v9332_v53 = vunpack.i.l.bf16 %v9331_v45 }
  0xf0   : > { %v9328_v48 = vunpack.i.h.bf16 %v9326_v46  ;;  %v9327_v49 = vunpack.i.l.bf16 %v9326_v46  ;;  %9620 = vrot.lane.b32.xlu1 %v11892_v20, %s11695_s15 }
  0xf1   : > { %9615 = vrot.lane.b32.xlu0 %v11884_v16, %s11695_s15  ;;  %v1272_v3 = vsel %vm1267_vm6, %v9332_v53, %v9333_v52 }
  0xf2   : > { %v9341_v54 = vpop.permute.xlu1 %9340  ;;  %v1271_v55 = vsel %vm1267_vm6, %v9327_v49, %v9328_v48  ;;  %v1270_v56 = vsel %vm1267_vm6, %v9323_v47, %v9327_v49  ;;  %v11538_v49 = vld [vmem:[%s11871_s29] sm:$0xff] }
  0xf3   : > { %v9343_v57 = vunpack.i.h.bf16 %v9341_v54  ;;  %v9342_v58 = vunpack.i.l.bf16 %v9341_v54  ;;  %v9336_v59 = vpop.permute.xlu0 %9335  ;;  %v8365_v60 = vpack.c.bf16 %v1271_v55, %v1269_v50  ;;  %v8367_v61 = vpack.c.bf16 %v1270_v56, %v1268_v51  ;;  %v11539_v50 = vld [vmem:[%s11871_s29 + $0x8] sm:$0xff] }
  0xf4   : > { %v9338_v62 = vunpack.i.h.bf16 %v9336_v59  ;;  %v9337_v63 = vunpack.i.l.bf16 %v9336_v59  ;;  %9630 = vrot.lane.b32.xlu1 %v11888_v18, %s11695_s15  ;;  %v12138_v51 = vpack.i.bf16 %v11539_v50, %v11538_v49 }
  0xf5   : > { %9625 = vrot.lane.b32.xlu0 %v11879_v12, %s11695_s15  ;;  %8366 = vmatprep.subr.bf16.mxu1 %v8365_v60  ;;  %v1275_v0 = vsel %vm1267_vm6, %v9342_v58, %v9343_v57  ;;  %v11540_v57 = vld [vmem:[%s11871_s29 + $0x20] sm:$0xff]  ;;  %v11542_v60 = vld [vmem:[%s11871_s29 + $0x18] sm:$0xff] }
  0xf6   : > { %8368 = vmatpush1.bf16.msra.mxu1 %v8367_v61  ;;  %v9351_v1 = vpop.permute.xlu1 %9350  ;;  %v1273_v2 = vsel %vm1267_vm6, %v9333_v52, %v9337_v63  ;;  %v1274_v4 = vsel %vm1267_vm6, %v9338_v62, %v9342_v58  ;;  %v11543_v61 = vld [vmem:[%s11876_s30 + $0x8] sm:$0xff]  ;;  %vm2435_vm6 = vcmask 809984  }
  0xf7   : > { %v9346_v5 = vpop.permute.xlu0 %9345  ;;  %v8369_v6 = vpack.c.bf16 %v1275_v0, %v1273_v2  ;;  %v8371_v7 = vpack.c.bf16 %v1274_v4, %v1272_v3  ;;  %v9352_v8 = vunpack.i.l.bf16 %v9351_v1  ;;  %v12151_v62 = vpack.i.bf16 %v11543_v61, %v11542_v60 }
  0xf8   : > { %9640 = vrot.lane.b32.xlu1 %v11901_v24, %s11695_s15  ;;  %v9348_v9 = vunpack.i.h.bf16 %v9346_v5  ;;  %v9347_v10 = vunpack.i.l.bf16 %v9346_v5  ;;  %v9353_v24 = vunpack.i.h.bf16 %v9351_v1 }
  0xf9   : > { %9635 = vrot.lane.b32.xlu0 %v11904_v25, %s11695_s15  ;;  %8370 = vmatprep.subr.bf16.mxu1 %v8369_v6  ;;  %s11705_s15 = smov 92  }
  0xfa   : > { %8372 = vmatpush1.bf16.msra.mxu1 %v8371_v7  ;;  %v9361_v11 = vpop.permute.xlu1 %9360  ;;  %v1341_v22 = vsel %vm1340_vm7, %v9347_v10, %v9348_v9  ;;  %v1342_v23 = vsel %vm1340_vm7, %v9348_v9, %v9352_v8 }
  0xfb   : > { %v9356_v14 = vpop.permute.xlu0 %9355  ;;  %v9363_v26 = vunpack.i.h.bf16 %v9361_v11  ;;  %v9362_v27 = vunpack.i.l.bf16 %v9361_v11 }
  0xfc   : > { %v9358_v17 = vunpack.i.h.bf16 %v9356_v14  ;;  %v9357_v19 = vunpack.i.l.bf16 %v9356_v14  ;;  %9650 = vrot.lane.b32.xlu1 %v11892_v20, %s11696_s9 }
  0xfd   : > { %9645 = vrot.lane.b32.xlu0 %v11884_v16, %s11696_s9  ;;  %7364 = vmatmul.mubr.f32.vlgmr.msra.gmra.mrb[0].mxu1 %v6621_v13  ;;  %v11535_v16 = vld [vmem:[%s11871_s29 + $0x38] sm:$0xff]  ;;  %v1345_v39 = vsel %vm1340_vm7, %v9362_v27, %v9363_v26 }
  0xfe   : > { %v1343_v28 = vsel %vm1340_vm7, %v9353_v24, %v9357_v19  ;;  %v9371_v29 = vpop.permute.xlu1 %9370  ;;  %v1344_v30 = vsel %vm1340_vm7, %v9357_v19, %v9358_v17  ;;  %7434 = vmatprep.mubr.f32.mxu1 %v6624_v15  ;;  %v9669_v37 = vpack.i.bf16 %v11895_v21, %v11535_v16  ;;  %v11536_v21 = vld [vmem:[%s11871_s29 + $0x10] sm:$0xff]  ;;  %v12159_v13 = vld [vmem:[%s11876_s30 + $0x18] sm:$0xff] }
  0xff   : > { %v9373_v31 = vunpack.i.h.bf16 %v9371_v29  ;;  %v9372_v32 = vunpack.i.l.bf16 %v9371_v29  ;;  %v9366_v20 = vpop.permute.xlu0 %9365  ;;  %v8373_v33 = vpack.c.bf16 %v1344_v30, %v1342_v23  ;;  %v8375_v34 = vpack.c.bf16 %v1343_v28, %v1341_v22  ;;  %v11545_v15 = vld [vmem:[%s11871_s29 + $0x30] sm:$0xff] }
 0x100   : > { %v9368_v35 = vunpack.i.h.bf16 %v9366_v20  ;;  %v9367_v36 = vunpack.i.l.bf16 %v9366_v20  ;;  %9660 = vrot.lane.b32.xlu1 %v11888_v18, %s11696_s9  ;;  %v12162_v14 = vpack.i.bf16 %v12159_v13, %v11535_v16  ;;  %v11546_v24 = vld [vmem:[%s11876_s30 + $0x10] sm:$0xff] }
 0x101   : > { %9655 = vrot.lane.b32.xlu0 %v11879_v12, %s11696_s9  ;;  %8374 = vmatprep.subr.bf16.mxu1 %v8373_v33  ;;  %v1348_v38 = vsel %vm1340_vm7, %v9372_v32, %v9373_v31  ;;  %v11537_v12 = vld [vmem:[%s11876_s30] sm:$0xff]  ;;  %v12168_v17 = vpack.i.bf16 %v11545_v15, %v11546_v24 }
 0x102   : > { %v1347_v40 = vsel %vm1340_vm7, %v9368_v35, %v9372_v32  ;;  %8376 = vmatpush1.bf16.msra.mxu1 %v8375_v34  ;;  %v9381_v41 = vpop.permute.xlu1 %9380  ;;  %v1346_v18 = vsel %vm1340_vm7, %v9363_v26, %v9367_v36  ;;  %v12132_v45 = vpack.i.bf16 %v11536_v21, %v11537_v12  ;;  %vm2508_vm7 = vcmask 801792  }
 0x103   : > { %v9376_v42 = vpop.permute.xlu0 %9375  ;;  %v8377_v43 = vpack.c.bf16 %v1348_v38, %v1346_v18  ;;  %v8379_v44 = vpack.c.bf16 %v1347_v40, %v1345_v39  ;;  %v9382_v46 = vunpack.i.l.bf16 %v9381_v41  ;;  %v9383_v54 = vunpack.i.h.bf16 %v9381_v41 }
 0x104   : > { %9670 = vrot.lane.b32.xlu1 %v9669_v37, %s11696_s9  ;;  %v9378_v47 = vunpack.i.h.bf16 %v9376_v42  ;;  %v9377_v48 = vunpack.i.l.bf16 %v9376_v42 }
 0x105   : > { %9665 = vrot.lane.b32.xlu0 %v11904_v25, %s11696_s9  ;;  %8378 = vmatprep.subr.bf16.mxu1 %v8377_v43  ;;  %v11541_v25 = vld [vmem:[%s11871_s29 + $0x28] sm:$0xff]  ;;  %s11710_s9 = smov 87  }
 0x106   : > { %8380 = vmatpush1.bf16.msra.mxu1 %v8379_v44  ;;  %v9391_v52 = vpop.permute.xlu1 %9390  ;;  %v12144_v58 = vpack.i.bf16 %v11541_v25, %v11540_v57  ;;  %v1414_v59 = vsel %vm1413_vm8, %v9377_v48, %v9378_v47  ;;  %v1415_v63 = vsel %vm1413_vm8, %v9378_v47, %v9382_v46 }
 0x107   : > { %v9386_v53 = vpop.permute.xlu0 %9385  ;;  %v9393_v0 = vunpack.i.h.bf16 %v9391_v52  ;;  %v9392_v1 = vunpack.i.l.bf16 %v9391_v52 }
 0x108   : > { %v9388_v55 = vunpack.i.h.bf16 %v9386_v53  ;;  %v9387_v56 = vunpack.i.l.bf16 %v9386_v53  ;;  %9680 = vrot.lane.b32.xlu1 %v12132_v45, %s11697_s10 }
 0x109   : > { %9675 = vrot.lane.b32.xlu0 %v12138_v51, %s11697_s10  ;;  %v1418_v22 = vsel %vm1413_vm8, %v9392_v1, %v9393_v0 }
 0x10a   : > { %v1416_v2 = vsel %vm1413_vm8, %v9383_v54, %v9387_v56  ;;  %v9401_v3 = vpop.permute.xlu1 %9400  ;;  %v1417_v4 = vsel %vm1413_vm8, %v9387_v56, %v9388_v55 }
 0x10b   : > { %v9403_v5 = vunpack.i.h.bf16 %v9401_v3  ;;  %v9402_v6 = vunpack.i.l.bf16 %v9401_v3  ;;  %v9396_v7 = vpop.permute.xlu0 %9395  ;;  %v8381_v8 = vpack.c.bf16 %v1417_v4, %v1415_v63  ;;  %v8383_v9 = vpack.c.bf16 %v1416_v2, %v1414_v59 }
 0x10c   : > { %v9398_v10 = vunpack.i.h.bf16 %v9396_v7  ;;  %v9397_v11 = vunpack.i.l.bf16 %v9396_v7  ;;  %9690 = vrot.lane.b32.xlu1 %v12144_v58, %s11697_s10 }
 0x10d   : > { %9685 = vrot.lane.b32.xlu0 %v12151_v62, %s11697_s10  ;;  %8382 = vmatprep.subr.bf16.mxu1 %v8381_v8  ;;  %v1421_v19 = vsel %vm1413_vm8, %v9402_v6, %v9403_v5 }
 0x10e   : > { %v1420_v23 = vsel %vm1413_vm8, %v9398_v10, %v9402_v6  ;;  %8384 = vmatpush1.bf16.msra.mxu1 %v8383_v9  ;;  %v9411_v26 = vpop.permute.xlu1 %9410  ;;  %v1419_v27 = vsel %vm1413_vm8, %v9393_v0, %v9397_v11  ;;  %vm2581_vm8 = vcmask 793600  }
 0x10f   : > { %v9406_v28 = vpop.permute.xlu0 %9405  ;;  %v8385_v29 = vpack.c.bf16 %v1421_v19, %v1419_v27  ;;  %v8387_v30 = vpack.c.bf16 %v1420_v23, %v1418_v22  ;;  %v9412_v31 = vunpack.i.l.bf16 %v9411_v26  ;;  %v9413_v35 = vunpack.i.h.bf16 %v9411_v26 }
 0x110   : > { %9700 = vrot.lane.b32.xlu1 %v12162_v14, %s11697_s10  ;;  %v9408_v32 = vunpack.i.h.bf16 %v9406_v28  ;;  %v9407_v20 = vunpack.i.l.bf16 %v9406_v28 }
 0x111   : > { %9695 = vrot.lane.b32.xlu0 %v12168_v17, %s11697_s10  ;;  %8386 = vmatprep.subr.bf16.mxu1 %v8385_v29  ;;  %s11711_s10 = smov 86  }
 0x112   : > { %8388 = vmatpush1.bf16.msra.mxu1 %v8387_v30  ;;  %v9421_v33 = vpop.permute.xlu1 %9420  ;;  %v1487_v37 = vsel %vm1486_vm9, %v9407_v20, %v9408_v32  ;;  %v1488_v38 = vsel %vm1486_vm9, %v9408_v32, %v9412_v31 }
 0x113   : > { %v9416_v34 = vpop.permute.xlu0 %9415  ;;  %v9423_v39 = vunpack.i.h.bf16 %v9421_v33  ;;  %v9422_v40 = vunpack.i.l.bf16 %v9421_v33 }
 0x114   : > { %v9418_v36 = vunpack.i.h.bf16 %v9416_v34  ;;  %v9417_v16 = vunpack.i.l.bf16 %v9416_v34  ;;  %9710 = vrot.lane.b32.xlu1 %v12132_v45, %s11698_s11 }
 0x115   : > { %9705 = vrot.lane.b32.xlu0 %v12138_v51, %s11698_s11  ;;  %v1491_v50 = vsel %vm1486_vm9, %v9422_v40, %v9423_v39 }
 0x116   : > { %v1489_v41 = vsel %vm1486_vm9, %v9413_v35, %v9417_v16  ;;  %v9431_v18 = vpop.permute.xlu1 %9430  ;;  %v1490_v42 = vsel %vm1486_vm9, %v9417_v16, %v9418_v36 }
 0x117   : > { %v9433_v43 = vunpack.i.h.bf16 %v9431_v18  ;;  %v9432_v44 = vunpack.i.l.bf16 %v9431_v18  ;;  %v9426_v21 = vpop.permute.xlu0 %9425  ;;  %v8389_v12 = vpack.c.bf16 %v1490_v42, %v1488_v38  ;;  %v8391_v46 = vpack.c.bf16 %v1489_v41, %v1487_v37 }
 0x118   : > { %v9428_v47 = vunpack.i.h.bf16 %v9426_v21  ;;  %v9427_v48 = vunpack.i.l.bf16 %v9426_v21  ;;  %9720 = vrot.lane.b32.xlu1 %v12144_v58, %s11698_s11 }
 0x119   : > { %9715 = vrot.lane.b32.xlu0 %v12151_v62, %s11698_s11  ;;  %8390 = vmatprep.subr.bf16.mxu1 %v8389_v12  ;;  %v1494_v49 = vsel %vm1486_vm9, %v9432_v44, %v9433_v43 }
 0x11a   : > { %v1493_v52 = vsel %vm1486_vm9, %v9428_v47, %v9432_v44  ;;  %8392 = vmatpush1.bf16.msra.mxu1 %v8391_v46  ;;  %v9441_v53 = vpop.permute.xlu1 %9440  ;;  %v1492_v54 = vsel %vm1486_vm9, %v9423_v39, %v9427_v48  ;;  %vm2654_vm9 = vcmask 785408  }
 0x11b   : > { %v9436_v55 = vpop.permute.xlu0 %9435  ;;  %v8393_v56 = vpack.c.bf16 %v1494_v49, %v1492_v54  ;;  %v8395_v57 = vpack.c.bf16 %v1493_v52, %v1491_v50  ;;  %v9442_v25 = vunpack.i.l.bf16 %v9441_v53  ;;  %v9443_v0 = vunpack.i.h.bf16 %v9441_v53 }
 0x11c   : > { %9730 = vrot.lane.b32.xlu1 %v12162_v14, %s11698_s11  ;;  %v9438_v59 = vunpack.i.h.bf16 %v9436_v55  ;;  %v9437_v60 = vunpack.i.l.bf16 %v9436_v55 }
 0x11d   : > { %9725 = vrot.lane.b32.xlu0 %v12168_v17, %s11698_s11  ;;  %8394 = vmatprep.subr.bf16.mxu1 %v8393_v56  ;;  %s11724_s11 = smov 67  }
 0x11e   : > { %8396 = vmatpush1.bf16.msra.mxu1 %v8395_v57  ;;  %v9451_v61 = vpop.permute.xlu1 %9450  ;;  %v1560_v3 = vsel %vm1559_vm10, %v9437_v60, %v9438_v59  ;;  %v1561_v4 = vsel %vm1559_vm10, %v9438_v59, %v9442_v25 }
 0x11f   : > { %v9446_v63 = vpop.permute.xlu0 %9445  ;;  %v9453_v5 = vunpack.i.h.bf16 %v9451_v61  ;;  %v9452_v6 = vunpack.i.l.bf16 %v9451_v61 }
 0x120   : > { %v9448_v1 = vunpack.i.h.bf16 %v9446_v63  ;;  %v9447_v2 = vunpack.i.l.bf16 %v9446_v63  ;;  %9740 = vrot.lane.b32.xlu1 %v12132_v45, %s11699_s12 }
 0x121   : > { %9735 = vrot.lane.b32.xlu0 %v12138_v51, %s11699_s12  ;;  %v1564_v27 = vsel %vm1559_vm10, %v9452_v6, %v9453_v5 }
 0x122   : > { %v1562_v7 = vsel %vm1559_vm10, %v9443_v0, %v9447_v2  ;;  %v9461_v8 = vpop.permute.xlu1 %9460  ;;  %v1563_v9 = vsel %vm1559_vm10, %v9447_v2, %v9448_v1 }
 0x123   : > { %v9463_v10 = vunpack.i.h.bf16 %v9461_v8  ;;  %v9462_v11 = vunpack.i.l.bf16 %v9461_v8  ;;  %v9456_v15 = vpop.permute.xlu0 %9455  ;;  %v8397_v24 = vpack.c.bf16 %v1563_v9, %v1561_v4  ;;  %v8399_v19 = vpack.c.bf16 %v1562_v7, %v1560_v3 }
 0x124   : > { %v9458_v22 = vunpack.i.h.bf16 %v9456_v15  ;;  %v9457_v23 = vunpack.i.l.bf16 %v9456_v15  ;;  %9750 = vrot.lane.b32.xlu1 %v12144_v58, %s11699_s12 }
 0x125   : > { %9745 = vrot.lane.b32.xlu0 %v12151_v62, %s11699_s12  ;;  %8398 = vmatprep.subr.bf16.mxu1 %v8397_v24  ;;  %v1567_v26 = vsel %vm1559_vm10, %v9462_v11, %v9463_v10 }
 0x126   : > { %v1566_v28 = vsel %vm1559_vm10, %v9458_v22, %v9462_v11  ;;  %8400 = vmatpush1.bf16.msra.mxu1 %v8399_v19  ;;  %v9471_v29 = vpop.permute.xlu1 %9470  ;;  %v1565_v30 = vsel %vm1559_vm10, %v9453_v5, %v9457_v23  ;;  %vm2727_vm10 = vcmask 752640  }
 0x127   : > { %v9466_v31 = vpop.permute.xlu0 %9465  ;;  %v8401_v32 = vpack.c.bf16 %v1567_v26, %v1565_v30  ;;  %v8403_v20 = vpack.c.bf16 %v1566_v28, %v1564_v27  ;;  %v9472_v33 = vunpack.i.l.bf16 %v9471_v29  ;;  %v9473_v37 = vunpack.i.h.bf16 %v9471_v29 }
 0x128   : > { %9760 = vrot.lane.b32.xlu1 %v12162_v14, %s11699_s12  ;;  %v9468_v34 = vunpack.i.h.bf16 %v9466_v31  ;;  %v9467_v35 = vunpack.i.l.bf16 %v9466_v31 }
 0x129   : > { %9755 = vrot.lane.b32.xlu0 %v12168_v17, %s11699_s12  ;;  %8402 = vmatprep.subr.bf16.mxu1 %v8401_v32  ;;  %s11725_s12 = smov 66  }
 0x12a   : > { %8404 = vmatpush1.bf16.msra.mxu1 %v8403_v20  ;;  %v9481_v36 = vpop.permute.xlu1 %9480  ;;  %v1633_v40 = vsel %vm1632_vm11, %v9467_v35, %v9468_v34  ;;  %v1634_v41 = vsel %vm1632_vm11, %v9468_v34, %v9472_v33 }
 0x12b   : > { %v9476_v16 = vpop.permute.xlu0 %9475  ;;  %v9483_v18 = vunpack.i.h.bf16 %v9481_v36  ;;  %v9482_v42 = vunpack.i.l.bf16 %v9481_v36 }
 0x12c   : > { %v9478_v38 = vunpack.i.h.bf16 %v9476_v16  ;;  %v9477_v39 = vunpack.i.l.bf16 %v9476_v16  ;;  %9770 = vrot.lane.b32.xlu1 %v12132_v45, %s11700_s13 }
 0x12d   : > { %9765 = vrot.lane.b32.xlu0 %v12138_v51, %s11700_s13  ;;  %v1637_v54 = vsel %vm1632_vm11, %v9482_v42, %v9483_v18 }
 0x12e   : > { %v1635_v43 = vsel %vm1632_vm11, %v9473_v37, %v9477_v39  ;;  %v9491_v44 = vpop.permute.xlu1 %9490  ;;  %v1636_v21 = vsel %vm1632_vm11, %v9477_v39, %v9478_v38 }
 0x12f   : > { %v9493_v12 = vunpack.i.h.bf16 %v9491_v44  ;;  %v9492_v46 = vunpack.i.l.bf16 %v9491_v44  ;;  %v9486_v47 = vpop.permute.xlu0 %9485  ;;  %v8405_v48 = vpack.c.bf16 %v1636_v21, %v1634_v41  ;;  %v8407_v49 = vpack.c.bf16 %v1635_v43, %v1633_v40 }
 0x130   : > { %v9488_v50 = vunpack.i.h.bf16 %v9486_v47  ;;  %v9487_v52 = vunpack.i.l.bf16 %v9486_v47  ;;  %9780 = vrot.lane.b32.xlu1 %v12144_v58, %s11700_s13 }
 0x131   : > { %9775 = vrot.lane.b32.xlu0 %v12151_v62, %s11700_s13  ;;  %8406 = vmatprep.subr.bf16.mxu1 %v8405_v48  ;;  %v1640_v53 = vsel %vm1632_vm11, %v9492_v46, %v9493_v12 }
 0x132   : > { %v1639_v55 = vsel %vm1632_vm11, %v9488_v50, %v9492_v46  ;;  %8408 = vmatpush1.bf16.msra.mxu1 %v8407_v49  ;;  %v9501_v56 = vpop.permute.xlu1 %9500  ;;  %v1638_v57 = vsel %vm1632_vm11, %v9483_v18, %v9487_v52  ;;  %vm2800_vm11 = vcmask 744448  }
 0x133   : > { %v9496_v25 = vpop.permute.xlu0 %9495  ;;  %v8409_v59 = vpack.c.bf16 %v1640_v53, %v1638_v57  ;;  %v8411_v60 = vpack.c.bf16 %v1639_v55, %v1637_v54  ;;  %v9502_v61 = vunpack.i.l.bf16 %v9501_v56  ;;  %v9503_v3 = vunpack.i.h.bf16 %v9501_v56 }
 0x134   : > { %9790 = vrot.lane.b32.xlu1 %v12162_v14, %s11700_s13  ;;  %v9498_v63 = vunpack.i.h.bf16 %v9496_v25  ;;  %v9497_v0 = vunpack.i.l.bf16 %v9496_v25 }
 0x135   : > { %9785 = vrot.lane.b32.xlu0 %v12168_v17, %s11700_s13  ;;  %8410 = vmatprep.subr.bf16.mxu1 %v8409_v59  ;;  %s11748_s13 = smov 37  }
 0x136   : > { %8412 = vmatpush1.bf16.msra.mxu1 %v8411_v60  ;;  %v9511_v1 = vpop.permute.xlu1 %9510  ;;  %v1706_v6 = vsel %vm1705_vm12, %v9497_v0, %v9498_v63  ;;  %v1707_v7 = vsel %vm1705_vm12, %v9498_v63, %v9502_v61 }
 0x137   : > { %v9506_v2 = vpop.permute.xlu0 %9505  ;;  %v9513_v8 = vunpack.i.h.bf16 %v9511_v1  ;;  %v9512_v9 = vunpack.i.l.bf16 %v9511_v1 }
 0x138   : > { %v9508_v4 = vunpack.i.h.bf16 %v9506_v2  ;;  %v9507_v5 = vunpack.i.l.bf16 %v9506_v2  ;;  %9800 = vrot.lane.b32.xlu1 %v12132_v45, %s11701_s14 }
 0x139   : > { %9795 = vrot.lane.b32.xlu0 %v12138_v51, %s11701_s14  ;;  %v1710_v30 = vsel %vm1705_vm12, %v9512_v9, %v9513_v8 }
 0x13a   : > { %v1708_v10 = vsel %vm1705_vm12, %v9503_v3, %v9507_v5  ;;  %v9521_v11 = vpop.permute.xlu1 %9520  ;;  %v1709_v15 = vsel %vm1705_vm12, %v9507_v5, %v9508_v4 }
 0x13b   : > { %v9523_v24 = vunpack.i.h.bf16 %v9521_v11  ;;  %v9522_v19 = vunpack.i.l.bf16 %v9521_v11  ;;  %v9516_v22 = vpop.permute.xlu0 %9515  ;;  %v8413_v23 = vpack.c.bf16 %v1709_v15, %v1707_v7  ;;  %v8415_v26 = vpack.c.bf16 %v1708_v10, %v1706_v6 }
 0x13c   : > { %v9518_v27 = vunpack.i.h.bf16 %v9516_v22  ;;  %v9517_v28 = vunpack.i.l.bf16 %v9516_v22  ;;  %9810 = vrot.lane.b32.xlu1 %v12144_v58, %s11701_s14 }
 0x13d   : > { %9805 = vrot.lane.b32.xlu0 %v12151_v62, %s11701_s14  ;;  %8414 = vmatprep.subr.bf16.mxu1 %v8413_v23  ;;  %v1713_v29 = vsel %vm1705_vm12, %v9522_v19, %v9523_v24 }
 0x13e   : > { %v1712_v31 = vsel %vm1705_vm12, %v9518_v27, %v9522_v19  ;;  %8416 = vmatpush1.bf16.msra.mxu1 %v8415_v26  ;;  %v9531_v32 = vpop.permute.xlu1 %9530  ;;  %v1711_v20 = vsel %vm1705_vm12, %v9513_v8, %v9517_v28  ;;  %vm2873_vm12 = vcmask 736256  }
 0x13f   : > { %v9526_v33 = vpop.permute.xlu0 %9525  ;;  %v8417_v34 = vpack.c.bf16 %v1713_v29, %v1711_v20  ;;  %v8419_v35 = vpack.c.bf16 %v1712_v31, %v1710_v30  ;;  %v9532_v36 = vunpack.i.l.bf16 %v9531_v32  ;;  %v9533_v40 = vunpack.i.h.bf16 %v9531_v32 }
 0x140   : > { %9820 = vrot.lane.b32.xlu1 %v12162_v14, %s11701_s14  ;;  %v9528_v16 = vunpack.i.h.bf16 %v9526_v33  ;;  %v9527_v37 = vunpack.i.l.bf16 %v9526_v33 }
 0x141   : > { %9815 = vrot.lane.b32.xlu0 %v12168_v17, %s11701_s14  ;;  %8418 = vmatprep.subr.bf16.mxu1 %v8417_v34  ;;  %s11750_s14 = smov 36  }
 0x142   : > { %8420 = vmatpush1.bf16.msra.mxu1 %v8419_v35  ;;  %v9541_v38 = vpop.permute.xlu1 %9540  ;;  %v1779_v42 = vsel %vm1778_vm13, %v9527_v37, %v9528_v16  ;;  %v1780_v43 = vsel %vm1778_vm13, %v9528_v16, %v9532_v36 }
 0x143   : > { %v9536_v39 = vpop.permute.xlu0 %9535  ;;  %v9543_v44 = vunpack.i.h.bf16 %v9541_v38  ;;  %v9542_v21 = vunpack.i.l.bf16 %v9541_v38 }
 0x144   : > { %v9538_v41 = vunpack.i.h.bf16 %v9536_v39  ;;  %v9537_v18 = vunpack.i.l.bf16 %v9536_v39  ;;  %9830 = vrot.lane.b32.xlu1 %v12132_v45, %s11702_s22 }
 0x145   : > { %9825 = vrot.lane.b32.xlu0 %v12138_v51, %s11702_s22  ;;  %v1783_v57 = vsel %vm1778_vm13, %v9542_v21, %v9543_v44 }
 0x146   : > { %v1781_v12 = vsel %vm1778_vm13, %v9533_v40, %v9537_v18  ;;  %v9551_v46 = vpop.permute.xlu1 %9550  ;;  %v1782_v47 = vsel %vm1778_vm13, %v9537_v18, %v9538_v41  ;;  %v6623_v18 = vld [vmem:[%s13712_s2 + $0x10] sm:$0xff] }
 0x147   : > { %v9553_v48 = vunpack.i.h.bf16 %v9551_v46  ;;  %v9552_v49 = vunpack.i.l.bf16 %v9551_v46  ;;  %v9546_v50 = vpop.permute.xlu0 %9545  ;;  %v8421_v52 = vpack.c.bf16 %v1782_v47, %v1780_v43  ;;  %v8423_v53 = vpack.c.bf16 %v1781_v12, %v1779_v42  ;;  %v6626_v43 = vld [vmem:[%s13712_s2 + $0x28] sm:$0xff] }
 0x148   : > { %v9548_v54 = vunpack.i.h.bf16 %v9546_v50  ;;  %v9547_v55 = vunpack.i.l.bf16 %v9546_v50  ;;  %9840 = vrot.lane.b32.xlu1 %v12144_v58, %s11702_s22 }
 0x149   : > { %9835 = vrot.lane.b32.xlu0 %v12151_v62, %s11702_s22  ;;  %8422 = vmatprep.subr.bf16.mxu1 %v8421_v52  ;;  %v1786_v56 = vsel %vm1778_vm13, %v9552_v49, %v9553_v48 }
 0x14a   : > { %v1785_v25 = vsel %vm1778_vm13, %v9548_v54, %v9552_v49  ;;  %8424 = vmatpush1.bf16.msra.mxu1 %v8423_v53  ;;  %v9561_v59 = vpop.permute.xlu1 %9560  ;;  %v1784_v60 = vsel %vm1778_vm13, %v9543_v44, %v9547_v55  ;;  %vm2946_vm13 = vcmask 728064  }
 0x14b   : > { %v9556_v61 = vpop.permute.xlu0 %9555  ;;  %v8425_v63 = vpack.c.bf16 %v1786_v56, %v1784_v60  ;;  %v8427_v0 = vpack.c.bf16 %v1785_v25, %v1783_v57  ;;  %v9562_v1 = vunpack.i.l.bf16 %v9561_v59  ;;  %v9563_v6 = vunpack.i.h.bf16 %v9561_v59 }
 0x14c   : > { %9850 = vrot.lane.b32.xlu1 %v12162_v14, %s11702_s22  ;;  %v9558_v2 = vunpack.i.h.bf16 %v9556_v61  ;;  %v9557_v3 = vunpack.i.l.bf16 %v9556_v61 }
 0x14d   : > { %9845 = vrot.lane.b32.xlu0 %v12168_v17, %s11702_s22  ;;  %8426 = vmatprep.subr.bf16.mxu1 %v8425_v63  ;;  %s11712_s22 = smov 85  }
 0x14e   : > { %8428 = vmatpush1.bf16.msra.mxu1 %v8427_v0  ;;  %v9571_v4 = vpop.permute.xlu1 %9570  ;;  %v1852_v9 = vsel %vm1851_vm14, %v9557_v3, %v9558_v2  ;;  %v1853_v10 = vsel %vm1851_vm14, %v9558_v2, %v9562_v1 }
 0x14f   : > { %v9566_v5 = vpop.permute.xlu0 %9565  ;;  %v9573_v11 = vunpack.i.h.bf16 %v9571_v4  ;;  %v9572_v15 = vunpack.i.l.bf16 %v9571_v4 }
 0x150   : > { %v9568_v7 = vunpack.i.h.bf16 %v9566_v5  ;;  %v9567_v8 = vunpack.i.l.bf16 %v9566_v5  ;;  %9860 = vrot.lane.b32.xlu1 %v12132_v45, %s11703_s23 }
 0x151   : > { %9855 = vrot.lane.b32.xlu0 %v12138_v51, %s11703_s23  ;;  %v1856_v20 = vsel %vm1851_vm14, %v9572_v15, %v9573_v11 }
 0x152   : > { %v1854_v24 = vsel %vm1851_vm14, %v9563_v6, %v9567_v8  ;;  %v9581_v19 = vpop.permute.xlu1 %9580  ;;  %v1855_v22 = vsel %vm1851_vm14, %v9567_v8, %v9568_v7 }
 0x153   : > { %v9583_v23 = vunpack.i.h.bf16 %v9581_v19  ;;  %v9582_v26 = vunpack.i.l.bf16 %v9581_v19  ;;  %v9576_v27 = vpop.permute.xlu0 %9575  ;;  %v8429_v28 = vpack.c.bf16 %v1855_v22, %v1853_v10  ;;  %v8431_v29 = vpack.c.bf16 %v1854_v24, %v1852_v9 }
 0x154   : > { %v9578_v30 = vunpack.i.h.bf16 %v9576_v27  ;;  %v9577_v31 = vunpack.i.l.bf16 %v9576_v27  ;;  %9870 = vrot.lane.b32.xlu1 %v12144_v58, %s11703_s23 }
 0x155   : > { %9865 = vrot.lane.b32.xlu0 %v12151_v62, %s11703_s23  ;;  %8430 = vmatprep.subr.bf16.mxu1 %v8429_v28  ;;  %v1859_v32 = vsel %vm1851_vm14, %v9582_v26, %v9583_v23 }
 0x156   : > { %v1858_v33 = vsel %vm1851_vm14, %v9578_v30, %v9582_v26  ;;  %8432 = vmatpush1.bf16.msra.mxu1 %v8431_v29  ;;  %v9591_v34 = vpop.permute.xlu1 %9590  ;;  %v1857_v35 = vsel %vm1851_vm14, %v9573_v11, %v9577_v31  ;;  %vm3019_vm14 = vcmask 719872  }
 0x157   : > { %v9586_v36 = vpop.permute.xlu0 %9585  ;;  %v8433_v16 = vpack.c.bf16 %v1859_v32, %v1857_v35  ;;  %v8435_v37 = vpack.c.bf16 %v1858_v33, %v1856_v20  ;;  %v9592_v38 = vunpack.i.l.bf16 %v9591_v34  ;;  %v9593_v44 = vunpack.i.h.bf16 %v9591_v34 }
 0x158   : > { %9880 = vrot.lane.b32.xlu1 %v12162_v14, %s11703_s23  ;;  %v9588_v39 = vunpack.i.h.bf16 %v9586_v36  ;;  %v9587_v40 = vunpack.i.l.bf16 %v9586_v36 }
 0x159   : > { %9875 = vrot.lane.b32.xlu0 %v12168_v17, %s11703_s23  ;;  %8434 = vmatprep.subr.bf16.mxu1 %v8433_v16  ;;  %s11713_s23 = smov 84  }
 0x15a   : > { %8436 = vmatpush1.bf16.msra.mxu1 %v8435_v37  ;;  %v9601_v41 = vpop.permute.xlu1 %9600  ;;  %v1925_v46 = vsel %vm1924_vm15, %v9587_v40, %v9588_v39  ;;  %v1926_v47 = vsel %vm1924_vm15, %v9588_v39, %v9592_v38 }
 0x15b   : > { %v9596_v42 = vpop.permute.xlu0 %9595  ;;  %v9603_v48 = vunpack.i.h.bf16 %v9601_v41  ;;  %v9602_v49 = vunpack.i.l.bf16 %v9601_v41 }
 0x15c   : > { %v9598_v21 = vunpack.i.h.bf16 %v9596_v42  ;;  %v9597_v12 = vunpack.i.l.bf16 %v9596_v42  ;;  %9890 = vrot.lane.b32.xlu1 %v12132_v45, %s11704_s28 }
 0x15d   : > { %9885 = vrot.lane.b32.xlu0 %v12138_v51, %s11704_s28  ;;  %7435 = vmatmul.mubr.f32.vlgmr.msra.gmra.mrb[0].mxu1 %v6623_v18  ;;  %v1929_v63 = vsel %vm1924_vm15, %v9602_v49, %v9603_v48 }
 0x15e   : > { %v1927_v50 = vsel %vm1924_vm15, %v9593_v44, %v9597_v12  ;;  %v9611_v52 = vpop.permute.xlu1 %9610  ;;  %v1928_v53 = vsel %vm1924_vm15, %v9597_v12, %v9598_v21  ;;  %7505 = vmatprep.mubr.f32.mxu1 %v6626_v43 }
 0x15f   : > { %v9613_v54 = vunpack.i.h.bf16 %v9611_v52  ;;  %v9612_v55 = vunpack.i.l.bf16 %v9611_v52  ;;  %v9606_v56 = vpop.permute.xlu0 %9605  ;;  %v8437_v57 = vpack.c.bf16 %v1928_v53, %v1926_v47  ;;  %v8439_v25 = vpack.c.bf16 %v1927_v50, %v1925_v46 }
 0x160   : > { %v9608_v59 = vunpack.i.h.bf16 %v9606_v56  ;;  %v9607_v60 = vunpack.i.l.bf16 %v9606_v56  ;;  %9900 = vrot.lane.b32.xlu1 %v12144_v58, %s11704_s28 }
 0x161   : > { %9895 = vrot.lane.b32.xlu0 %v12151_v62, %s11704_s28  ;;  %8438 = vmatprep.subr.bf16.mxu1 %v8437_v57  ;;  %v1932_v61 = vsel %vm1924_vm15, %v9612_v55, %v9613_v54 }
 0x162   : > { %v1931_v0 = vsel %vm1924_vm15, %v9608_v59, %v9612_v55  ;;  %8440 = vmatpush1.bf16.msra.mxu1 %v8439_v25  ;;  %v9621_v1 = vpop.permute.xlu1 %9620  ;;  %v1930_v2 = vsel %vm1924_vm15, %v9603_v48, %v9607_v60  ;;  %vm3092_vm15 = vcmask 711680  }
 0x163   : > { %v9616_v3 = vpop.permute.xlu0 %9615  ;;  %v8441_v4 = vpack.c.bf16 %v1932_v61, %v1930_v2  ;;  %v8443_v5 = vpack.c.bf16 %v1931_v0, %v1929_v63  ;;  %v9622_v6 = vunpack.i.l.bf16 %v9621_v1  ;;  %v9623_v11 = vunpack.i.h.bf16 %v9621_v1 }
 0x164   : > { %9910 = vrot.lane.b32.xlu1 %v12162_v14, %s11704_s28  ;;  %v9618_v7 = vunpack.i.h.bf16 %v9616_v3  ;;  %v9617_v8 = vunpack.i.l.bf16 %v9616_v3 }
 0x165   : > { %9905 = vrot.lane.b32.xlu0 %v12168_v17, %s11704_s28  ;;  %8442 = vmatprep.subr.bf16.mxu1 %v8441_v4  ;;  %s11718_s28 = smov 76  }
 0x166   : > { %8444 = vmatpush1.bf16.msra.mxu1 %v8443_v5  ;;  %v9631_v9 = vpop.permute.xlu1 %9630  ;;  %v1998_v19 = vsel %vm1997_vm0, %v9617_v8, %v9618_v7  ;;  %v1999_v22 = vsel %vm1997_vm0, %v9618_v7, %v9622_v6 }
 0x167   : > { %v9626_v10 = vpop.permute.xlu0 %9625  ;;  %v9633_v23 = vunpack.i.h.bf16 %v9631_v9  ;;  %v9632_v26 = vunpack.i.l.bf16 %v9631_v9 }
 0x168   : > { %v9628_v15 = vunpack.i.h.bf16 %v9626_v10  ;;  %v9627_v24 = vunpack.i.l.bf16 %v9626_v10  ;;  %9920 = vrot.lane.b32.xlu1 %v12132_v45, %s11705_s15 }
 0x169   : > { %9915 = vrot.lane.b32.xlu0 %v12138_v51, %s11705_s15  ;;  %v2002_v16 = vsel %vm1997_vm0, %v9632_v26, %v9633_v23 }
 0x16a   : > { %v2000_v27 = vsel %vm1997_vm0, %v9623_v11, %v9627_v24  ;;  %v9641_v28 = vpop.permute.xlu1 %9640  ;;  %v2001_v29 = vsel %vm1997_vm0, %v9627_v24, %v9628_v15 }
 0x16b   : > { %v9643_v30 = vunpack.i.h.bf16 %v9641_v28  ;;  %v9642_v31 = vunpack.i.l.bf16 %v9641_v28  ;;  %v9636_v32 = vpop.permute.xlu0 %9635  ;;  %v8445_v20 = vpack.c.bf16 %v2001_v29, %v1999_v22  ;;  %v8447_v33 = vpack.c.bf16 %v2000_v27, %v1998_v19 }
 0x16c   : > { %v9638_v34 = vunpack.i.h.bf16 %v9636_v32  ;;  %v9637_v35 = vunpack.i.l.bf16 %v9636_v32  ;;  %9930 = vrot.lane.b32.xlu1 %v12144_v58, %s11705_s15 }
 0x16d   : > { %9925 = vrot.lane.b32.xlu0 %v12151_v62, %s11705_s15  ;;  %8446 = vmatprep.subr.bf16.mxu1 %v8445_v20  ;;  %v2005_v36 = vsel %vm1997_vm0, %v9642_v31, %v9643_v30 }
 0x16e   : > { %v2004_v37 = vsel %vm1997_vm0, %v9638_v34, %v9642_v31  ;;  %8448 = vmatpush1.bf16.msra.mxu1 %v8447_v33  ;;  %v9651_v38 = vpop.permute.xlu1 %9650  ;;  %v2003_v39 = vsel %vm1997_vm0, %v9633_v23, %v9637_v35  ;;  %vm3165_vm0 = vcmask 703488  }
 0x16f   : > { %v9646_v40 = vpop.permute.xlu0 %9645  ;;  %v8449_v41 = vpack.c.bf16 %v2005_v36, %v2003_v39  ;;  %v8451_v18 = vpack.c.bf16 %v2004_v37, %v2002_v16  ;;  %v9652_v42 = vunpack.i.l.bf16 %v9651_v38  ;;  %v9653_v46 = vunpack.i.h.bf16 %v9651_v38 }
 0x170   : > { %9940 = vrot.lane.b32.xlu1 %v12162_v14, %s11705_s15  ;;  %v9648_v43 = vunpack.i.h.bf16 %v9646_v40  ;;  %v9647_v44 = vunpack.i.l.bf16 %v9646_v40 }
 0x171   : > { %9935 = vrot.lane.b32.xlu0 %v12168_v17, %s11705_s15  ;;  %8450 = vmatprep.subr.bf16.mxu1 %v8449_v41  ;;  %s11719_s15 = smov 75  }
 0x172   : > { %8452 = vmatpush1.bf16.msra.mxu1 %v8451_v18  ;;  %v9661_v21 = vpop.permute.xlu1 %9660  ;;  %v2071_v49 = vsel %vm2070_vm1, %v9647_v44, %v9648_v43  ;;  %v2072_v50 = vsel %vm2070_vm1, %v9648_v43, %v9652_v42 }
 0x173   : > { %v9656_v12 = vpop.permute.xlu0 %9655  ;;  %v9663_v52 = vunpack.i.h.bf16 %v9661_v21  ;;  %v9662_v53 = vunpack.i.l.bf16 %v9661_v21 }
 0x174   : > { %v9658_v47 = vunpack.i.h.bf16 %v9656_v12  ;;  %v9657_v48 = vunpack.i.l.bf16 %v9656_v12  ;;  %9950 = vrot.lane.b32.xlu1 %v12132_v45, %s11706_s5 }
 0x175   : > { %9945 = vrot.lane.b32.xlu0 %v12138_v51, %s11706_s5  ;;  %v2075_v2 = vsel %vm2070_vm1, %v9662_v53, %v9663_v52 }
 0x176   : > { %v2073_v54 = vsel %vm2070_vm1, %v9653_v46, %v9657_v48  ;;  %v9671_v55 = vpop.permute.xlu1 %9670  ;;  %v2074_v56 = vsel %vm2070_vm1, %v9657_v48, %v9658_v47  ;;  %v11550_v46 = vld [vmem:[%s11871_s29] sm:$0xff]  ;;  %v11551_v47 = vld [vmem:[%s11871_s29 + $0x8] sm:$0xff] }
 0x177   : > { %v9673_v57 = vunpack.i.h.bf16 %v9671_v55  ;;  %v9672_v25 = vunpack.i.l.bf16 %v9671_v55  ;;  %v9666_v59 = vpop.permute.xlu0 %9665  ;;  %v8453_v60 = vpack.c.bf16 %v2074_v56, %v2072_v50  ;;  %v8455_v61 = vpack.c.bf16 %v2073_v54, %v2071_v49  ;;  %v11552_v55 = vld [vmem:[%s11871_s29 + $0x20] sm:$0xff] }
 0x178   : > { %v9668_v63 = vunpack.i.h.bf16 %v9666_v59  ;;  %v9667_v0 = vunpack.i.l.bf16 %v9666_v59  ;;  %9960 = vrot.lane.b32.xlu1 %v12144_v58, %s11706_s5  ;;  %v12391_v48 = vpack.i.bf16 %v11551_v47, %v11550_v46  ;;  %v11555_v59 = vld [vmem:[%s11876_s30 + $0x8] sm:$0xff] }
 0x179   : > { %9955 = vrot.lane.b32.xlu0 %v12151_v62, %s11706_s5  ;;  %8454 = vmatprep.subr.bf16.mxu1 %v8453_v60  ;;  %v2078_v1 = vsel %vm2070_vm1, %v9672_v25, %v9673_v57 }
 0x17a   : > { %v2077_v3 = vsel %vm2070_vm1, %v9668_v63, %v9672_v25  ;;  %8456 = vmatpush1.bf16.msra.mxu1 %v8455_v61  ;;  %v9681_v4 = vpop.permute.xlu1 %9680  ;;  %v2076_v5 = vsel %vm2070_vm1, %v9663_v52, %v9667_v0  ;;  %v11554_v25 = vld [vmem:[%s11871_s29 + $0x18] sm:$0xff]  ;;  %vm3238_vm1 = vcmask 695296  }
 0x17b   : > { %v9676_v6 = vpop.permute.xlu0 %9675  ;;  %v8457_v7 = vpack.c.bf16 %v2078_v1, %v2076_v5  ;;  %v8459_v8 = vpack.c.bf16 %v2077_v3, %v2075_v2  ;;  %v9682_v9 = vunpack.i.l.bf16 %v9681_v4  ;;  %v9683_v19 = vunpack.i.h.bf16 %v9681_v4 }
 0x17c   : > { %9970 = vrot.lane.b32.xlu1 %v12162_v14, %s11706_s5  ;;  %v9678_v10 = vunpack.i.h.bf16 %v9676_v6  ;;  %v9677_v11 = vunpack.i.l.bf16 %v9676_v6  ;;  %v12404_v60 = vpack.i.bf16 %v11555_v59, %v11554_v25 }
 0x17d   : > { %9965 = vrot.lane.b32.xlu0 %v12168_v17, %s11706_s5  ;;  %8458 = vmatprep.subr.bf16.mxu1 %v8457_v7  ;;  %s11734_s5 = smov 54  }
 0x17e   : > { %8460 = vmatpush1.bf16.msra.mxu1 %v8459_v8  ;;  %v9691_v15 = vpop.permute.xlu1 %9690  ;;  %v2144_v14 = vsel %vm2143_vm2, %v9677_v11, %v9678_v10  ;;  %v2145_v26 = vsel %vm2143_vm2, %v9678_v10, %v9682_v9  ;;  %v12412_v11 = vld [vmem:[%s11876_s30 + $0x18] sm:$0xff] }
 0x17f   : > { %v9686_v24 = vpop.permute.xlu0 %9685  ;;  %v9693_v27 = vunpack.i.h.bf16 %v9691_v15  ;;  %v9692_v28 = vunpack.i.l.bf16 %v9691_v15 }
 0x180   : > { %v9688_v22 = vunpack.i.h.bf16 %v9686_v24  ;;  %v9687_v23 = vunpack.i.l.bf16 %v9686_v24  ;;  %9980 = vrot.lane.b32.xlu1 %v12132_v45, %s11707_s6  ;;  %v11557_v24 = vld [vmem:[%s11871_s29 + $0x30] sm:$0xff] }
 0x181   : > { %9975 = vrot.lane.b32.xlu0 %v12138_v51, %s11707_s6  ;;  %v11547_v51 = vld [vmem:[%s11871_s29 + $0x38] sm:$0xff]  ;;  %v2148_v38 = vsel %vm2143_vm2, %v9692_v28, %v9693_v27 }
 0x182   : > { %v2146_v29 = vsel %vm2143_vm2, %v9683_v19, %v9687_v23  ;;  %v9701_v30 = vpop.permute.xlu1 %9700  ;;  %v2147_v31 = vsel %vm2143_vm2, %v9687_v23, %v9688_v22  ;;  %v9999_v16 = vpack.i.bf16 %v12159_v13, %v11547_v51  ;;  %v11548_v13 = vld [vmem:[%s11871_s29 + $0x10] sm:$0xff]  ;;  %v12415_v15 = vpack.i.bf16 %v12412_v11, %v11547_v51 }
 0x183   : > { %v9703_v32 = vunpack.i.h.bf16 %v9701_v30  ;;  %v9702_v20 = vunpack.i.l.bf16 %v9701_v30  ;;  %v9696_v33 = vpop.permute.xlu0 %9695  ;;  %v8461_v34 = vpack.c.bf16 %v2147_v31, %v2145_v26  ;;  %v8463_v45 = vpack.c.bf16 %v2146_v29, %v2144_v14  ;;  %v11558_v19 = vld [vmem:[%s11876_s30 + $0x10] sm:$0xff] }
 0x184   : > { %v9698_v35 = vunpack.i.h.bf16 %v9696_v33  ;;  %v9697_v36 = vunpack.i.l.bf16 %v9696_v33  ;;  %9990 = vrot.lane.b32.xlu1 %v12144_v58, %s11707_s6  ;;  %v12421_v22 = vpack.i.bf16 %v11557_v24, %v11558_v19 }
 0x185   : > { %9985 = vrot.lane.b32.xlu0 %v12151_v62, %s11707_s6  ;;  %8462 = vmatprep.subr.bf16.mxu1 %v8461_v34  ;;  %v2151_v37 = vsel %vm2143_vm2, %v9702_v20, %v9703_v32  ;;  %v11549_v62 = vld [vmem:[%s11876_s30] sm:$0xff] }
 0x186   : > { %v2150_v39 = vsel %vm2143_vm2, %v9698_v35, %v9702_v20  ;;  %8464 = vmatpush1.bf16.msra.mxu1 %v8463_v45  ;;  %v9711_v40 = vpop.permute.xlu1 %9710  ;;  %v2149_v58 = vsel %vm2143_vm2, %v9693_v27, %v9697_v36  ;;  %v12385_v43 = vpack.i.bf16 %v11548_v13, %v11549_v62  ;;  %vm3311_vm2 = vcmask 687104  }
 0x187   : > { %v9706_v41 = vpop.permute.xlu0 %9705  ;;  %v8465_v18 = vpack.c.bf16 %v2151_v37, %v2149_v58  ;;  %v8467_v42 = vpack.c.bf16 %v2150_v39, %v2148_v38  ;;  %v9712_v44 = vunpack.i.l.bf16 %v9711_v40  ;;  %v9713_v52 = vunpack.i.h.bf16 %v9711_v40 }
 0x188   : > { %10000 = vrot.lane.b32.xlu1 %v9999_v16, %s11707_s6  ;;  %v9708_v21 = vunpack.i.h.bf16 %v9706_v41  ;;  %v9707_v12 = vunpack.i.l.bf16 %v9706_v41 }
 0x189   : > { %9995 = vrot.lane.b32.xlu0 %v12168_v17, %s11707_s6  ;;  %8466 = vmatprep.subr.bf16.mxu1 %v8465_v18  ;;  %v11553_v17 = vld [vmem:[%s11871_s29 + $0x28] sm:$0xff]  ;;  %s11735_s6 = smov 53  }
 0x18a   : > { %8468 = vmatpush1.bf16.msra.mxu1 %v8467_v42  ;;  %v9721_v49 = vpop.permute.xlu1 %9720  ;;  %v12397_v56 = vpack.i.bf16 %v11553_v17, %v11552_v55  ;;  %v2217_v57 = vsel %vm2216_vm3, %v9707_v12, %v9708_v21  ;;  %v2218_v61 = vsel %vm2216_vm3, %v9708_v21, %v9712_v44 }
 0x18b   : > { %v9716_v50 = vpop.permute.xlu0 %9715  ;;  %v9723_v63 = vunpack.i.h.bf16 %v9721_v49  ;;  %v9722_v0 = vunpack.i.l.bf16 %v9721_v49 }
 0x18c   : > { %v9718_v53 = vunpack.i.h.bf16 %v9716_v50  ;;  %v9717_v54 = vunpack.i.l.bf16 %v9716_v50  ;;  %10010 = vrot.lane.b32.xlu1 %v12385_v43, %s11708_s7 }
 0x18d   : > { %10005 = vrot.lane.b32.xlu0 %v12391_v48, %s11708_s7  ;;  %v2221_v14 = vsel %vm2216_vm3, %v9722_v0, %v9723_v63 }
 0x18e   : > { %v2219_v1 = vsel %vm2216_vm3, %v9713_v52, %v9717_v54  ;;  %v9731_v2 = vpop.permute.xlu1 %9730  ;;  %v2220_v3 = vsel %vm2216_vm3, %v9717_v54, %v9718_v53 }
 0x18f   : > { %v9733_v4 = vunpack.i.h.bf16 %v9731_v2  ;;  %v9732_v5 = vunpack.i.l.bf16 %v9731_v2  ;;  %v9726_v6 = vpop.permute.xlu0 %9725  ;;  %v8469_v7 = vpack.c.bf16 %v2220_v3, %v2218_v61  ;;  %v8471_v8 = vpack.c.bf16 %v2219_v1, %v2217_v57 }
 0x190   : > { %v9728_v9 = vunpack.i.h.bf16 %v9726_v6  ;;  %v9727_v10 = vunpack.i.l.bf16 %v9726_v6  ;;  %10020 = vrot.lane.b32.xlu1 %v12397_v56, %s11708_s7 }
 0x191   : > { %10015 = vrot.lane.b32.xlu0 %v12404_v60, %s11708_s7  ;;  %8470 = vmatprep.subr.bf16.mxu1 %v8469_v7  ;;  %v2224_v23 = vsel %vm2216_vm3, %v9732_v5, %v9733_v4 }
 0x192   : > { %v2223_v26 = vsel %vm2216_vm3, %v9728_v9, %v9732_v5  ;;  %8472 = vmatpush1.bf16.msra.mxu1 %v8471_v8  ;;  %v9741_v27 = vpop.permute.xlu1 %9740  ;;  %v2222_v28 = vsel %vm2216_vm3, %v9723_v63, %v9727_v10  ;;  %vm3384_vm3 = vcmask 654336  }
 0x193   : > { %v9736_v29 = vpop.permute.xlu0 %9735  ;;  %v8473_v30 = vpack.c.bf16 %v2224_v23, %v2222_v28  ;;  %v8475_v31 = vpack.c.bf16 %v2223_v26, %v2221_v14  ;;  %v9742_v32 = vunpack.i.l.bf16 %v9741_v27  ;;  %v9743_v35 = vunpack.i.h.bf16 %v9741_v27 }
 0x194   : > { %10030 = vrot.lane.b32.xlu1 %v12415_v15, %s11708_s7  ;;  %v9738_v20 = vunpack.i.h.bf16 %v9736_v29  ;;  %v9737_v33 = vunpack.i.l.bf16 %v9736_v29 }
 0x195   : > { %10025 = vrot.lane.b32.xlu0 %v12421_v22, %s11708_s7  ;;  %8474 = vmatprep.subr.bf16.mxu1 %v8473_v30  ;;  %s11720_s7 = smov 74  }
 0x196   : > { %8476 = vmatpush1.bf16.msra.mxu1 %v8475_v31  ;;  %v9751_v34 = vpop.permute.xlu1 %9750  ;;  %v2290_v16 = vsel %vm2289_vm4, %v9737_v33, %v9738_v20  ;;  %v2291_v37 = vsel %vm2289_vm4, %v9738_v20, %v9742_v32 }
 0x197   : > { %v9746_v45 = vpop.permute.xlu0 %9745  ;;  %v9753_v38 = vunpack.i.h.bf16 %v9751_v34  ;;  %v9752_v39 = vunpack.i.l.bf16 %v9751_v34 }
 0x198   : > { %v9748_v36 = vunpack.i.h.bf16 %v9746_v45  ;;  %v9747_v51 = vunpack.i.l.bf16 %v9746_v45  ;;  %10040 = vrot.lane.b32.xlu1 %v12385_v43, %s11709_s8 }
 0x199   : > { %10035 = vrot.lane.b32.xlu0 %v12391_v48, %s11709_s8  ;;  %v2294_v47 = vsel %vm2289_vm4, %v9752_v39, %v9753_v38 }
 0x19a   : > { %v2292_v40 = vsel %vm2289_vm4, %v9743_v35, %v9747_v51  ;;  %v9761_v58 = vpop.permute.xlu1 %9760  ;;  %v2293_v41 = vsel %vm2289_vm4, %v9747_v51, %v9748_v36 }
 0x19b   : > { %v9763_v18 = vunpack.i.h.bf16 %v9761_v58  ;;  %v9762_v42 = vunpack.i.l.bf16 %v9761_v58  ;;  %v9756_v13 = vpop.permute.xlu0 %9755  ;;  %v8477_v62 = vpack.c.bf16 %v2293_v41, %v2291_v37  ;;  %v8479_v44 = vpack.c.bf16 %v2292_v40, %v2290_v16 }
 0x19c   : > { %v9758_v21 = vunpack.i.h.bf16 %v9756_v13  ;;  %v9757_v12 = vunpack.i.l.bf16 %v9756_v13  ;;  %10050 = vrot.lane.b32.xlu1 %v12397_v56, %s11709_s8 }
 0x19d   : > { %10045 = vrot.lane.b32.xlu0 %v12404_v60, %s11709_s8  ;;  %8478 = vmatprep.subr.bf16.mxu1 %v8477_v62  ;;  %v2297_v46 = vsel %vm2289_vm4, %v9762_v42, %v9763_v18 }
 0x19e   : > { %v2296_v49 = vsel %vm2289_vm4, %v9758_v21, %v9762_v42  ;;  %8480 = vmatpush1.bf16.msra.mxu1 %v8479_v44  ;;  %v9771_v50 = vpop.permute.xlu1 %9770  ;;  %v2295_v52 = vsel %vm2289_vm4, %v9753_v38, %v9757_v12  ;;  %vm3457_vm4 = vcmask 646144  }
 0x19f   : > { %v9766_v53 = vpop.permute.xlu0 %9765  ;;  %v8481_v54 = vpack.c.bf16 %v2297_v46, %v2295_v52  ;;  %v8483_v55 = vpack.c.bf16 %v2296_v49, %v2294_v47  ;;  %v9772_v17 = vunpack.i.l.bf16 %v9771_v50  ;;  %v9773_v63 = vunpack.i.h.bf16 %v9771_v50 }
 0x1a0   : > { %10060 = vrot.lane.b32.xlu1 %v12415_v15, %s11709_s8  ;;  %v9768_v57 = vunpack.i.h.bf16 %v9766_v53  ;;  %v9767_v25 = vunpack.i.l.bf16 %v9766_v53 }
 0x1a1   : > { %10055 = vrot.lane.b32.xlu0 %v12421_v22, %s11709_s8  ;;  %8482 = vmatprep.subr.bf16.mxu1 %v8481_v54  ;;  %s11721_s8 = smov 73  }
 0x1a2   : > { %8484 = vmatpush1.bf16.msra.mxu1 %v8483_v55  ;;  %v9781_v59 = vpop.permute.xlu1 %9780  ;;  %v2363_v2 = vsel %vm2362_vm5, %v9767_v25, %v9768_v57  ;;  %v2364_v3 = vsel %vm2362_vm5, %v9768_v57, %v9772_v17 }
 0x1a3   : > { %v9776_v61 = vpop.permute.xlu0 %9775  ;;  %v9783_v4 = vunpack.i.h.bf16 %v9781_v59  ;;  %v9782_v5 = vunpack.i.l.bf16 %v9781_v59 }
 0x1a4   : > { %v9778_v0 = vunpack.i.h.bf16 %v9776_v61  ;;  %v9777_v1 = vunpack.i.l.bf16 %v9776_v61  ;;  %10070 = vrot.lane.b32.xlu1 %v12385_v43, %s11710_s9 }
 0x1a5   : > { %10065 = vrot.lane.b32.xlu0 %v12391_v48, %s11710_s9  ;;  %v2367_v28 = vsel %vm2362_vm5, %v9782_v5, %v9783_v4 }
 0x1a6   : > { %v2365_v6 = vsel %vm2362_vm5, %v9773_v63, %v9777_v1  ;;  %v9791_v7 = vpop.permute.xlu1 %9790  ;;  %v2366_v8 = vsel %vm2362_vm5, %v9777_v1, %v9778_v0  ;;  %v6625_v1 = vld [vmem:[%s13712_s2 + $0x20] sm:$0xff] }
 0x1a7   : > { %v9793_v9 = vunpack.i.h.bf16 %v9791_v7  ;;  %v9792_v10 = vunpack.i.l.bf16 %v9791_v7  ;;  %v9786_v24 = vpop.permute.xlu0 %9785  ;;  %v8485_v19 = vpack.c.bf16 %v2366_v8, %v2364_v3  ;;  %v8487_v23 = vpack.c.bf16 %v2365_v6, %v2363_v2  ;;  %v6628_v3 = vld [vmem:[%s13712_s2 + $0x38] sm:$0xff] }
 0x1a8   : > { %v9788_v14 = vunpack.i.h.bf16 %v9786_v24  ;;  %v9787_v26 = vunpack.i.l.bf16 %v9786_v24  ;;  %10080 = vrot.lane.b32.xlu1 %v12397_v56, %s11710_s9 }
 0x1a9   : > { %10075 = vrot.lane.b32.xlu0 %v12404_v60, %s11710_s9  ;;  %8486 = vmatprep.subr.bf16.mxu1 %v8485_v19  ;;  %v2370_v27 = vsel %vm2362_vm5, %v9792_v10, %v9793_v9 }
 0x1aa   : > { %v2369_v29 = vsel %vm2362_vm5, %v9788_v14, %v9792_v10  ;;  %8488 = vmatpush1.bf16.msra.mxu1 %v8487_v23  ;;  %v9801_v30 = vpop.permute.xlu1 %9800  ;;  %v2368_v31 = vsel %vm2362_vm5, %v9783_v4, %v9787_v26  ;;  %vm3530_vm5 = vcmask 637952  }
 0x1ab   : > { %v9796_v32 = vpop.permute.xlu0 %9795  ;;  %v8489_v20 = vpack.c.bf16 %v2370_v27, %v2368_v31  ;;  %v8491_v33 = vpack.c.bf16 %v2369_v29, %v2367_v28  ;;  %v9802_v34 = vunpack.i.l.bf16 %v9801_v30  ;;  %v9803_v16 = vunpack.i.h.bf16 %v9801_v30 }
 0x1ac   : > { %10090 = vrot.lane.b32.xlu1 %v12415_v15, %s11710_s9  ;;  %v9798_v45 = vunpack.i.h.bf16 %v9796_v32  ;;  %v9797_v35 = vunpack.i.l.bf16 %v9796_v32 }
 0x1ad   : > { %10085 = vrot.lane.b32.xlu0 %v12421_v22, %s11710_s9  ;;  %8490 = vmatprep.subr.bf16.mxu1 %v8489_v20  ;;  %s11722_s9 = smov 72  }
 0x1ae   : > { %8492 = vmatpush1.bf16.msra.mxu1 %v8491_v33  ;;  %v9811_v36 = vpop.permute.xlu1 %9810  ;;  %v2436_v39 = vsel %vm2435_vm6, %v9797_v35, %v9798_v45  ;;  %v2437_v40 = vsel %vm2435_vm6, %v9798_v45, %v9802_v34 }
 0x1af   : > { %v9806_v51 = vpop.permute.xlu0 %9805  ;;  %v9813_v58 = vunpack.i.h.bf16 %v9811_v36  ;;  %v9812_v41 = vunpack.i.l.bf16 %v9811_v36 }
 0x1b0   : > { %v9808_v37 = vunpack.i.h.bf16 %v9806_v51  ;;  %v9807_v38 = vunpack.i.l.bf16 %v9806_v51  ;;  %10100 = vrot.lane.b32.xlu1 %v12385_v43, %s11711_s10 }
 0x1b1   : > { %10095 = vrot.lane.b32.xlu0 %v12391_v48, %s11711_s10  ;;  %v2440_v52 = vsel %vm2435_vm6, %v9812_v41, %v9813_v58 }
 0x1b2   : > { %v2438_v18 = vsel %vm2435_vm6, %v9803_v16, %v9807_v38  ;;  %v9821_v42 = vpop.permute.xlu1 %9820  ;;  %v2439_v13 = vsel %vm2435_vm6, %v9807_v38, %v9808_v37 }
 0x1b3   : > { %v9823_v62 = vunpack.i.h.bf16 %v9821_v42  ;;  %v9822_v44 = vunpack.i.l.bf16 %v9821_v42  ;;  %v9816_v21 = vpop.permute.xlu0 %9815  ;;  %v8493_v12 = vpack.c.bf16 %v2439_v13, %v2437_v40  ;;  %v8495_v46 = vpack.c.bf16 %v2438_v18, %v2436_v39 }
 0x1b4   : > { %v9818_v47 = vunpack.i.h.bf16 %v9816_v21  ;;  %v9817_v49 = vunpack.i.l.bf16 %v9816_v21  ;;  %10110 = vrot.lane.b32.xlu1 %v12397_v56, %s11711_s10 }
 0x1b5   : > { %10105 = vrot.lane.b32.xlu0 %v12404_v60, %s11711_s10  ;;  %8494 = vmatprep.subr.bf16.mxu1 %v8493_v12  ;;  %v2443_v50 = vsel %vm2435_vm6, %v9822_v44, %v9823_v62 }
 0x1b6   : > { %v2442_v53 = vsel %vm2435_vm6, %v9818_v47, %v9822_v44  ;;  %8496 = vmatpush1.bf16.msra.mxu1 %v8495_v46  ;;  %v9831_v54 = vpop.permute.xlu1 %9830  ;;  %v2441_v55 = vsel %vm2435_vm6, %v9813_v58, %v9817_v49  ;;  %vm3603_vm6 = vcmask 629760  }
 0x1b7   : > { %v9826_v17 = vpop.permute.xlu0 %9825  ;;  %v8497_v57 = vpack.c.bf16 %v2443_v50, %v2441_v55  ;;  %v8499_v25 = vpack.c.bf16 %v2442_v53, %v2440_v52  ;;  %v9832_v59 = vunpack.i.l.bf16 %v9831_v54  ;;  %v9833_v4 = vunpack.i.h.bf16 %v9831_v54 }
 0x1b8   : > { %10120 = vrot.lane.b32.xlu1 %v12415_v15, %s11711_s10  ;;  %v9828_v61 = vunpack.i.h.bf16 %v9826_v17  ;;  %v9827_v63 = vunpack.i.l.bf16 %v9826_v17 }
 0x1b9   : > { %10115 = vrot.lane.b32.xlu0 %v12421_v22, %s11711_s10  ;;  %8498 = vmatprep.subr.bf16.mxu1 %v8497_v57  ;;  %s11723_s10 = smov 68  }
 0x1ba   : > { %8500 = vmatpush1.bf16.msra.mxu1 %v8499_v25  ;;  %v9841_v0 = vpop.permute.xlu1 %9840  ;;  %v2509_v7 = vsel %vm2508_vm7, %v9827_v63, %v9828_v61  ;;  %v2510_v8 = vsel %vm2508_vm7, %v9828_v61, %v9832_v59 }
 0x1bb   : > { %v9836_v2 = vpop.permute.xlu0 %9835  ;;  %v9843_v9 = vunpack.i.h.bf16 %v9841_v0  ;;  %v9842_v10 = vunpack.i.l.bf16 %v9841_v0 }
 0x1bc   : > { %v9838_v5 = vunpack.i.h.bf16 %v9836_v2  ;;  %v9837_v6 = vunpack.i.l.bf16 %v9836_v2  ;;  %10130 = vrot.lane.b32.xlu1 %v12385_v43, %s11712_s22 }
 0x1bd   : > { %10125 = vrot.lane.b32.xlu0 %v12391_v48, %s11712_s22  ;;  %7506 = vmatmul.mubr.f32.vlgmr.msra.gmra.mrb[0].mxu1 %v6625_v1  ;;  %v2513_v20 = vsel %vm2508_vm7, %v9842_v10, %v9843_v9 }
 0x1be   : > { %v2511_v24 = vsel %vm2508_vm7, %v9833_v4, %v9837_v6  ;;  %v9851_v19 = vpop.permute.xlu1 %9850  ;;  %v2512_v23 = vsel %vm2508_vm7, %v9837_v6, %v9838_v5  ;;  %7576 = vmatprep.mubr.f32.mxu1 %v6628_v3 }
 0x1bf   : > { %v9853_v14 = vunpack.i.h.bf16 %v9851_v19  ;;  %v9852_v26 = vunpack.i.l.bf16 %v9851_v19  ;;  %v9846_v27 = vpop.permute.xlu0 %9845  ;;  %v8501_v28 = vpack.c.bf16 %v2512_v23, %v2510_v8  ;;  %v8503_v29 = vpack.c.bf16 %v2511_v24, %v2509_v7 }
 0x1c0   : > { %v9848_v30 = vunpack.i.h.bf16 %v9846_v27  ;;  %v9847_v31 = vunpack.i.l.bf16 %v9846_v27  ;;  %10140 = vrot.lane.b32.xlu1 %v12397_v56, %s11712_s22 }
 0x1c1   : > { %10135 = vrot.lane.b32.xlu0 %v12404_v60, %s11712_s22  ;;  %8502 = vmatprep.subr.bf16.mxu1 %v8501_v28  ;;  %v2516_v32 = vsel %vm2508_vm7, %v9852_v26, %v9853_v14 }
 0x1c2   : > { %v2515_v33 = vsel %vm2508_vm7, %v9848_v30, %v9852_v26  ;;  %8504 = vmatpush1.bf16.msra.mxu1 %v8503_v29  ;;  %v9861_v34 = vpop.permute.xlu1 %9860  ;;  %v2514_v45 = vsel %vm2508_vm7, %v9843_v9, %v9847_v31  ;;  %vm3676_vm7 = vcmask 621568  }
 0x1c3   : > { %v9856_v35 = vpop.permute.xlu0 %9855  ;;  %v8505_v36 = vpack.c.bf16 %v2516_v32, %v2514_v45  ;;  %v8507_v51 = vpack.c.bf16 %v2515_v33, %v2513_v20  ;;  %v9862_v16 = vunpack.i.l.bf16 %v9861_v34  ;;  %v9863_v58 = vunpack.i.h.bf16 %v9861_v34 }
 0x1c4   : > { %10150 = vrot.lane.b32.xlu1 %v12415_v15, %s11712_s22  ;;  %v9858_v37 = vunpack.i.h.bf16 %v9856_v35  ;;  %v9857_v38 = vunpack.i.l.bf16 %v9856_v35 }
 0x1c5   : > { %10145 = vrot.lane.b32.xlu0 %v12421_v22, %s11712_s22  ;;  %8506 = vmatprep.subr.bf16.mxu1 %v8505_v36  ;;  %s11726_s22 = smov 65  }
 0x1c6   : > { %8508 = vmatpush1.bf16.msra.mxu1 %v8507_v51  ;;  %v9871_v39 = vpop.permute.xlu1 %9870  ;;  %v2582_v42 = vsel %vm2581_vm8, %v9857_v38, %v9858_v37  ;;  %v2583_v13 = vsel %vm2581_vm8, %v9858_v37, %v9862_v16 }
 0x1c7   : > { %v9866_v40 = vpop.permute.xlu0 %9865  ;;  %v9873_v62 = vunpack.i.h.bf16 %v9871_v39  ;;  %v9872_v44 = vunpack.i.l.bf16 %v9871_v39 }
 0x1c8   : > { %v9868_v41 = vunpack.i.h.bf16 %v9866_v40  ;;  %v9867_v18 = vunpack.i.l.bf16 %v9866_v40  ;;  %10160 = vrot.lane.b32.xlu1 %v12385_v43, %s11713_s23 }
 0x1c9   : > { %10155 = vrot.lane.b32.xlu0 %v12391_v48, %s11713_s23  ;;  %v2586_v57 = vsel %vm2581_vm8, %v9872_v44, %v9873_v62 }
 0x1ca   : > { %v2584_v21 = vsel %vm2581_vm8, %v9863_v58, %v9867_v18  ;;  %v9881_v12 = vpop.permute.xlu1 %9880  ;;  %v2585_v46 = vsel %vm2581_vm8, %v9867_v18, %v9868_v41 }
 0x1cb   : > { %v9883_v47 = vunpack.i.h.bf16 %v9881_v12  ;;  %v9882_v49 = vunpack.i.l.bf16 %v9881_v12  ;;  %v9876_v50 = vpop.permute.xlu0 %9875  ;;  %v8509_v52 = vpack.c.bf16 %v2585_v46, %v2583_v13  ;;  %v8511_v53 = vpack.c.bf16 %v2584_v21, %v2582_v42 }
 0x1cc   : > { %v9878_v54 = vunpack.i.h.bf16 %v9876_v50  ;;  %v9877_v55 = vunpack.i.l.bf16 %v9876_v50  ;;  %10170 = vrot.lane.b32.xlu1 %v12397_v56, %s11713_s23 }
 0x1cd   : > { %10165 = vrot.lane.b32.xlu0 %v12404_v60, %s11713_s23  ;;  %8510 = vmatprep.subr.bf16.mxu1 %v8509_v52  ;;  %v2589_v17 = vsel %vm2581_vm8, %v9882_v49, %v9883_v47 }
 0x1ce   : > { %v2588_v25 = vsel %vm2581_vm8, %v9878_v54, %v9882_v49  ;;  %8512 = vmatpush1.bf16.msra.mxu1 %v8511_v53  ;;  %v9891_v59 = vpop.permute.xlu1 %9890  ;;  %v2587_v61 = vsel %vm2581_vm8, %v9873_v62, %v9877_v55  ;;  %vm3749_vm8 = vcmask 613376  }
 0x1cf   : > { %v9886_v63 = vpop.permute.xlu0 %9885  ;;  %v8513_v0 = vpack.c.bf16 %v2589_v17, %v2587_v61  ;;  %v8515_v1 = vpack.c.bf16 %v2588_v25, %v2586_v57  ;;  %v9892_v2 = vunpack.i.l.bf16 %v9891_v59  ;;  %v9893_v7 = vunpack.i.h.bf16 %v9891_v59 }
 0x1d0   : > { %10180 = vrot.lane.b32.xlu1 %v12415_v15, %s11713_s23  ;;  %v9888_v3 = vunpack.i.h.bf16 %v9886_v63  ;;  %v9887_v4 = vunpack.i.l.bf16 %v9886_v63 }
 0x1d1   : > { %10175 = vrot.lane.b32.xlu0 %v12421_v22, %s11713_s23  ;;  %8514 = vmatprep.subr.bf16.mxu1 %v8513_v0  ;;  %s11727_s23 = smov 64  }
 0x1d2   : > { %8516 = vmatpush1.bf16.msra.mxu1 %v8515_v1  ;;  %v9901_v5 = vpop.permute.xlu1 %9900  ;;  %v2655_v10 = vsel %vm2654_vm9, %v9887_v4, %v9888_v3  ;;  %v2656_v24 = vsel %vm2654_vm9, %v9888_v3, %v9892_v2 }
 0x1d3   : > { %v9896_v6 = vpop.permute.xlu0 %9895  ;;  %v9903_v19 = vunpack.i.h.bf16 %v9901_v5  ;;  %v9902_v23 = vunpack.i.l.bf16 %v9901_v5 }
 0x1d4   : > { %v9898_v8 = vunpack.i.h.bf16 %v9896_v6  ;;  %v9897_v9 = vunpack.i.l.bf16 %v9896_v6  ;;  %10190 = vrot.lane.b32.xlu1 %v12385_v43, %s11714_s25 }
 0x1d5   : > { %10185 = vrot.lane.b32.xlu0 %v12391_v48, %s11714_s25  ;;  %v2659_v45 = vsel %vm2654_vm9, %v9902_v23, %v9903_v19 }
 0x1d6   : > { %v2657_v14 = vsel %vm2654_vm9, %v9893_v7, %v9897_v9  ;;  %v9911_v26 = vpop.permute.xlu1 %9910  ;;  %v2658_v27 = vsel %vm2654_vm9, %v9897_v9, %v9898_v8 }
 0x1d7   : > { %v9913_v28 = vunpack.i.h.bf16 %v9911_v26  ;;  %v9912_v29 = vunpack.i.l.bf16 %v9911_v26  ;;  %v9906_v30 = vpop.permute.xlu0 %9905  ;;  %v8517_v31 = vpack.c.bf16 %v2658_v27, %v2656_v24  ;;  %v8519_v32 = vpack.c.bf16 %v2657_v14, %v2655_v10 }
 0x1d8   : > { %v9908_v20 = vunpack.i.h.bf16 %v9906_v30  ;;  %v9907_v33 = vunpack.i.l.bf16 %v9906_v30  ;;  %10200 = vrot.lane.b32.xlu1 %v12397_v56, %s11714_s25 }
 0x1d9   : > { %10195 = vrot.lane.b32.xlu0 %v12404_v60, %s11714_s25  ;;  %8518 = vmatprep.subr.bf16.mxu1 %v8517_v31  ;;  %v2662_v34 = vsel %vm2654_vm9, %v9912_v29, %v9913_v28 }
 0x1da   : > { %v2661_v35 = vsel %vm2654_vm9, %v9908_v20, %v9912_v29  ;;  %8520 = vmatpush1.bf16.msra.mxu1 %v8519_v32  ;;  %v9921_v36 = vpop.permute.xlu1 %9920  ;;  %v2660_v51 = vsel %vm2654_vm9, %v9903_v19, %v9907_v33  ;;  %vm3822_vm9 = vcmask 605184  }
 0x1db   : > { %v9916_v16 = vpop.permute.xlu0 %9915  ;;  %v8521_v37 = vpack.c.bf16 %v2662_v34, %v2660_v51  ;;  %v8523_v38 = vpack.c.bf16 %v2661_v35, %v2659_v45  ;;  %v9922_v39 = vunpack.i.l.bf16 %v9921_v36  ;;  %v9923_v42 = vunpack.i.h.bf16 %v9921_v36 }
 0x1dc   : > { %10210 = vrot.lane.b32.xlu1 %v12415_v15, %s11714_s25  ;;  %v9918_v40 = vunpack.i.h.bf16 %v9916_v16  ;;  %v9917_v58 = vunpack.i.l.bf16 %v9916_v16 }
 0x1dd   : > { %10205 = vrot.lane.b32.xlu0 %v12421_v22, %s11714_s25  ;;  %8522 = vmatprep.subr.bf16.mxu1 %v8521_v37  ;;  %s11728_s25 = smov 63  }
 0x1de   : > { %8524 = vmatpush1.bf16.msra.mxu1 %v8523_v38  ;;  %v9931_v41 = vpop.permute.xlu1 %9930  ;;  %v2728_v44 = vsel %vm2727_vm10, %v9917_v58, %v9918_v40  ;;  %v2729_v21 = vsel %vm2727_vm10, %v9918_v40, %v9922_v39 }
 0x1df   : > { %v9926_v18 = vpop.permute.xlu0 %9925  ;;  %v9933_v12 = vunpack.i.h.bf16 %v9931_v41  ;;  %v9932_v46 = vunpack.i.l.bf16 %v9931_v41 }
 0x1e0   : > { %v9928_v13 = vunpack.i.h.bf16 %v9926_v18  ;;  %v9927_v62 = vunpack.i.l.bf16 %v9926_v18  ;;  %10220 = vrot.lane.b32.xlu1 %v12385_v43, %s11715_s26 }
 0x1e1   : > { %10215 = vrot.lane.b32.xlu0 %v12391_v48, %s11715_s26  ;;  %v2732_v61 = vsel %vm2727_vm10, %v9932_v46, %v9933_v12 }
 0x1e2   : > { %v2730_v47 = vsel %vm2727_vm10, %v9923_v42, %v9927_v62  ;;  %v9941_v49 = vpop.permute.xlu1 %9940  ;;  %v2731_v50 = vsel %vm2727_vm10, %v9927_v62, %v9928_v13 }
 0x1e3   : > { %v9943_v52 = vunpack.i.h.bf16 %v9941_v49  ;;  %v9942_v53 = vunpack.i.l.bf16 %v9941_v49  ;;  %v9936_v54 = vpop.permute.xlu0 %9935  ;;  %v8525_v55 = vpack.c.bf16 %v2731_v50, %v2729_v21  ;;  %v8527_v17 = vpack.c.bf16 %v2730_v47, %v2728_v44 }
 0x1e4   : > { %v9938_v57 = vunpack.i.h.bf16 %v9936_v54  ;;  %v9937_v25 = vunpack.i.l.bf16 %v9936_v54  ;;  %10230 = vrot.lane.b32.xlu1 %v12397_v56, %s11715_s26 }
 0x1e5   : > { %10225 = vrot.lane.b32.xlu0 %v12404_v60, %s11715_s26  ;;  %8526 = vmatprep.subr.bf16.mxu1 %v8525_v55  ;;  %v2735_v59 = vsel %vm2727_vm10, %v9942_v53, %v9943_v52 }
 0x1e6   : > { %v2734_v63 = vsel %vm2727_vm10, %v9938_v57, %v9942_v53  ;;  %8528 = vmatpush1.bf16.msra.mxu1 %v8527_v17  ;;  %v9951_v0 = vpop.permute.xlu1 %9950  ;;  %v2733_v1 = vsel %vm2727_vm10, %v9933_v12, %v9937_v25  ;;  %vm3895_vm10 = vcmask 596992  }
 0x1e7   : > { %v9946_v2 = vpop.permute.xlu0 %9945  ;;  %v8529_v3 = vpack.c.bf16 %v2735_v59, %v2733_v1  ;;  %v8531_v4 = vpack.c.bf16 %v2734_v63, %v2732_v61  ;;  %v9952_v5 = vunpack.i.l.bf16 %v9951_v0  ;;  %v9953_v10 = vunpack.i.h.bf16 %v9951_v0 }
 0x1e8   : > { %10240 = vrot.lane.b32.xlu1 %v12415_v15, %s11715_s26  ;;  %v9948_v6 = vunpack.i.h.bf16 %v9946_v2  ;;  %v9947_v7 = vunpack.i.l.bf16 %v9946_v2 }
 0x1e9   : > { %10235 = vrot.lane.b32.xlu0 %v12421_v22, %s11715_s26  ;;  %8530 = vmatprep.subr.bf16.mxu1 %v8529_v3  ;;  %s11729_s26 = smov 62  }
 0x1ea   : > { %8532 = vmatpush1.bf16.msra.mxu1 %v8531_v4  ;;  %v9961_v8 = vpop.permute.xlu1 %9960  ;;  %v2801_v23 = vsel %vm2800_vm11, %v9947_v7, %v9948_v6  ;;  %v2802_v14 = vsel %vm2800_vm11, %v9948_v6, %v9952_v5 }
 0x1eb   : > { %v9956_v9 = vpop.permute.xlu0 %9955  ;;  %v9963_v26 = vunpack.i.h.bf16 %v9961_v8  ;;  %v9962_v27 = vunpack.i.l.bf16 %v9961_v8 }
 0x1ec   : > { %v9958_v24 = vunpack.i.h.bf16 %v9956_v9  ;;  %v9957_v19 = vunpack.i.l.bf16 %v9956_v9  ;;  %10250 = vrot.lane.b32.xlu1 %v12385_v43, %s11716_s21 }
 0x1ed   : > { %10245 = vrot.lane.b32.xlu0 %v12391_v48, %s11716_s21  ;;  %v2805_v51 = vsel %vm2800_vm11, %v9962_v27, %v9963_v26 }
 0x1ee   : > { %v2803_v28 = vsel %vm2800_vm11, %v9953_v10, %v9957_v19  ;;  %v9971_v29 = vpop.permute.xlu1 %9970  ;;  %v2804_v30 = vsel %vm2800_vm11, %v9957_v19, %v9958_v24 }
 0x1ef   : > { %v9973_v31 = vunpack.i.h.bf16 %v9971_v29  ;;  %v9972_v32 = vunpack.i.l.bf16 %v9971_v29  ;;  %v9966_v20 = vpop.permute.xlu0 %9965  ;;  %v8533_v33 = vpack.c.bf16 %v2804_v30, %v2802_v14  ;;  %v8535_v34 = vpack.c.bf16 %v2803_v28, %v2801_v23 }
 0x1f0   : > { %v9968_v45 = vunpack.i.h.bf16 %v9966_v20  ;;  %v9967_v35 = vunpack.i.l.bf16 %v9966_v20  ;;  %10260 = vrot.lane.b32.xlu1 %v12397_v56, %s11716_s21 }
 0x1f1   : > { %10255 = vrot.lane.b32.xlu0 %v12404_v60, %s11716_s21  ;;  %8534 = vmatprep.subr.bf16.mxu1 %v8533_v33  ;;  %v2808_v36 = vsel %vm2800_vm11, %v9972_v32, %v9973_v31 }
 0x1f2   : > { %v2807_v16 = vsel %vm2800_vm11, %v9968_v45, %v9972_v32  ;;  %8536 = vmatpush1.bf16.msra.mxu1 %v8535_v34  ;;  %v9981_v37 = vpop.permute.xlu1 %9980  ;;  %v2806_v38 = vsel %vm2800_vm11, %v9963_v26, %v9967_v35  ;;  %vm3968_vm11 = vcmask 588800  }
 0x1f3   : > { %v9976_v39 = vpop.permute.xlu0 %9975  ;;  %v8537_v40 = vpack.c.bf16 %v2808_v36, %v2806_v38  ;;  %v8539_v58 = vpack.c.bf16 %v2807_v16, %v2805_v51  ;;  %v9982_v41 = vunpack.i.l.bf16 %v9981_v37  ;;  %v9983_v44 = vunpack.i.h.bf16 %v9981_v37 }
 0x1f4   : > { %10270 = vrot.lane.b32.xlu1 %v12415_v15, %s11716_s21  ;;  %v9978_v18 = vunpack.i.h.bf16 %v9976_v39  ;;  %v9977_v42 = vunpack.i.l.bf16 %v9976_v39 }
 0x1f5   : > { %10265 = vrot.lane.b32.xlu0 %v12421_v22, %s11716_s21  ;;  %8538 = vmatprep.subr.bf16.mxu1 %v8537_v40  ;;  %s11730_s21 = smov 61  }
 0x1f6   : > { %8540 = vmatpush1.bf16.msra.mxu1 %v8539_v58  ;;  %v9991_v13 = vpop.permute.xlu1 %9990  ;;  %v2874_v46 = vsel %vm2873_vm12, %v9977_v42, %v9978_v18  ;;  %v2875_v47 = vsel %vm2873_vm12, %v9978_v18, %v9982_v41 }
 0x1f7   : > { %v9986_v62 = vpop.permute.xlu0 %9985  ;;  %v9993_v49 = vunpack.i.h.bf16 %v9991_v13  ;;  %v9992_v50 = vunpack.i.l.bf16 %v9991_v13 }
 0x1f8   : > { %v9988_v21 = vunpack.i.h.bf16 %v9986_v62  ;;  %v9987_v12 = vunpack.i.l.bf16 %v9986_v62  ;;  %10280 = vrot.lane.b32.xlu1 %v12385_v43, %s11717_s27 }
 0x1f9   : > { %10275 = vrot.lane.b32.xlu0 %v12391_v48, %s11717_s27  ;;  %v2878_v1 = vsel %vm2873_vm12, %v9992_v50, %v9993_v49 }
 0x1fa   : > { %v2876_v52 = vsel %vm2873_vm12, %v9983_v44, %v9987_v12  ;;  %v10001_v53 = vpop.permute.xlu1 %10000  ;;  %v2877_v54 = vsel %vm2873_vm12, %v9987_v12, %v9988_v21  ;;  %v11562_v44 = vld [vmem:[%s11871_s29] sm:$0xff]  ;;  %v11563_v21 = vld [vmem:[%s11871_s29 + $0x8] sm:$0xff] }
 0x1fb   : > { %v10003_v55 = vunpack.i.h.bf16 %v10001_v53  ;;  %v10002_v17 = vunpack.i.l.bf16 %v10001_v53  ;;  %v9996_v57 = vpop.permute.xlu0 %9995  ;;  %v8541_v25 = vpack.c.bf16 %v2877_v54, %v2875_v47  ;;  %v8543_v59 = vpack.c.bf16 %v2876_v52, %v2874_v46  ;;  %v11564_v53 = vld [vmem:[%s11871_s29 + $0x20] sm:$0xff] }
 0x1fc   : > { %v9998_v61 = vunpack.i.h.bf16 %v9996_v57  ;;  %v9997_v63 = vunpack.i.l.bf16 %v9996_v57  ;;  %10290 = vrot.lane.b32.xlu1 %v12397_v56, %s11717_s27  ;;  %v12644_v12 = vpack.i.bf16 %v11563_v21, %v11562_v44  ;;  %v11567_v57 = vld [vmem:[%s11876_s30 + $0x8] sm:$0xff] }
 0x1fd   : > { %10285 = vrot.lane.b32.xlu0 %v12404_v60, %s11717_s27  ;;  %8542 = vmatprep.subr.bf16.mxu1 %v8541_v25  ;;  %v2881_v0 = vsel %vm2873_vm12, %v10002_v17, %v10003_v55 }
 0x1fe   : > { %v2880_v2 = vsel %vm2873_vm12, %v9998_v61, %v10002_v17  ;;  %8544 = vmatpush1.bf16.msra.mxu1 %v8543_v59  ;;  %v10011_v3 = vpop.permute.xlu1 %10010  ;;  %v2879_v4 = vsel %vm2873_vm12, %v9993_v49, %v9997_v63  ;;  %v11566_v17 = vld [vmem:[%s11871_s29 + $0x18] sm:$0xff]  ;;  %vm4041_vm12 = vcmask 556032  }
 0x1ff   : > { %v10006_v5 = vpop.permute.xlu0 %10005  ;;  %v8545_v6 = vpack.c.bf16 %v2881_v0, %v2879_v4  ;;  %v8547_v7 = vpack.c.bf16 %v2880_v2, %v2878_v1  ;;  %v10012_v8 = vunpack.i.l.bf16 %v10011_v3  ;;  %v10013_v23 = vunpack.i.h.bf16 %v10011_v3 }
 0x200   : > { %10300 = vrot.lane.b32.xlu1 %v12415_v15, %s11717_s27  ;;  %v10008_v9 = vunpack.i.h.bf16 %v10006_v5  ;;  %v10007_v10 = vunpack.i.l.bf16 %v10006_v5  ;;  %v12657_v25 = vpack.i.bf16 %v11567_v57, %v11566_v17 }
 0x201   : > { %10295 = vrot.lane.b32.xlu0 %v12421_v22, %s11717_s27  ;;  %8546 = vmatprep.subr.bf16.mxu1 %v8545_v6  ;;  %s11731_s27 = smov 60  }
 0x202   : > { %8548 = vmatpush1.bf16.msra.mxu1 %v8547_v7  ;;  %v10021_v24 = vpop.permute.xlu1 %10020  ;;  %v2947_v15 = vsel %vm2946_vm13, %v10007_v10, %v10008_v9  ;;  %v2948_v27 = vsel %vm2946_vm13, %v10008_v9, %v10012_v8  ;;  %v12665_v10 = vld [vmem:[%s11876_s30 + $0x18] sm:$0xff] }
 0x203   : > { %v10016_v19 = vpop.permute.xlu0 %10015  ;;  %v10023_v28 = vunpack.i.h.bf16 %v10021_v24  ;;  %v10022_v29 = vunpack.i.l.bf16 %v10021_v24 }
 0x204   : > { %v10018_v14 = vunpack.i.h.bf16 %v10016_v19  ;;  %v10017_v26 = vunpack.i.l.bf16 %v10016_v19  ;;  %10310 = vrot.lane.b32.xlu1 %v12385_v43, %s11718_s28  ;;  %v11569_v19 = vld [vmem:[%s11871_s29 + $0x30] sm:$0xff] }
 0x205   : > { %10305 = vrot.lane.b32.xlu0 %v12391_v48, %s11718_s28  ;;  %v11559_v48 = vld [vmem:[%s11871_s29 + $0x38] sm:$0xff]  ;;  %v2951_v37 = vsel %vm2946_vm13, %v10022_v29, %v10023_v28 }
 0x206   : > { %v2949_v30 = vsel %vm2946_vm13, %v10013_v23, %v10017_v26  ;;  %v10031_v31 = vpop.permute.xlu1 %10030  ;;  %v2950_v32 = vsel %vm2946_vm13, %v10017_v26, %v10018_v14  ;;  %v10329_v51 = vpack.i.bf16 %v12412_v11, %v11559_v48  ;;  %v11560_v11 = vld [vmem:[%s11871_s29 + $0x10] sm:$0xff]  ;;  %v12668_v24 = vpack.i.bf16 %v12665_v10, %v11559_v48 }
 0x207   : > { %v10033_v20 = vunpack.i.h.bf16 %v10031_v31  ;;  %v10032_v33 = vunpack.i.l.bf16 %v10031_v31  ;;  %v10026_v34 = vpop.permute.xlu0 %10025  ;;  %v8549_v45 = vpack.c.bf16 %v2950_v32, %v2948_v27  ;;  %v8551_v43 = vpack.c.bf16 %v2949_v30, %v2947_v15  ;;  %v11570_v23 = vld [vmem:[%s11876_s30 + $0x10] sm:$0xff] }
 0x208   : > { %v10028_v35 = vunpack.i.h.bf16 %v10026_v34  ;;  %v10027_v36 = vunpack.i.l.bf16 %v10026_v34  ;;  %10320 = vrot.lane.b32.xlu1 %v12397_v56, %s11718_s28  ;;  %v12674_v14 = vpack.i.bf16 %v11569_v19, %v11570_v23 }
 0x209   : > { %10315 = vrot.lane.b32.xlu0 %v12404_v60, %s11718_s28  ;;  %8550 = vmatprep.subr.bf16.mxu1 %v8549_v45  ;;  %v2954_v16 = vsel %vm2946_vm13, %v10032_v33, %v10033_v20  ;;  %v11561_v60 = vld [vmem:[%s11876_s30] sm:$0xff] }
 0x20a   : > { %v2953_v38 = vsel %vm2946_vm13, %v10028_v35, %v10032_v33  ;;  %8552 = vmatpush1.bf16.msra.mxu1 %v8551_v43  ;;  %v10041_v39 = vpop.permute.xlu1 %10040  ;;  %v2952_v56 = vsel %vm2946_vm13, %v10023_v28, %v10027_v36  ;;  %v12638_v18 = vpack.i.bf16 %v11560_v11, %v11561_v60  ;;  %v6627_v43 = vld [vmem:[%s13712_s2 + $0x30] sm:$0xff]  ;;  %vm4114_vm13 = vcmask 547840  }
 0x20b   : > { %v10036_v40 = vpop.permute.xlu0 %10035  ;;  %v8553_v58 = vpack.c.bf16 %v2954_v16, %v2952_v56  ;;  %v8555_v41 = vpack.c.bf16 %v2953_v38, %v2951_v37  ;;  %v10042_v42 = vunpack.i.l.bf16 %v10041_v39  ;;  %v10043_v49 = vunpack.i.h.bf16 %v10041_v39 }
 0x20c   : > { %10330 = vrot.lane.b32.xlu1 %v10329_v51, %s11718_s28  ;;  %v10038_v13 = vunpack.i.h.bf16 %v10036_v40  ;;  %v10037_v62 = vunpack.i.l.bf16 %v10036_v40 }
 0x20d   : > { %10325 = vrot.lane.b32.xlu0 %v12421_v22, %s11718_s28  ;;  %8554 = vmatprep.subr.bf16.mxu1 %v8553_v58  ;;  %v11565_v22 = vld [vmem:[%s11871_s29 + $0x28] sm:$0xff]  ;;  %s11732_s28 = smov 56  }
 0x20e   : > { %8556 = vmatpush1.bf16.msra.mxu1 %v8555_v41  ;;  %v10051_v46 = vpop.permute.xlu1 %10050  ;;  %v12650_v54 = vpack.i.bf16 %v11565_v22, %v11564_v53  ;;  %v3020_v55 = vsel %vm3019_vm14, %v10037_v62, %v10038_v13  ;;  %v3021_v59 = vsel %vm3019_vm14, %v10038_v13, %v10042_v42 }
 0x20f   : > { %v10046_v47 = vpop.permute.xlu0 %10045  ;;  %v10053_v61 = vunpack.i.h.bf16 %v10051_v46  ;;  %v10052_v63 = vunpack.i.l.bf16 %v10051_v46 }
 0x210   : > { %v10048_v50 = vunpack.i.h.bf16 %v10046_v47  ;;  %v10047_v52 = vunpack.i.l.bf16 %v10046_v47  ;;  %10340 = vrot.lane.b32.xlu1 %v12638_v18, %s11719_s15 }
 0x211   : > { %10335 = vrot.lane.b32.xlu0 %v12644_v12, %s11719_s15  ;;  %v3024_v15 = vsel %vm3019_vm14, %v10052_v63, %v10053_v61 }
 0x212   : > { %v3022_v0 = vsel %vm3019_vm14, %v10043_v49, %v10047_v52  ;;  %v10061_v1 = vpop.permute.xlu1 %10060  ;;  %v3023_v2 = vsel %vm3019_vm14, %v10047_v52, %v10048_v50 }
 0x213   : > { %v10063_v3 = vunpack.i.h.bf16 %v10061_v1  ;;  %v10062_v4 = vunpack.i.l.bf16 %v10061_v1  ;;  %v10056_v5 = vpop.permute.xlu0 %10055  ;;  %v8557_v6 = vpack.c.bf16 %v3023_v2, %v3021_v59  ;;  %v8559_v7 = vpack.c.bf16 %v3022_v0, %v3020_v55 }
 0x214   : > { %v10058_v8 = vunpack.i.h.bf16 %v10056_v5  ;;  %v10057_v9 = vunpack.i.l.bf16 %v10056_v5  ;;  %10350 = vrot.lane.b32.xlu1 %v12650_v54, %s11719_s15 }
 0x215   : > { %10345 = vrot.lane.b32.xlu0 %v12657_v25, %s11719_s15  ;;  %8558 = vmatprep.subr.bf16.mxu1 %v8557_v6  ;;  %v3027_v26 = vsel %vm3019_vm14, %v10062_v4, %v10063_v3 }
 0x216   : > { %v3026_v27 = vsel %vm3019_vm14, %v10058_v8, %v10062_v4  ;;  %8560 = vmatpush1.bf16.msra.mxu1 %v8559_v7  ;;  %v10071_v28 = vpop.permute.xlu1 %10070  ;;  %v3025_v29 = vsel %vm3019_vm14, %v10053_v61, %v10057_v9  ;;  %vm4187_vm14 = vcmask 539648  }
 0x217   : > { %v10066_v30 = vpop.permute.xlu0 %10065  ;;  %v8561_v31 = vpack.c.bf16 %v3027_v26, %v3025_v29  ;;  %v8563_v32 = vpack.c.bf16 %v3026_v27, %v3024_v15  ;;  %v10072_v20 = vunpack.i.l.bf16 %v10071_v28  ;;  %v10073_v36 = vunpack.i.h.bf16 %v10071_v28 }
 0x218   : > { %10360 = vrot.lane.b32.xlu1 %v12668_v24, %s11719_s15  ;;  %v10068_v33 = vunpack.i.h.bf16 %v10066_v30  ;;  %v10067_v34 = vunpack.i.l.bf16 %v10066_v30 }
 0x219   : > { %10355 = vrot.lane.b32.xlu0 %v12674_v14, %s11719_s15  ;;  %8562 = vmatprep.subr.bf16.mxu1 %v8561_v31  ;;  %s11733_s15 = smov 55  }
 0x21a   : > { %8564 = vmatpush1.bf16.msra.mxu1 %v8563_v32  ;;  %v10081_v45 = vpop.permute.xlu1 %10080  ;;  %v3093_v16 = vsel %vm3092_vm15, %v10067_v34, %v10068_v33  ;;  %v3094_v37 = vsel %vm3092_vm15, %v10068_v33, %v10072_v20 }
 0x21b   : > { %v10076_v35 = vpop.permute.xlu0 %10075  ;;  %v10083_v38 = vunpack.i.h.bf16 %v10081_v45  ;;  %v10082_v39 = vunpack.i.l.bf16 %v10081_v45 }
 0x21c   : > { %v10078_v48 = vunpack.i.h.bf16 %v10076_v35  ;;  %v10077_v51 = vunpack.i.l.bf16 %v10076_v35  ;;  %10370 = vrot.lane.b32.xlu1 %v12638_v18, %s11720_s7 }
 0x21d   : > { %10365 = vrot.lane.b32.xlu0 %v12644_v12, %s11720_s7  ;;  %7577 = vmatmul.mubr.f32.vlgmr.msra.gmra.mrb[0].mxu1 %v6627_v43  ;;  %v3097_v46 = vsel %vm3092_vm15, %v10082_v39, %v10083_v38 }
 0x21e   : > { %v3095_v56 = vsel %vm3092_vm15, %v10073_v36, %v10077_v51  ;;  %v10091_v40 = vpop.permute.xlu1 %10090  ;;  %v3096_v58 = vsel %vm3092_vm15, %v10077_v51, %v10078_v48 }
 0x21f   : > { %v10093_v41 = vunpack.i.h.bf16 %v10091_v40  ;;  %v10092_v11 = vunpack.i.l.bf16 %v10091_v40  ;;  %v10086_v60 = vpop.permute.xlu0 %10085  ;;  %v8565_v42 = vpack.c.bf16 %v3096_v58, %v3094_v37  ;;  %v8567_v13 = vpack.c.bf16 %v3095_v56, %v3093_v16 }
 0x220   : > { %v10088_v62 = vunpack.i.h.bf16 %v10086_v60  ;;  %v10087_v44 = vunpack.i.l.bf16 %v10086_v60  ;;  %10380 = vrot.lane.b32.xlu1 %v12650_v54, %s11720_s7 }
 0x221   : > { %10375 = vrot.lane.b32.xlu0 %v12657_v25, %s11720_s7  ;;  %8566 = vmatprep.subr.bf16.mxu1 %v8565_v42  ;;  %v3100_v21 = vsel %vm3092_vm15, %v10092_v11, %v10093_v41 }
 0x222   : > { %v3099_v47 = vsel %vm3092_vm15, %v10088_v62, %v10092_v11  ;;  %8568 = vmatpush1.bf16.msra.mxu1 %v8567_v13  ;;  %v10101_v49 = vpop.permute.xlu1 %10100  ;;  %v3098_v50 = vsel %vm3092_vm15, %v10083_v38, %v10087_v44  ;;  %vm4260_vm15 = vcmask 531456  }
 0x223   : > { %v10096_v52 = vpop.permute.xlu0 %10095  ;;  %v8569_v53 = vpack.c.bf16 %v3100_v21, %v3098_v50  ;;  %v8571_v22 = vpack.c.bf16 %v3099_v47, %v3097_v46  ;;  %v10102_v55 = vunpack.i.l.bf16 %v10101_v49  ;;  %v10103_v63 = vunpack.i.h.bf16 %v10101_v49 }
 0x224   : > { %10390 = vrot.lane.b32.xlu1 %v12668_v24, %s11720_s7  ;;  %v10098_v17 = vunpack.i.h.bf16 %v10096_v52  ;;  %v10097_v57 = vunpack.i.l.bf16 %v10096_v52 }
 0x225   : > { %10385 = vrot.lane.b32.xlu0 %v12674_v14, %s11720_s7  ;;  %8570 = vmatprep.subr.bf16.mxu1 %v8569_v53  ;;  %s11759_s7 = smov 24  }
 0x226   : > { %8572 = vmatpush1.bf16.msra.mxu1 %v8571_v22  ;;  %v10111_v59 = vpop.permute.xlu1 %10110  ;;  %v3166_v2 = vsel %vm3165_vm0, %v10097_v57, %v10098_v17  ;;  %v3167_v3 = vsel %vm3165_vm0, %v10098_v17, %v10102_v55 }
 0x227   : > { %v10106_v61 = vpop.permute.xlu0 %10105  ;;  %v10113_v4 = vunpack.i.h.bf16 %v10111_v59  ;;  %v10112_v5 = vunpack.i.l.bf16 %v10111_v59 }
 0x228   : > { %v10108_v0 = vunpack.i.h.bf16 %v10106_v61  ;;  %v10107_v1 = vunpack.i.l.bf16 %v10106_v61  ;;  %10400 = vrot.lane.b32.xlu1 %v12638_v18, %s11721_s8 }
 0x229   : > { %10395 = vrot.lane.b32.xlu0 %v12644_v12, %s11721_s8  ;;  %v3170_v30 = vsel %vm3165_vm0, %v10112_v5, %v10113_v4 }
 0x22a   : > { %v3168_v6 = vsel %vm3165_vm0, %v10103_v63, %v10107_v1  ;;  %v10121_v7 = vpop.permute.xlu1 %10120  ;;  %v3169_v8 = vsel %vm3165_vm0, %v10107_v1, %v10108_v0 }
 0x22b   : > { %v10123_v9 = vunpack.i.h.bf16 %v10121_v7  ;;  %v10122_v19 = vunpack.i.l.bf16 %v10121_v7  ;;  %v10116_v23 = vpop.permute.xlu0 %10115  ;;  %v8573_v26 = vpack.c.bf16 %v3169_v8, %v3167_v3  ;;  %v8575_v15 = vpack.c.bf16 %v3168_v6, %v3166_v2 }
 0x22c   : > { %v10118_v27 = vunpack.i.h.bf16 %v10116_v23  ;;  %v10117_v28 = vunpack.i.l.bf16 %v10116_v23  ;;  %10410 = vrot.lane.b32.xlu1 %v12650_v54, %s11721_s8 }
 0x22d   : > { %10405 = vrot.lane.b32.xlu0 %v12657_v25, %s11721_s8  ;;  %8574 = vmatprep.subr.bf16.mxu1 %v8573_v26  ;;  %v3173_v29 = vsel %vm3165_vm0, %v10122_v19, %v10123_v9 }
 0x22e   : > { %v3172_v31 = vsel %vm3165_vm0, %v10118_v27, %v10122_v19  ;;  %8576 = vmatpush1.bf16.msra.mxu1 %v8575_v15  ;;  %v10131_v32 = vpop.permute.xlu1 %10130  ;;  %v3171_v20 = vsel %vm3165_vm0, %v10113_v4, %v10117_v28  ;;  %vm4333_vm0 = vcmask 523264  }
 0x22f   : > { %v10126_v33 = vpop.permute.xlu0 %10125  ;;  %v8577_v34 = vpack.c.bf16 %v3173_v29, %v3171_v20  ;;  %v8579_v45 = vpack.c.bf16 %v3172_v31, %v3170_v30  ;;  %v10132_v43 = vunpack.i.l.bf16 %v10131_v32  ;;  %v10133_v16 = vunpack.i.h.bf16 %v10131_v32 }
 0x230   : > { %10420 = vrot.lane.b32.xlu1 %v12668_v24, %s11721_s8  ;;  %v10128_v35 = vunpack.i.h.bf16 %v10126_v33  ;;  %v10127_v36 = vunpack.i.l.bf16 %v10126_v33 }
 0x231   : > { %10415 = vrot.lane.b32.xlu0 %v12674_v14, %s11721_s8  ;;  %8578 = vmatprep.subr.bf16.mxu1 %v8577_v34 }
 0x232   : > { %8580 = vmatpush1.bf16.msra.mxu1 %v8579_v45  ;;  %v10141_v48 = vpop.permute.xlu1 %10140  ;;  %v3239_v39 = vsel %vm3238_vm1, %v10127_v36, %v10128_v35  ;;  %v3240_v56 = vsel %vm3238_vm1, %v10128_v35, %v10132_v43 }
 0x233   : > { %v10136_v51 = vpop.permute.xlu0 %10135  ;;  %v10143_v40 = vunpack.i.h.bf16 %v10141_v48  ;;  %v10142_v58 = vunpack.i.l.bf16 %v10141_v48 }
 0x234   : > { %v10138_v37 = vunpack.i.h.bf16 %v10136_v51  ;;  %v10137_v38 = vunpack.i.l.bf16 %v10136_v51  ;;  %10430 = vrot.lane.b32.xlu1 %v12638_v18, %s11722_s9 }
 0x235   : > { %10425 = vrot.lane.b32.xlu0 %v12644_v12, %s11722_s9  ;;  %v3243_v50 = vsel %vm3238_vm1, %v10142_v58, %v10143_v40 }
 0x236   : > { %v3241_v41 = vsel %vm3238_vm1, %v10133_v16, %v10137_v38  ;;  %v10151_v11 = vpop.permute.xlu1 %10150  ;;  %v3242_v60 = vsel %vm3238_vm1, %v10137_v38, %v10138_v37 }
 0x237   : > { %v10153_v42 = vunpack.i.h.bf16 %v10151_v11  ;;  %v10152_v13 = vunpack.i.l.bf16 %v10151_v11  ;;  %v10146_v62 = vpop.permute.xlu0 %10145  ;;  %v8581_v44 = vpack.c.bf16 %v3242_v60, %v3240_v56  ;;  %v8583_v21 = vpack.c.bf16 %v3241_v41, %v3239_v39 }
 0x238   : > { %v10148_v46 = vunpack.i.h.bf16 %v10146_v62  ;;  %v10147_v47 = vunpack.i.l.bf16 %v10146_v62  ;;  %10440 = vrot.lane.b32.xlu1 %v12650_v54, %s11722_s9 }
 0x239   : > { %10435 = vrot.lane.b32.xlu0 %v12657_v25, %s11722_s9  ;;  %8582 = vmatprep.subr.bf16.mxu1 %v8581_v44  ;;  %v3246_v49 = vsel %vm3238_vm1, %v10152_v13, %v10153_v42 }
 0x23a   : > { %v3245_v52 = vsel %vm3238_vm1, %v10148_v46, %v10152_v13  ;;  %8584 = vmatpush1.bf16.msra.mxu1 %v8583_v21  ;;  %v10161_v53 = vpop.permute.xlu1 %10160  ;;  %v3244_v22 = vsel %vm3238_vm1, %v10143_v40, %v10147_v47  ;;  %vm4406_vm1 = vcmask 515072  }
 0x23b   : > { %v10156_v55 = vpop.permute.xlu0 %10155  ;;  %v8585_v17 = vpack.c.bf16 %v3246_v49, %v3244_v22  ;;  %v8587_v57 = vpack.c.bf16 %v3245_v52, %v3243_v50  ;;  %v10162_v59 = vunpack.i.l.bf16 %v10161_v53  ;;  %v10163_v2 = vunpack.i.h.bf16 %v10161_v53 }
 0x23c   : > { %10450 = vrot.lane.b32.xlu1 %v12668_v24, %s11722_s9  ;;  %v10158_v61 = vunpack.i.h.bf16 %v10156_v55  ;;  %v10157_v63 = vunpack.i.l.bf16 %v10156_v55 }
 0x23d   : > { %10445 = vrot.lane.b32.xlu0 %v12674_v14, %s11722_s9  ;;  %8586 = vmatprep.subr.bf16.mxu1 %v8585_v17  ;;  %s11744_s9 = smov 41  }
 0x23e   : > { %8588 = vmatpush1.bf16.msra.mxu1 %v8587_v57  ;;  %v10171_v0 = vpop.permute.xlu1 %10170  ;;  %v3312_v5 = vsel %vm3311_vm2, %v10157_v63, %v10158_v61  ;;  %v3313_v6 = vsel %vm3311_vm2, %v10158_v61, %v10162_v59 }
 0x23f   : > { %v10166_v1 = vpop.permute.xlu0 %10165  ;;  %v10173_v7 = vunpack.i.h.bf16 %v10171_v0  ;;  %v10172_v8 = vunpack.i.l.bf16 %v10171_v0 }
 0x240   : > { %v10168_v3 = vunpack.i.h.bf16 %v10166_v1  ;;  %v10167_v4 = vunpack.i.l.bf16 %v10166_v1  ;;  %10460 = vrot.lane.b32.xlu1 %v12638_v18, %s11723_s10 }
 0x241   : > { %10455 = vrot.lane.b32.xlu0 %v12644_v12, %s11723_s10  ;;  %v3316_v20 = vsel %vm3311_vm2, %v10172_v8, %v10173_v7 }
 0x242   : > { %v3314_v9 = vsel %vm3311_vm2, %v10163_v2, %v10167_v4  ;;  %v10181_v19 = vpop.permute.xlu1 %10180  ;;  %v3315_v23 = vsel %vm3311_vm2, %v10167_v4, %v10168_v3 }
 0x243   : > { %v10183_v26 = vunpack.i.h.bf16 %v10181_v19  ;;  %v10182_v15 = vunpack.i.l.bf16 %v10181_v19  ;;  %v10176_v27 = vpop.permute.xlu0 %10175  ;;  %v8589_v28 = vpack.c.bf16 %v3315_v23, %v3313_v6  ;;  %v8591_v29 = vpack.c.bf16 %v3314_v9, %v3312_v5 }
 0x244   : > { %v10178_v30 = vunpack.i.h.bf16 %v10176_v27  ;;  %v10177_v31 = vunpack.i.l.bf16 %v10176_v27  ;;  %10470 = vrot.lane.b32.xlu1 %v12650_v54, %s11723_s10 }
 0x245   : > { %10465 = vrot.lane.b32.xlu0 %v12657_v25, %s11723_s10  ;;  %8590 = vmatprep.subr.bf16.mxu1 %v8589_v28  ;;  %v3319_v32 = vsel %vm3311_vm2, %v10182_v15, %v10183_v26 }
 0x246   : > { %v3318_v33 = vsel %vm3311_vm2, %v10178_v30, %v10182_v15  ;;  %8592 = vmatpush1.bf16.msra.mxu1 %v8591_v29  ;;  %v10191_v34 = vpop.permute.xlu1 %10190  ;;  %v3317_v45 = vsel %vm3311_vm2, %v10173_v7, %v10177_v31  ;;  %vm4479_vm2 = vcmask 506880  }
 0x247   : > { %v10186_v43 = vpop.permute.xlu0 %10185  ;;  %v8593_v35 = vpack.c.bf16 %v3319_v32, %v3317_v45  ;;  %v8595_v36 = vpack.c.bf16 %v3318_v33, %v3316_v20  ;;  %v10192_v48 = vunpack.i.l.bf16 %v10191_v34  ;;  %v10193_v39 = vunpack.i.h.bf16 %v10191_v34 }
 0x248   : > { %10480 = vrot.lane.b32.xlu1 %v12668_v24, %s11723_s10  ;;  %v10188_v51 = vunpack.i.h.bf16 %v10186_v43  ;;  %v10187_v16 = vunpack.i.l.bf16 %v10186_v43 }
 0x249   : > { %10475 = vrot.lane.b32.xlu0 %v12674_v14, %s11723_s10  ;;  %8594 = vmatprep.subr.bf16.mxu1 %v8593_v35  ;;  %s11745_s10 = smov 40  }
 0x24a   : > { %8596 = vmatpush1.bf16.msra.mxu1 %v8595_v36  ;;  %v10201_v37 = vpop.permute.xlu1 %10200  ;;  %v3385_v58 = vsel %vm3384_vm3, %v10187_v16, %v10188_v51  ;;  %v3386_v41 = vsel %vm3384_vm3, %v10188_v51, %v10192_v48 }
 0x24b   : > { %v10196_v38 = vpop.permute.xlu0 %10195  ;;  %v10203_v11 = vunpack.i.h.bf16 %v10201_v37  ;;  %v10202_v60 = vunpack.i.l.bf16 %v10201_v37  ;;  %v6632_v37 = vld [vmem:[%s13712_s2 + $0x58] sm:$0xff] }
 0x24c   : > { %v10198_v56 = vunpack.i.h.bf16 %v10196_v38  ;;  %v10197_v40 = vunpack.i.l.bf16 %v10196_v38  ;;  %10490 = vrot.lane.b32.xlu1 %v12638_v18, %s11724_s11  ;;  %7718 = vmatprep.mubr.f32.mxu0 %v6632_v37 }
 0x24d   : > { %10485 = vrot.lane.b32.xlu0 %v12644_v12, %s11724_s11  ;;  %v3389_v22 = vsel %vm3384_vm3, %v10202_v60, %v10203_v11 }
 0x24e   : > { %v3387_v42 = vsel %vm3384_vm3, %v10193_v39, %v10197_v40  ;;  %v10211_v13 = vpop.permute.xlu1 %10210  ;;  %v3388_v62 = vsel %vm3384_vm3, %v10197_v40, %v10198_v56 }
 0x24f   : > { %v10213_v44 = vunpack.i.h.bf16 %v10211_v13  ;;  %v10212_v21 = vunpack.i.l.bf16 %v10211_v13  ;;  %v10206_v46 = vpop.permute.xlu0 %10205  ;;  %v8597_v47 = vpack.c.bf16 %v3388_v62, %v3386_v41  ;;  %v8599_v49 = vpack.c.bf16 %v3387_v42, %v3385_v58 }
 0x250   : > { %v10208_v50 = vunpack.i.h.bf16 %v10206_v46  ;;  %v10207_v52 = vunpack.i.l.bf16 %v10206_v46  ;;  %10500 = vrot.lane.b32.xlu1 %v12650_v54, %s11724_s11 }
 0x251   : > { %10495 = vrot.lane.b32.xlu0 %v12657_v25, %s11724_s11  ;;  %8598 = vmatprep.subr.bf16.mxu1 %v8597_v47  ;;  %v3392_v53 = vsel %vm3384_vm3, %v10212_v21, %v10213_v44 }
 0x252   : > { %v3391_v55 = vsel %vm3384_vm3, %v10208_v50, %v10212_v21  ;;  %8600 = vmatpush1.bf16.msra.mxu1 %v8599_v49  ;;  %v10221_v17 = vpop.permute.xlu1 %10220  ;;  %v3390_v57 = vsel %vm3384_vm3, %v10203_v11, %v10207_v52  ;;  %vm4552_vm3 = vcmask 498688  }
 0x253   : > { %v10216_v59 = vpop.permute.xlu0 %10215  ;;  %v8601_v61 = vpack.c.bf16 %v3392_v53, %v3390_v57  ;;  %v8603_v63 = vpack.c.bf16 %v3391_v55, %v3389_v22  ;;  %v10222_v0 = vunpack.i.l.bf16 %v10221_v17  ;;  %v10223_v5 = vunpack.i.h.bf16 %v10221_v17 }
 0x254   : > { %10510 = vrot.lane.b32.xlu1 %v12668_v24, %s11724_s11  ;;  %v10218_v1 = vunpack.i.h.bf16 %v10216_v59  ;;  %v10217_v2 = vunpack.i.l.bf16 %v10216_v59 }
 0x255   : > { %10505 = vrot.lane.b32.xlu0 %v12674_v14, %s11724_s11  ;;  %8602 = vmatprep.subr.bf16.mxu1 %v8601_v61  ;;  %s11736_s11 = smov 52  }
 0x256   : > { %8604 = vmatpush1.bf16.msra.mxu1 %v8603_v63  ;;  %v10231_v3 = vpop.permute.xlu1 %10230  ;;  %v3458_v8 = vsel %vm3457_vm4, %v10217_v2, %v10218_v1  ;;  %v3459_v9 = vsel %vm3457_vm4, %v10218_v1, %v10222_v0 }
 0x257   : > { %v10226_v4 = vpop.permute.xlu0 %10225  ;;  %v10233_v19 = vunpack.i.h.bf16 %v10231_v3  ;;  %v10232_v23 = vunpack.i.l.bf16 %v10231_v3 }
 0x258   : > { %v10228_v6 = vunpack.i.h.bf16 %v10226_v4  ;;  %v10227_v7 = vunpack.i.l.bf16 %v10226_v4  ;;  %10520 = vrot.lane.b32.xlu1 %v12638_v18, %s11725_s12 }
 0x259   : > { %10515 = vrot.lane.b32.xlu0 %v12644_v12, %s11725_s12  ;;  %v3462_v45 = vsel %vm3457_vm4, %v10232_v23, %v10233_v19 }
 0x25a   : > { %v3460_v26 = vsel %vm3457_vm4, %v10223_v5, %v10227_v7  ;;  %v10241_v15 = vpop.permute.xlu1 %10240  ;;  %v3461_v27 = vsel %vm3457_vm4, %v10227_v7, %v10228_v6 }
 0x25b   : > { %v10243_v28 = vunpack.i.h.bf16 %v10241_v15  ;;  %v10242_v29 = vunpack.i.l.bf16 %v10241_v15  ;;  %v10236_v30 = vpop.permute.xlu0 %10235  ;;  %v8605_v31 = vpack.c.bf16 %v3461_v27, %v3459_v9  ;;  %v8607_v32 = vpack.c.bf16 %v3460_v26, %v3458_v8 }
 0x25c   : > { %v10238_v20 = vunpack.i.h.bf16 %v10236_v30  ;;  %v10237_v33 = vunpack.i.l.bf16 %v10236_v30  ;;  %10530 = vrot.lane.b32.xlu1 %v12650_v54, %s11725_s12 }
 0x25d   : > { %10525 = vrot.lane.b32.xlu0 %v12657_v25, %s11725_s12  ;;  %8606 = vmatprep.subr.bf16.mxu1 %v8605_v31  ;;  %v3465_v34 = vsel %vm3457_vm4, %v10242_v29, %v10243_v28 }
 0x25e   : > { %v3464_v43 = vsel %vm3457_vm4, %v10238_v20, %v10242_v29  ;;  %8608 = vmatpush1.bf16.msra.mxu1 %v8607_v32  ;;  %v10251_v35 = vpop.permute.xlu1 %10250  ;;  %v3463_v36 = vsel %vm3457_vm4, %v10233_v19, %v10237_v33  ;;  %vm4625_vm4 = vcmask 490496  }
 0x25f   : > { %v10246_v48 = vpop.permute.xlu0 %10245  ;;  %v8609_v51 = vpack.c.bf16 %v3465_v34, %v3463_v36  ;;  %v8611_v16 = vpack.c.bf16 %v3464_v43, %v3462_v45  ;;  %v10252_v38 = vunpack.i.l.bf16 %v10251_v35  ;;  %v10253_v41 = vunpack.i.h.bf16 %v10251_v35 }
 0x260   : > { %10540 = vrot.lane.b32.xlu1 %v12668_v24, %s11725_s12  ;;  %v10248_v39 = vunpack.i.h.bf16 %v10246_v48  ;;  %v10247_v56 = vunpack.i.l.bf16 %v10246_v48 }
 0x261   : > { %10535 = vrot.lane.b32.xlu0 %v12674_v14, %s11725_s12  ;;  %8610 = vmatprep.subr.bf16.mxu1 %v8609_v51  ;;  %s11747_s12 = smov 38  }
 0x262   : > { %8612 = vmatpush1.bf16.msra.mxu1 %v8611_v16  ;;  %v10261_v40 = vpop.permute.xlu1 %10260  ;;  %v3531_v42 = vsel %vm3530_vm5, %v10247_v56, %v10248_v39  ;;  %v3532_v13 = vsel %vm3530_vm5, %v10248_v39, %v10252_v38 }
 0x263   : > { %v10256_v58 = vpop.permute.xlu0 %10255  ;;  %v10263_v62 = vunpack.i.h.bf16 %v10261_v40  ;;  %v10262_v44 = vunpack.i.l.bf16 %v10261_v40 }
 0x264   : > { %v10258_v11 = vunpack.i.h.bf16 %v10256_v58  ;;  %v10257_v60 = vunpack.i.l.bf16 %v10256_v58  ;;  %10550 = vrot.lane.b32.xlu1 %v12638_v18, %s11726_s22 }
 0x265   : > { %10545 = vrot.lane.b32.xlu0 %v12644_v12, %s11726_s22  ;;  %v3535_v59 = vsel %vm3530_vm5, %v10262_v44, %v10263_v62 }
 0x266   : > { %v3533_v21 = vsel %vm3530_vm5, %v10253_v41, %v10257_v60  ;;  %v10271_v46 = vpop.permute.xlu1 %10270  ;;  %v3534_v47 = vsel %vm3530_vm5, %v10257_v60, %v10258_v11 }
 0x267   : > { %v10273_v49 = vunpack.i.h.bf16 %v10271_v46  ;;  %v10272_v50 = vunpack.i.l.bf16 %v10271_v46  ;;  %v10266_v52 = vpop.permute.xlu0 %10265  ;;  %v8613_v53 = vpack.c.bf16 %v3534_v47, %v3532_v13  ;;  %v8615_v22 = vpack.c.bf16 %v3533_v21, %v3531_v42 }
 0x268   : > { %v10268_v55 = vunpack.i.h.bf16 %v10266_v52  ;;  %v10267_v17 = vunpack.i.l.bf16 %v10266_v52  ;;  %10560 = vrot.lane.b32.xlu1 %v12650_v54, %s11726_s22 }
 0x269   : > { %10555 = vrot.lane.b32.xlu0 %v12657_v25, %s11726_s22  ;;  %8614 = vmatprep.subr.bf16.mxu1 %v8613_v53  ;;  %v3538_v57 = vsel %vm3530_vm5, %v10272_v50, %v10273_v49 }
 0x26a   : > { %v3537_v61 = vsel %vm3530_vm5, %v10268_v55, %v10272_v50  ;;  %8616 = vmatpush1.bf16.msra.mxu1 %v8615_v22  ;;  %v10281_v63 = vpop.permute.xlu1 %10280  ;;  %v3536_v0 = vsel %vm3530_vm5, %v10263_v62, %v10267_v17  ;;  %vm4698_vm5 = vcmask 457728  }
 0x26b   : > { %v10276_v1 = vpop.permute.xlu0 %10275  ;;  %v8617_v2 = vpack.c.bf16 %v3538_v57, %v3536_v0  ;;  %v8619_v3 = vpack.c.bf16 %v3537_v61, %v3535_v59  ;;  %v10282_v4 = vunpack.i.l.bf16 %v10281_v63  ;;  %v10283_v9 = vunpack.i.h.bf16 %v10281_v63 }
 0x26c   : > { %10570 = vrot.lane.b32.xlu1 %v12668_v24, %s11726_s22  ;;  %v10278_v5 = vunpack.i.h.bf16 %v10276_v1  ;;  %v10277_v6 = vunpack.i.l.bf16 %v10276_v1 }
 0x26d   : > { %10565 = vrot.lane.b32.xlu0 %v12674_v14, %s11726_s22  ;;  %8618 = vmatprep.subr.bf16.mxu1 %v8617_v2  ;;  %s11751_s22 = smov 32  }
 0x26e   : > { %8620 = vmatpush1.bf16.msra.mxu1 %v8619_v3  ;;  %v10291_v7 = vpop.permute.xlu1 %10290  ;;  %v3604_v26 = vsel %vm3603_vm6, %v10277_v6, %v10278_v5  ;;  %v3605_v15 = vsel %vm3603_vm6, %v10278_v5, %v10282_v4 }
 0x26f   : > { %v10286_v8 = vpop.permute.xlu0 %10285  ;;  %v10293_v27 = vunpack.i.h.bf16 %v10291_v7  ;;  %v10292_v28 = vunpack.i.l.bf16 %v10291_v7 }
 0x270   : > { %v10288_v19 = vunpack.i.h.bf16 %v10286_v8  ;;  %v10287_v23 = vunpack.i.l.bf16 %v10286_v8  ;;  %10580 = vrot.lane.b32.xlu1 %v12638_v18, %s11727_s23 }
 0x271   : > { %10575 = vrot.lane.b32.xlu0 %v12644_v12, %s11727_s23  ;;  %v3608_v48 = vsel %vm3603_vm6, %v10292_v28, %v10293_v27 }
 0x272   : > { %v3606_v29 = vsel %vm3603_vm6, %v10283_v9, %v10287_v23  ;;  %v10301_v30 = vpop.permute.xlu1 %10300  ;;  %v3607_v31 = vsel %vm3603_vm6, %v10287_v23, %v10288_v19 }
 0x273   : > { %v10303_v32 = vunpack.i.h.bf16 %v10301_v30  ;;  %v10302_v20 = vunpack.i.l.bf16 %v10301_v30  ;;  %v10296_v33 = vpop.permute.xlu0 %10295  ;;  %v8621_v34 = vpack.c.bf16 %v3607_v31, %v3605_v15  ;;  %v8623_v45 = vpack.c.bf16 %v3606_v29, %v3604_v26 }
 0x274   : > { %v10298_v43 = vunpack.i.h.bf16 %v10296_v33  ;;  %v10297_v35 = vunpack.i.l.bf16 %v10296_v33  ;;  %10590 = vrot.lane.b32.xlu1 %v12650_v54, %s11727_s23 }
 0x275   : > { %10585 = vrot.lane.b32.xlu0 %v12657_v25, %s11727_s23  ;;  %8622 = vmatprep.subr.bf16.mxu1 %v8621_v34  ;;  %v3611_v36 = vsel %vm3603_vm6, %v10302_v20, %v10303_v32 }
 0x276   : > { %v3610_v51 = vsel %vm3603_vm6, %v10298_v43, %v10302_v20  ;;  %8624 = vmatpush1.bf16.msra.mxu1 %v8623_v45  ;;  %v10311_v16 = vpop.permute.xlu1 %10310  ;;  %v3609_v37 = vsel %vm3603_vm6, %v10293_v27, %v10297_v35  ;;  %vm4771_vm6 = vcmask 449536  }
 0x277   : > { %v10306_v38 = vpop.permute.xlu0 %10305  ;;  %v8625_v39 = vpack.c.bf16 %v3611_v36, %v3609_v37  ;;  %v8627_v56 = vpack.c.bf16 %v3610_v51, %v3608_v48  ;;  %v10312_v40 = vunpack.i.l.bf16 %v10311_v16  ;;  %v10313_v42 = vunpack.i.h.bf16 %v10311_v16 }
 0x278   : > { %10600 = vrot.lane.b32.xlu1 %v12668_v24, %s11727_s23  ;;  %v10308_v58 = vunpack.i.h.bf16 %v10306_v38  ;;  %v10307_v41 = vunpack.i.l.bf16 %v10306_v38 }
 0x279   : > { %10595 = vrot.lane.b32.xlu0 %v12674_v14, %s11727_s23  ;;  %8626 = vmatprep.subr.bf16.mxu1 %v8625_v39  ;;  %s11737_s23 = smov 51  }
 0x27a   : > { %8628 = vmatpush1.bf16.msra.mxu1 %v8627_v56  ;;  %v10321_v11 = vpop.permute.xlu1 %10320  ;;  %v3678_v44 = vsel %vm3676_vm7, %v10308_v58, %v10312_v40  ;;  %v3677_v21 = vsel %vm3676_vm7, %v10307_v41, %v10308_v58 }
 0x27b   : > { %v10316_v60 = vpop.permute.xlu0 %10315  ;;  %v10323_v46 = vunpack.i.h.bf16 %v10321_v11  ;;  %v10322_v47 = vunpack.i.l.bf16 %v10321_v11 }
 0x27c   : > { %v10318_v13 = vunpack.i.h.bf16 %v10316_v60  ;;  %v10317_v62 = vunpack.i.l.bf16 %v10316_v60  ;;  %10610 = vrot.lane.b32.xlu1 %v12638_v18, %s11728_s25 }
 0x27d   : > { %10605 = vrot.lane.b32.xlu0 %v12644_v12, %s11728_s25  ;;  %v3681_v2 = vsel %vm3676_vm7, %v10322_v47, %v10323_v46 }
 0x27e   : > { %v10331_v49 = vpop.permute.xlu1 %10330  ;;  %v3680_v50 = vsel %vm3676_vm7, %v10317_v62, %v10318_v13  ;;  %v3679_v52 = vsel %vm3676_vm7, %v10313_v42, %v10317_v62  ;;  %v11574_v42 = vld [vmem:[%s11871_s29] sm:$0xff]  ;;  %v11575_v13 = vld [vmem:[%s11871_s29 + $0x8] sm:$0xff] }
 0x27f   : > { %v10333_v53 = vunpack.i.h.bf16 %v10331_v49  ;;  %v10332_v22 = vunpack.i.l.bf16 %v10331_v49  ;;  %v10326_v55 = vpop.permute.xlu0 %10325  ;;  %v8629_v17 = vpack.c.bf16 %v3680_v50, %v3678_v44  ;;  %v8631_v57 = vpack.c.bf16 %v3679_v52, %v3677_v21  ;;  %v11576_v50 = vld [vmem:[%s11871_s29 + $0x20] sm:$0xff] }
 0x280   : > { %v10328_v59 = vunpack.i.h.bf16 %v10326_v55  ;;  %v10327_v61 = vunpack.i.l.bf16 %v10326_v55  ;;  %10620 = vrot.lane.b32.xlu1 %v12650_v54, %s11728_s25  ;;  %v12897_v62 = vpack.i.bf16 %v11575_v13, %v11574_v42 }
 0x281   : > { %10615 = vrot.lane.b32.xlu0 %v12657_v25, %s11728_s25  ;;  %8630 = vmatprep.subr.bf16.mxu0 %v8629_v17  ;;  %v3684_v63 = vsel %vm3676_vm7, %v10332_v22, %v10333_v53  ;;  %v11578_v53 = vld [vmem:[%s11871_s29 + $0x18] sm:$0xff] }
 0x282   : > { %8632 = vmatpush1.bf16.msra.mxu0 %v8631_v57  ;;  %v10341_v0 = vpop.permute.xlu1 %10340  ;;  %v3682_v1 = vsel %vm3676_vm7, %v10323_v46, %v10327_v61  ;;  %v3683_v3 = vsel %vm3676_vm7, %v10328_v59, %v10332_v22  ;;  %v11579_v22 = vld [vmem:[%s11876_s30 + $0x8] sm:$0xff]  ;;  %vm4844_vm7 = vcmask 441344  }
 0x283   : > { %v10336_v4 = vpop.permute.xlu0 %10335  ;;  %v8633_v5 = vpack.c.bf16 %v3684_v63, %v3682_v1  ;;  %v8635_v6 = vpack.c.bf16 %v3683_v3, %v3681_v2  ;;  %v10342_v7 = vunpack.i.l.bf16 %v10341_v0  ;;  %v10343_v26 = vunpack.i.h.bf16 %v10341_v0 }
 0x284   : > { %10630 = vrot.lane.b32.xlu1 %v12668_v24, %s11728_s25  ;;  %v10338_v8 = vunpack.i.h.bf16 %v10336_v4  ;;  %v10337_v9 = vunpack.i.l.bf16 %v10336_v4  ;;  %v12909_v55 = vpack.i.bf16 %v11579_v22, %v11578_v53 }
 0x285   : > { %10625 = vrot.lane.b32.xlu0 %v12674_v14, %s11728_s25  ;;  %8634 = vmatprep.subr.bf16.mxu0 %v8633_v5  ;;  %s11738_s25 = smov 50  }
 0x286   : > { %8636 = vmatpush1.bf16.msra.mxu0 %v8635_v6  ;;  %v10351_v19 = vpop.permute.xlu1 %10350  ;;  %v3751_v24 = vsel %vm3749_vm8, %v10338_v8, %v10342_v7  ;;  %v3750_v28 = vsel %vm3749_vm8, %v10337_v9, %v10338_v8  ;;  %v12918_v9 = vld [vmem:[%s11876_s30 + $0x18] sm:$0xff] }
 0x287   : > { %v10346_v23 = vpop.permute.xlu0 %10345  ;;  %v10353_v29 = vunpack.i.h.bf16 %v10351_v19  ;;  %v10352_v30 = vunpack.i.l.bf16 %v10351_v19 }
 0x288   : > { %v10348_v15 = vunpack.i.h.bf16 %v10346_v23  ;;  %v10347_v27 = vunpack.i.l.bf16 %v10346_v23  ;;  %10640 = vrot.lane.b32.xlu1 %v12638_v18, %s11729_s26  ;;  %v11581_v23 = vld [vmem:[%s11871_s29 + $0x30] sm:$0xff] }
 0x289   : > { %10635 = vrot.lane.b32.xlu0 %v12644_v12, %s11729_s26  ;;  %v11571_v12 = vld [vmem:[%s11871_s29 + $0x38] sm:$0xff]  ;;  %v3754_v38 = vsel %vm3749_vm8, %v10352_v30, %v10353_v29 }
 0x28a   : > { %v10361_v31 = vpop.permute.xlu1 %10360  ;;  %v3753_v32 = vsel %vm3749_vm8, %v10347_v27, %v10348_v15  ;;  %v3752_v20 = vsel %vm3749_vm8, %v10343_v26, %v10347_v27  ;;  %v10659_v48 = vpack.i.bf16 %v12665_v10, %v11571_v12  ;;  %v11572_v10 = vld [vmem:[%s11871_s29 + $0x10] sm:$0xff]  ;;  %v12921_v19 = vpack.i.bf16 %v12918_v9, %v11571_v12 }
 0x28b   : > { %v10363_v33 = vunpack.i.h.bf16 %v10361_v31  ;;  %v10362_v34 = vunpack.i.l.bf16 %v10361_v31  ;;  %v10356_v45 = vpop.permute.xlu0 %10355  ;;  %v8637_v43 = vpack.c.bf16 %v3753_v32, %v3751_v24  ;;  %v8639_v18 = vpack.c.bf16 %v3752_v20, %v3750_v28  ;;  %v11582_v26 = vld [vmem:[%s11876_s30 + $0x10] sm:$0xff] }
 0x28c   : > { %v10358_v35 = vunpack.i.h.bf16 %v10356_v45  ;;  %v10357_v36 = vunpack.i.l.bf16 %v10356_v45  ;;  %10650 = vrot.lane.b32.xlu1 %v12650_v54, %s11729_s26  ;;  %v12927_v15 = vpack.i.bf16 %v11581_v23, %v11582_v26 }
 0x28d   : > { %10645 = vrot.lane.b32.xlu0 %v12657_v25, %s11729_s26  ;;  %8638 = vmatprep.subr.bf16.mxu0 %v8637_v43  ;;  %v3757_v51 = vsel %vm3749_vm8, %v10362_v34, %v10363_v33  ;;  %v11573_v25 = vld [vmem:[%s11876_s30] sm:$0xff] }
 0x28e   : > { %8640 = vmatpush1.bf16.msra.mxu0 %v8639_v18  ;;  %v10371_v16 = vpop.permute.xlu1 %10370  ;;  %v3755_v37 = vsel %vm3749_vm8, %v10353_v29, %v10357_v36  ;;  %v3756_v54 = vsel %vm3749_vm8, %v10358_v35, %v10362_v34  ;;  %v12891_v58 = vpack.i.bf16 %v11572_v10, %v11573_v25  ;;  %vm4917_vm8 = vcmask 433152  }
 0x28f   : > { %v10366_v39 = vpop.permute.xlu0 %10365  ;;  %v8641_v56 = vpack.c.bf16 %v3757_v51, %v3755_v37  ;;  %v8643_v40 = vpack.c.bf16 %v3756_v54, %v3754_v38  ;;  %v10372_v41 = vunpack.i.l.bf16 %v10371_v16  ;;  %v10373_v46 = vunpack.i.h.bf16 %v10371_v16 }
 0x290   : > { %10660 = vrot.lane.b32.xlu1 %v10659_v48, %s11729_s26  ;;  %v10368_v11 = vunpack.i.h.bf16 %v10366_v39  ;;  %v10367_v60 = vunpack.i.l.bf16 %v10366_v39 }
 0x291   : > { %10655 = vrot.lane.b32.xlu0 %v12674_v14, %s11729_s26  ;;  %8642 = vmatprep.subr.bf16.mxu0 %v8641_v56  ;;  %v11577_v14 = vld [vmem:[%s11871_s29 + $0x28] sm:$0xff]  ;;  %s11739_s26 = smov 49  }
 0x292   : > { %8644 = vmatpush1.bf16.msra.mxu0 %v8643_v40  ;;  %v10381_v44 = vpop.permute.xlu1 %10380  ;;  %v12903_v52 = vpack.i.bf16 %v11577_v14, %v11576_v50  ;;  %v3824_v17 = vsel %vm3822_vm9, %v10368_v11, %v10372_v41  ;;  %v3823_v57 = vsel %vm3822_vm9, %v10367_v60, %v10368_v11 }
 0x293   : > { %v10376_v21 = vpop.permute.xlu0 %10375  ;;  %v10383_v59 = vunpack.i.h.bf16 %v10381_v44  ;;  %v10382_v61 = vunpack.i.l.bf16 %v10381_v44 }
 0x294   : > { %v10378_v47 = vunpack.i.h.bf16 %v10376_v21  ;;  %v10377_v49 = vunpack.i.l.bf16 %v10376_v21  ;;  %10670 = vrot.lane.b32.xlu1 %v12891_v58, %s11730_s21 }
 0x295   : > { %10665 = vrot.lane.b32.xlu0 %v12897_v62, %s11730_s21  ;;  %v3827_v29 = vsel %vm3822_vm9, %v10382_v61, %v10383_v59 }
 0x296   : > { %v10391_v63 = vpop.permute.xlu1 %10390  ;;  %v3826_v0 = vsel %vm3822_vm9, %v10377_v49, %v10378_v47  ;;  %v3825_v1 = vsel %vm3822_vm9, %v10373_v46, %v10377_v49 }
 0x297   : > { %v10393_v2 = vunpack.i.h.bf16 %v10391_v63  ;;  %v10392_v3 = vunpack.i.l.bf16 %v10391_v63  ;;  %v10386_v4 = vpop.permute.xlu0 %10385  ;;  %v8645_v5 = vpack.c.bf16 %v3826_v0, %v3824_v17  ;;  %v8647_v6 = vpack.c.bf16 %v3825_v1, %v3823_v57 }
 0x298   : > { %v10388_v7 = vunpack.i.h.bf16 %v10386_v4  ;;  %v10387_v8 = vunpack.i.l.bf16 %v10386_v4  ;;  %10680 = vrot.lane.b32.xlu1 %v12903_v52, %s11730_s21 }
 0x299   : > { %10675 = vrot.lane.b32.xlu0 %v12909_v55, %s11730_s21  ;;  %8646 = vmatprep.subr.bf16.mxu0 %v8645_v5  ;;  %v3830_v27 = vsel %vm3822_vm9, %v10392_v3, %v10393_v2 }
 0x29a   : > { %8648 = vmatpush1.bf16.msra.mxu0 %v8647_v6  ;;  %v10401_v24 = vpop.permute.xlu1 %10400  ;;  %v3828_v28 = vsel %vm3822_vm9, %v10383_v59, %v10387_v8  ;;  %v3829_v30 = vsel %vm3822_vm9, %v10388_v7, %v10392_v3  ;;  %vm4990_vm9 = vcmask 424960  }
 0x29b   : > { %v10396_v31 = vpop.permute.xlu0 %10395  ;;  %v8649_v32 = vpack.c.bf16 %v3830_v27, %v3828_v28  ;;  %v8651_v20 = vpack.c.bf16 %v3829_v30, %v3827_v29  ;;  %v10402_v33 = vunpack.i.l.bf16 %v10401_v24  ;;  %v10403_v35 = vunpack.i.h.bf16 %v10401_v24 }
 0x29c   : > { %10690 = vrot.lane.b32.xlu1 %v12921_v19, %s11730_s21  ;;  %v10398_v34 = vunpack.i.h.bf16 %v10396_v31  ;;  %v10397_v45 = vunpack.i.l.bf16 %v10396_v31 }
 0x29d   : > { %10685 = vrot.lane.b32.xlu0 %v12927_v15, %s11730_s21  ;;  %8650 = vmatprep.subr.bf16.mxu0 %v8649_v32  ;;  %s11740_s21 = smov 48  }
 0x29e   : > { %8652 = vmatpush1.bf16.msra.mxu0 %v8651_v20  ;;  %v10411_v43 = vpop.permute.xlu1 %10410  ;;  %v3897_v48 = vsel %vm3895_vm10, %v10398_v34, %v10402_v33  ;;  %v3896_v51 = vsel %vm3895_vm10, %v10397_v45, %v10398_v34 }
 0x29f   : > { %v10406_v18 = vpop.permute.xlu0 %10405  ;;  %v10413_v16 = vunpack.i.h.bf16 %v10411_v43  ;;  %v10412_v37 = vunpack.i.l.bf16 %v10411_v43 }
 0x2a0   : > { %v10408_v36 = vunpack.i.h.bf16 %v10406_v18  ;;  %v10407_v12 = vunpack.i.l.bf16 %v10406_v18  ;;  %10700 = vrot.lane.b32.xlu1 %v12891_v58, %s11731_s27 }
 0x2a1   : > { %10695 = vrot.lane.b32.xlu0 %v12897_v62, %s11731_s27  ;;  %v3900_v21 = vsel %vm3895_vm10, %v10412_v37, %v10413_v16 }
 0x2a2   : > { %v10421_v38 = vpop.permute.xlu1 %10420  ;;  %v3899_v54 = vsel %vm3895_vm10, %v10407_v12, %v10408_v36  ;;  %v3898_v39 = vsel %vm3895_vm10, %v10403_v35, %v10407_v12 }
 0x2a3   : > { %v10423_v56 = vunpack.i.h.bf16 %v10421_v38  ;;  %v10422_v40 = vunpack.i.l.bf16 %v10421_v38  ;;  %v10416_v10 = vpop.permute.xlu0 %10415  ;;  %v8653_v25 = vpack.c.bf16 %v3899_v54, %v3897_v48  ;;  %v8655_v41 = vpack.c.bf16 %v3898_v39, %v3896_v51 }
 0x2a4   : > { %v10418_v11 = vunpack.i.h.bf16 %v10416_v10  ;;  %v10417_v60 = vunpack.i.l.bf16 %v10416_v10  ;;  %10710 = vrot.lane.b32.xlu1 %v12903_v52, %s11731_s27 }
 0x2a5   : > { %10705 = vrot.lane.b32.xlu0 %v12909_v55, %s11731_s27  ;;  %8654 = vmatprep.subr.bf16.mxu0 %v8653_v25  ;;  %v3903_v42 = vsel %vm3895_vm10, %v10422_v40, %v10423_v56 }
 0x2a6   : > { %8656 = vmatpush1.bf16.msra.mxu0 %v8655_v41  ;;  %v10431_v13 = vpop.permute.xlu1 %10430  ;;  %v3901_v44 = vsel %vm3895_vm10, %v10413_v16, %v10417_v60  ;;  %v3902_v46 = vsel %vm3895_vm10, %v10418_v11, %v10422_v40  ;;  %vm5063_vm10 = vcmask 416768  }
 0x2a7   : > { %v10426_v47 = vpop.permute.xlu0 %10425  ;;  %v8657_v49 = vpack.c.bf16 %v3903_v42, %v3901_v44  ;;  %v8659_v50 = vpack.c.bf16 %v3902_v46, %v3900_v21  ;;  %v10432_v14 = vunpack.i.l.bf16 %v10431_v13  ;;  %v10433_v59 = vunpack.i.h.bf16 %v10431_v13 }
 0x2a8   : > { %10720 = vrot.lane.b32.xlu1 %v12921_v19, %s11731_s27  ;;  %v10428_v53 = vunpack.i.h.bf16 %v10426_v47  ;;  %v10427_v22 = vunpack.i.l.bf16 %v10426_v47 }
 0x2a9   : > { %10715 = vrot.lane.b32.xlu0 %v12927_v15, %s11731_s27  ;;  %8658 = vmatprep.subr.bf16.mxu0 %v8657_v49  ;;  %s11741_s27 = smov 44  }
 0x2aa   : > { %8660 = vmatpush1.bf16.msra.mxu0 %v8659_v50  ;;  %v10441_v17 = vpop.permute.xlu1 %10440  ;;  %v3970_v0 = vsel %vm3968_vm11, %v10428_v53, %v10432_v14  ;;  %v3969_v1 = vsel %vm3968_vm11, %v10427_v22, %v10428_v53 }
 0x2ab   : > { %v10436_v57 = vpop.permute.xlu0 %10435  ;;  %v10443_v2 = vunpack.i.h.bf16 %v10441_v17  ;;  %v10442_v3 = vunpack.i.l.bf16 %v10441_v17 }
 0x2ac   : > { %v10438_v61 = vunpack.i.h.bf16 %v10436_v57  ;;  %v10437_v63 = vunpack.i.l.bf16 %v10436_v57  ;;  %10730 = vrot.lane.b32.xlu1 %v12891_v58, %s11732_s28 }
 0x2ad   : > { %10725 = vrot.lane.b32.xlu0 %v12897_v62, %s11732_s28  ;;  %v3973_v32 = vsel %vm3968_vm11, %v10442_v3, %v10443_v2 }
 0x2ae   : > { %v10451_v4 = vpop.permute.xlu1 %10450  ;;  %v3972_v5 = vsel %vm3968_vm11, %v10437_v63, %v10438_v61  ;;  %v3971_v6 = vsel %vm3968_vm11, %v10433_v59, %v10437_v63 }
 0x2af   : > { %v10453_v7 = vunpack.i.h.bf16 %v10451_v4  ;;  %v10452_v8 = vunpack.i.l.bf16 %v10451_v4  ;;  %v10446_v23 = vpop.permute.xlu0 %10445  ;;  %v8661_v26 = vpack.c.bf16 %v3972_v5, %v3970_v0  ;;  %v8663_v27 = vpack.c.bf16 %v3971_v6, %v3969_v1 }
 0x2b0   : > { %v10448_v24 = vunpack.i.h.bf16 %v10446_v23  ;;  %v10447_v28 = vunpack.i.l.bf16 %v10446_v23  ;;  %10740 = vrot.lane.b32.xlu1 %v12903_v52, %s11732_s28 }
 0x2b1   : > { %10735 = vrot.lane.b32.xlu0 %v12909_v55, %s11732_s28  ;;  %8662 = vmatprep.subr.bf16.mxu0 %v8661_v26  ;;  %v3976_v29 = vsel %vm3968_vm11, %v10452_v8, %v10453_v7 }
 0x2b2   : > { %8664 = vmatpush1.bf16.msra.mxu0 %v8663_v27  ;;  %v10461_v30 = vpop.permute.xlu1 %10460  ;;  %v3974_v31 = vsel %vm3968_vm11, %v10443_v2, %v10447_v28  ;;  %v3975_v20 = vsel %vm3968_vm11, %v10448_v24, %v10452_v8  ;;  %vm5136_vm11 = vcmask 408576  }
 0x2b3   : > { %v10456_v33 = vpop.permute.xlu0 %10455  ;;  %v8665_v34 = vpack.c.bf16 %v3976_v29, %v3974_v31  ;;  %v8667_v45 = vpack.c.bf16 %v3975_v20, %v3973_v32  ;;  %v10462_v43 = vunpack.i.l.bf16 %v10461_v30  ;;  %v10463_v48 = vunpack.i.h.bf16 %v10461_v30 }
 0x2b4   : > { %10750 = vrot.lane.b32.xlu1 %v12921_v19, %s11732_s28  ;;  %v10458_v18 = vunpack.i.h.bf16 %v10456_v33  ;;  %v10457_v35 = vunpack.i.l.bf16 %v10456_v33 }
 0x2b5   : > { %10745 = vrot.lane.b32.xlu0 %v12927_v15, %s11732_s28  ;;  %8666 = vmatprep.subr.bf16.mxu0 %v8665_v34  ;;  %s11742_s28 = smov 43  }
 0x2b6   : > { %8668 = vmatpush1.bf16.msra.mxu0 %v8667_v45  ;;  %v10471_v36 = vpop.permute.xlu1 %10470  ;;  %v4043_v37 = vsel %vm4041_vm12, %v10458_v18, %v10462_v43  ;;  %v4042_v38 = vsel %vm4041_vm12, %v10457_v35, %v10458_v18 }
 0x2b7   : > { %v10466_v12 = vpop.permute.xlu0 %10465  ;;  %v10473_v54 = vunpack.i.h.bf16 %v10471_v36  ;;  %v10472_v39 = vunpack.i.l.bf16 %v10471_v36 }
 0x2b8   : > { %v10468_v51 = vunpack.i.h.bf16 %v10466_v12  ;;  %v10467_v16 = vunpack.i.l.bf16 %v10466_v12  ;;  %10760 = vrot.lane.b32.xlu1 %v12891_v58, %s11733_s15 }
 0x2b9   : > { %10755 = vrot.lane.b32.xlu0 %v12897_v62, %s11733_s15  ;;  %v4046_v49 = vsel %vm4041_vm12, %v10472_v39, %v10473_v54 }
 0x2ba   : > { %v10481_v56 = vpop.permute.xlu1 %10480  ;;  %v4045_v40 = vsel %vm4041_vm12, %v10467_v16, %v10468_v51  ;;  %v4044_v10 = vsel %vm4041_vm12, %v10463_v48, %v10467_v16 }
 0x2bb   : > { %v10483_v25 = vunpack.i.h.bf16 %v10481_v56  ;;  %v10482_v41 = vunpack.i.l.bf16 %v10481_v56  ;;  %v10476_v11 = vpop.permute.xlu0 %10475  ;;  %v8669_v60 = vpack.c.bf16 %v4045_v40, %v4043_v37  ;;  %v8671_v42 = vpack.c.bf16 %v4044_v10, %v4042_v38 }
 0x2bc   : > { %v10478_v13 = vunpack.i.h.bf16 %v10476_v11  ;;  %v10477_v44 = vunpack.i.l.bf16 %v10476_v11  ;;  %10770 = vrot.lane.b32.xlu1 %v12903_v52, %s11733_s15 }
 0x2bd   : > { %10765 = vrot.lane.b32.xlu0 %v12909_v55, %s11733_s15  ;;  %8670 = vmatprep.subr.bf16.mxu0 %v8669_v60  ;;  %v4049_v21 = vsel %vm4041_vm12, %v10482_v41, %v10483_v25 }
 0x2be   : > { %8672 = vmatpush1.bf16.msra.mxu0 %v8671_v42  ;;  %v10491_v46 = vpop.permute.xlu1 %10490  ;;  %v4047_v47 = vsel %vm4041_vm12, %v10473_v54, %v10477_v44  ;;  %v4048_v50 = vsel %vm4041_vm12, %v10478_v13, %v10482_v41  ;;  %vm5209_vm12 = vcmask 400384  }
 0x2bf   : > { %v10486_v14 = vpop.permute.xlu0 %10485  ;;  %v8673_v53 = vpack.c.bf16 %v4049_v21, %v4047_v47  ;;  %v8675_v22 = vpack.c.bf16 %v4048_v50, %v4046_v49  ;;  %v10492_v17 = vunpack.i.l.bf16 %v10491_v46  ;;  %v10493_v0 = vunpack.i.h.bf16 %v10491_v46 }
 0x2c0   : > { %10780 = vrot.lane.b32.xlu1 %v12921_v19, %s11733_s15  ;;  %v10488_v57 = vunpack.i.h.bf16 %v10486_v14  ;;  %v10487_v59 = vunpack.i.l.bf16 %v10486_v14 }
 0x2c1   : > { %10775 = vrot.lane.b32.xlu0 %v12927_v15, %s11733_s15  ;;  %8674 = vmatprep.subr.bf16.mxu0 %v8673_v53  ;;  %s11743_s15 = smov 42  }
 0x2c2   : > { %8676 = vmatpush1.bf16.msra.mxu0 %v8675_v22  ;;  %v10501_v61 = vpop.permute.xlu1 %10500  ;;  %v4116_v3 = vsel %vm4114_vm13, %v10488_v57, %v10492_v17  ;;  %v4115_v4 = vsel %vm4114_vm13, %v10487_v59, %v10488_v57 }
 0x2c3   : > { %v10496_v63 = vpop.permute.xlu0 %10495  ;;  %v10503_v5 = vunpack.i.h.bf16 %v10501_v61  ;;  %v10502_v6 = vunpack.i.l.bf16 %v10501_v61 }
 0x2c4   : > { %v10498_v1 = vunpack.i.h.bf16 %v10496_v63  ;;  %v10497_v2 = vunpack.i.l.bf16 %v10496_v63  ;;  %10790 = vrot.lane.b32.xlu1 %v12891_v58, %s11734_s5 }
 0x2c5   : > { %10785 = vrot.lane.b32.xlu0 %v12897_v62, %s11734_s5  ;;  %v4119_v34 = vsel %vm4114_vm13, %v10502_v6, %v10503_v5 }
 0x2c6   : > { %v10511_v7 = vpop.permute.xlu1 %10510  ;;  %v4118_v8 = vsel %vm4114_vm13, %v10497_v2, %v10498_v1  ;;  %v4117_v23 = vsel %vm4114_vm13, %v10493_v0, %v10497_v2  ;;  %v6631_v2 = vld [vmem:[%s13712_s2 + $0x50] sm:$0xff] }
 0x2c7   : > { %v10513_v26 = vunpack.i.h.bf16 %v10511_v7  ;;  %v10512_v27 = vunpack.i.l.bf16 %v10511_v7  ;;  %v10506_v24 = vpop.permute.xlu0 %10505  ;;  %v8677_v28 = vpack.c.bf16 %v4118_v8, %v4116_v3  ;;  %v8679_v29 = vpack.c.bf16 %v4117_v23, %v4115_v4  ;;  %v6634_v4 = vld [vmem:[%s13712_s2 + $0x68] sm:$0xff] }
 0x2c8   : > { %v10508_v30 = vunpack.i.h.bf16 %v10506_v24  ;;  %v10507_v31 = vunpack.i.l.bf16 %v10506_v24  ;;  %10800 = vrot.lane.b32.xlu1 %v12903_v52, %s11734_s5 }
 0x2c9   : > { %10795 = vrot.lane.b32.xlu0 %v12909_v55, %s11734_s5  ;;  %8678 = vmatprep.subr.bf16.mxu0 %v8677_v28  ;;  %v4122_v32 = vsel %vm4114_vm13, %v10512_v27, %v10513_v26 }
 0x2ca   : > { %8680 = vmatpush1.bf16.msra.mxu0 %v8679_v29  ;;  %v10521_v20 = vpop.permute.xlu1 %10520  ;;  %v4120_v33 = vsel %vm4114_vm13, %v10503_v5, %v10507_v31  ;;  %v4121_v45 = vsel %vm4114_vm13, %v10508_v30, %v10512_v27  ;;  %vm5282_vm13 = vcmask 392192  }
 0x2cb   : > { %v10516_v43 = vpop.permute.xlu0 %10515  ;;  %v8681_v18 = vpack.c.bf16 %v4122_v32, %v4120_v33  ;;  %v8683_v35 = vpack.c.bf16 %v4121_v45, %v4119_v34  ;;  %v10522_v36 = vunpack.i.l.bf16 %v10521_v20  ;;  %v10523_v37 = vunpack.i.h.bf16 %v10521_v20 }
 0x2cc   : > { %10810 = vrot.lane.b32.xlu1 %v12921_v19, %s11734_s5  ;;  %v10518_v12 = vunpack.i.h.bf16 %v10516_v43  ;;  %v10517_v48 = vunpack.i.l.bf16 %v10516_v43 }
 0x2cd   : > { %10805 = vrot.lane.b32.xlu0 %v12927_v15, %s11734_s5  ;;  %8682 = vmatprep.subr.bf16.mxu0 %v8681_v18  ;;  %s11757_s5 = smov 26  }
 0x2ce   : > { %8684 = vmatpush1.bf16.msra.mxu0 %v8683_v35  ;;  %v10531_v51 = vpop.permute.xlu1 %10530  ;;  %v4189_v39 = vsel %vm4187_vm14, %v10518_v12, %v10522_v36  ;;  %v4188_v56 = vsel %vm4187_vm14, %v10517_v48, %v10518_v12 }
 0x2cf   : > { %v10526_v16 = vpop.permute.xlu0 %10525  ;;  %v10533_v40 = vunpack.i.h.bf16 %v10531_v51  ;;  %v10532_v10 = vunpack.i.l.bf16 %v10531_v51 }
 0x2d0   : > { %v10528_v38 = vunpack.i.h.bf16 %v10526_v16  ;;  %v10527_v54 = vunpack.i.l.bf16 %v10526_v16  ;;  %10820 = vrot.lane.b32.xlu1 %v12891_v58, %s11735_s6 }
 0x2d1   : > { %10815 = vrot.lane.b32.xlu0 %v12897_v62, %s11735_s6  ;;  %v4192_v53 = vsel %vm4187_vm14, %v10532_v10, %v10533_v40 }
 0x2d2   : > { %v10541_v25 = vpop.permute.xlu1 %10540  ;;  %v4191_v41 = vsel %vm4187_vm14, %v10527_v54, %v10528_v38  ;;  %v4190_v11 = vsel %vm4187_vm14, %v10523_v37, %v10527_v54 }
 0x2d3   : > { %v10543_v60 = vunpack.i.h.bf16 %v10541_v25  ;;  %v10542_v42 = vunpack.i.l.bf16 %v10541_v25  ;;  %v10536_v13 = vpop.permute.xlu0 %10535  ;;  %v8685_v44 = vpack.c.bf16 %v4191_v41, %v4189_v39  ;;  %v8687_v21 = vpack.c.bf16 %v4190_v11, %v4188_v56  ;;  %v6630_v39 = vld [vmem:[%s13712_s2 + $0x48] sm:$0xff] }
 0x2d4   : > { %v10538_v46 = vunpack.i.h.bf16 %v10536_v13  ;;  %v10537_v47 = vunpack.i.l.bf16 %v10536_v13  ;;  %10830 = vrot.lane.b32.xlu1 %v12903_v52, %s11735_s6  ;;  %7647 = vmatprep.mubr.f32.mxu1 %v6630_v39 }
 0x2d5   : > { %10825 = vrot.lane.b32.xlu0 %v12909_v55, %s11735_s6  ;;  %8686 = vmatprep.subr.bf16.mxu0 %v8685_v44  ;;  %v4195_v49 = vsel %vm4187_vm14, %v10542_v42, %v10543_v60 }
 0x2d6   : > { %8688 = vmatpush1.bf16.msra.mxu0 %v8687_v21  ;;  %v10551_v50 = vpop.permute.xlu1 %10550  ;;  %v4193_v14 = vsel %vm4187_vm14, %v10533_v40, %v10537_v47  ;;  %v4194_v22 = vsel %vm4187_vm14, %v10538_v46, %v10542_v42  ;;  %v6629_v40 = vld [vmem:[%s13712_s2 + $0x40] sm:$0xff]  ;;  %vm5355_vm14 = vcmask 359424  }
 0x2d7   : > { %v10546_v17 = vpop.permute.xlu0 %10545  ;;  %v8689_v57 = vpack.c.bf16 %v4195_v49, %v4193_v14  ;;  %v8691_v59 = vpack.c.bf16 %v4194_v22, %v4192_v53  ;;  %v10552_v61 = vunpack.i.l.bf16 %v10551_v50  ;;  %v10553_v5 = vunpack.i.h.bf16 %v10551_v50  ;;  %7648 = vmatmul.mubr.f32.vlgmr.msra.gmra.mrb[0].mxu1 %v6629_v40 }
 0x2d8   : > { %10840 = vrot.lane.b32.xlu1 %v12921_v19, %s11735_s6  ;;  %v10548_v63 = vunpack.i.h.bf16 %v10546_v17  ;;  %v10547_v0 = vunpack.i.l.bf16 %v10546_v17 }
 0x2d9   : > { %10835 = vrot.lane.b32.xlu0 %v12927_v15, %s11735_s6  ;;  %8690 = vmatprep.subr.bf16.mxu0 %v8689_v57  ;;  %s11758_s6 = smov 25  }
 0x2da   : > { %8692 = vmatpush1.bf16.msra.mxu0 %v8691_v59  ;;  %v10561_v1 = vpop.permute.xlu1 %10560  ;;  %v4261_v8 = vsel %vm4260_vm15, %v10547_v0, %v10548_v63  ;;  %v4262_v23 = vsel %vm4260_vm15, %v10548_v63, %v10552_v61 }
 0x2db   : > { %v10556_v3 = vpop.permute.xlu0 %10555  ;;  %v10563_v26 = vunpack.i.h.bf16 %v10561_v1  ;;  %v10562_v27 = vunpack.i.l.bf16 %v10561_v1 }
 0x2dc   : > { %v10558_v6 = vunpack.i.h.bf16 %v10556_v3  ;;  %v10557_v7 = vunpack.i.l.bf16 %v10556_v3  ;;  %10850 = vrot.lane.b32.xlu1 %v12891_v58, %s11736_s11 }
 0x2dd   : > { %10845 = vrot.lane.b32.xlu0 %v12897_v62, %s11736_s11  ;;  %7719 = vmatmul.mubr.f32.vlgmr.msra.gmra.mrb[0].mxu0 %v6631_v2  ;;  %v4265_v18 = vsel %vm4260_vm15, %v10562_v27, %v10563_v26 }
 0x2de   : > { %v4263_v24 = vsel %vm4260_vm15, %v10553_v5, %v10557_v7  ;;  %v10571_v28 = vpop.permute.xlu1 %10570  ;;  %v4264_v29 = vsel %vm4260_vm15, %v10557_v7, %v10558_v6  ;;  %7789 = vmatprep.mubr.f32.mxu0 %v6634_v4 }
 0x2df   : > { %v10573_v30 = vunpack.i.h.bf16 %v10571_v28  ;;  %v10572_v31 = vunpack.i.l.bf16 %v10571_v28  ;;  %v10566_v32 = vpop.permute.xlu0 %10565  ;;  %v8693_v20 = vpack.c.bf16 %v4264_v29, %v4262_v23  ;;  %v8695_v33 = vpack.c.bf16 %v4263_v24, %v4261_v8 }
 0x2e0   : > { %v10568_v34 = vunpack.i.h.bf16 %v10566_v32  ;;  %v10567_v45 = vunpack.i.l.bf16 %v10566_v32  ;;  %10860 = vrot.lane.b32.xlu1 %v12903_v52, %s11736_s11 }
 0x2e1   : > { %10855 = vrot.lane.b32.xlu0 %v12909_v55, %s11736_s11  ;;  %8694 = vmatprep.subr.bf16.mxu0 %v8693_v20  ;;  %v4268_v43 = vsel %vm4260_vm15, %v10572_v31, %v10573_v30 }
 0x2e2   : > { %v4267_v35 = vsel %vm4260_vm15, %v10568_v34, %v10572_v31  ;;  %8696 = vmatpush1.bf16.msra.mxu0 %v8695_v33  ;;  %v10581_v36 = vpop.permute.xlu1 %10580  ;;  %v4266_v12 = vsel %vm4260_vm15, %v10563_v26, %v10567_v45  ;;  %vm5428_vm15 = vcmask 351232  }
 0x2e3   : > { %v10576_v48 = vpop.permute.xlu0 %10575  ;;  %v8697_v51 = vpack.c.bf16 %v4268_v43, %v4266_v12  ;;  %v8699_v16 = vpack.c.bf16 %v4267_v35, %v4265_v18  ;;  %v10582_v37 = vunpack.i.l.bf16 %v10581_v36  ;;  %v10583_v25 = vunpack.i.h.bf16 %v10581_v36 }
 0x2e4   : > { %10870 = vrot.lane.b32.xlu1 %v12921_v19, %s11736_s11  ;;  %v10578_v38 = vunpack.i.h.bf16 %v10576_v48  ;;  %v10577_v54 = vunpack.i.l.bf16 %v10576_v48 }
 0x2e5   : > { %10865 = vrot.lane.b32.xlu0 %v12927_v15, %s11736_s11  ;;  %8698 = vmatprep.subr.bf16.mxu0 %v8697_v51  ;;  %s11746_s11 = smov 39  }
 0x2e6   : > { %8700 = vmatpush1.bf16.msra.mxu0 %v8699_v16  ;;  %v10591_v56 = vpop.permute.xlu1 %10590  ;;  %v4334_v60 = vsel %vm4333_vm0, %v10577_v54, %v10578_v38  ;;  %v4335_v42 = vsel %vm4333_vm0, %v10578_v38, %v10582_v37 }
 0x2e7   : > { %v10586_v10 = vpop.permute.xlu0 %10585  ;;  %v10593_v13 = vunpack.i.h.bf16 %v10591_v56  ;;  %v10592_v44 = vunpack.i.l.bf16 %v10591_v56 }
 0x2e8   : > { %v10588_v41 = vunpack.i.h.bf16 %v10586_v10  ;;  %v10587_v11 = vunpack.i.l.bf16 %v10586_v10  ;;  %10880 = vrot.lane.b32.xlu1 %v12891_v58, %s11737_s23 }
 0x2e9   : > { %10875 = vrot.lane.b32.xlu0 %v12897_v62, %s11737_s23  ;;  %v4338_v61 = vsel %vm4333_vm0, %v10592_v44, %v10593_v13 }
 0x2ea   : > { %v4336_v21 = vsel %vm4333_vm0, %v10583_v25, %v10587_v11  ;;  %v10601_v46 = vpop.permute.xlu1 %10600  ;;  %v4337_v47 = vsel %vm4333_vm0, %v10587_v11, %v10588_v41 }
 0x2eb   : > { %v10603_v49 = vunpack.i.h.bf16 %v10601_v46  ;;  %v10602_v50 = vunpack.i.l.bf16 %v10601_v46  ;;  %v10596_v14 = vpop.permute.xlu0 %10595  ;;  %v8701_v53 = vpack.c.bf16 %v4337_v47, %v4335_v42  ;;  %v8703_v22 = vpack.c.bf16 %v4336_v21, %v4334_v60 }
 0x2ec   : > { %v10598_v17 = vunpack.i.h.bf16 %v10596_v14  ;;  %v10597_v57 = vunpack.i.l.bf16 %v10596_v14  ;;  %10890 = vrot.lane.b32.xlu1 %v12903_v52, %s11737_s23 }
 0x2ed   : > { %10885 = vrot.lane.b32.xlu0 %v12909_v55, %s11737_s23  ;;  %8702 = vmatprep.subr.bf16.mxu0 %v8701_v53  ;;  %v4341_v59 = vsel %vm4333_vm0, %v10602_v50, %v10603_v49 }
 0x2ee   : > { %v4340_v63 = vsel %vm4333_vm0, %v10598_v17, %v10602_v50  ;;  %8704 = vmatpush1.bf16.msra.mxu0 %v8703_v22  ;;  %v10611_v0 = vpop.permute.xlu1 %10610  ;;  %v4339_v1 = vsel %vm4333_vm0, %v10593_v13, %v10597_v57  ;;  %vm5501_vm0 = vcmask 343040  }
 0x2ef   : > { %v10606_v2 = vpop.permute.xlu0 %10605  ;;  %v8705_v3 = vpack.c.bf16 %v4341_v59, %v4339_v1  ;;  %v8707_v4 = vpack.c.bf16 %v4340_v63, %v4338_v61  ;;  %v10612_v5 = vunpack.i.l.bf16 %v10611_v0  ;;  %v10613_v26 = vunpack.i.h.bf16 %v10611_v0 }
 0x2f0   : > { %10900 = vrot.lane.b32.xlu1 %v12921_v19, %s11737_s23  ;;  %v10608_v6 = vunpack.i.h.bf16 %v10606_v2  ;;  %v10607_v7 = vunpack.i.l.bf16 %v10606_v2 }
 0x2f1   : > { %10895 = vrot.lane.b32.xlu0 %v12927_v15, %s11737_s23  ;;  %8706 = vmatprep.subr.bf16.mxu0 %v8705_v3  ;;  %s11752_s23 = smov 31  }
 0x2f2   : > { %8708 = vmatpush1.bf16.msra.mxu0 %v8707_v4  ;;  %v10621_v8 = vpop.permute.xlu1 %10620  ;;  %v4407_v28 = vsel %vm4406_vm1, %v10607_v7, %v10608_v6  ;;  %v4408_v29 = vsel %vm4406_vm1, %v10608_v6, %v10612_v5 }
 0x2f3   : > { %v10616_v23 = vpop.permute.xlu0 %10615  ;;  %v10623_v30 = vunpack.i.h.bf16 %v10621_v8  ;;  %v10622_v31 = vunpack.i.l.bf16 %v10621_v8 }
 0x2f4   : > { %v10618_v27 = vunpack.i.h.bf16 %v10616_v23  ;;  %v10617_v24 = vunpack.i.l.bf16 %v10616_v23  ;;  %10910 = vrot.lane.b32.xlu1 %v12891_v58, %s11738_s25 }
 0x2f5   : > { %10905 = vrot.lane.b32.xlu0 %v12897_v62, %s11738_s25  ;;  %v4411_v51 = vsel %vm4406_vm1, %v10622_v31, %v10623_v30 }
 0x2f6   : > { %v4409_v32 = vsel %vm4406_vm1, %v10613_v26, %v10617_v24  ;;  %v10631_v20 = vpop.permute.xlu1 %10630  ;;  %v4410_v33 = vsel %vm4406_vm1, %v10617_v24, %v10618_v27 }
 0x2f7   : > { %v10633_v34 = vunpack.i.h.bf16 %v10631_v20  ;;  %v10632_v45 = vunpack.i.l.bf16 %v10631_v20  ;;  %v10626_v43 = vpop.permute.xlu0 %10625  ;;  %v8709_v18 = vpack.c.bf16 %v4410_v33, %v4408_v29  ;;  %v8711_v35 = vpack.c.bf16 %v4409_v32, %v4407_v28 }
 0x2f8   : > { %v10628_v36 = vunpack.i.h.bf16 %v10626_v43  ;;  %v10627_v12 = vunpack.i.l.bf16 %v10626_v43  ;;  %10920 = vrot.lane.b32.xlu1 %v12903_v52, %s11738_s25 }
 0x2f9   : > { %10915 = vrot.lane.b32.xlu0 %v12909_v55, %s11738_s25  ;;  %8710 = vmatprep.subr.bf16.mxu0 %v8709_v18  ;;  %v4414_v48 = vsel %vm4406_vm1, %v10632_v45, %v10633_v34 }
 0x2fa   : > { %v4413_v16 = vsel %vm4406_vm1, %v10628_v36, %v10632_v45  ;;  %8712 = vmatpush1.bf16.msra.mxu0 %v8711_v35  ;;  %v10641_v37 = vpop.permute.xlu1 %10640  ;;  %v4412_v38 = vsel %vm4406_vm1, %v10623_v30, %v10627_v12  ;;  %vm5574_vm1 = vcmask 334848  }
 0x2fb   : > { %v10636_v54 = vpop.permute.xlu0 %10635  ;;  %v8713_v39 = vpack.c.bf16 %v4414_v48, %v4412_v38  ;;  %v8715_v56 = vpack.c.bf16 %v4413_v16, %v4411_v51  ;;  %v10642_v40 = vunpack.i.l.bf16 %v10641_v37  ;;  %v10643_v60 = vunpack.i.h.bf16 %v10641_v37 }
 0x2fc   : > { %10930 = vrot.lane.b32.xlu1 %v12921_v19, %s11738_s25  ;;  %v10638_v10 = vunpack.i.h.bf16 %v10636_v54  ;;  %v10637_v25 = vunpack.i.l.bf16 %v10636_v54 }
 0x2fd   : > { %10925 = vrot.lane.b32.xlu0 %v12927_v15, %s11738_s25  ;;  %8714 = vmatprep.subr.bf16.mxu0 %v8713_v39 }
 0x2fe   : > { %8716 = vmatpush1.bf16.msra.mxu0 %v8715_v56  ;;  %v10651_v41 = vpop.permute.xlu1 %10650  ;;  %v4480_v44 = vsel %vm4479_vm2, %v10637_v25, %v10638_v10  ;;  %v4481_v21 = vsel %vm4479_vm2, %v10638_v10, %v10642_v40 }
 0x2ff   : > { %v10646_v11 = vpop.permute.xlu0 %10645  ;;  %v10653_v46 = vunpack.i.h.bf16 %v10651_v41  ;;  %v10652_v47 = vunpack.i.l.bf16 %v10651_v41 }
 0x300   : > { %v10648_v42 = vunpack.i.h.bf16 %v10646_v11  ;;  %v10647_v13 = vunpack.i.l.bf16 %v10646_v11  ;;  %10940 = vrot.lane.b32.xlu1 %v12891_v58, %s11739_s26 }
 0x301   : > { %10935 = vrot.lane.b32.xlu0 %v12897_v62, %s11739_s26  ;;  %v4484_v1 = vsel %vm4479_vm2, %v10652_v47, %v10653_v46 }
 0x302   : > { %v4482_v49 = vsel %vm4479_vm2, %v10643_v60, %v10647_v13  ;;  %v10661_v50 = vpop.permute.xlu1 %10660  ;;  %v4483_v14 = vsel %vm4479_vm2, %v10647_v13, %v10648_v42  ;;  %v13159_v60 = vld [vmem:[%s11871_s29] sm:$0xff]  ;;  %v11587_v42 = vld [vmem:[%s11871_s29 + $0x8] sm:$0xff] }
 0x303   : > { %v10663_v53 = vunpack.i.h.bf16 %v10661_v50  ;;  %v10662_v22 = vunpack.i.l.bf16 %v10661_v50  ;;  %v10656_v17 = vpop.permute.xlu0 %10655  ;;  %v8717_v57 = vpack.c.bf16 %v4483_v14, %v4481_v21  ;;  %v8719_v59 = vpack.c.bf16 %v4482_v49, %v4480_v44  ;;  %v13165_v50 = vld [vmem:[%s11871_s29 + $0x20] sm:$0xff] }
 0x304   : > { %v10658_v61 = vunpack.i.h.bf16 %v10656_v17  ;;  %v10657_v63 = vunpack.i.l.bf16 %v10656_v17  ;;  %10950 = vrot.lane.b32.xlu1 %v12903_v52, %s11739_s26  ;;  %v10994_v13 = vpack.i.bf16 %v11587_v42, %v13159_v60  ;;  %v11591_v17 = vld [vmem:[%s11876_s30 + $0x8] sm:$0xff] }
 0x305   : > { %10945 = vrot.lane.b32.xlu0 %v12909_v55, %s11739_s26  ;;  %8718 = vmatprep.subr.bf16.mxu0 %v8717_v57  ;;  %v4487_v0 = vsel %vm4479_vm2, %v10662_v22, %v10663_v53 }
 0x306   : > { %v4486_v2 = vsel %vm4479_vm2, %v10658_v61, %v10662_v22  ;;  %8720 = vmatpush1.bf16.msra.mxu0 %v8719_v59  ;;  %v10671_v3 = vpop.permute.xlu1 %10670  ;;  %v4485_v4 = vsel %vm4479_vm2, %v10653_v46, %v10657_v63  ;;  %v11590_v22 = vld [vmem:[%s11871_s29 + $0x18] sm:$0xff]  ;;  %vm5647_vm2 = vcmask 326656  }
 0x307   : > { %v10666_v5 = vpop.permute.xlu0 %10665  ;;  %v8721_v6 = vpack.c.bf16 %v4487_v0, %v4485_v4  ;;  %v8723_v7 = vpack.c.bf16 %v4486_v2, %v4484_v1  ;;  %v10672_v8 = vunpack.i.l.bf16 %v10671_v3  ;;  %v10673_v28 = vunpack.i.h.bf16 %v10671_v3 }
 0x308   : > { %10960 = vrot.lane.b32.xlu1 %v12921_v19, %s11739_s26  ;;  %v10668_v23 = vunpack.i.h.bf16 %v10666_v5  ;;  %v10667_v26 = vunpack.i.l.bf16 %v10666_v5  ;;  %v13173_v57 = vpack.i.bf16 %v11591_v17, %v11590_v22 }
 0x309   : > { %10955 = vrot.lane.b32.xlu0 %v12927_v15, %s11739_s26  ;;  %8722 = vmatprep.subr.bf16.mxu0 %v8721_v6  ;;  %s8308_s26 = sshll.u32 %s13728_s17, 4 }
 0x30a   : > { %8724 = vmatpush1.bf16.msra.mxu0 %v8723_v7  ;;  %v10681_v27 = vpop.permute.xlu1 %10680  ;;  %v4553_v19 = vsel %vm4552_vm3, %v10667_v26, %v10668_v23  ;;  %v4554_v31 = vsel %vm4552_vm3, %v10668_v23, %v10672_v8  ;;  %v13180_v26 = vld [vmem:[%s11876_s30 + $0x18] sm:$0xff] }
 0x30b   : > { %v10676_v24 = vpop.permute.xlu0 %10675  ;;  %v10683_v32 = vunpack.i.h.bf16 %v10681_v27  ;;  %v10682_v20 = vunpack.i.l.bf16 %v10681_v27 }
 0x30c   : > { %v10678_v29 = vunpack.i.h.bf16 %v10676_v24  ;;  %v10677_v30 = vunpack.i.l.bf16 %v10676_v24  ;;  %10970 = vrot.lane.b32.xlu1 %v12891_v58, %s11740_s21  ;;  %v11593_v24 = vld [vmem:[%s11871_s29 + $0x30] sm:$0xff] }
 0x30d   : > { %10965 = vrot.lane.b32.xlu0 %v12897_v62, %s11740_s21  ;;  %v11583_v62 = vld [vmem:[%s11871_s29 + $0x38] sm:$0xff]  ;;  %v4557_v37 = vsel %vm4552_vm3, %v10682_v20, %v10683_v32 }
 0x30e   : > { %v4555_v33 = vsel %vm4552_vm3, %v10673_v28, %v10677_v30  ;;  %v10691_v34 = vpop.permute.xlu1 %10690  ;;  %v4556_v45 = vsel %vm4552_vm3, %v10677_v30, %v10678_v29  ;;  %v10989_v51 = vpack.i.bf16 %v12918_v9, %v11583_v62  ;;  %v13149_v9 = vld [vmem:[%s11871_s29 + $0x10] sm:$0xff]  ;;  %v13183_v27 = vpack.i.bf16 %v13180_v26, %v11583_v62 }
 0x30f   : > { %v10693_v43 = vunpack.i.h.bf16 %v10691_v34  ;;  %v10692_v18 = vunpack.i.l.bf16 %v10691_v34  ;;  %v10686_v35 = vpop.permute.xlu0 %10685  ;;  %v8725_v36 = vpack.c.bf16 %v4556_v45, %v4554_v31  ;;  %v8727_v58 = vpack.c.bf16 %v4555_v33, %v4553_v19  ;;  %v11594_v28 = vld [vmem:[%s11876_s30 + $0x10] sm:$0xff] }
 0x310   : > { %v10688_v12 = vunpack.i.h.bf16 %v10686_v35  ;;  %v10687_v48 = vunpack.i.l.bf16 %v10686_v35  ;;  %10980 = vrot.lane.b32.xlu1 %v12903_v52, %s11740_s21  ;;  %v11014_v29 = vpack.i.bf16 %v11593_v24, %v11594_v28 }
 0x311   : > { %10975 = vrot.lane.b32.xlu0 %v12909_v55, %s11740_s21  ;;  %8726 = vmatprep.subr.bf16.mxu0 %v8725_v36  ;;  %v4560_v16 = vsel %vm4552_vm3, %v10692_v18, %v10693_v43  ;;  %v13152_v55 = vld [vmem:[%s11876_s30] sm:$0xff] }
 0x312   : > { %v4559_v38 = vsel %vm4552_vm3, %v10688_v12, %v10692_v18  ;;  %8728 = vmatpush1.bf16.msra.mxu0 %v8727_v58  ;;  %v10701_v54 = vpop.permute.xlu1 %10700  ;;  %v4558_v52 = vsel %vm4552_vm3, %v10683_v32, %v10687_v48  ;;  %v10999_v10 = vpack.i.bf16 %v13149_v9, %v13152_v55  ;;  %v13197_v36 = vpack.i.bf16 %v13152_v55, %v11587_v42 }
 0x313   : > { %v10696_v39 = vpop.permute.xlu0 %10695  ;;  %v8729_v56 = vpack.c.bf16 %v4560_v16, %v4558_v52  ;;  %v8731_v40 = vpack.c.bf16 %v4559_v38, %v4557_v37  ;;  %v10702_v25 = vunpack.i.l.bf16 %v10701_v54  ;;  %v10703_v46 = vunpack.i.h.bf16 %v10701_v54 }
 0x314   : > { %10990 = vrot.lane.b32.xlu1 %v10989_v51, %s11740_s21  ;;  %v10698_v41 = vunpack.i.h.bf16 %v10696_v39  ;;  %v10697_v11 = vunpack.i.l.bf16 %v10696_v39  ;;  %v13208_v38 = vpack.i.bf16 %v13149_v9, %v13159_v60  ;;  %v13216_v9 = vpack.i.bf16 %v11593_v24, %v13165_v50 }
 0x315   : > { %10985 = vrot.lane.b32.xlu0 %v12927_v15, %s11740_s21  ;;  %8730 = vmatprep.subr.bf16.mxu0 %v8729_v56  ;;  %v11589_v15 = vld [vmem:[%s11871_s29 + $0x28] sm:$0xff]  ;;  %s11753_s21 = smov 30   ;;  %vm5720_vm3 = vcmask 318464  }
 0x316   : > { %8732 = vmatpush1.bf16.msra.mxu0 %v8731_v40  ;;  %v10711_v44 = vpop.permute.xlu1 %10710  ;;  %v11009_v14 = vpack.i.bf16 %v11589_v15, %v13165_v50  ;;  %v4626_v53 = vsel %vm4625_vm4, %v10697_v11, %v10698_v41  ;;  %v4627_v59 = vsel %vm4625_vm4, %v10698_v41, %v10702_v25  ;;  %v13201_v16 = vpack.i.bf16 %v11594_v28, %v11589_v15 }
 0x317   : > { %v10706_v21 = vpop.permute.xlu0 %10705  ;;  %v10713_v61 = vunpack.i.h.bf16 %v10711_v44  ;;  %v10712_v63 = vunpack.i.l.bf16 %v10711_v44 }
 0x318   : > { %v10708_v47 = vunpack.i.h.bf16 %v10706_v21  ;;  %v10707_v49 = vunpack.i.l.bf16 %v10706_v21  ;;  %11000 = vrot.lane.b32.xlu1 %v10999_v10, %s11741_s27 }
 0x319   : > { %10995 = vrot.lane.b32.xlu0 %v10994_v13, %s11741_s27  ;;  %v4630_v19 = vsel %vm4625_vm4, %v10712_v63, %v10713_v61 }
 0x31a   : > { %v4628_v0 = vsel %vm4625_vm4, %v10703_v46, %v10707_v49  ;;  %v10721_v1 = vpop.permute.xlu1 %10720  ;;  %v4629_v2 = vsel %vm4625_vm4, %v10707_v49, %v10708_v47 }
 0x31b   : > { %v10723_v3 = vunpack.i.h.bf16 %v10721_v1  ;;  %v10722_v4 = vunpack.i.l.bf16 %v10721_v1  ;;  %v10716_v5 = vpop.permute.xlu0 %10715  ;;  %v8733_v6 = vpack.c.bf16 %v4629_v2, %v4627_v59  ;;  %v8735_v7 = vpack.c.bf16 %v4628_v0, %v4626_v53 }
 0x31c   : > { %v10718_v8 = vunpack.i.h.bf16 %v10716_v5  ;;  %v10717_v23 = vunpack.i.l.bf16 %v10716_v5  ;;  %11010 = vrot.lane.b32.xlu1 %v11009_v14, %s11741_s27 }
 0x31d   : > { %11005 = vrot.lane.b32.xlu0 %v13173_v57, %s11741_s27  ;;  %8734 = vmatprep.subr.bf16.mxu0 %v8733_v6  ;;  %v4633_v30 = vsel %vm4625_vm4, %v10722_v4, %v10723_v3 }
 0x31e   : > { %v4632_v31 = vsel %vm4625_vm4, %v10718_v8, %v10722_v4  ;;  %8736 = vmatpush1.bf16.msra.mxu0 %v8735_v7  ;;  %v10731_v32 = vpop.permute.xlu1 %10730  ;;  %v4631_v20 = vsel %vm4625_vm4, %v10713_v61, %v10717_v23  ;;  %vm5793_vm4 = vcmask 310272  }
 0x31f   : > { %v10726_v33 = vpop.permute.xlu0 %10725  ;;  %v8737_v34 = vpack.c.bf16 %v4633_v30, %v4631_v20  ;;  %v8739_v45 = vpack.c.bf16 %v4632_v31, %v4630_v19  ;;  %v10732_v43 = vunpack.i.l.bf16 %v10731_v32  ;;  %v10733_v48 = vunpack.i.h.bf16 %v10731_v32 }
 0x320   : > { %11020 = vrot.lane.b32.xlu1 %v13183_v27, %s11741_s27  ;;  %v10728_v18 = vunpack.i.h.bf16 %v10726_v33  ;;  %v10727_v35 = vunpack.i.l.bf16 %v10726_v33 }
 0x321   : > { %11015 = vrot.lane.b32.xlu0 %v11014_v29, %s11741_s27  ;;  %8738 = vmatprep.subr.bf16.mxu0 %v8737_v34 }
 0x322   : > { %8740 = vmatpush1.bf16.msra.mxu0 %v8739_v45  ;;  %v10741_v58 = vpop.permute.xlu1 %10740  ;;  %v4699_v37 = vsel %vm4698_vm5, %v10727_v35, %v10728_v18  ;;  %v4700_v54 = vsel %vm4698_vm5, %v10728_v18, %v10732_v43 }
 0x323   : > { %v10736_v12 = vpop.permute.xlu0 %10735  ;;  %v10743_v52 = vunpack.i.h.bf16 %v10741_v58  ;;  %v10742_v39 = vunpack.i.l.bf16 %v10741_v58 }
 0x324   : > { %v10738_v62 = vunpack.i.h.bf16 %v10736_v12  ;;  %v10737_v51 = vunpack.i.l.bf16 %v10736_v12  ;;  %11030 = vrot.lane.b32.xlu1 %v13173_v57, %s11742_s28 }
 0x325   : > { %11025 = vrot.lane.b32.xlu0 %v13197_v36, %s11742_s28  ;;  %v4703_v21 = vsel %vm4698_vm5, %v10742_v39, %v10743_v52 }
 0x326   : > { %v4701_v56 = vsel %vm4698_vm5, %v10733_v48, %v10737_v51  ;;  %v10751_v40 = vpop.permute.xlu1 %10750  ;;  %v4702_v55 = vsel %vm4698_vm5, %v10737_v51, %v10738_v62  ;;  %v6633_v51 = vld [vmem:[%s13712_s2 + $0x60] sm:$0xff] }
 0x327   : > { %v10753_v10 = vunpack.i.h.bf16 %v10751_v40  ;;  %v10752_v25 = vunpack.i.l.bf16 %v10751_v40  ;;  %v10746_v41 = vpop.permute.xlu0 %10745  ;;  %v8741_v11 = vpack.c.bf16 %v4702_v55, %v4700_v54  ;;  %v8743_v42 = vpack.c.bf16 %v4701_v56, %v4699_v37  ;;  %v6636_v54 = vld [vmem:[%s13712_s2 + $0x78] sm:$0xff] }
 0x328   : > { %v10748_v13 = vunpack.i.h.bf16 %v10746_v41  ;;  %v10747_v44 = vunpack.i.l.bf16 %v10746_v41  ;;  %11040 = vrot.lane.b32.xlu1 %v13201_v16, %s11742_s28 }
 0x329   : > { %11035 = vrot.lane.b32.xlu0 %v13208_v38, %s11742_s28  ;;  %8742 = vmatprep.subr.bf16.mxu0 %v8741_v11  ;;  %v4706_v60 = vsel %vm4698_vm5, %v10752_v25, %v10753_v10 }
 0x32a   : > { %v4705_v46 = vsel %vm4698_vm5, %v10748_v13, %v10752_v25  ;;  %8744 = vmatpush1.bf16.msra.mxu0 %v8743_v42  ;;  %v10761_v47 = vpop.permute.xlu1 %10760  ;;  %v4704_v49 = vsel %vm4698_vm5, %v10743_v52, %v10747_v44  ;;  %vm5866_vm5 = vcmask 302080  }
 0x32b   : > { %v10756_v15 = vpop.permute.xlu0 %10755  ;;  %v8745_v14 = vpack.c.bf16 %v4706_v60, %v4704_v49  ;;  %v8747_v53 = vpack.c.bf16 %v4705_v46, %v4703_v21  ;;  %v10762_v50 = vunpack.i.l.bf16 %v10761_v47  ;;  %v10763_v63 = vunpack.i.h.bf16 %v10761_v47 }
 0x32c   : > { %11050 = vrot.lane.b32.xlu1 %v13216_v9, %s11742_s28  ;;  %v10758_v22 = vunpack.i.h.bf16 %v10756_v15  ;;  %v10757_v17 = vunpack.i.l.bf16 %v10756_v15 }
 0x32d   : > { %11045 = vrot.lane.b32.xlu0 %v13183_v27, %s11742_s28  ;;  %8746 = vmatprep.subr.bf16.mxu0 %v8745_v14  ;;  %s739_s28 = scalar_lea.vmem %s13714_s4, %s8308_s26 }
 0x32e   : > { %8748 = vmatpush1.bf16.msra.mxu0 %v8747_v53  ;;  %v10771_v59 = vpop.permute.xlu1 %10770  ;;  %v4772_v2 = vsel %vm4771_vm6, %v10757_v17, %v10758_v22  ;;  %v4773_v3 = vsel %vm4771_vm6, %v10758_v22, %v10762_v50 }
 0x32f   : > { %v10766_v61 = vpop.permute.xlu0 %10765  ;;  %v10773_v4 = vunpack.i.h.bf16 %v10771_v59  ;;  %v10772_v5 = vunpack.i.l.bf16 %v10771_v59 }
 0x330   : > { %v10768_v0 = vunpack.i.h.bf16 %v10766_v61  ;;  %v10767_v1 = vunpack.i.l.bf16 %v10766_v61  ;;  %11060 = vrot.lane.b32.xlu1 %v13173_v57, %s11743_s15 }
 0x331   : > { %11055 = vrot.lane.b32.xlu0 %v13197_v36, %s11743_s15  ;;  %v4776_v20 = vsel %vm4771_vm6, %v10772_v5, %v10773_v4 }
 0x332   : > { %v4774_v6 = vsel %vm4771_vm6, %v10763_v63, %v10767_v1  ;;  %v10781_v7 = vpop.permute.xlu1 %10780  ;;  %v4775_v8 = vsel %vm4771_vm6, %v10767_v1, %v10768_v0 }
 0x333   : > { %v10783_v23 = vunpack.i.h.bf16 %v10781_v7  ;;  %v10782_v24 = vunpack.i.l.bf16 %v10781_v7  ;;  %v10776_v28 = vpop.permute.xlu0 %10775  ;;  %v8749_v29 = vpack.c.bf16 %v4775_v8, %v4773_v3  ;;  %v8751_v30 = vpack.c.bf16 %v4774_v6, %v4772_v2 }
 0x334   : > { %v10778_v19 = vunpack.i.h.bf16 %v10776_v28  ;;  %v10777_v31 = vunpack.i.l.bf16 %v10776_v28  ;;  %11070 = vrot.lane.b32.xlu1 %v13201_v16, %s11743_s15 }
 0x335   : > { %11065 = vrot.lane.b32.xlu0 %v13208_v38, %s11743_s15  ;;  %8750 = vmatprep.subr.bf16.mxu0 %v8749_v29  ;;  %v4779_v32 = vsel %vm4771_vm6, %v10782_v24, %v10783_v23 }
 0x336   : > { %v4778_v33 = vsel %vm4771_vm6, %v10778_v19, %v10782_v24  ;;  %8752 = vmatpush1.bf16.msra.mxu0 %v8751_v30  ;;  %v10791_v34 = vpop.permute.xlu1 %10790  ;;  %v4777_v45 = vsel %vm4771_vm6, %v10773_v4, %v10777_v31  ;;  %vm5939_vm6 = vcmask 293888  }
 0x337   : > { %v10786_v43 = vpop.permute.xlu0 %10785  ;;  %v8753_v18 = vpack.c.bf16 %v4779_v32, %v4777_v45  ;;  %v8755_v35 = vpack.c.bf16 %v4778_v33, %v4776_v20  ;;  %v10792_v58 = vunpack.i.l.bf16 %v10791_v34  ;;  %v10793_v52 = vunpack.i.h.bf16 %v10791_v34 }
 0x338   : > { %11080 = vrot.lane.b32.xlu1 %v13216_v9, %s11743_s15  ;;  %v10788_v12 = vunpack.i.h.bf16 %v10786_v43  ;;  %v10787_v48 = vunpack.i.l.bf16 %v10786_v43 }
 0x339   : > { %11075 = vrot.lane.b32.xlu0 %v13183_v27, %s11743_s15  ;;  %8754 = vmatprep.subr.bf16.mxu0 %v8753_v18  ;;  %s11756_s15 = smov 27  }
 0x33a   : > { %8756 = vmatpush1.bf16.msra.mxu0 %v8755_v35  ;;  %v10801_v62 = vpop.permute.xlu1 %10800  ;;  %v4845_v40 = vsel %vm4844_vm7, %v10787_v48, %v10788_v12  ;;  %v4846_v55 = vsel %vm4844_vm7, %v10788_v12, %v10792_v58 }
 0x33b   : > { %v10796_v37 = vpop.permute.xlu0 %10795  ;;  %v10803_v10 = vunpack.i.h.bf16 %v10801_v62  ;;  %v10802_v25 = vunpack.i.l.bf16 %v10801_v62 }
 0x33c   : > { %v10798_v39 = vunpack.i.h.bf16 %v10796_v37  ;;  %v10797_v56 = vunpack.i.l.bf16 %v10796_v37  ;;  %11090 = vrot.lane.b32.xlu1 %v13173_v57, %s11744_s9 }
 0x33d   : > { %11085 = vrot.lane.b32.xlu0 %v13197_v36, %s11744_s9  ;;  %7790 = vmatmul.mubr.f32.vlgmr.msra.gmra.mrb[0].mxu0 %v6633_v51  ;;  %v4849_v14 = vsel %vm4844_vm7, %v10802_v25, %v10803_v10 }
 0x33e   : > { %v4847_v41 = vsel %vm4844_vm7, %v10793_v52, %v10797_v56  ;;  %v10811_v11 = vpop.permute.xlu1 %10810  ;;  %v4848_v42 = vsel %vm4844_vm7, %v10797_v56, %v10798_v39  ;;  %7860 = vmatprep.mubr.f32.mxu0 %v6636_v54 }
 0x33f   : > { %v10813_v13 = vunpack.i.h.bf16 %v10811_v11  ;;  %v10812_v44 = vunpack.i.l.bf16 %v10811_v11  ;;  %v10806_v60 = vpop.permute.xlu0 %10805  ;;  %v8757_v21 = vpack.c.bf16 %v4848_v42, %v4846_v55  ;;  %v8759_v46 = vpack.c.bf16 %v4847_v41, %v4845_v40 }
 0x340   : > { %v10808_v47 = vunpack.i.h.bf16 %v10806_v60  ;;  %v10807_v49 = vunpack.i.l.bf16 %v10806_v60  ;;  %11100 = vrot.lane.b32.xlu1 %v13201_v16, %s11744_s9 }
 0x341   : > { %11095 = vrot.lane.b32.xlu0 %v13208_v38, %s11744_s9  ;;  %8758 = vmatprep.subr.bf16.mxu0 %v8757_v21  ;;  %v4852_v15 = vsel %vm4844_vm7, %v10812_v44, %v10813_v13 }
 0x342   : > { %v4851_v53 = vsel %vm4844_vm7, %v10808_v47, %v10812_v44  ;;  %8760 = vmatpush1.bf16.msra.mxu0 %v8759_v46  ;;  %v10821_v50 = vpop.permute.xlu1 %10820  ;;  %v4850_v22 = vsel %vm4844_vm7, %v10803_v10, %v10807_v49  ;;  %vm6012_vm7 = vcmask 261120  }
 0x343   : > { %v10816_v17 = vpop.permute.xlu0 %10815  ;;  %v8761_v59 = vpack.c.bf16 %v4852_v15, %v4850_v22  ;;  %v8763_v61 = vpack.c.bf16 %v4851_v53, %v4849_v14  ;;  %v10822_v63 = vunpack.i.l.bf16 %v10821_v50  ;;  %v10823_v4 = vunpack.i.h.bf16 %v10821_v50 }
 0x344   : > { %11110 = vrot.lane.b32.xlu1 %v13216_v9, %s11744_s9  ;;  %v10818_v0 = vunpack.i.h.bf16 %v10816_v17  ;;  %v10817_v1 = vunpack.i.l.bf16 %v10816_v17 }
 0x345   : > { %11105 = vrot.lane.b32.xlu0 %v13183_v27, %s11744_s9  ;;  %8762 = vmatprep.subr.bf16.mxu0 %v8761_v59 }
 0x346   : > { %8764 = vmatpush1.bf16.msra.mxu0 %v8763_v61  ;;  %v10831_v2 = vpop.permute.xlu1 %10830  ;;  %v4918_v7 = vsel %vm4917_vm8, %v10817_v1, %v10818_v0  ;;  %v4919_v8 = vsel %vm4917_vm8, %v10818_v0, %v10822_v63 }
 0x347   : > { %v10826_v3 = vpop.permute.xlu0 %10825  ;;  %v10833_v23 = vunpack.i.h.bf16 %v10831_v2  ;;  %v10832_v24 = vunpack.i.l.bf16 %v10831_v2 }
 0x348   : > { %v10828_v5 = vunpack.i.h.bf16 %v10826_v3  ;;  %v10827_v6 = vunpack.i.l.bf16 %v10826_v3  ;;  %11120 = vrot.lane.b32.xlu1 %v13173_v57, %s11745_s10 }
 0x349   : > { %11115 = vrot.lane.b32.xlu0 %v13197_v36, %s11745_s10  ;;  %v4922_v18 = vsel %vm4917_vm8, %v10832_v24, %v10833_v23 }
 0x34a   : > { %v4920_v28 = vsel %vm4917_vm8, %v10823_v4, %v10827_v6  ;;  %v10841_v29 = vpop.permute.xlu1 %10840  ;;  %v4921_v30 = vsel %vm4917_vm8, %v10827_v6, %v10828_v5 }
 0x34b   : > { %v10843_v19 = vunpack.i.h.bf16 %v10841_v29  ;;  %v10842_v31 = vunpack.i.l.bf16 %v10841_v29  ;;  %v10836_v32 = vpop.permute.xlu0 %10835  ;;  %v8765_v20 = vpack.c.bf16 %v4921_v30, %v4919_v8  ;;  %v8767_v33 = vpack.c.bf16 %v4920_v28, %v4918_v7 }
 0x34c   : > { %v10838_v34 = vunpack.i.h.bf16 %v10836_v32  ;;  %v10837_v45 = vunpack.i.l.bf16 %v10836_v32  ;;  %11130 = vrot.lane.b32.xlu1 %v13201_v16, %s11745_s10 }
 0x34d   : > { %11125 = vrot.lane.b32.xlu0 %v13208_v38, %s11745_s10  ;;  %8766 = vmatprep.subr.bf16.mxu0 %v8765_v20  ;;  %v4925_v43 = vsel %vm4917_vm8, %v10842_v31, %v10843_v19 }
 0x34e   : > { %v4924_v35 = vsel %vm4917_vm8, %v10838_v34, %v10842_v31  ;;  %8768 = vmatpush1.bf16.msra.mxu0 %v8767_v33  ;;  %v10851_v58 = vpop.permute.xlu1 %10850  ;;  %v4923_v12 = vsel %vm4917_vm8, %v10833_v23, %v10837_v45  ;;  %vm6085_vm8 = vcmask 252928  }
 0x34f   : > { %v10846_v48 = vpop.permute.xlu0 %10845  ;;  %v8769_v62 = vpack.c.bf16 %v4925_v43, %v4923_v12  ;;  %v8771_v51 = vpack.c.bf16 %v4924_v35, %v4922_v18  ;;  %v10852_v37 = vunpack.i.l.bf16 %v10851_v58  ;;  %v10853_v40 = vunpack.i.h.bf16 %v10851_v58 }
 0x350   : > { %11140 = vrot.lane.b32.xlu1 %v13216_v9, %s11745_s10  ;;  %v10848_v54 = vunpack.i.h.bf16 %v10846_v48  ;;  %v10847_v52 = vunpack.i.l.bf16 %v10846_v48 }
 0x351   : > { %11135 = vrot.lane.b32.xlu0 %v13183_v27, %s11745_s10  ;;  %8770 = vmatprep.subr.bf16.mxu0 %v8769_v62 }
 0x352   : > { %8772 = vmatpush1.bf16.msra.mxu0 %v8771_v51  ;;  %v10861_v39 = vpop.permute.xlu1 %10860  ;;  %v4991_v25 = vsel %vm4990_vm9, %v10847_v52, %v10848_v54  ;;  %v4992_v41 = vsel %vm4990_vm9, %v10848_v54, %v10852_v37 }
 0x353   : > { %v10856_v56 = vpop.permute.xlu0 %10855  ;;  %v10863_v11 = vunpack.i.h.bf16 %v10861_v39  ;;  %v10862_v42 = vunpack.i.l.bf16 %v10861_v39 }
 0x354   : > { %v10858_v55 = vunpack.i.h.bf16 %v10856_v56  ;;  %v10857_v10 = vunpack.i.l.bf16 %v10856_v56  ;;  %11150 = vrot.lane.b32.xlu1 %v13173_v57, %s11746_s11 }
 0x355   : > { %11145 = vrot.lane.b32.xlu0 %v13197_v36, %s11746_s11  ;;  %v4995_v22 = vsel %vm4990_vm9, %v10862_v42, %v10863_v11 }
 0x356   : > { %v4993_v13 = vsel %vm4990_vm9, %v10853_v40, %v10857_v10  ;;  %v10871_v44 = vpop.permute.xlu1 %10870  ;;  %v4994_v60 = vsel %vm4990_vm9, %v10857_v10, %v10858_v55 }
 0x357   : > { %v10873_v21 = vunpack.i.h.bf16 %v10871_v44  ;;  %v10872_v46 = vunpack.i.l.bf16 %v10871_v44  ;;  %v10866_v47 = vpop.permute.xlu0 %10865  ;;  %v8773_v49 = vpack.c.bf16 %v4994_v60, %v4992_v41  ;;  %v8775_v15 = vpack.c.bf16 %v4993_v13, %v4991_v25 }
 0x358   : > { %v10868_v14 = vunpack.i.h.bf16 %v10866_v47  ;;  %v10867_v53 = vunpack.i.l.bf16 %v10866_v47  ;;  %11160 = vrot.lane.b32.xlu1 %v13201_v16, %s11746_s11 }
 0x359   : > { %11155 = vrot.lane.b32.xlu0 %v13208_v38, %s11746_s11  ;;  %8774 = vmatprep.subr.bf16.mxu0 %v8773_v49  ;;  %v4998_v50 = vsel %vm4990_vm9, %v10872_v46, %v10873_v21 }
 0x35a   : > { %v4997_v17 = vsel %vm4990_vm9, %v10868_v14, %v10872_v46  ;;  %8776 = vmatpush1.bf16.msra.mxu0 %v8775_v15  ;;  %v10881_v59 = vpop.permute.xlu1 %10880  ;;  %v4996_v61 = vsel %vm4990_vm9, %v10863_v11, %v10867_v53  ;;  %vm6158_vm9 = vcmask 244736  }
 0x35b   : > { %v10876_v63 = vpop.permute.xlu0 %10875  ;;  %v8777_v0 = vpack.c.bf16 %v4998_v50, %v4996_v61  ;;  %v8779_v1 = vpack.c.bf16 %v4997_v17, %v4995_v22  ;;  %v10882_v2 = vunpack.i.l.bf16 %v10881_v59  ;;  %v10883_v7 = vunpack.i.h.bf16 %v10881_v59 }
 0x35c   : > { %11170 = vrot.lane.b32.xlu1 %v13216_v9, %s11746_s11  ;;  %v10878_v3 = vunpack.i.h.bf16 %v10876_v63  ;;  %v10877_v4 = vunpack.i.l.bf16 %v10876_v63 }
 0x35d   : > { %11165 = vrot.lane.b32.xlu0 %v13183_v27, %s11746_s11  ;;  %8778 = vmatprep.subr.bf16.mxu0 %v8777_v0 }
 0x35e   : > { %8780 = vmatpush1.bf16.msra.mxu0 %v8779_v1  ;;  %v10891_v5 = vpop.permute.xlu1 %10890  ;;  %v5064_v24 = vsel %vm5063_vm10, %v10877_v4, %v10878_v3  ;;  %v5065_v28 = vsel %vm5063_vm10, %v10878_v3, %v10882_v2  ;;  %v11749_v2 = vmov 0  }
 0x35f   : > { %v10886_v6 = vpop.permute.xlu0 %10885  ;;  %v10893_v29 = vunpack.i.h.bf16 %v10891_v5  ;;  %v10892_v30 = vunpack.i.l.bf16 %v10891_v5  ;;  %11534 = vset.pattern.permute.xlu0 %v11749_v2 }
 0x360   : > { %v10888_v8 = vunpack.i.h.bf16 %v10886_v6  ;;  %v10887_v23 = vunpack.i.l.bf16 %v10886_v6  ;;  %11180 = vrot.lane.b32.xlu1 %v13173_v57, %s11747_s12 }
 0x361   : > { %11175 = vrot.lane.b32.xlu0 %v13197_v36, %s11747_s12  ;;  %v5068_v12 = vsel %vm5063_vm10, %v10892_v30, %v10893_v29 }
 0x362   : > { %v5066_v19 = vsel %vm5063_vm10, %v10883_v7, %v10887_v23  ;;  %v10901_v31 = vpop.permute.xlu1 %10900  ;;  %v5067_v32 = vsel %vm5063_vm10, %v10887_v23, %v10888_v8 }
 0x363   : > { %v10903_v20 = vunpack.i.h.bf16 %v10901_v31  ;;  %v10902_v33 = vunpack.i.l.bf16 %v10901_v31  ;;  %v10896_v34 = vpop.permute.xlu0 %10895  ;;  %v8781_v45 = vpack.c.bf16 %v5067_v32, %v5065_v28  ;;  %v8783_v43 = vpack.c.bf16 %v5066_v19, %v5064_v24 }
 0x364   : > { %v10898_v18 = vunpack.i.h.bf16 %v10896_v34  ;;  %v10897_v35 = vunpack.i.l.bf16 %v10896_v34  ;;  %11190 = vrot.lane.b32.xlu1 %v13201_v16, %s11747_s12 }
 0x365   : > { %11185 = vrot.lane.b32.xlu0 %v13208_v38, %s11747_s12  ;;  %8782 = vmatprep.subr.bf16.mxu0 %v8781_v45  ;;  %v5071_v58 = vsel %vm5063_vm10, %v10902_v33, %v10903_v20 }
 0x366   : > { %v5070_v48 = vsel %vm5063_vm10, %v10898_v18, %v10902_v33  ;;  %8784 = vmatpush1.bf16.msra.mxu0 %v8783_v43  ;;  %v10911_v62 = vpop.permute.xlu1 %10910  ;;  %v5069_v51 = vsel %vm5063_vm10, %v10893_v29, %v10897_v35  ;;  %vm6231_vm10 = vcmask 236544  }
 0x367   : > { %v10906_v37 = vpop.permute.xlu0 %10905  ;;  %v8785_v54 = vpack.c.bf16 %v5071_v58, %v5069_v51  ;;  %v8787_v52 = vpack.c.bf16 %v5070_v48, %v5068_v12  ;;  %v10912_v39 = vunpack.i.l.bf16 %v10911_v62  ;;  %v10913_v25 = vunpack.i.h.bf16 %v10911_v62 }
 0x368   : > { %11200 = vrot.lane.b32.xlu1 %v13216_v9, %s11747_s12  ;;  %v10908_v56 = vunpack.i.h.bf16 %v10906_v37  ;;  %v10907_v40 = vunpack.i.l.bf16 %v10906_v37 }
 0x369   : > { %11195 = vrot.lane.b32.xlu0 %v13183_v27, %s11747_s12  ;;  %8786 = vmatprep.subr.bf16.mxu0 %v8785_v54 }
 0x36a   : > { %8788 = vmatpush1.bf16.msra.mxu0 %v8787_v52  ;;  %v10921_v55 = vpop.permute.xlu1 %10920  ;;  %v5137_v42 = vsel %vm5136_vm11, %v10907_v40, %v10908_v56  ;;  %v5138_v13 = vsel %vm5136_vm11, %v10908_v56, %v10912_v39 }
 0x36b   : > { %v10916_v10 = vpop.permute.xlu0 %10915  ;;  %v10923_v44 = vunpack.i.h.bf16 %v10921_v55  ;;  %v10922_v60 = vunpack.i.l.bf16 %v10921_v55 }
 0x36c   : > { %v10918_v41 = vunpack.i.h.bf16 %v10916_v10  ;;  %v10917_v11 = vunpack.i.l.bf16 %v10916_v10  ;;  %11210 = vrot.lane.b32.xlu1 %v13173_v57, %s11748_s13 }
 0x36d   : > { %11205 = vrot.lane.b32.xlu0 %v13197_v36, %s11748_s13  ;;  %v5141_v61 = vsel %vm5136_vm11, %v10922_v60, %v10923_v44 }
 0x36e   : > { %v5139_v21 = vsel %vm5136_vm11, %v10913_v25, %v10917_v11  ;;  %v10931_v46 = vpop.permute.xlu1 %10930  ;;  %v5140_v47 = vsel %vm5136_vm11, %v10917_v11, %v10918_v41 }
 0x36f   : > { %v10933_v49 = vunpack.i.h.bf16 %v10931_v46  ;;  %v10932_v15 = vunpack.i.l.bf16 %v10931_v46  ;;  %v10926_v14 = vpop.permute.xlu0 %10925  ;;  %v8789_v53 = vpack.c.bf16 %v5140_v47, %v5138_v13  ;;  %v8791_v50 = vpack.c.bf16 %v5139_v21, %v5137_v42 }
 0x370   : > { %v10928_v22 = vunpack.i.h.bf16 %v10926_v14  ;;  %v10927_v17 = vunpack.i.l.bf16 %v10926_v14  ;;  %11220 = vrot.lane.b32.xlu1 %v13201_v16, %s11748_s13 }
 0x371   : > { %11215 = vrot.lane.b32.xlu0 %v13208_v38, %s11748_s13  ;;  %8790 = vmatprep.subr.bf16.mxu0 %v8789_v53  ;;  %v5144_v59 = vsel %vm5136_vm11, %v10932_v15, %v10933_v49 }
 0x372   : > { %v5143_v63 = vsel %vm5136_vm11, %v10928_v22, %v10932_v15  ;;  %8792 = vmatpush1.bf16.msra.mxu0 %v8791_v50  ;;  %v10941_v0 = vpop.permute.xlu1 %10940  ;;  %v5142_v1 = vsel %vm5136_vm11, %v10923_v44, %v10927_v17  ;;  %vm6304_vm11 = vcmask 228352  }
 0x373   : > { %v10936_v3 = vpop.permute.xlu0 %10935  ;;  %v8793_v4 = vpack.c.bf16 %v5144_v59, %v5142_v1  ;;  %v8795_v5 = vpack.c.bf16 %v5143_v63, %v5141_v61  ;;  %v10942_v6 = vunpack.i.l.bf16 %v10941_v0  ;;  %v10943_v28 = vunpack.i.h.bf16 %v10941_v0 }
 0x374   : > { %11230 = vrot.lane.b32.xlu1 %v13216_v9, %s11748_s13  ;;  %v10938_v7 = vunpack.i.h.bf16 %v10936_v3  ;;  %v10937_v8 = vunpack.i.l.bf16 %v10936_v3 }
 0x375   : > { %11225 = vrot.lane.b32.xlu0 %v13183_v27, %s11748_s13  ;;  %8794 = vmatprep.subr.bf16.mxu0 %v8793_v4 }
 0x376   : > { %8796 = vmatpush1.bf16.msra.mxu0 %v8795_v5  ;;  %v10951_v23 = vpop.permute.xlu1 %10950  ;;  %v5210_v19 = vsel %vm5209_vm12, %v10937_v8, %v10938_v7  ;;  %v5211_v31 = vsel %vm5209_vm12, %v10938_v7, %v10942_v6 }
 0x377   : > { %v10946_v24 = vpop.permute.xlu0 %10945  ;;  %v10953_v32 = vunpack.i.h.bf16 %v10951_v23  ;;  %v10952_v20 = vunpack.i.l.bf16 %v10951_v23 }
 0x378   : > { %v10948_v29 = vunpack.i.h.bf16 %v10946_v24  ;;  %v10947_v30 = vunpack.i.l.bf16 %v10946_v24  ;;  %11240 = vrot.lane.b32.xlu1 %v13173_v57, %s11750_s14 }
 0x379   : > { %11235 = vrot.lane.b32.xlu0 %v13197_v36, %s11750_s14  ;;  %v5214_v37 = vsel %vm5209_vm12, %v10952_v20, %v10953_v32 }
 0x37a   : > { %v5212_v33 = vsel %vm5209_vm12, %v10943_v28, %v10947_v30  ;;  %v10961_v34 = vpop.permute.xlu1 %10960  ;;  %v5213_v45 = vsel %vm5209_vm12, %v10947_v30, %v10948_v29 }
 0x37b   : > { %v10963_v43 = vunpack.i.h.bf16 %v10961_v34  ;;  %v10962_v18 = vunpack.i.l.bf16 %v10961_v34  ;;  %v10956_v35 = vpop.permute.xlu0 %10955  ;;  %v8797_v58 = vpack.c.bf16 %v5213_v45, %v5211_v31  ;;  %v8799_v12 = vpack.c.bf16 %v5212_v33, %v5210_v19 }
 0x37c   : > { %v10958_v48 = vunpack.i.h.bf16 %v10956_v35  ;;  %v10957_v62 = vunpack.i.l.bf16 %v10956_v35  ;;  %11250 = vrot.lane.b32.xlu1 %v13201_v16, %s11750_s14 }
 0x37d   : > { %11245 = vrot.lane.b32.xlu0 %v13208_v38, %s11750_s14  ;;  %8798 = vmatprep.subr.bf16.mxu0 %v8797_v58  ;;  %v5217_v51 = vsel %vm5209_vm12, %v10962_v18, %v10963_v43 }
 0x37e   : > { %v5216_v54 = vsel %vm5209_vm12, %v10958_v48, %v10962_v18  ;;  %8800 = vmatpush1.bf16.msra.mxu0 %v8799_v12  ;;  %v10971_v52 = vpop.permute.xlu1 %10970  ;;  %v5215_v39 = vsel %vm5209_vm12, %v10953_v32, %v10957_v62  ;;  %vm6377_vm12 = vcmask 220160  }
 0x37f   : > { %v10966_v56 = vpop.permute.xlu0 %10965  ;;  %v8801_v40 = vpack.c.bf16 %v5217_v51, %v5215_v39  ;;  %v8803_v55 = vpack.c.bf16 %v5216_v54, %v5214_v37  ;;  %v10972_v10 = vunpack.i.l.bf16 %v10971_v52  ;;  %v10973_v13 = vunpack.i.h.bf16 %v10971_v52 }
 0x380   : > { %11260 = vrot.lane.b32.xlu1 %v13216_v9, %s11750_s14  ;;  %v10968_v25 = vunpack.i.h.bf16 %v10966_v56  ;;  %v10967_v41 = vunpack.i.l.bf16 %v10966_v56 }
 0x381   : > { %11255 = vrot.lane.b32.xlu0 %v13183_v27, %s11750_s14  ;;  %8802 = vmatprep.subr.bf16.mxu0 %v8801_v40 }
 0x382   : > { %8804 = vmatpush1.bf16.msra.mxu0 %v8803_v55  ;;  %v10981_v11 = vpop.permute.xlu1 %10980  ;;  %v5283_v21 = vsel %vm5282_vm13, %v10967_v41, %v10968_v25  ;;  %v5284_v46 = vsel %vm5282_vm13, %v10968_v25, %v10972_v10 }
 0x383   : > { %v10976_v42 = vpop.permute.xlu0 %10975  ;;  %v10983_v47 = vunpack.i.h.bf16 %v10981_v11  ;;  %v10982_v49 = vunpack.i.l.bf16 %v10981_v11  ;;  %v11596_v11 = vld [vmem:[%s11871_s29 + $0x18] sm:$0xff] }
 0x384   : > { %v10978_v44 = vunpack.i.h.bf16 %v10976_v42  ;;  %v10977_v60 = vunpack.i.l.bf16 %v10976_v42  ;;  %11270 = vrot.lane.b32.xlu1 %v13173_v57, %s11751_s22  ;;  %v11597_v42 = vld [vmem:[%s11876_s30 + $0x8] sm:$0xff] }
 0x385   : > { %11265 = vrot.lane.b32.xlu0 %v13197_v36, %s11751_s22  ;;  %v5287_v2 = vsel %vm5282_vm13, %v10982_v49, %v10983_v47 }
 0x386   : > { %v5285_v15 = vsel %vm5282_vm13, %v10973_v13, %v10977_v60  ;;  %v10991_v14 = vpop.permute.xlu1 %10990  ;;  %v5286_v53 = vsel %vm5282_vm13, %v10977_v60, %v10978_v44  ;;  %v13419_v13 = vpack.i.bf16 %v11597_v42, %v11596_v11  ;;  %v11598_v44 = vld [vmem:[%s11871_s29 + $0x8] sm:$0xff]  ;;  %v11599_v60 = vld [vmem:[%s11876_s30] sm:$0xff] }
 0x387   : > { %v10993_v50 = vunpack.i.h.bf16 %v10991_v14  ;;  %v10992_v22 = vunpack.i.l.bf16 %v10991_v14  ;;  %v10986_v17 = vpop.permute.xlu0 %10985  ;;  %v8805_v59 = vpack.c.bf16 %v5286_v53, %v5284_v46  ;;  %v8807_v61 = vpack.c.bf16 %v5285_v15, %v5283_v21  ;;  %v6635_v14 = vld [vmem:[%s13712_s2 + $0x70] sm:$0xff] }
 0x388   : > { %v10988_v63 = vunpack.i.h.bf16 %v10986_v17  ;;  %v10987_v0 = vunpack.i.l.bf16 %v10986_v17  ;;  %11280 = vrot.lane.b32.xlu1 %v13201_v16, %s11751_s22  ;;  %v13424_v21 = vpack.i.bf16 %v11599_v60, %v11598_v44  ;;  %v11601_v17 = vld [vmem:[%s11876_s30 + $0x10] sm:$0xff] }
 0x389   : > { %11275 = vrot.lane.b32.xlu0 %v13208_v38, %s11751_s22  ;;  %8806 = vmatprep.subr.bf16.mxu0 %v8805_v59  ;;  %v5290_v1 = vsel %vm5282_vm13, %v10992_v22, %v10993_v50 }
 0x38a   : > { %v5289_v3 = vsel %vm5282_vm13, %v10988_v63, %v10992_v22  ;;  %8808 = vmatpush1.bf16.msra.mxu0 %v8807_v61  ;;  %v11001_v4 = vpop.permute.xlu1 %11000  ;;  %v5288_v5 = vsel %vm5282_vm13, %v10983_v47, %v10987_v0  ;;  %v11600_v22 = vld [vmem:[%s11871_s29 + $0x28] sm:$0xff]  ;;  %v11602_v63 = vld [vmem:[%s11871_s29] sm:$0xff]  ;;  %v11603_v0 = vld [vmem:[%s11871_s29 + $0x10] sm:$0xff]  ;;  %vm6450_vm13 = vcmask 211968  }
 0x38b   : > { %v10996_v6 = vpop.permute.xlu0 %10995  ;;  %v8809_v7 = vpack.c.bf16 %v5290_v1, %v5288_v5  ;;  %v8811_v8 = vpack.c.bf16 %v5289_v3, %v5287_v2  ;;  %v11002_v23 = vunpack.i.l.bf16 %v11001_v4  ;;  %v11003_v19 = vunpack.i.h.bf16 %v11001_v4  ;;  %v6638_v61 = vld [vmem:[%s13712_s2 + $0x88] sm:$0xff] }
 0x38c   : > { %11290 = vrot.lane.b32.xlu1 %v13216_v9, %s11751_s22  ;;  %v10998_v24 = vunpack.i.h.bf16 %v10996_v6  ;;  %v10997_v28 = vunpack.i.l.bf16 %v10996_v6  ;;  %v13435_v59 = vpack.i.bf16 %v11601_v17, %v11600_v22  ;;  %v13444_v1 = vpack.i.bf16 %v11603_v0, %v11602_v63 }
 0x38d   : > { %11285 = vrot.lane.b32.xlu0 %v13183_v27, %s11751_s22  ;;  %8810 = vmatprep.subr.bf16.mxu0 %v8809_v7 }
 0x38e   : > { %8812 = vmatpush1.bf16.msra.mxu0 %v8811_v8  ;;  %v11011_v29 = vpop.permute.xlu1 %11010  ;;  %v5356_v20 = vsel %vm5355_vm14, %v10997_v28, %v10998_v24  ;;  %v5357_v33 = vsel %vm5355_vm14, %v10998_v24, %v11002_v23 }
 0x38f   : > { %v11006_v30 = vpop.permute.xlu0 %11005  ;;  %v11013_v27 = vunpack.i.h.bf16 %v11011_v29  ;;  %v11012_v34 = vunpack.i.l.bf16 %v11011_v29 }
 0x390   : > { %v11008_v31 = vunpack.i.h.bf16 %v11006_v30  ;;  %v11007_v32 = vunpack.i.l.bf16 %v11006_v30  ;;  %11300 = vrot.lane.b32.xlu1 %v13173_v57, %s11752_s23  ;;  %v11604_v30 = vld [vmem:[%s11871_s29 + $0x20] sm:$0xff] }
 0x391   : > { %11295 = vrot.lane.b32.xlu0 %v13197_v36, %s11752_s23  ;;  %v13407_v36 = vld [vmem:[%s11871_s29 + $0x38] sm:$0xff]  ;;  %v5360_v52 = vsel %vm5355_vm14, %v11012_v34, %v11013_v27 }
 0x392   : > { %v5358_v45 = vsel %vm5355_vm14, %v11003_v19, %v11007_v32  ;;  %v11021_v43 = vpop.permute.xlu1 %11020  ;;  %v5359_v18 = vsel %vm5355_vm14, %v11007_v32, %v11008_v31  ;;  %v11314_v37 = vpack.i.bf16 %v13180_v26, %v13407_v36  ;;  %v11605_v19 = vld [vmem:[%s11871_s29 + $0x30] sm:$0xff]  ;;  %s11754_s29 = smov 29  }
 0x393   : > { %v11023_v35 = vunpack.i.h.bf16 %v11021_v43  ;;  %v11022_v58 = vunpack.i.l.bf16 %v11021_v43  ;;  %v11016_v12 = vpop.permute.xlu0 %11015  ;;  %v8813_v48 = vpack.c.bf16 %v5359_v18, %v5357_v33  ;;  %v8815_v57 = vpack.c.bf16 %v5358_v45, %v5356_v20  ;;  %v11606_v20 = vld [vmem:[%s11876_s30 + $0x18] sm:$0xff]  ;;  %s11755_s30 = smov 28  }
 0x394   : > { %v11018_v62 = vunpack.i.h.bf16 %v11016_v12  ;;  %v11017_v51 = vunpack.i.l.bf16 %v11016_v12  ;;  %11310 = vrot.lane.b32.xlu1 %v13201_v16, %s11752_s23  ;;  %v13452_v31 = vpack.i.bf16 %v11605_v19, %v11604_v30  ;;  %v13459_v33 = vpack.i.bf16 %v11606_v20, %v13407_v36 }
 0x395   : > { %11305 = vrot.lane.b32.xlu0 %v13208_v38, %s11752_s23  ;;  %8814 = vmatprep.subr.bf16.mxu0 %v8813_v48  ;;  %v5363_v54 = vsel %vm5355_vm14, %v11022_v58, %v11023_v35 }
 0x396   : > { %v5362_v39 = vsel %vm5355_vm14, %v11018_v62, %v11022_v58  ;;  %8816 = vmatpush1.bf16.msra.mxu0 %v8815_v57  ;;  %v11031_v56 = vpop.permute.xlu1 %11030  ;;  %v5361_v16 = vsel %vm5355_vm14, %v11013_v27, %v11017_v51  ;;  %vm6523_vm14 = vcmask 203776  }
 0x397   : > { %v11033_v38 = vunpack.i.h.bf16 %v11031_v56  ;;  %v11032_v40 = vunpack.i.l.bf16 %v11031_v56  ;;  %v11026_v55 = vpop.permute.xlu0 %11025  ;;  %v8817_v10 = vpack.c.bf16 %v5363_v54, %v5361_v16  ;;  %v8819_v26 = vpack.c.bf16 %v5362_v39, %v5360_v52 }
 0x398   : > { %v11028_v25 = vunpack.i.h.bf16 %v11026_v55  ;;  %v11027_v41 = vunpack.i.l.bf16 %v11026_v55  ;;  %11320 = vrot.lane.b32.xlu1 %v13216_v9, %s11752_s23 }
 0x399   : > { %11315 = vrot.lane.b32.xlu0 %v11314_v37, %s11752_s23  ;;  %8818 = vmatprep.subr.bf16.mxu0 %v8817_v10  ;;  %v5432_v46 = vsel %vm5428_vm15, %v11032_v40, %v11033_v38 }
 0x39a   : > { %8820 = vmatpush1.bf16.msra.mxu0 %v8819_v26  ;;  %v11041_v47 = vpop.permute.xlu1 %11040  ;;  %v5430_v9 = vsel %vm5428_vm15, %v11027_v41, %v11028_v25 }
 0x39b   : > { %v11036_v49 = vpop.permute.xlu0 %11035  ;;  %v8821_v15 = vpack.c.bf16 %v5432_v46, %v5430_v9  ;;  %v11043_v2 = vunpack.i.h.bf16 %v11041_v47  ;;  %v11042_v3 = vunpack.i.l.bf16 %v11041_v47 }
 0x39c   : > { %v11038_v53 = vunpack.i.h.bf16 %v11036_v49  ;;  %v11037_v50 = vunpack.i.l.bf16 %v11036_v49  ;;  %11330 = vrot.lane.b32.xlu1 %v13419_v13, %s11753_s21 }
 0x39d   : > { %11325 = vrot.lane.b32.xlu0 %v13424_v21, %s11753_s21  ;;  %8822 = vmatprep.subr.bf16.mxu0 %v8821_v15  ;;  %v5434_v45 = vsel %vm5428_vm15, %v11042_v3, %v11043_v2 }
 0x39e   : > { %v5431_v4 = vsel %vm5428_vm15, %v11038_v53, %v11032_v40  ;;  %v5429_v5 = vsel %vm5428_vm15, %v11037_v50, %v11027_v41  ;;  %v11051_v6 = vpop.permute.xlu1 %11050  ;;  %7861 = vmatmul.mubr.f32.vlgmr.msra.gmra.mrb[0].mxu0 %v6635_v14 }
 0x39f   : > { %v11053_v7 = vunpack.i.h.bf16 %v11051_v6  ;;  %v11052_v8 = vunpack.i.l.bf16 %v11051_v6  ;;  %v11046_v23 = vpop.permute.xlu0 %11045  ;;  %v8823_v24 = vpack.c.bf16 %v5431_v4, %v5429_v5  ;;  %7931 = vmatprep.mubr.f32.mxu0 %v6638_v61 }
 0x3a0   : > { %v11048_v28 = vunpack.i.h.bf16 %v11046_v23  ;;  %v11047_v29 = vunpack.i.l.bf16 %v11046_v23  ;;  %11340 = vrot.lane.b32.xlu1 %v13435_v59, %s11753_s21 }
 0x3a1   : > { %v5433_v32 = vsel %vm5428_vm15, %v11052_v8, %v11042_v3  ;;  %11335 = vrot.lane.b32.xlu0 %v13444_v1, %s11753_s21  ;;  %8824 = vmatpush1.bf16.msra.mxu0 %v8823_v24 }
 0x3a2   : > { %v5435_v27 = vsel %vm5428_vm15, %v11053_v7, %v11047_v29  ;;  %v11061_v34 = vpop.permute.xlu1 %11060  ;;  %v5436_v43 = vsel %vm5428_vm15, %v11047_v29, %v11048_v28  ;;  %vm6596_vm15 = vcmask 195584  }
 0x3a3   : > { %v11063_v18 = vunpack.i.h.bf16 %v11061_v34  ;;  %v11062_v35 = vunpack.i.l.bf16 %v11061_v34  ;;  %v11056_v58 = vpop.permute.xlu0 %11055  ;;  %v8825_v12 = vpack.c.bf16 %v5436_v43, %v5434_v45  ;;  %v8827_v48 = vpack.c.bf16 %v5435_v27, %v5433_v32 }
 0x3a4   : > { %v11058_v57 = vunpack.i.h.bf16 %v11056_v58  ;;  %v11057_v62 = vunpack.i.l.bf16 %v11056_v58  ;;  %11350 = vrot.lane.b32.xlu1 %v13452_v31, %s11753_s21 }
 0x3a5   : > { %11345 = vrot.lane.b32.xlu0 %v13459_v33, %s11753_s21  ;;  %8826 = vmatprep.subr.bf16.mxu0 %v8825_v12  ;;  %v5505_v51 = vsel %vm5501_vm0, %v11062_v35, %v11063_v18 }
 0x3a6   : > { %8828 = vmatpush1.bf16.msra.mxu0 %v8827_v48  ;;  %v11071_v36 = vpop.permute.xlu1 %11070  ;;  %v5503_v37 = vsel %vm5501_vm0, %v11057_v62, %v11058_v57 }
 0x3a7   : > { %v11066_v54 = vpop.permute.xlu0 %11065  ;;  %v8829_v52 = vpack.c.bf16 %v5505_v51, %v5503_v37  ;;  %v11073_v16 = vunpack.i.h.bf16 %v11071_v36  ;;  %v11072_v38 = vunpack.i.l.bf16 %v11071_v36 }
 0x3a8   : > { %v11068_v39 = vunpack.i.h.bf16 %v11066_v54  ;;  %v11067_v56 = vunpack.i.l.bf16 %v11066_v54  ;;  %11360 = vrot.lane.b32.xlu1 %v13419_v13, %s11754_s29 }
 0x3a9   : > { %11355 = vrot.lane.b32.xlu0 %v13424_v21, %s11754_s29  ;;  %8830 = vmatprep.subr.bf16.mxu0 %v8829_v52  ;;  %v5507_v9 = vsel %vm5501_vm0, %v11072_v38, %v11073_v16 }
 0x3aa   : > { %v5504_v40 = vsel %vm5501_vm0, %v11068_v39, %v11062_v35  ;;  %v5502_v55 = vsel %vm5501_vm0, %v11067_v56, %v11057_v62  ;;  %v11081_v10 = vpop.permute.xlu1 %11080  ;;  %v13504_v58 = vpop.f32.mrb[0].mxu1 }
 0x3ab   : > { %v8831_v26 = vpack.c.bf16 %v5504_v40, %v5502_v55  ;;  %v11083_v25 = vunpack.i.h.bf16 %v11081_v10  ;;  %v11082_v41 = vunpack.i.l.bf16 %v11081_v10  ;;  %v11076_v11 = vpop.permute.xlu0 %11075  ;;  %v13506_v36 = vpop.f32.mrb[1].mxu1 }
 0x3ac   : > { %v11078_v42 = vunpack.i.h.bf16 %v11076_v11  ;;  %v11077_v44 = vunpack.i.l.bf16 %v11076_v11  ;;  %11370 = vrot.lane.b32.xlu1 %v13435_v59, %s11754_s29 }
 0x3ad   : > { %v5506_v60 = vsel %vm5501_vm0, %v11082_v41, %v11072_v38  ;;  %11365 = vrot.lane.b32.xlu0 %v13444_v1, %s11754_s29  ;;  %8832 = vmatpush1.bf16.msra.mxu0 %v8831_v26 }
 0x3ae   : > { %v5508_v46 = vsel %vm5501_vm0, %v11083_v25, %v11077_v44  ;;  %v11091_v47 = vpop.permute.xlu1 %11090  ;;  %v5509_v49 = vsel %vm5501_vm0, %v11077_v44, %v11078_v42 }
 0x3af   : > { %v8835_v15 = vpack.c.bf16 %v5508_v46, %v5506_v60  ;;  %v11093_v14 = vunpack.i.h.bf16 %v11091_v47  ;;  %v11092_v53 = vunpack.i.l.bf16 %v11091_v47  ;;  %v11086_v50 = vpop.permute.xlu0 %11085  ;;  %v8833_v22 = vpack.c.bf16 %v5509_v49, %v5507_v9 }
 0x3b0   : > { %v11088_v17 = vunpack.i.h.bf16 %v11086_v50  ;;  %v11087_v61 = vunpack.i.l.bf16 %v11086_v50  ;;  %11380 = vrot.lane.b32.xlu1 %v13452_v31, %s11754_s29 }
 0x3b1   : > { %11375 = vrot.lane.b32.xlu0 %v13459_v33, %s11754_s29  ;;  %8834 = vmatprep.subr.bf16.mxu0 %v8833_v22  ;;  %v5578_v63 = vsel %vm5574_vm1, %v11092_v53, %v11093_v14 }
 0x3b2   : > { %8836 = vmatpush1.bf16.msra.mxu0 %v8835_v15  ;;  %v11101_v0 = vpop.permute.xlu1 %11100  ;;  %v5576_v2 = vsel %vm5574_vm1, %v11087_v61, %v11088_v17 }
 0x3b3   : > { %v11096_v3 = vpop.permute.xlu0 %11095  ;;  %v8837_v4 = vpack.c.bf16 %v5578_v63, %v5576_v2  ;;  %v11103_v7 = vunpack.i.h.bf16 %v11101_v0  ;;  %v11102_v8 = vunpack.i.l.bf16 %v11101_v0 }
 0x3b4   : > { %v11098_v5 = vunpack.i.h.bf16 %v11096_v3  ;;  %v11097_v6 = vunpack.i.l.bf16 %v11096_v3  ;;  %11390 = vrot.lane.b32.xlu1 %v13419_v13, %s11755_s30 }
 0x3b5   : > { %11385 = vrot.lane.b32.xlu0 %v13424_v21, %s11755_s30  ;;  %8838 = vmatprep.subr.bf16.mxu0 %v8837_v4  ;;  %v5580_v18 = vsel %vm5574_vm1, %v11102_v8, %v11103_v7 }
 0x3b6   : > { %v5577_v23 = vsel %vm5574_vm1, %v11098_v5, %v11092_v53  ;;  %v5575_v24 = vsel %vm5574_vm1, %v11097_v6, %v11087_v61  ;;  %v11111_v28 = vpop.permute.xlu1 %11110 }
 0x3b7   : > { %v8839_v29 = vpack.c.bf16 %v5577_v23, %v5575_v24  ;;  %v11113_v30 = vunpack.i.h.bf16 %v11111_v28  ;;  %v11112_v19 = vunpack.i.l.bf16 %v11111_v28  ;;  %v11106_v32 = vpop.permute.xlu0 %11105 }
 0x3b8   : > { %v11108_v20 = vunpack.i.h.bf16 %v11106_v32  ;;  %v11107_v27 = vunpack.i.l.bf16 %v11106_v32  ;;  %11400 = vrot.lane.b32.xlu1 %v13435_v59, %s11755_s30 }
 0x3b9   : > { %v5579_v34 = vsel %vm5574_vm1, %v11112_v19, %v11102_v8  ;;  %11395 = vrot.lane.b32.xlu0 %v13444_v1, %s11755_s30  ;;  %8840 = vmatpush1.bf16.msra.mxu0 %v8839_v29 }
 0x3ba   : > { %v5581_v45 = vsel %vm5574_vm1, %v11113_v30, %v11107_v27  ;;  %v11121_v43 = vpop.permute.xlu1 %11120  ;;  %v5582_v35 = vsel %vm5574_vm1, %v11107_v27, %v11108_v20 }
 0x3bb   : > { %v8843_v12 = vpack.c.bf16 %v5581_v45, %v5579_v34  ;;  %v11123_v48 = vunpack.i.h.bf16 %v11121_v43  ;;  %v11122_v57 = vunpack.i.l.bf16 %v11121_v43  ;;  %v11116_v62 = vpop.permute.xlu0 %11115  ;;  %v8841_v51 = vpack.c.bf16 %v5582_v35, %v5580_v18 }
 0x3bc   : > { %v11118_v37 = vunpack.i.h.bf16 %v11116_v62  ;;  %v11117_v54 = vunpack.i.l.bf16 %v11116_v62  ;;  %11410 = vrot.lane.b32.xlu1 %v13452_v31, %s11755_s30 }
 0x3bd   : > { %11405 = vrot.lane.b32.xlu0 %v13459_v33, %s11755_s30  ;;  %8842 = vmatprep.subr.bf16.mxu0 %v8841_v51  ;;  %v5651_v52 = vsel %vm5647_vm2, %v11122_v57, %v11123_v48 }
 0x3be   : > { %8844 = vmatpush1.bf16.msra.mxu0 %v8843_v12  ;;  %v11131_v39 = vpop.permute.xlu1 %11130  ;;  %v5649_v56 = vsel %vm5647_vm2, %v11117_v54, %v11118_v37 }
 0x3bf   : > { %v11126_v16 = vpop.permute.xlu0 %11125  ;;  %v8845_v38 = vpack.c.bf16 %v5651_v52, %v5649_v56  ;;  %v11133_v10 = vunpack.i.h.bf16 %v11131_v39  ;;  %v11132_v26 = vunpack.i.l.bf16 %v11131_v39 }
 0x3c0   : > { %v11128_v40 = vunpack.i.h.bf16 %v11126_v16  ;;  %v11127_v55 = vunpack.i.l.bf16 %v11126_v16  ;;  %11420 = vrot.lane.b32.xlu1 %v13419_v13, %s11756_s15 }
 0x3c1   : > { %11415 = vrot.lane.b32.xlu0 %v13424_v21, %s11756_s15  ;;  %8846 = vmatprep.subr.bf16.mxu0 %v8845_v38  ;;  %v5653_v53 = vsel %vm5647_vm2, %v11132_v26, %v11133_v10 }
 0x3c2   : > { %v5650_v25 = vsel %vm5647_vm2, %v11128_v40, %v11122_v57  ;;  %v5648_v41 = vsel %vm5647_vm2, %v11127_v55, %v11117_v54  ;;  %v11141_v11 = vpop.permute.xlu1 %11140 }
 0x3c3   : > { %v8847_v42 = vpack.c.bf16 %v5650_v25, %v5648_v41  ;;  %v11143_v44 = vunpack.i.h.bf16 %v11141_v11  ;;  %v11142_v60 = vunpack.i.l.bf16 %v11141_v11  ;;  %v11136_v46 = vpop.permute.xlu0 %11135 }
 0x3c4   : > { %v11138_v47 = vunpack.i.h.bf16 %v11136_v46  ;;  %v11137_v9 = vunpack.i.l.bf16 %v11136_v46  ;;  %11430 = vrot.lane.b32.xlu1 %v13435_v59, %s11756_s15 }
 0x3c5   : > { %v5652_v49 = vsel %vm5647_vm2, %v11142_v60, %v11132_v26  ;;  %11425 = vrot.lane.b32.xlu0 %v13444_v1, %s11756_s15  ;;  %8848 = vmatpush1.bf16.msra.mxu0 %v8847_v42 }
 0x3c6   : > { %v5654_v15 = vsel %vm5647_vm2, %v11143_v44, %v11137_v9  ;;  %v11151_v14 = vpop.permute.xlu1 %11150  ;;  %v5655_v50 = vsel %vm5647_vm2, %v11137_v9, %v11138_v47 }
 0x3c7   : > { %v8851_v22 = vpack.c.bf16 %v5654_v15, %v5652_v49  ;;  %v11153_v17 = vunpack.i.h.bf16 %v11151_v14  ;;  %v11152_v61 = vunpack.i.l.bf16 %v11151_v14  ;;  %v11146_v63 = vpop.permute.xlu0 %11145  ;;  %v8849_v0 = vpack.c.bf16 %v5655_v50, %v5653_v53 }
 0x3c8   : > { %v11148_v2 = vunpack.i.h.bf16 %v11146_v63  ;;  %v11147_v3 = vunpack.i.l.bf16 %v11146_v63  ;;  %11440 = vrot.lane.b32.xlu1 %v13452_v31, %s11756_s15 }
 0x3c9   : > { %11435 = vrot.lane.b32.xlu0 %v13459_v33, %s11756_s15  ;;  %8850 = vmatprep.subr.bf16.mxu0 %v8849_v0  ;;  %v5724_v4 = vsel %vm5720_vm3, %v11152_v61, %v11153_v17 }
 0x3ca   : > { %8852 = vmatpush1.bf16.msra.mxu0 %v8851_v22  ;;  %v11161_v5 = vpop.permute.xlu1 %11160  ;;  %v5722_v6 = vsel %vm5720_vm3, %v11147_v3, %v11148_v2 }
 0x3cb   : > { %v11156_v7 = vpop.permute.xlu0 %11155  ;;  %v8853_v8 = vpack.c.bf16 %v5724_v4, %v5722_v6  ;;  %v11163_v28 = vunpack.i.h.bf16 %v11161_v5  ;;  %v11162_v29 = vunpack.i.l.bf16 %v11161_v5 }
 0x3cc   : > { %v11158_v23 = vunpack.i.h.bf16 %v11156_v7  ;;  %v11157_v24 = vunpack.i.l.bf16 %v11156_v7  ;;  %11450 = vrot.lane.b32.xlu1 %v13419_v13, %s11757_s5 }
 0x3cd   : > { %11445 = vrot.lane.b32.xlu0 %v13424_v21, %s11757_s5  ;;  %8854 = vmatprep.subr.bf16.mxu0 %v8853_v8  ;;  %v5726_v57 = vsel %vm5720_vm3, %v11162_v29, %v11163_v28 }
 0x3ce   : > { %v5723_v30 = vsel %vm5720_vm3, %v11158_v23, %v11152_v61  ;;  %v5721_v19 = vsel %vm5720_vm3, %v11157_v24, %v11147_v3  ;;  %v11171_v32 = vpop.permute.xlu1 %11170 }
 0x3cf   : > { %v8855_v20 = vpack.c.bf16 %v5723_v30, %v5721_v19  ;;  %v11173_v27 = vunpack.i.h.bf16 %v11171_v32  ;;  %v11172_v34 = vunpack.i.l.bf16 %v11171_v32  ;;  %v11166_v45 = vpop.permute.xlu0 %11165 }
 0x3d0   : > { %v11168_v43 = vunpack.i.h.bf16 %v11166_v45  ;;  %v11167_v18 = vunpack.i.l.bf16 %v11166_v45  ;;  %11460 = vrot.lane.b32.xlu1 %v13435_v59, %s11757_s5 }
 0x3d1   : > { %v5725_v35 = vsel %vm5720_vm3, %v11172_v34, %v11162_v29  ;;  %11455 = vrot.lane.b32.xlu0 %v13444_v1, %s11757_s5  ;;  %8856 = vmatpush1.bf16.msra.mxu0 %v8855_v20 }
 0x3d2   : > { %v5727_v12 = vsel %vm5720_vm3, %v11173_v27, %v11167_v18  ;;  %v11181_v48 = vpop.permute.xlu1 %11180  ;;  %v5728_v62 = vsel %vm5720_vm3, %v11167_v18, %v11168_v43 }
 0x3d3   : > { %v8859_v51 = vpack.c.bf16 %v5727_v12, %v5725_v35  ;;  %v11183_v37 = vunpack.i.h.bf16 %v11181_v48  ;;  %v11182_v54 = vunpack.i.l.bf16 %v11181_v48  ;;  %v11176_v52 = vpop.permute.xlu0 %11175  ;;  %v8857_v39 = vpack.c.bf16 %v5728_v62, %v5726_v57 }
 0x3d4   : > { %v11178_v56 = vunpack.i.h.bf16 %v11176_v52  ;;  %v11177_v16 = vunpack.i.l.bf16 %v11176_v52  ;;  %11470 = vrot.lane.b32.xlu1 %v13452_v31, %s11757_s5 }
 0x3d5   : > { %11465 = vrot.lane.b32.xlu0 %v13459_v33, %s11757_s5  ;;  %8858 = vmatprep.subr.bf16.mxu0 %v8857_v39  ;;  %v5797_v38 = vsel %vm5793_vm4, %v11182_v54, %v11183_v37 }
 0x3d6   : > { %8860 = vmatpush1.bf16.msra.mxu0 %v8859_v51  ;;  %v11191_v40 = vpop.permute.xlu1 %11190  ;;  %v5795_v55 = vsel %vm5793_vm4, %v11177_v16, %v11178_v56 }
 0x3d7   : > { %v11186_v10 = vpop.permute.xlu0 %11185  ;;  %v8861_v26 = vpack.c.bf16 %v5797_v38, %v5795_v55  ;;  %v11193_v11 = vunpack.i.h.bf16 %v11191_v40  ;;  %v11192_v42 = vunpack.i.l.bf16 %v11191_v40  ;;  %v7290_v55 = vld [vmem:[%s13713_s3] sm:$0xff] }
 0x3d8   : > { %v11188_v25 = vunpack.i.h.bf16 %v11186_v10  ;;  %v11187_v41 = vunpack.i.l.bf16 %v11186_v10  ;;  %11480 = vrot.lane.b32.xlu1 %v13419_v13, %s11758_s6 }
 0x3d9   : > { %11475 = vrot.lane.b32.xlu0 %v13424_v21, %s11758_s6  ;;  %8862 = vmatprep.subr.bf16.mxu0 %v8861_v26  ;;  %v5799_v61 = vsel %vm5793_vm4, %v11192_v42, %v11193_v11 }
 0x3da   : > { %v5796_v44 = vsel %vm5793_vm4, %v11188_v25, %v11182_v54  ;;  %v5794_v60 = vsel %vm5793_vm4, %v11187_v41, %v11177_v16  ;;  %v11201_v46 = vpop.permute.xlu1 %11200 }
 0x3db   : > { %v8863_v47 = vpack.c.bf16 %v5796_v44, %v5794_v60  ;;  %v11203_v9 = vunpack.i.h.bf16 %v11201_v46  ;;  %v11202_v49 = vunpack.i.l.bf16 %v11201_v46  ;;  %v11196_v15 = vpop.permute.xlu0 %11195 }
 0x3dc   : > { %v11198_v14 = vunpack.i.h.bf16 %v11196_v15  ;;  %v11197_v53 = vunpack.i.l.bf16 %v11196_v15  ;;  %11490 = vrot.lane.b32.xlu1 %v13435_v59, %s11758_s6 }
 0x3dd   : > { %v5798_v50 = vsel %vm5793_vm4, %v11202_v49, %v11192_v42  ;;  %11485 = vrot.lane.b32.xlu0 %v13444_v1, %s11758_s6  ;;  %8864 = vmatpush1.bf16.msra.mxu0 %v8863_v47 }
 0x3de   : > { %v5800_v22 = vsel %vm5793_vm4, %v11203_v9, %v11197_v53  ;;  %v11211_v17 = vpop.permute.xlu1 %11210  ;;  %v5801_v63 = vsel %vm5793_vm4, %v11197_v53, %v11198_v14 }
 0x3df   : > { %v8867_v0 = vpack.c.bf16 %v5800_v22, %v5798_v50  ;;  %v11213_v2 = vunpack.i.h.bf16 %v11211_v17  ;;  %v11212_v3 = vunpack.i.l.bf16 %v11211_v17  ;;  %v11206_v4 = vpop.permute.xlu0 %11205  ;;  %v8865_v5 = vpack.c.bf16 %v5801_v63, %v5799_v61 }
 0x3e0   : > { %v11208_v6 = vunpack.i.h.bf16 %v11206_v4  ;;  %v11207_v7 = vunpack.i.l.bf16 %v11206_v4  ;;  %11500 = vrot.lane.b32.xlu1 %v13452_v31, %s11758_s6 }
 0x3e1   : > { %11495 = vrot.lane.b32.xlu0 %v13459_v33, %s11758_s6  ;;  %8866 = vmatprep.subr.bf16.mxu0 %v8865_v5  ;;  %v5870_v8 = vsel %vm5866_vm5, %v11212_v3, %v11213_v2 }
 0x3e2   : > { %8868 = vmatpush1.bf16.msra.mxu0 %v8867_v0  ;;  %v11221_v23 = vpop.permute.xlu1 %11220  ;;  %v5868_v24 = vsel %vm5866_vm5, %v11207_v7, %v11208_v6 }
 0x3e3   : > { %v11216_v28 = vpop.permute.xlu0 %11215  ;;  %v8869_v29 = vpack.c.bf16 %v5870_v8, %v5868_v24  ;;  %v11223_v32 = vunpack.i.h.bf16 %v11221_v23  ;;  %v11222_v20 = vunpack.i.l.bf16 %v11221_v23  ;;  %v6637_v24 = vld [vmem:[%s13712_s2 + $0x80] sm:$0xff] }
 0x3e4   : > { %v11218_v30 = vunpack.i.h.bf16 %v11216_v28  ;;  %v11217_v19 = vunpack.i.l.bf16 %v11216_v28  ;;  %11510 = vrot.lane.b32.xlu1 %v13419_v13, %s11759_s7 }
 0x3e5   : > { %11505 = vrot.lane.b32.xlu0 %v13424_v21, %s11759_s7  ;;  %8870 = vmatprep.subr.bf16.mxu0 %v8869_v29  ;;  %v5872_v51 = vsel %vm5866_vm5, %v11222_v20, %v11223_v32 }
 0x3e6   : > { %v5869_v27 = vsel %vm5866_vm5, %v11218_v30, %v11212_v3  ;;  %v5867_v34 = vsel %vm5866_vm5, %v11217_v19, %v11207_v7  ;;  %v11231_v45 = vpop.permute.xlu1 %11230  ;;  %v6640_v30 = vld [vmem:[%s13712_s2 + $0x98] sm:$0xff] }
 0x3e7   : > { %v8871_v43 = vpack.c.bf16 %v5869_v27, %v5867_v34  ;;  %v11233_v18 = vunpack.i.h.bf16 %v11231_v45  ;;  %v11232_v35 = vunpack.i.l.bf16 %v11231_v45  ;;  %v11226_v12 = vpop.permute.xlu0 %11225 }
 0x3e8   : > { %v11228_v48 = vunpack.i.h.bf16 %v11226_v12  ;;  %v11227_v57 = vunpack.i.l.bf16 %v11226_v12  ;;  %11520 = vrot.lane.b32.xlu1 %v13435_v59, %s11759_s7 }
 0x3e9   : > { %v5871_v13 = vsel %vm5866_vm5, %v11232_v35, %v11222_v20  ;;  %11515 = vrot.lane.b32.xlu0 %v13444_v1, %s11759_s7  ;;  %8872 = vmatpush1.bf16.msra.mxu0 %v8871_v43 }
 0x3ea   : > { %v5873_v21 = vsel %vm5866_vm5, %v11233_v18, %v11227_v57  ;;  %v11241_v62 = vpop.permute.xlu1 %11240  ;;  %v5874_v37 = vsel %vm5866_vm5, %v11227_v57, %v11228_v48 }
 0x3eb   : > { %v8875_v54 = vpack.c.bf16 %v5873_v21, %v5871_v13  ;;  %v11243_v52 = vunpack.i.h.bf16 %v11241_v62  ;;  %v11242_v39 = vunpack.i.l.bf16 %v11241_v62  ;;  %v11236_v56 = vpop.permute.xlu0 %11235  ;;  %v8873_v16 = vpack.c.bf16 %v5874_v37, %v5872_v51 }
 0x3ec   : > { %v11238_v59 = vunpack.i.h.bf16 %v11236_v56  ;;  %v11237_v38 = vunpack.i.l.bf16 %v11236_v56  ;;  %11530 = vrot.lane.b32.xlu1 %v13452_v31, %s11759_s7 }
 0x3ed   : > { %11525 = vrot.lane.b32.xlu0 %v13459_v33, %s11759_s7  ;;  %8874 = vmatprep.subr.bf16.mxu0 %v8873_v16  ;;  %v5943_v1 = vsel %vm5939_vm6, %v11242_v39, %v11243_v52 }
 0x3ee   : > { %8876 = vmatpush1.bf16.msra.mxu0 %v8875_v54  ;;  %v11251_v40 = vpop.permute.xlu1 %11250  ;;  %v5941_v10 = vsel %vm5939_vm6, %v11237_v38, %v11238_v59 }
 0x3ef   : > { %v11246_v26 = vpop.permute.xlu0 %11245  ;;  %v8877_v25 = vpack.c.bf16 %v5943_v1, %v5941_v10  ;;  %v11253_v31 = vunpack.i.h.bf16 %v11251_v40  ;;  %v11252_v42 = vunpack.i.l.bf16 %v11251_v40 }
 0x3f0   : > { %v11248_v41 = vunpack.i.h.bf16 %v11246_v26  ;;  %v11247_v11 = vunpack.i.l.bf16 %v11246_v26 }
 0x3f1   : > { %7293 = vperm.xlu0 %11534, %v7290_v55   ;;  %8878 = vmatprep.subr.bf16.mxu0 %v8877_v25  ;;  %v5945_v17 = vsel %vm5939_vm6, %v11252_v42, %v11253_v31 }
 0x3f2   : > { %v5942_v33 = vsel %vm5939_vm6, %v11248_v41, %v11242_v39  ;;  %v5940_v44 = vsel %vm5939_vm6, %v11247_v11, %v11237_v38  ;;  %v11261_v60 = vpop.permute.xlu1 %11260 }
 0x3f3   : > { %v8879_v46 = vpack.c.bf16 %v5942_v33, %v5940_v44  ;;  %v11263_v47 = vunpack.i.h.bf16 %v11261_v60  ;;  %v11262_v9 = vunpack.i.l.bf16 %v11261_v60  ;;  %v11256_v49 = vpop.permute.xlu0 %11255 }
 0x3f4   : > { %v11258_v15 = vunpack.i.h.bf16 %v11256_v49  ;;  %v11257_v14 = vunpack.i.l.bf16 %v11256_v49 }
 0x3f5   : > { %v5944_v53 = vsel %vm5939_vm6, %v11262_v9, %v11252_v42  ;;  %8880 = vmatpush1.bf16.msra.mxu0 %v8879_v46 }
 0x3f6   : > { %v5946_v50 = vsel %vm5939_vm6, %v11263_v47, %v11257_v14  ;;  %v11271_v22 = vpop.permute.xlu1 %11270  ;;  %v5947_v61 = vsel %vm5939_vm6, %v11257_v14, %v11258_v15 }
 0x3f7   : > { %v8883_v63 = vpack.c.bf16 %v5946_v50, %v5944_v53  ;;  %v11273_v0 = vunpack.i.h.bf16 %v11271_v22  ;;  %v11272_v2 = vunpack.i.l.bf16 %v11271_v22  ;;  %v11266_v3 = vpop.permute.xlu0 %11265  ;;  %v8881_v4 = vpack.c.bf16 %v5947_v61, %v5945_v17 }
 0x3f8   : > { %v11268_v5 = vunpack.i.h.bf16 %v11266_v3  ;;  %v11267_v6 = vunpack.i.l.bf16 %v11266_v3 }
 0x3f9   : > { %8882 = vmatprep.subr.bf16.mxu0 %v8881_v4  ;;  %v6016_v7 = vsel %vm6012_vm7, %v11272_v2, %v11273_v0 }
 0x3fa   : > { %8884 = vmatpush1.bf16.msra.mxu0 %v8883_v63  ;;  %v11281_v8 = vpop.permute.xlu1 %11280  ;;  %v6014_v23 = vsel %vm6012_vm7, %v11267_v6, %v11268_v5 }
 0x3fb   : > { %v11276_v28 = vpop.permute.xlu0 %11275  ;;  %v8885_v29 = vpack.c.bf16 %v6016_v7, %v6014_v23  ;;  %v11283_v20 = vunpack.i.h.bf16 %v11281_v8  ;;  %v11282_v27 = vunpack.i.l.bf16 %v11281_v8 }
 0x3fc   : > { %v11278_v19 = vunpack.i.h.bf16 %v11276_v28  ;;  %v11277_v32 = vunpack.i.l.bf16 %v11276_v28 }
 0x3fd   : > { %8886 = vmatprep.subr.bf16.mxu0 %v8885_v29  ;;  %7932 = vmatmul.mubr.f32.vlgmr.msra.gmra.mrb[0].mxu0 %v6637_v24  ;;  %v6018_v37 = vsel %vm6012_vm7, %v11282_v27, %v11283_v20 }
 0x3fe   : > { %v6015_v34 = vsel %vm6012_vm7, %v11278_v19, %v11272_v2  ;;  %v6013_v45 = vsel %vm6012_vm7, %v11277_v32, %v11267_v6  ;;  %v11291_v43 = vpop.permute.xlu1 %11290  ;;  %8002 = vmatprep.mubr.f32.mxu0 %v6640_v30 }
 0x3ff   : > { %v8887_v18 = vpack.c.bf16 %v6015_v34, %v6013_v45  ;;  %v11293_v35 = vunpack.i.h.bf16 %v11291_v43  ;;  %v11292_v12 = vunpack.i.l.bf16 %v11291_v43  ;;  %v11286_v48 = vpop.permute.xlu0 %11285 }
 0x400   : > { %v11288_v57 = vunpack.i.h.bf16 %v11286_v48  ;;  %v11287_v13 = vunpack.i.l.bf16 %v11286_v48 }
 0x401   : > { %v6017_v21 = vsel %vm6012_vm7, %v11292_v12, %v11282_v27  ;;  %8888 = vmatpush1.bf16.msra.mxu0 %v8887_v18 }
 0x402   : > { %v6019_v62 = vsel %vm6012_vm7, %v11293_v35, %v11287_v13  ;;  %v11301_v51 = vpop.permute.xlu1 %11300  ;;  %v6020_v54 = vsel %vm6012_vm7, %v11287_v13, %v11288_v57 }
 0x403   : > { %v8891_v52 = vpack.c.bf16 %v6019_v62, %v6017_v21  ;;  %v11303_v39 = vunpack.i.h.bf16 %v11301_v51  ;;  %v11302_v56 = vunpack.i.l.bf16 %v11301_v51  ;;  %v11296_v16 = vpop.permute.xlu0 %11295  ;;  %v8889_v59 = vpack.c.bf16 %v6020_v54, %v6018_v37 }
 0x404   : > { %v11298_v38 = vunpack.i.h.bf16 %v11296_v16  ;;  %v11297_v1 = vunpack.i.l.bf16 %v11296_v16 }
 0x405   : > { %8890 = vmatprep.subr.bf16.mxu0 %v8889_v59  ;;  %v6089_v40 = vsel %vm6085_vm8, %v11302_v56, %v11303_v39 }
 0x406   : > { %8892 = vmatpush1.bf16.msra.mxu0 %v8891_v52  ;;  %v11311_v55 = vpop.permute.xlu1 %11310  ;;  %v6087_v10 = vsel %vm6085_vm8, %v11297_v1, %v11298_v38 }
 0x407   : > { %v11306_v26 = vpop.permute.xlu0 %11305  ;;  %v8893_v25 = vpack.c.bf16 %v6089_v40, %v6087_v10  ;;  %v11313_v31 = vunpack.i.h.bf16 %v11311_v55  ;;  %v11312_v42 = vunpack.i.l.bf16 %v11311_v55 }
 0x408   : > { %v11308_v41 = vunpack.i.h.bf16 %v11306_v26  ;;  %v11307_v11 = vunpack.i.l.bf16 %v11306_v26 }
 0x409   : > { %8894 = vmatprep.subr.bf16.mxu0 %v8893_v25  ;;  %v6091_v17 = vsel %vm6085_vm8, %v11312_v42, %v11313_v31 }
 0x40a   : > { %v6088_v33 = vsel %vm6085_vm8, %v11308_v41, %v11302_v56  ;;  %v6086_v44 = vsel %vm6085_vm8, %v11307_v11, %v11297_v1  ;;  %v11321_v60 = vpop.permute.xlu1 %11320 }
 0x40b   : > { %v8895_v46 = vpack.c.bf16 %v6088_v33, %v6086_v44  ;;  %v11323_v47 = vunpack.i.h.bf16 %v11321_v60  ;;  %v11322_v9 = vunpack.i.l.bf16 %v11321_v60  ;;  %v11316_v49 = vpop.permute.xlu0 %11315 }
 0x40c   : > { %v11318_v15 = vunpack.i.h.bf16 %v11316_v49  ;;  %v11317_v14 = vunpack.i.l.bf16 %v11316_v49 }
 0x40d   : > { %v6090_v53 = vsel %vm6085_vm8, %v11322_v9, %v11312_v42  ;;  %8896 = vmatpush1.bf16.msra.mxu0 %v8895_v46 }
 0x40e   : > { %v6092_v50 = vsel %vm6085_vm8, %v11323_v47, %v11317_v14  ;;  %v11331_v22 = vpop.permute.xlu1 %11330  ;;  %v6093_v61 = vsel %vm6085_vm8, %v11317_v14, %v11318_v15 }
 0x40f   : > { %v8899_v63 = vpack.c.bf16 %v6092_v50, %v6090_v53  ;;  %v11333_v0 = vunpack.i.h.bf16 %v11331_v22  ;;  %v11332_v2 = vunpack.i.l.bf16 %v11331_v22  ;;  %v11326_v3 = vpop.permute.xlu0 %11325  ;;  %v8897_v4 = vpack.c.bf16 %v6093_v61, %v6091_v17 }
 0x410   : > { %v11328_v5 = vunpack.i.h.bf16 %v11326_v3  ;;  %v11327_v6 = vunpack.i.l.bf16 %v11326_v3 }
 0x411   : > { %8898 = vmatprep.subr.bf16.mxu0 %v8897_v4  ;;  %v6162_v7 = vsel %vm6158_vm9, %v11332_v2, %v11333_v0 }
 0x412   : > { %8900 = vmatpush1.bf16.msra.mxu0 %v8899_v63  ;;  %v11341_v8 = vpop.permute.xlu1 %11340  ;;  %v6160_v23 = vsel %vm6158_vm9, %v11327_v6, %v11328_v5 }
 0x413   : > { %v11336_v24 = vpop.permute.xlu0 %11335  ;;  %v8901_v28 = vpack.c.bf16 %v6162_v7, %v6160_v23  ;;  %v11343_v19 = vunpack.i.h.bf16 %v11341_v8  ;;  %v11342_v32 = vunpack.i.l.bf16 %v11341_v8 }
 0x414   : > { %v11338_v29 = vunpack.i.h.bf16 %v11336_v24  ;;  %v11337_v30 = vunpack.i.l.bf16 %v11336_v24 }
 0x415   : > { %8902 = vmatprep.subr.bf16.mxu0 %v8901_v28  ;;  %v6164_v62 = vsel %vm6158_vm9, %v11342_v32, %v11343_v19 }
 0x416   : > { %v6161_v20 = vsel %vm6158_vm9, %v11338_v29, %v11332_v2  ;;  %v6159_v27 = vsel %vm6158_vm9, %v11337_v30, %v11327_v6  ;;  %v11351_v34 = vpop.permute.xlu1 %11350 }
 0x417   : > { %v8903_v45 = vpack.c.bf16 %v6161_v20, %v6159_v27  ;;  %v11353_v43 = vunpack.i.h.bf16 %v11351_v34  ;;  %v11352_v18 = vunpack.i.l.bf16 %v11351_v34  ;;  %v11346_v35 = vpop.permute.xlu0 %11345 }
 0x418   : > { %v11348_v12 = vunpack.i.h.bf16 %v11346_v35  ;;  %v11347_v48 = vunpack.i.l.bf16 %v11346_v35 }
 0x419   : > { %v6163_v57 = vsel %vm6158_vm9, %v11352_v18, %v11342_v32  ;;  %8904 = vmatpush1.bf16.msra.mxu0 %v8903_v45 }
 0x41a   : > { %v6165_v13 = vsel %vm6158_vm9, %v11353_v43, %v11347_v48  ;;  %v11361_v21 = vpop.permute.xlu1 %11360  ;;  %v6166_v51 = vsel %vm6158_vm9, %v11347_v48, %v11348_v12 }
 0x41b   : > { %v8907_v37 = vpack.c.bf16 %v6165_v13, %v6163_v57  ;;  %v11363_v54 = vunpack.i.h.bf16 %v11361_v21  ;;  %v11362_v52 = vunpack.i.l.bf16 %v11361_v21  ;;  %v11356_v39 = vpop.permute.xlu0 %11355  ;;  %v8905_v56 = vpack.c.bf16 %v6166_v51, %v6164_v62 }
 0x41c   : > { %v11358_v16 = vunpack.i.h.bf16 %v11356_v39  ;;  %v11357_v59 = vunpack.i.l.bf16 %v11356_v39 }
 0x41d   : > { %8906 = vmatprep.subr.bf16.mxu0 %v8905_v56  ;;  %v6235_v38 = vsel %vm6231_vm10, %v11362_v52, %v11363_v54 }
 0x41e   : > { %8908 = vmatpush1.bf16.msra.mxu0 %v8907_v37  ;;  %v11371_v1 = vpop.permute.xlu1 %11370  ;;  %v6233_v40 = vsel %vm6231_vm10, %v11357_v59, %v11358_v16 }
 0x41f   : > { %v11366_v55 = vpop.permute.xlu0 %11365  ;;  %v8909_v10 = vpack.c.bf16 %v6235_v38, %v6233_v40  ;;  %v11373_v41 = vunpack.i.h.bf16 %v11371_v1  ;;  %v11372_v11 = vunpack.i.l.bf16 %v11371_v1 }
 0x420   : > { %v11368_v26 = vunpack.i.h.bf16 %v11366_v55  ;;  %v11367_v25 = vunpack.i.l.bf16 %v11366_v55 }
 0x421   : > { %8910 = vmatprep.subr.bf16.mxu0 %v8909_v10  ;;  %v6237_v50 = vsel %vm6231_vm10, %v11372_v11, %v11373_v41 }
 0x422   : > { %v6234_v31 = vsel %vm6231_vm10, %v11368_v26, %v11362_v52  ;;  %v6232_v42 = vsel %vm6231_vm10, %v11367_v25, %v11357_v59  ;;  %v11381_v33 = vpop.permute.xlu1 %11380 }
 0x423   : > { %v8911_v44 = vpack.c.bf16 %v6234_v31, %v6232_v42  ;;  %v11383_v60 = vunpack.i.h.bf16 %v11381_v33  ;;  %v11382_v46 = vunpack.i.l.bf16 %v11381_v33  ;;  %v11376_v47 = vpop.permute.xlu0 %11375 }
 0x424   : > { %v11378_v9 = vunpack.i.h.bf16 %v11376_v47  ;;  %v11377_v49 = vunpack.i.l.bf16 %v11376_v47 }
 0x425   : > { %v6236_v15 = vsel %vm6231_vm10, %v11382_v46, %v11372_v11  ;;  %8912 = vmatpush1.bf16.msra.mxu0 %v8911_v44 }
 0x426   : > { %v6238_v14 = vsel %vm6231_vm10, %v11383_v60, %v11377_v49  ;;  %v11391_v53 = vpop.permute.xlu1 %11390  ;;  %v6239_v22 = vsel %vm6231_vm10, %v11377_v49, %v11378_v9 }
 0x427   : > { %v8915_v17 = vpack.c.bf16 %v6238_v14, %v6236_v15  ;;  %v11393_v61 = vunpack.i.h.bf16 %v11391_v53  ;;  %v11392_v63 = vunpack.i.l.bf16 %v11391_v53  ;;  %v11386_v0 = vpop.permute.xlu0 %11385  ;;  %v8913_v2 = vpack.c.bf16 %v6239_v22, %v6237_v50 }
 0x428   : > { %v11388_v3 = vunpack.i.h.bf16 %v11386_v0  ;;  %v11387_v4 = vunpack.i.l.bf16 %v11386_v0 }
 0x429   : > { %8914 = vmatprep.subr.bf16.mxu0 %v8913_v2  ;;  %v6308_v5 = vsel %vm6304_vm11, %v11392_v63, %v11393_v61 }
 0x42a   : > { %8916 = vmatpush1.bf16.msra.mxu0 %v8915_v17  ;;  %v11401_v6 = vpop.permute.xlu1 %11400  ;;  %v6306_v7 = vsel %vm6304_vm11, %v11387_v4, %v11388_v3 }
 0x42b   : > { %v11396_v8 = vpop.permute.xlu0 %11395  ;;  %v8917_v23 = vpack.c.bf16 %v6308_v5, %v6306_v7  ;;  %v11403_v29 = vunpack.i.h.bf16 %v11401_v6  ;;  %v11402_v30 = vunpack.i.l.bf16 %v11401_v6 }
 0x42c   : > { %v11398_v24 = vunpack.i.h.bf16 %v11396_v8  ;;  %v11397_v28 = vunpack.i.l.bf16 %v11396_v8 }
 0x42d   : > { %8918 = vmatprep.subr.bf16.mxu0 %v8917_v23  ;;  %v6310_v13 = vsel %vm6304_vm11, %v11402_v30, %v11403_v29 }
 0x42e   : > { %v6307_v19 = vsel %vm6304_vm11, %v11398_v24, %v11392_v63  ;;  %v6305_v32 = vsel %vm6304_vm11, %v11397_v28, %v11387_v4  ;;  %v11411_v20 = vpop.permute.xlu1 %11410 }
 0x42f   : > { %v8919_v27 = vpack.c.bf16 %v6307_v19, %v6305_v32  ;;  %v11413_v34 = vunpack.i.h.bf16 %v11411_v20  ;;  %v11412_v45 = vunpack.i.l.bf16 %v11411_v20  ;;  %v11406_v43 = vpop.permute.xlu0 %11405 }
 0x430   : > { %v11408_v18 = vunpack.i.h.bf16 %v11406_v43  ;;  %v11407_v35 = vunpack.i.l.bf16 %v11406_v43 }
 0x431   : > { %v6309_v12 = vsel %vm6304_vm11, %v11412_v45, %v11402_v30  ;;  %8920 = vmatpush1.bf16.msra.mxu0 %v8919_v27 }
 0x432   : > { %v6311_v48 = vsel %vm6304_vm11, %v11413_v34, %v11407_v35  ;;  %v11421_v57 = vpop.permute.xlu1 %11420  ;;  %v6312_v21 = vsel %vm6304_vm11, %v11407_v35, %v11408_v18 }
 0x433   : > { %v8923_v62 = vpack.c.bf16 %v6311_v48, %v6309_v12  ;;  %v11423_v51 = vunpack.i.h.bf16 %v11421_v57  ;;  %v11422_v37 = vunpack.i.l.bf16 %v11421_v57  ;;  %v11416_v54 = vpop.permute.xlu0 %11415  ;;  %v8921_v52 = vpack.c.bf16 %v6312_v21, %v6310_v13 }
 0x434   : > { %v11418_v39 = vunpack.i.h.bf16 %v11416_v54  ;;  %v11417_v56 = vunpack.i.l.bf16 %v11416_v54 }
 0x435   : > { %8922 = vmatprep.subr.bf16.mxu0 %v8921_v52  ;;  %v6381_v16 = vsel %vm6377_vm12, %v11422_v37, %v11423_v51 }
 0x436   : > { %8924 = vmatpush1.bf16.msra.mxu0 %v8923_v62  ;;  %v11431_v59 = vpop.permute.xlu1 %11430  ;;  %v6379_v38 = vsel %vm6377_vm12, %v11417_v56, %v11418_v39 }
 0x437   : > { %v11426_v1 = vpop.permute.xlu0 %11425  ;;  %v8925_v40 = vpack.c.bf16 %v6381_v16, %v6379_v38  ;;  %v11433_v26 = vunpack.i.h.bf16 %v11431_v59  ;;  %v11432_v25 = vunpack.i.l.bf16 %v11431_v59 }
 0x438   : > { %v11428_v55 = vunpack.i.h.bf16 %v11426_v1  ;;  %v11427_v10 = vunpack.i.l.bf16 %v11426_v1 }
 0x439   : > { %8926 = vmatprep.subr.bf16.mxu0 %v8925_v40  ;;  %v6383_v14 = vsel %vm6377_vm12, %v11432_v25, %v11433_v26 }
 0x43a   : > { %v6380_v41 = vsel %vm6377_vm12, %v11428_v55, %v11422_v37  ;;  %v6378_v11 = vsel %vm6377_vm12, %v11427_v10, %v11417_v56  ;;  %v11441_v31 = vpop.permute.xlu1 %11440 }
 0x43b   : > { %v8927_v42 = vpack.c.bf16 %v6380_v41, %v6378_v11  ;;  %v11443_v33 = vunpack.i.h.bf16 %v11441_v31  ;;  %v11442_v44 = vunpack.i.l.bf16 %v11441_v31  ;;  %v11436_v60 = vpop.permute.xlu0 %11435 }
 0x43c   : > { %v11438_v46 = vunpack.i.h.bf16 %v11436_v60  ;;  %v11437_v47 = vunpack.i.l.bf16 %v11436_v60 }
 0x43d   : > { %v6382_v9 = vsel %vm6377_vm12, %v11442_v44, %v11432_v25  ;;  %8928 = vmatpush1.bf16.msra.mxu0 %v8927_v42 }
 0x43e   : > { %v6384_v49 = vsel %vm6377_vm12, %v11443_v33, %v11437_v47  ;;  %v11451_v15 = vpop.permute.xlu1 %11450  ;;  %v6385_v53 = vsel %vm6377_vm12, %v11437_v47, %v11438_v46 }
 0x43f   : > { %v8931_v50 = vpack.c.bf16 %v6384_v49, %v6382_v9  ;;  %v11453_v22 = vunpack.i.h.bf16 %v11451_v15  ;;  %v11452_v17 = vunpack.i.l.bf16 %v11451_v15  ;;  %v11446_v61 = vpop.permute.xlu0 %11445  ;;  %v8929_v63 = vpack.c.bf16 %v6385_v53, %v6383_v14 }
 0x440   : > { %v11448_v0 = vunpack.i.h.bf16 %v11446_v61  ;;  %v11447_v2 = vunpack.i.l.bf16 %v11446_v61 }
 0x441   : > { %8930 = vmatprep.subr.bf16.mxu0 %v8929_v63  ;;  %v6454_v3 = vsel %vm6450_vm13, %v11452_v17, %v11453_v22 }
 0x442   : > { %8932 = vmatpush1.bf16.msra.mxu0 %v8931_v50  ;;  %v11461_v4 = vpop.permute.xlu1 %11460  ;;  %v6452_v5 = vsel %vm6450_vm13, %v11447_v2, %v11448_v0 }
 0x443   : > { %v11456_v6 = vpop.permute.xlu0 %11455  ;;  %v8933_v7 = vpack.c.bf16 %v6454_v3, %v6452_v5  ;;  %v11463_v24 = vunpack.i.h.bf16 %v11461_v4  ;;  %v11462_v28 = vunpack.i.l.bf16 %v11461_v4  ;;  %v6639_v4 = vld [vmem:[%s13712_s2 + $0x90] sm:$0xff] }
 0x444   : > { %v11458_v8 = vunpack.i.h.bf16 %v11456_v6  ;;  %v11457_v23 = vunpack.i.l.bf16 %v11456_v6 }
 0x445   : > { %8934 = vmatprep.subr.bf16.mxu0 %v8933_v7  ;;  %v6456_v48 = vsel %vm6450_vm13, %v11462_v28, %v11463_v24 }
 0x446   : > { %v6453_v29 = vsel %vm6450_vm13, %v11458_v8, %v11452_v17  ;;  %v6451_v30 = vsel %vm6450_vm13, %v11457_v23, %v11447_v2  ;;  %v11471_v19 = vpop.permute.xlu1 %11470 }
 0x447   : > { %v8935_v32 = vpack.c.bf16 %v6453_v29, %v6451_v30  ;;  %v11473_v20 = vunpack.i.h.bf16 %v11471_v19  ;;  %v11472_v27 = vunpack.i.l.bf16 %v11471_v19  ;;  %v11466_v34 = vpop.permute.xlu0 %11465  ;;  %v11760_v19 = vmov 0.0  }
 0x448   : > { %v11468_v45 = vunpack.i.h.bf16 %v11466_v34  ;;  %v11467_v43 = vunpack.i.l.bf16 %v11466_v34 }
 0x449   : > { %v6455_v18 = vsel %vm6450_vm13, %v11472_v27, %v11462_v28  ;;  %8936 = vmatpush1.bf16.msra.mxu0 %v8935_v32 }
 0x44a   : > { %v6457_v35 = vsel %vm6450_vm13, %v11473_v20, %v11467_v43  ;;  %v11481_v12 = vpop.permute.xlu1 %11480  ;;  %v6458_v57 = vsel %vm6450_vm13, %v11467_v43, %v11468_v45 }
 0x44b   : > { %v8939_v13 = vpack.c.bf16 %v6457_v35, %v6455_v18  ;;  %v11483_v21 = vunpack.i.h.bf16 %v11481_v12  ;;  %v11482_v62 = vunpack.i.l.bf16 %v11481_v12  ;;  %v11476_v51 = vpop.permute.xlu0 %11475  ;;  %v8937_v37 = vpack.c.bf16 %v6458_v57, %v6456_v48 }
 0x44c   : > { %v11478_v54 = vunpack.i.h.bf16 %v11476_v51  ;;  %v11477_v52 = vunpack.i.l.bf16 %v11476_v51 }
 0x44d   : > { %8938 = vmatprep.subr.bf16.mxu0 %v8937_v37  ;;  %v6527_v39 = vsel %vm6523_vm14, %v11482_v62, %v11483_v21  ;;  %v6641_v21 = vld [vmem:[%s13712_s2 + $0xa0] sm:$0xff] }
 0x44e   : > { %8940 = vmatpush1.bf16.msra.mxu0 %v8939_v13  ;;  %v11491_v56 = vpop.permute.xlu1 %11490  ;;  %v6525_v16 = vsel %vm6523_vm14, %v11477_v52, %v11478_v54 }
 0x44f   : > { %v11486_v59 = vpop.permute.xlu0 %11485  ;;  %v8941_v38 = vpack.c.bf16 %v6527_v39, %v6525_v16  ;;  %v11493_v55 = vunpack.i.h.bf16 %v11491_v56  ;;  %v11492_v10 = vunpack.i.l.bf16 %v11491_v56 }
 0x450   : > { %v11488_v1 = vunpack.i.h.bf16 %v11486_v59  ;;  %v11487_v40 = vunpack.i.l.bf16 %v11486_v59 }
 0x451   : > { %8942 = vmatprep.subr.bf16.mxu0 %v8941_v38  ;;  %v6529_v49 = vsel %vm6523_vm14, %v11492_v10, %v11493_v55 }
 0x452   : > { %v6526_v26 = vsel %vm6523_vm14, %v11488_v1, %v11482_v62  ;;  %v6524_v25 = vsel %vm6523_vm14, %v11487_v40, %v11477_v52  ;;  %v11501_v41 = vpop.permute.xlu1 %11500 }
 0x453   : > { %v8943_v11 = vpack.c.bf16 %v6526_v26, %v6524_v25  ;;  %v11503_v31 = vunpack.i.h.bf16 %v11501_v41  ;;  %v11502_v42 = vunpack.i.l.bf16 %v11501_v41  ;;  %v11496_v33 = vpop.permute.xlu0 %11495 }
 0x454   : > { %v11498_v44 = vunpack.i.h.bf16 %v11496_v33  ;;  %v11497_v60 = vunpack.i.l.bf16 %v11496_v33 }
 0x455   : > { %v6528_v46 = vsel %vm6523_vm14, %v11502_v42, %v11492_v10  ;;  %8944 = vmatpush1.bf16.msra.mxu0 %v8943_v11 }
 0x456   : > { %v6530_v47 = vsel %vm6523_vm14, %v11503_v31, %v11497_v60  ;;  %v11511_v9 = vpop.permute.xlu1 %11510  ;;  %v6531_v15 = vsel %vm6523_vm14, %v11497_v60, %v11498_v44 }
 0x457   : > { %v8947_v14 = vpack.c.bf16 %v6530_v47, %v6528_v46  ;;  %v11513_v53 = vunpack.i.h.bf16 %v11511_v9  ;;  %v11512_v50 = vunpack.i.l.bf16 %v11511_v9  ;;  %v11506_v22 = vpop.permute.xlu0 %11505  ;;  %v8945_v17 = vpack.c.bf16 %v6531_v15, %v6529_v49 }
 0x458   : > { %v11508_v61 = vunpack.i.h.bf16 %v11506_v22  ;;  %v11507_v63 = vunpack.i.l.bf16 %v11506_v22 }
 0x459   : > { %8946 = vmatprep.subr.bf16.mxu0 %v8945_v17  ;;  %v6600_v0 = vsel %vm6596_vm15, %v11512_v50, %v11513_v53 }
 0x45a   : > { %8948 = vmatpush1.bf16.msra.mxu0 %v8947_v14  ;;  %v11521_v2 = vpop.permute.xlu1 %11520  ;;  %v6598_v3 = vsel %vm6596_vm15, %v11507_v63, %v11508_v61 }
 0x45b   : > { %v11516_v5 = vpop.permute.xlu0 %11515  ;;  %v8949_v6 = vpack.c.bf16 %v6600_v0, %v6598_v3  ;;  %v11523_v23 = vunpack.i.h.bf16 %v11521_v2  ;;  %v11522_v24 = vunpack.i.l.bf16 %v11521_v2 }
 0x45c   : > { %v11518_v7 = vunpack.i.h.bf16 %v11516_v5  ;;  %v11517_v8 = vunpack.i.l.bf16 %v11516_v5 }
 0x45d   : > { %8950 = vmatprep.subr.bf16.mxu0 %v8949_v6  ;;  %8003 = vmatmul.mubr.f32.vlgmr.msra.gmra.mrb[0].mxu0 %v6639_v4  ;;  %v6602_v12 = vsel %vm6596_vm15, %v11522_v24, %v11523_v23 }
 0x45e   : > { %v6599_v28 = vsel %vm6596_vm15, %v11518_v7, %v11512_v50  ;;  %v6597_v29 = vsel %vm6596_vm15, %v11517_v8, %v11507_v63  ;;  %v11531_v30 = vpop.permute.xlu1 %11530  ;;  %8073 = vmatprep.mubr.f32.mxu0 %v11760_v19 }
 0x45f   : > { %v8951_v32 = vpack.c.bf16 %v6599_v28, %v6597_v29  ;;  %v11533_v20 = vunpack.i.h.bf16 %v11531_v30  ;;  %v11532_v27 = vunpack.i.l.bf16 %v11531_v30  ;;  %v11526_v34 = vpop.permute.xlu0 %11525 }
 0x460   : > { %v11528_v45 = vunpack.i.h.bf16 %v11526_v34  ;;  %v11527_v43 = vunpack.i.l.bf16 %v11526_v34 }
 0x461   : > { %v6601_v18 = vsel %vm6596_vm15, %v11532_v27, %v11522_v24  ;;  %8952 = vmatpush1.bf16.msra.mxu0 %v8951_v32 }
 0x462   : > { %v6603_v35 = vsel %vm6596_vm15, %v11533_v20, %v11527_v43  ;;  %v6604_v48 = vsel %vm6596_vm15, %v11527_v43, %v11528_v45 }
 0x463   : > { %v8955_v57 = vpack.c.bf16 %v6603_v35, %v6601_v18  ;;  %v8953_v13 = vpack.c.bf16 %v6604_v48, %v6602_v12 }
 0x465   : > { %8954 = vmatprep.subr.bf16.mxu0 %v8953_v13 }
 0x466   : > { %8956 = vmatpush1.bf16.msra.mxu0 %v8955_v57 }
 0x469   : > { %8305 = vmatmul.mubr.msk.f32.vlgmr.msra.gmra.mrb[0].mxu0 %vm6012_vm7, %v6641_v21 }
 0x470   : > { %v7294_v62 = vpop.permute.xlu0 %7293 }
 0x471   : > { %v8957_v51 = vadd.f32 %v13504_v58, %v7294_v62  ;;  %v8959_v37 = vadd.f32 %v13506_v36, %v7294_v62 }
 0x53c   : > { %v8075_v54 = vpop.f32.mrb[0].mxu0 }
 0x53d   : > { %v8958_v52 = vadd.f32 %v8957_v51, %v8075_v54  ;;  %v8077_v39 = vpop.f32.mrb[1].mxu0 }
 0x53e   : > { %v8960_v56 = vadd.f32 %v8959_v37, %v8077_v39 }
 0x53f   : > { %8080 = vst [vmem:[%s739_s28] sm:$0xff] %v8958_v52 }
 0x540   : > { %8081 = vst [vmem:[%s739_s28 + $0x8] sm:$0xff] %v8960_v56 }
 0x541 PF: > { %s14_s19 = sadd.s32 1, %s11661_s19   ;;  %s13719_s15 = smov %s11649_s16 }
 0x542   : > { %p11_p12 = scmp.ge.s32.totalorder %s14_s19, 4   ;;  %s13720_s16 = smov %s11825_s24 }
 0x543   : > { %s13721_s17 = smov %s11657_s18  ;;  %s13722_s18 = smov %s13724_s20 }
 0x544   :  { %13 = sbr.rel (!%p11_p12) target bundleno = 3 (0x3), region = 245 }

</bundles_post_ra>
